<compile_context>
chip_gen: v7x
topology: tpu7x:2x2x1
jax: 0.10.0
libtpu: 0.0.40
codegen_flags: <defaults>
</compile_context>

<pallas_src>
import jax
import jax.numpy as jnp
from jax.experimental import pallas as pl
from jax.experimental.pallas import tpu as pltpu

D = 512            # inp_dim = hid_dim = out_dim = 512 (fixed by the module)
BP = 8             # padded batch rows: one full f32 sublane tile (avoids vst.msk)
PRIOR_SIGMA = 0.1  # prior_sigma for the BayesLinear layers (prior_mu = 0.0)


# ---------------------------------------------------------------------------
# Pallas kernel (one fused call: CLIP-stub proj + BayesCap MLP, grid over heads)
# ---------------------------------------------------------------------------
def _relu(x):
    return jnp.maximum(x, 0.0)


def _mm(x, w_ref, b_ref):
    # bf16 weights on the MXU, f32 accumulation, f32 bias add.
    return jnp.dot(x.astype(jnp.bfloat16), w_ref[...],
                   preferred_element_type=jnp.float32) + b_ref[...]


def fused_bayesclip_kernel(
    x_ref,                       # (BP, K)   f32  padded backbone input for this head
    wp_ref, bp_ref,              # (K, D) bf16 / (1, D) f32  stub CLIP projection
    # self.mod : sampled BayesLinear weights (layer0, layer1, layer2)
    w1_ref, b1_ref, w2_ref, b2_ref, w3_ref, b3_ref,
    # fused first layers of block_mu / block_alpha / block_beta : (D, 3D)
    wh1_ref, bh1_ref,
    # second layers of the three heads
    wm2_ref, bm2_ref, wa2_ref, ba2_ref, wb2_ref, bb2_ref,
    # outputs (all (BP, D) f32)
    feat_ref, mu_ref, alpha_ref, beta_ref,
):
    x = x_ref[...]

    # frozen CLIP backbone stub: linear projection -> 512-d features (kept in VMEM)
    feat = _mm(x, wp_ref, bp_ref)
    feat_ref[...] = feat

    # self.mod: BayesLinear+ReLU, BayesLinear+ReLU, BayesLinear
    h = _relu(_mm(feat, w1_ref, b1_ref))
    h = _relu(_mm(h, w2_ref, b2_ref))
    h = _mm(h, w3_ref, b3_ref)

    # residual: x_intr = mod(x) + x
    x_intr = h + feat

    # fused first layers of all three heads: one (BP, D) x (D, 3D) matmul + ReLU
    hh = _relu(_mm(x_intr, wh1_ref, bh1_ref))            # (BP, 3D)
    m = hh[:, 0 * D:1 * D]
    a = hh[:, 1 * D:2 * D]
    b = hh[:, 2 * D:3 * D]

    # block_mu  : Linear (no final ReLU)
    mu_ref[...] = _mm(m, wm2_ref, bm2_ref)
    # block_alpha / block_beta : Linear -> ReLU
    alpha_ref[...] = _relu(_mm(a, wa2_ref, ba2_ref))
    beta_ref[...] = _relu(_mm(b, wb2_ref, bb2_ref))


def fused_forward(x_stacked, wp, bp, head_params):
    """x_stacked: (2, BP, K) f32; wp: (2, K, D) bf16; bp: (2, 1, D) f32;
    head_params: 14 arrays, each stacked over the 2 heads along axis 0."""
    in_arrays = [x_stacked, wp, bp] + list(head_params)

    def spec(arr):
        tail = arr.shape[1:]
        nd = len(tail)
        # leading head dim squeezed away; weights/inputs selected per grid step
        return pl.BlockSpec((None,) + tail, lambda h, _nd=nd: (h,) + (0,) * _nd)

    out_spec = pl.BlockSpec((None, BP, D), lambda h: (h, 0, 0))
    out_shape = tuple(jax.ShapeDtypeStruct((2, BP, D), jnp.float32) for _ in range(4))

    return pl.pallas_call(
        fused_bayesclip_kernel,
        grid=(2,),                                   # one step per head (img, txt)
        out_shape=out_shape,
        in_specs=[spec(a) for a in in_arrays],
        out_specs=(out_spec,) * 4,
        compiler_params=pltpu.CompilerParams(
            dimension_semantics=("parallel",),       # shard heads across v7x TCs
            vmem_limit_bytes=48 << 20,               # <= 56 MiB headroom on v7x
        ),
    )(*in_arrays)


# ---------------------------------------------------------------------------
# Deterministic parameter construction
# ---------------------------------------------------------------------------
def _make_linear(key, fan_in, fan_out, scale=0.03):
    k1, k2 = jax.random.split(key)
    w = scale * jax.random.normal(k1, (fan_in, fan_out), jnp.float32)  # (in, out)
    b = scale * jax.random.normal(k2, (1, fan_out), jnp.float32)
    return w, b


def _make_bayes_linear(key, fan_in, fan_out, prior_sigma=PRIOR_SIGMA, scale=0.03):
    """BayesLinear forward sample: W = W_mu + sigma * eps (deterministic eps)."""
    k_mu, k_bmu, k_eps_w, k_eps_b = jax.random.split(key, 4)
    w_mu = scale * jax.random.normal(k_mu, (fan_in, fan_out), jnp.float32)
    b_mu = scale * jax.random.normal(k_bmu, (1, fan_out), jnp.float32)
    sigma = jnp.float32(prior_sigma)
    w = w_mu + sigma * jax.random.normal(k_eps_w, (fan_in, fan_out), jnp.float32)
    b = b_mu + sigma * jax.random.normal(k_eps_b, (1, fan_out), jnp.float32)
    return w, b


def make_bayescap_params(key):
    """14 arrays for one BayesCap_MLP_BBB_Enc head, in kernel order.
    Weights cast to bf16 (halves HBM->VMEM traffic), biases kept f32."""
    keys = jax.random.split(key, 9)
    w1, b1 = _make_bayes_linear(keys[0], D, D)
    w2, b2 = _make_bayes_linear(keys[1], D, D)
    w3, b3 = _make_bayes_linear(keys[2], D, D)
    wm1, bm1 = _make_linear(keys[3], D, D)
    wm2, bm2 = _make_linear(keys[4], D, D)
    wa1, ba1 = _make_linear(keys[5], D, D)
    wa2, ba2 = _make_linear(keys[6], D, D)
    wb1, bb1 = _make_linear(keys[7], D, D)
    wb2, bb2 = _make_linear(keys[8], D, D)
    # fuse the three head first layers into a single (D, 3D) matmul
    wh1 = jnp.concatenate([wm1, wa1, wb1], axis=1)
    bh1 = jnp.concatenate([bm1, ba1, bb1], axis=1)
    bf = lambda w: w.astype(jnp.bfloat16)
    return [bf(w1), b1, bf(w2), b2, bf(w3), b3,
            bf(wh1), bh1,
            bf(wm2), bm2, bf(wa2), ba2, bf(wb2), bb2]


# ---------------------------------------------------------------------------
# Full BayesCLIP_BBB_Enc forward
# ---------------------------------------------------------------------------
def bayesclip_forward(i_inputs, t_inputs, clip_params, img_params, txt_params):
    # TODO(synk): real CLIP (ViT image tower + transformer text tower) has no
    # self-contained equivalent here; replaced by a deterministic frozen linear
    # projection stub producing 512-d features (same output shape as CLIP).
    B = i_inputs.shape[0]
    img_flat = i_inputs.reshape(B, -1).astype(jnp.float32)      # (B, K)
    K = img_flat.shape[1]
    assert K >= D

    # text: token-id embedding lookup + mean pool (gather glue), zero-pad to K cols
    emb = jnp.take(clip_params["tok_emb"], t_inputs, axis=0)    # (B, S, D)
    txt_pooled = jnp.mean(emb, axis=1)                          # (B, D)
    txt_padded = jnp.pad(txt_pooled, ((0, 0), (0, K - D)))      # (B, K)

    # pad batch rows to a full 8-sublane tile, stack the two heads
    x_img = jnp.pad(img_flat, ((0, BP - B), (0, 0)))
    x_txt = jnp.pad(txt_padded, ((0, BP - B), (0, 0)))
    x_stacked = jnp.stack([x_img, x_txt], axis=0)               # (2, BP, K)

    # stub CLIP projection weights: zero-pad txt rows to K, stack heads, cast bf16
    txt_w_padded = jnp.pad(clip_params["txt_w"], ((0, K - D), (0, 0)))
    wp = jnp.stack([clip_params["img_w"], txt_w_padded], 0).astype(jnp.bfloat16)
    bp = jnp.stack([clip_params["img_b"], clip_params["txt_b"]], 0)   # (2, 1, D)

    head_params = [jnp.stack([pi, pt], axis=0)
                   for pi, pt in zip(img_params, txt_params)]

    feat, mu, alpha, beta = fused_forward(x_stacked, wp, bp, head_params)

    i_features, t_features = feat[0, :B], feat[1, :B]
    img_mu, txt_mu = mu[0, :B], mu[1, :B]
    img_1alpha, txt_1alpha = alpha[0, :B], alpha[1, :B]
    img_beta, txt_beta = beta[0, :B], beta[1, :B]
    return ((img_mu, img_1alpha, img_beta),
            (txt_mu, txt_1alpha, txt_beta),
            (i_features, t_features))


# ---------------------------------------------------------------------------
if __name__ == "__main__":
    key = jax.random.PRNGKey(0)
    k_img_in, k_txt_in, k_clip1, k_clip2, k_clip3, k_bayes_img, k_bayes_txt = \
        jax.random.split(key, 7)

    # small synthetic inputs: images NCHW (2,4,16,16), text token ids (2,8)
    B, C, H, W, S, V = 2, 4, 16, 16, 8, 64
    i_inputs = jax.random.normal(k_img_in, (B, C, H, W), jnp.float32)
    t_inputs = jax.random.randint(k_txt_in, (B, S), 0, V, jnp.int32)

    # frozen stub-CLIP parameters (f32 masters; cast to bf16 at the call boundary)
    kc1, kc2 = jax.random.split(k_clip1)
    img_w, img_b = _make_linear(kc1, C * H * W, D)
    txt_w, txt_b = _make_linear(kc2, D, D)
    tok_emb = 0.05 * jax.random.normal(k_clip3, (V, D), jnp.float32)
    clip_params = {"img_w": img_w, "img_b": img_b,
                   "txt_w": txt_w, "txt_b": txt_b,
                   "tok_emb": tok_emb}

    # BayesCap MLP parameters (img and txt heads)
    img_params = make_bayescap_params(k_bayes_img)
    txt_params = make_bayescap_params(k_bayes_txt)

    out = bayesclip_forward(i_inputs, t_inputs, clip_params, img_params, txt_params)
    jax.block_until_ready(out)

    (img_mu, img_1alpha, img_beta), (txt_mu, txt_1alpha, txt_beta), (i_f, t_f) = out
    assert img_mu.shape == (B, D) and txt_beta.shape == (B, D)
    assert i_f.shape == (B, D) and t_f.shape == (B, D)
    # alpha / beta heads end in ReLU -> must be non-negative
    assert float(jnp.min(img_1alpha)) >= 0.0 and float(jnp.min(txt_beta)) >= 0.0
    assert float(jnp.min(txt_1alpha)) >= 0.0 and float(jnp.min(img_beta)) >= 0.0

    print("KERNEL_OK")
</pallas_src>

<mosaic_0001>
module attributes {stable_mosaic.version = 11 : i64} {
  func.func @fused_bayesclip_kernel(%arg0: i32, %arg1: memref<1x8x1024xf32, #tpu.memory_space<vmem>>, %arg2: memref<1x1024x512xbf16, #tpu.memory_space<vmem>>, %arg3: memref<1x1x512xf32, #tpu.memory_space<vmem>>, %arg4: memref<1x512x512xbf16, #tpu.memory_space<vmem>>, %arg5: memref<1x1x512xf32, #tpu.memory_space<vmem>>, %arg6: memref<1x512x512xbf16, #tpu.memory_space<vmem>>, %arg7: memref<1x1x512xf32, #tpu.memory_space<vmem>>, %arg8: memref<1x512x512xbf16, #tpu.memory_space<vmem>>, %arg9: memref<1x1x512xf32, #tpu.memory_space<vmem>>, %arg10: memref<1x512x1536xbf16, #tpu.memory_space<vmem>>, %arg11: memref<1x1x1536xf32, #tpu.memory_space<vmem>>, %arg12: memref<1x512x512xbf16, #tpu.memory_space<vmem>>, %arg13: memref<1x1x512xf32, #tpu.memory_space<vmem>>, %arg14: memref<1x512x512xbf16, #tpu.memory_space<vmem>>, %arg15: memref<1x1x512xf32, #tpu.memory_space<vmem>>, %arg16: memref<1x512x512xbf16, #tpu.memory_space<vmem>>, %arg17: memref<1x1x512xf32, #tpu.memory_space<vmem>>, %arg18: memref<1x8x512xf32, #tpu.memory_space<vmem>>, %arg19: memref<1x8x512xf32, #tpu.memory_space<vmem>>, %arg20: memref<1x8x512xf32, #tpu.memory_space<vmem>>, %arg21: memref<1x8x512xf32, #tpu.memory_space<vmem>>) attributes {dimension_semantics = [#tpu.dimension_semantics<parallel>], iteration_bounds = array<i64: 2>, scalar_prefetch = 0 : i64, scratch_operands = 0 : i64, tpu.core_type = #tpu.core_type<tc>, window_params = [{transform_indices = @transform_0, window_bounds = array<i64: 1, 8, 1024>}, {transform_indices = @transform_1, window_bounds = array<i64: 1, 1024, 512>}, {transform_indices = @transform_2, window_bounds = array<i64: 1, 1, 512>}, {transform_indices = @transform_3, window_bounds = array<i64: 1, 512, 512>}, {transform_indices = @transform_4, window_bounds = array<i64: 1, 1, 512>}, {transform_indices = @transform_5, window_bounds = array<i64: 1, 512, 512>}, {transform_indices = @transform_6, window_bounds = array<i64: 1, 1, 512>}, {transform_indices = @transform_7, window_bounds = array<i64: 1, 512, 512>}, {transform_indices = @transform_8, window_bounds = array<i64: 1, 1, 512>}, {transform_indices = @transform_9, window_bounds = array<i64: 1, 512, 1536>}, {transform_indices = @transform_10, window_bounds = array<i64: 1, 1, 1536>}, {transform_indices = @transform_11, window_bounds = array<i64: 1, 512, 512>}, {transform_indices = @transform_12, window_bounds = array<i64: 1, 1, 512>}, {transform_indices = @transform_13, window_bounds = array<i64: 1, 512, 512>}, {transform_indices = @transform_14, window_bounds = array<i64: 1, 1, 512>}, {transform_indices = @transform_15, window_bounds = array<i64: 1, 512, 512>}, {transform_indices = @transform_16, window_bounds = array<i64: 1, 1, 512>}, {transform_indices = @transform_17, window_bounds = array<i64: 1, 8, 512>}, {transform_indices = @transform_18, window_bounds = array<i64: 1, 8, 512>}, {transform_indices = @transform_19, window_bounds = array<i64: 1, 8, 512>}, {transform_indices = @transform_20, window_bounds = array<i64: 1, 8, 512>}]} {
    %c0 = arith.constant 0 : index
    %c0_0 = arith.constant 0 : index
    %c0_1 = arith.constant 0 : index
    %0 = vector.load %arg1[%c0, %c0_0, %c0_1] : memref<1x8x1024xf32, #tpu.memory_space<vmem>>, vector<1x8x1024xf32>
    %1 = vector.shape_cast %0 : vector<1x8x1024xf32> to vector<8x1024xf32>
    %2 = arith.truncf %1 : vector<8x1024xf32> to vector<8x1024xbf16>
    %c0_2 = arith.constant 0 : index
    %c0_3 = arith.constant 0 : index
    %c0_4 = arith.constant 0 : index
    %3 = vector.load %arg2[%c0_2, %c0_3, %c0_4] : memref<1x1024x512xbf16, #tpu.memory_space<vmem>>, vector<1x1024x512xbf16>
    %4 = vector.shape_cast %3 : vector<1x1024x512xbf16> to vector<1024x512xbf16>
    %cst = arith.constant dense<0.000000e+00> : vector<8x512xf32>
    %5 = tpu.matmul %2, %4, %cst {dimension_numbers = #tpu.dot_dimension_numbers<[1], [0], [0], [1], [0, 0, 1, 1], [], []>} : vector<8x1024xbf16>, vector<1024x512xbf16>, vector<8x512xf32> -> vector<8x512xf32>
    %c0_5 = arith.constant 0 : index
    %c0_6 = arith.constant 0 : index
    %c0_7 = arith.constant 0 : index
    %6 = vector.load %arg3[%c0_5, %c0_6, %c0_7] : memref<1x1x512xf32, #tpu.memory_space<vmem>>, vector<1x1x512xf32>
    %7 = vector.shape_cast %6 : vector<1x1x512xf32> to vector<1x512xf32>
    %8 = vector.broadcast %7 : vector<1x512xf32> to vector<8x512xf32>
    %9 = arith.addf %5, %8 : vector<8x512xf32>
    %c0_8 = arith.constant 0 : index
    %c0_9 = arith.constant 0 : index
    %c0_10 = arith.constant 0 : index
    %10 = vector.load %arg18[%c0_8, %c0_9, %c0_10] : memref<1x8x512xf32, #tpu.memory_space<vmem>>, vector<1x8x512xf32>
    %11 = vector.shape_cast %10 : vector<1x8x512xf32> to vector<8x512xf32>
    %12 = vector.shape_cast %9 : vector<8x512xf32> to vector<1x8x512xf32>
    tpu.vector_store %arg18[%c0_8, %c0_9, %c0_10], %12 {strides = array<i32>} : memref<1x8x512xf32, #tpu.memory_space<vmem>>, vector<1x8x512xf32>,
    %13 = arith.truncf %9 : vector<8x512xf32> to vector<8x512xbf16>
    %c0_11 = arith.constant 0 : index
    %c0_12 = arith.constant 0 : index
    %c0_13 = arith.constant 0 : index
    %14 = vector.load %arg4[%c0_11, %c0_12, %c0_13] : memref<1x512x512xbf16, #tpu.memory_space<vmem>>, vector<1x512x512xbf16>
    %15 = vector.shape_cast %14 : vector<1x512x512xbf16> to vector<512x512xbf16>
    %cst_14 = arith.constant dense<0.000000e+00> : vector<8x512xf32>
    %16 = tpu.matmul %13, %15, %cst_14 {dimension_numbers = #tpu.dot_dimension_numbers<[1], [0], [0], [1], [0, 0, 1, 1], [], []>} : vector<8x512xbf16>, vector<512x512xbf16>, vector<8x512xf32> -> vector<8x512xf32>
    %c0_15 = arith.constant 0 : index
    %c0_16 = arith.constant 0 : index
    %c0_17 = arith.constant 0 : index
    %17 = vector.load %arg5[%c0_15, %c0_16, %c0_17] : memref<1x1x512xf32, #tpu.memory_space<vmem>>, vector<1x1x512xf32>
    %18 = vector.shape_cast %17 : vector<1x1x512xf32> to vector<1x512xf32>
    %19 = vector.broadcast %18 : vector<1x512xf32> to vector<8x512xf32>
    %20 = arith.addf %16, %19 : vector<8x512xf32>
    %cst_18 = arith.constant 0.000000e+00 : f32
    %21 = vector.broadcast %cst_18 : f32 to vector<8x512xf32>
    %22 = arith.maximumf %20, %21 : vector<8x512xf32>
    %23 = arith.truncf %22 : vector<8x512xf32> to vector<8x512xbf16>
    %c0_19 = arith.constant 0 : index
    %c0_20 = arith.constant 0 : index
    %c0_21 = arith.constant 0 : index
    %24 = vector.load %arg6[%c0_19, %c0_20, %c0_21] : memref<1x512x512xbf16, #tpu.memory_space<vmem>>, vector<1x512x512xbf16>
    %25 = vector.shape_cast %24 : vector<1x512x512xbf16> to vector<512x512xbf16>
    %cst_22 = arith.constant dense<0.000000e+00> : vector<8x512xf32>
    %26 = tpu.matmul %23, %25, %cst_22 {dimension_numbers = #tpu.dot_dimension_numbers<[1], [0], [0], [1], [0, 0, 1, 1], [], []>} : vector<8x512xbf16>, vector<512x512xbf16>, vector<8x512xf32> -> vector<8x512xf32>
    %c0_23 = arith.constant 0 : index
    %c0_24 = arith.constant 0 : index
    %c0_25 = arith.constant 0 : index
    %27 = vector.load %arg7[%c0_23, %c0_24, %c0_25] : memref<1x1x512xf32, #tpu.memory_space<vmem>>, vector<1x1x512xf32>
    %28 = vector.shape_cast %27 : vector<1x1x512xf32> to vector<1x512xf32>
    %29 = vector.broadcast %28 : vector<1x512xf32> to vector<8x512xf32>
    %30 = arith.addf %26, %29 : vector<8x512xf32>
    %cst_26 = arith.constant 0.000000e+00 : f32
    %31 = vector.broadcast %cst_26 : f32 to vector<8x512xf32>
    %32 = arith.maximumf %30, %31 : vector<8x512xf32>
    %33 = arith.truncf %32 : vector<8x512xf32> to vector<8x512xbf16>
    %c0_27 = arith.constant 0 : index
    %c0_28 = arith.constant 0 : index
    %c0_29 = arith.constant 0 : index
    %34 = vector.load %arg8[%c0_27, %c0_28, %c0_29] : memref<1x512x512xbf16, #tpu.memory_space<vmem>>, vector<1x512x512xbf16>
    %35 = vector.shape_cast %34 : vector<1x512x512xbf16> to vector<512x512xbf16>
    %cst_30 = arith.constant dense<0.000000e+00> : vector<8x512xf32>
    %36 = tpu.matmul %33, %35, %cst_30 {dimension_numbers = #tpu.dot_dimension_numbers<[1], [0], [0], [1], [0, 0, 1, 1], [], []>} : vector<8x512xbf16>, vector<512x512xbf16>, vector<8x512xf32> -> vector<8x512xf32>
    %c0_31 = arith.constant 0 : index
    %c0_32 = arith.constant 0 : index
    %c0_33 = arith.constant 0 : index
    %37 = vector.load %arg9[%c0_31, %c0_32, %c0_33] : memref<1x1x512xf32, #tpu.memory_space<vmem>>, vector<1x1x512xf32>
    %38 = vector.shape_cast %37 : vector<1x1x512xf32> to vector<1x512xf32>
    %39 = vector.broadcast %38 : vector<1x512xf32> to vector<8x512xf32>
    %40 = arith.addf %36, %39 : vector<8x512xf32>
    %41 = arith.addf %40, %9 : vector<8x512xf32>
    %42 = arith.truncf %41 : vector<8x512xf32> to vector<8x512xbf16>
    %c0_34 = arith.constant 0 : index
    %c0_35 = arith.constant 0 : index
    %c0_36 = arith.constant 0 : index
    %43 = vector.load %arg10[%c0_34, %c0_35, %c0_36] : memref<1x512x1536xbf16, #tpu.memory_space<vmem>>, vector<1x512x1536xbf16>
    %44 = vector.shape_cast %43 : vector<1x512x1536xbf16> to vector<512x1536xbf16>
    %cst_37 = arith.constant dense<0.000000e+00> : vector<8x1536xf32>
    %45 = tpu.matmul %42, %44, %cst_37 {dimension_numbers = #tpu.dot_dimension_numbers<[1], [0], [0], [1], [0, 0, 1, 1], [], []>} : vector<8x512xbf16>, vector<512x1536xbf16>, vector<8x1536xf32> -> vector<8x1536xf32>
    %c0_38 = arith.constant 0 : index
    %c0_39 = arith.constant 0 : index
    %c0_40 = arith.constant 0 : index
    %46 = vector.load %arg11[%c0_38, %c0_39, %c0_40] : memref<1x1x1536xf32, #tpu.memory_space<vmem>>, vector<1x1x1536xf32>
    %47 = vector.shape_cast %46 : vector<1x1x1536xf32> to vector<1x1536xf32>
    %48 = vector.broadcast %47 : vector<1x1536xf32> to vector<8x1536xf32>
    %49 = arith.addf %45, %48 : vector<8x1536xf32>
    %cst_41 = arith.constant 0.000000e+00 : f32
    %50 = vector.broadcast %cst_41 : f32 to vector<8x1536xf32>
    %51 = arith.maximumf %49, %50 : vector<8x1536xf32>
    %52 = vector.extract_strided_slice %51 {offsets = [0, 0], sizes = [8, 512], strides = [1, 1]} : vector<8x1536xf32> to vector<8x512xf32>
    %53 = vector.extract_strided_slice %51 {offsets = [0, 512], sizes = [8, 512], strides = [1, 1]} : vector<8x1536xf32> to vector<8x512xf32>
    %54 = vector.extract_strided_slice %51 {offsets = [0, 1024], sizes = [8, 512], strides = [1, 1]} : vector<8x1536xf32> to vector<8x512xf32>
    %55 = arith.truncf %52 : vector<8x512xf32> to vector<8x512xbf16>
    %c0_42 = arith.constant 0 : index
    %c0_43 = arith.constant 0 : index
    %c0_44 = arith.constant 0 : index
    %56 = vector.load %arg12[%c0_42, %c0_43, %c0_44] : memref<1x512x512xbf16, #tpu.memory_space<vmem>>, vector<1x512x512xbf16>
    %57 = vector.shape_cast %56 : vector<1x512x512xbf16> to vector<512x512xbf16>
    %cst_45 = arith.constant dense<0.000000e+00> : vector<8x512xf32>
    %58 = tpu.matmul %55, %57, %cst_45 {dimension_numbers = #tpu.dot_dimension_numbers<[1], [0], [0], [1], [0, 0, 1, 1], [], []>} : vector<8x512xbf16>, vector<512x512xbf16>, vector<8x512xf32> -> vector<8x512xf32>
    %c0_46 = arith.constant 0 : index
    %c0_47 = arith.constant 0 : index
    %c0_48 = arith.constant 0 : index
    %59 = vector.load %arg13[%c0_46, %c0_47, %c0_48] : memref<1x1x512xf32, #tpu.memory_space<vmem>>, vector<1x1x512xf32>
    %60 = vector.shape_cast %59 : vector<1x1x512xf32> to vector<1x512xf32>
    %61 = vector.broadcast %60 : vector<1x512xf32> to vector<8x512xf32>
    %62 = arith.addf %58, %61 : vector<8x512xf32>
    %c0_49 = arith.constant 0 : index
    %c0_50 = arith.constant 0 : index
    %c0_51 = arith.constant 0 : index
    %63 = vector.load %arg19[%c0_49, %c0_50, %c0_51] : memref<1x8x512xf32, #tpu.memory_space<vmem>>, vector<1x8x512xf32>
    %64 = vector.shape_cast %63 : vector<1x8x512xf32> to vector<8x512xf32>
    %65 = vector.shape_cast %62 : vector<8x512xf32> to vector<1x8x512xf32>
    tpu.vector_store %arg19[%c0_49, %c0_50, %c0_51], %65 {strides = array<i32>} : memref<1x8x512xf32, #tpu.memory_space<vmem>>, vector<1x8x512xf32>,
    %66 = arith.truncf %53 : vector<8x512xf32> to vector<8x512xbf16>
    %c0_52 = arith.constant 0 : index
    %c0_53 = arith.constant 0 : index
    %c0_54 = arith.constant 0 : index
    %67 = vector.load %arg14[%c0_52, %c0_53, %c0_54] : memref<1x512x512xbf16, #tpu.memory_space<vmem>>, vector<1x512x512xbf16>
    %68 = vector.shape_cast %67 : vector<1x512x512xbf16> to vector<512x512xbf16>
    %cst_55 = arith.constant dense<0.000000e+00> : vector<8x512xf32>
    %69 = tpu.matmul %66, %68, %cst_55 {dimension_numbers = #tpu.dot_dimension_numbers<[1], [0], [0], [1], [0, 0, 1, 1], [], []>} : vector<8x512xbf16>, vector<512x512xbf16>, vector<8x512xf32> -> vector<8x512xf32>
    %c0_56 = arith.constant 0 : index
    %c0_57 = arith.constant 0 : index
    %c0_58 = arith.constant 0 : index
    %70 = vector.load %arg15[%c0_56, %c0_57, %c0_58] : memref<1x1x512xf32, #tpu.memory_space<vmem>>, vector<1x1x512xf32>
    %71 = vector.shape_cast %70 : vector<1x1x512xf32> to vector<1x512xf32>
    %72 = vector.broadcast %71 : vector<1x512xf32> to vector<8x512xf32>
    %73 = arith.addf %69, %72 : vector<8x512xf32>
    %cst_59 = arith.constant 0.000000e+00 : f32
    %74 = vector.broadcast %cst_59 : f32 to vector<8x512xf32>
    %75 = arith.maximumf %73, %74 : vector<8x512xf32>
    %c0_60 = arith.constant 0 : index
    %c0_61 = arith.constant 0 : index
    %c0_62 = arith.constant 0 : index
    %76 = vector.load %arg20[%c0_60, %c0_61, %c0_62] : memref<1x8x512xf32, #tpu.memory_space<vmem>>, vector<1x8x512xf32>
    %77 = vector.shape_cast %76 : vector<1x8x512xf32> to vector<8x512xf32>
    %78 = vector.shape_cast %75 : vector<8x512xf32> to vector<1x8x512xf32>
    tpu.vector_store %arg20[%c0_60, %c0_61, %c0_62], %78 {strides = array<i32>} : memref<1x8x512xf32, #tpu.memory_space<vmem>>, vector<1x8x512xf32>,
    %79 = arith.truncf %54 : vector<8x512xf32> to vector<8x512xbf16>
    %c0_63 = arith.constant 0 : index
    %c0_64 = arith.constant 0 : index
    %c0_65 = arith.constant 0 : index
    %80 = vector.load %arg16[%c0_63, %c0_64, %c0_65] : memref<1x512x512xbf16, #tpu.memory_space<vmem>>, vector<1x512x512xbf16>
    %81 = vector.shape_cast %80 : vector<1x512x512xbf16> to vector<512x512xbf16>
    %cst_66 = arith.constant dense<0.000000e+00> : vector<8x512xf32>
    %82 = tpu.matmul %79, %81, %cst_66 {dimension_numbers = #tpu.dot_dimension_numbers<[1], [0], [0], [1], [0, 0, 1, 1], [], []>} : vector<8x512xbf16>, vector<512x512xbf16>, vector<8x512xf32> -> vector<8x512xf32>
    %c0_67 = arith.constant 0 : index
    %c0_68 = arith.constant 0 : index
    %c0_69 = arith.constant 0 : index
    %83 = vector.load %arg17[%c0_67, %c0_68, %c0_69] : memref<1x1x512xf32, #tpu.memory_space<vmem>>, vector<1x1x512xf32>
    %84 = vector.shape_cast %83 : vector<1x1x512xf32> to vector<1x512xf32>
    %85 = vector.broadcast %84 : vector<1x512xf32> to vector<8x512xf32>
    %86 = arith.addf %82, %85 : vector<8x512xf32>
    %cst_70 = arith.constant 0.000000e+00 : f32
    %87 = vector.broadcast %cst_70 : f32 to vector<8x512xf32>
    %88 = arith.maximumf %86, %87 : vector<8x512xf32>
    %c0_71 = arith.constant 0 : index
    %c0_72 = arith.constant 0 : index
    %c0_73 = arith.constant 0 : index
    %89 = vector.load %arg21[%c0_71, %c0_72, %c0_73] : memref<1x8x512xf32, #tpu.memory_space<vmem>>, vector<1x8x512xf32>
    %90 = vector.shape_cast %89 : vector<1x8x512xf32> to vector<8x512xf32>
    %91 = vector.shape_cast %88 : vector<8x512xf32> to vector<1x8x512xf32>
    tpu.vector_store %arg21[%c0_71, %c0_72, %c0_73], %91 {strides = array<i32>} : memref<1x8x512xf32, #tpu.memory_space<vmem>>, vector<1x8x512xf32>,
    return
  }
  func.func @transform_0(%arg0: i32) -> (i32, i32, i32) {
    %c0_i32 = arith.constant 0 : i32
    %c0_i32_0 = arith.constant 0 : i32
    %c0_i32_1 = arith.constant 0 : i32
    return %arg0, %c0_i32, %c0_i32_0 : i32, i32, i32
  }
  func.func @transform_1(%arg0: i32) -> (i32, i32, i32) {
    %c0_i32 = arith.constant 0 : i32
    %c0_i32_0 = arith.constant 0 : i32
    %c0_i32_1 = arith.constant 0 : i32
    return %arg0, %c0_i32, %c0_i32_0 : i32, i32, i32
  }
  func.func @transform_2(%arg0: i32) -> (i32, i32, i32) {
    %c0_i32 = arith.constant 0 : i32
    %c0_i32_0 = arith.constant 0 : i32
    %c0_i32_1 = arith.constant 0 : i32
    return %arg0, %c0_i32, %c0_i32_0 : i32, i32, i32
  }
  func.func @transform_3(%arg0: i32) -> (i32, i32, i32) {
    %c0_i32 = arith.constant 0 : i32
    %c0_i32_0 = arith.constant 0 : i32
    %c0_i32_1 = arith.constant 0 : i32
    return %arg0, %c0_i32, %c0_i32_0 : i32, i32, i32
  }
  func.func @transform_4(%arg0: i32) -> (i32, i32, i32) {
    %c0_i32 = arith.constant 0 : i32
    %c0_i32_0 = arith.constant 0 : i32
    %c0_i32_1 = arith.constant 0 : i32
    return %arg0, %c0_i32, %c0_i32_0 : i32, i32, i32
  }
  func.func @transform_5(%arg0: i32) -> (i32, i32, i32) {
    %c0_i32 = arith.constant 0 : i32
    %c0_i32_0 = arith.constant 0 : i32
    %c0_i32_1 = arith.constant 0 : i32
    return %arg0, %c0_i32, %c0_i32_0 : i32, i32, i32
  }
  func.func @transform_6(%arg0: i32) -> (i32, i32, i32) {
    %c0_i32 = arith.constant 0 : i32
    %c0_i32_0 = arith.constant 0 : i32
    %c0_i32_1 = arith.constant 0 : i32
    return %arg0, %c0_i32, %c0_i32_0 : i32, i32, i32
  }
  func.func @transform_7(%arg0: i32) -> (i32, i32, i32) {
    %c0_i32 = arith.constant 0 : i32
    %c0_i32_0 = arith.constant 0 : i32
    %c0_i32_1 = arith.constant 0 : i32
    return %arg0, %c0_i32, %c0_i32_0 : i32, i32, i32
  }
  func.func @transform_8(%arg0: i32) -> (i32, i32, i32) {
    %c0_i32 = arith.constant 0 : i32
    %c0_i32_0 = arith.constant 0 : i32
    %c0_i32_1 = arith.constant 0 : i32
    return %arg0, %c0_i32, %c0_i32_0 : i32, i32, i32
  }
  func.func @transform_9(%arg0: i32) -> (i32, i32, i32) {
    %c0_i32 = arith.constant 0 : i32
    %c0_i32_0 = arith.constant 0 : i32
    %c0_i32_1 = arith.constant 0 : i32
    return %arg0, %c0_i32, %c0_i32_0 : i32, i32, i32
  }
  func.func @transform_10(%arg0: i32) -> (i32, i32, i32) {
    %c0_i32 = arith.constant 0 : i32
    %c0_i32_0 = arith.constant 0 : i32
    %c0_i32_1 = arith.constant 0 : i32
    return %arg0, %c0_i32, %c0_i32_0 : i32, i32, i32
  }
  func.func @transform_11(%arg0: i32) -> (i32, i32, i32) {
    %c0_i32 = arith.constant 0 : i32
    %c0_i32_0 = arith.constant 0 : i32
    %c0_i32_1 = arith.constant 0 : i32
    return %arg0, %c0_i32, %c0_i32_0 : i32, i32, i32
  }
  func.func @transform_12(%arg0: i32) -> (i32, i32, i32) {
    %c0_i32 = arith.constant 0 : i32
    %c0_i32_0 = arith.constant 0 : i32
    %c0_i32_1 = arith.constant 0 : i32
    return %arg0, %c0_i32, %c0_i32_0 : i32, i32, i32
  }
  func.func @transform_13(%arg0: i32) -> (i32, i32, i32) {
    %c0_i32 = arith.constant 0 : i32
    %c0_i32_0 = arith.constant 0 : i32
    %c0_i32_1 = arith.constant 0 : i32
    return %arg0, %c0_i32, %c0_i32_0 : i32, i32, i32
  }
  func.func @transform_14(%arg0: i32) -> (i32, i32, i32) {
    %c0_i32 = arith.constant 0 : i32
    %c0_i32_0 = arith.constant 0 : i32
    %c0_i32_1 = arith.constant 0 : i32
    return %arg0, %c0_i32, %c0_i32_0 : i32, i32, i32
  }
  func.func @transform_15(%arg0: i32) -> (i32, i32, i32) {
    %c0_i32 = arith.constant 0 : i32
    %c0_i32_0 = arith.constant 0 : i32
    %c0_i32_1 = arith.constant 0 : i32
    return %arg0, %c0_i32, %c0_i32_0 : i32, i32, i32
  }
  func.func @transform_16(%arg0: i32) -> (i32, i32, i32) {
    %c0_i32 = arith.constant 0 : i32
    %c0_i32_0 = arith.constant 0 : i32
    %c0_i32_1 = arith.constant 0 : i32
    return %arg0, %c0_i32, %c0_i32_0 : i32, i32, i32
  }
  func.func @transform_17(%arg0: i32) -> (i32, i32, i32) {
    %c0_i32 = arith.constant 0 : i32
    %c0_i32_0 = arith.constant 0 : i32
    %c0_i32_1 = arith.constant 0 : i32
    return %arg0, %c0_i32, %c0_i32_0 : i32, i32, i32
  }
  func.func @transform_18(%arg0: i32) -> (i32, i32, i32) {
    %c0_i32 = arith.constant 0 : i32
    %c0_i32_0 = arith.constant 0 : i32
    %c0_i32_1 = arith.constant 0 : i32
    return %arg0, %c0_i32, %c0_i32_0 : i32, i32, i32
  }
  func.func @transform_19(%arg0: i32) -> (i32, i32, i32) {
    %c0_i32 = arith.constant 0 : i32
    %c0_i32_0 = arith.constant 0 : i32
    %c0_i32_1 = arith.constant 0 : i32
    return %arg0, %c0_i32, %c0_i32_0 : i32, i32, i32
  }
  func.func @transform_20(%arg0: i32) -> (i32, i32, i32) {
    %c0_i32 = arith.constant 0 : i32
    %c0_i32_0 = arith.constant 0 : i32
    %c0_i32_1 = arith.constant 0 : i32
    return %arg0, %c0_i32, %c0_i32_0 : i32, i32, i32
  }
}

</mosaic_0001>

<bundles_post_ra>
// kernel: tpu_custom_call.1
= control target key start
LH: loop header
LB: loop body
LE: loop exit
PB: predicated region body
PF: predicated region fallthrough
CT: control target
= control target key end

     0   :  { %s19520_s0 = inlined_call_operand.hbm [shape: f32[2,8,1024], index: 0, kind: input, shape index: {}]   ;;  %s19521_s1 = inlined_call_operand.hbm [shape: bf16[2,1024,512], index: 1, kind: input, shape index: {}]   ;;  %s19522_s2 = inlined_call_operand.hbm [shape: f32[2,1,512], index: 2, kind: input, shape index: {}]   ;;  %s19523_s3 = inlined_call_operand.hbm [shape: bf16[2,512,512], index: 3, kind: input, shape index: {}]   ;;  %s19524_s4 = inlined_call_operand.hbm [shape: f32[2,1,512], index: 4, kind: input, shape index: {}]   ;;  %s19525_s5 = inlined_call_operand.hbm [shape: bf16[2,512,512], index: 5, kind: input, shape index: {}]   ;;  %s19526_s6 = inlined_call_operand.hbm [shape: f32[2,1,512], index: 6, kind: input, shape index: {}]   ;;  %s19527_s7 = inlined_call_operand.hbm [shape: bf16[2,512,512], index: 7, kind: input, shape index: {}]   ;;  %s19528_s8 = inlined_call_operand.hbm [shape: f32[2,1,512], index: 8, kind: input, shape index: {}]   ;;  %s19529_s9 = inlined_call_operand.hbm [shape: bf16[2,512,1536], index: 9, kind: input, shape index: {}]   ;;  %s19530_s10 = inlined_call_operand.hbm [shape: f32[2,1,1536], index: 10, kind: input, shape index: {}]   ;;  %s19531_s11 = inlined_call_operand.hbm [shape: bf16[2,512,512], index: 11, kind: input, shape index: {}]   ;;  %s19532_s12 = inlined_call_operand.hbm [shape: f32[2,1,512], index: 12, kind: input, shape index: {}]   ;;  %s19533_s13 = inlined_call_operand.hbm [shape: bf16[2,512,512], index: 13, kind: input, shape index: {}]   ;;  %s19534_s14 = inlined_call_operand.hbm [shape: f32[2,1,512], index: 14, kind: input, shape index: {}]   ;;  %s19535_s15 = inlined_call_operand.hbm [shape: bf16[2,512,512], index: 15, kind: input, shape index: {}]   ;;  %s19536_s16 = inlined_call_operand.hbm [shape: f32[2,1,512], index: 16, kind: input, shape index: {}]   ;;  %s19537_s17 = inlined_call_operand.hbm [shape: f32[2,8,512], index: 17, kind: output, shape index: {0}]   ;;  %s19538_s18 = inlined_call_operand.hbm [shape: f32[2,8,512], index: 18, kind: output, shape index: {1}]   ;;  %s19539_s19 = inlined_call_operand.hbm [shape: f32[2,8,512], index: 19, kind: output, shape index: {2}]   ;;  %s19540_s20 = inlined_call_operand.hbm [shape: f32[2,8,512], index: 20, kind: output, shape index: {3}]  }
   0x1   :  { %19581 = sst [smem:[#allocation55_spill]] %s19520_s0 }
   0x2   :  { %19582 = sst [smem:[#allocation56_spill]] %s19521_s1 }
   0x3   :  { %19583 = sst [smem:[#allocation57_spill]] %s19522_s2 }
   0x4   :  { %19584 = sst [smem:[#allocation58_spill]] %s19523_s3 }
   0x5   :  { %19585 = sst [smem:[#allocation59_spill]] %s19524_s4 }
   0x6   :  { %19586 = sst [smem:[#allocation60_spill]] %s19525_s5 }
   0x7   :  { %19587 = sst [smem:[#allocation61_spill]] %s19526_s6 }
   0x8   :  { %19588 = sst [smem:[#allocation62_spill]] %s19527_s7 }
   0x9   :  { %19589 = sst [smem:[#allocation63_spill]] %s19528_s8 }
   0xa   :  { %19590 = sst [smem:[#allocation64_spill]] %s19529_s9 }
   0xb   :  { %19591 = sst [smem:[#allocation65_spill]] %s19530_s10 }
   0xc   :  { %19592 = sst [smem:[#allocation66_spill]] %s19531_s11 }
   0xd   :  { %19593 = sst [smem:[#allocation67_spill]] %s19532_s12 }
   0xe   :  { %19594 = sst [smem:[#allocation68_spill]] %s19537_s17 }
   0xf   :  { %19595 = sst [smem:[#allocation69_spill]] %s19538_s18 }
  0x10   :  { %19596 = sst [smem:[#allocation70_spill]] %s19539_s19 }
  0x11   :  { %19597 = sst [smem:[#allocation71_spill]] %s19540_s20 }
  0x12   :  { %26 = vsyncpa [#allocation3], 0 }
  0x13   :  { %28 = vsyncpa [#allocation3 + $0x1], 0 }
  0x14   :  { %29 = vsyncpa [#allocation6], 0 }
  0x15   :  { %31 = vsyncpa [#allocation6 + $0x1], 0 }
  0x16   :  { %32 = vsyncpa [#allocation9], 0 }
  0x17   :  { %34 = vsyncpa [#allocation9 + $0x1], 0 }
  0x18   :  { %35 = vsyncpa [#allocation12], 0 }
  0x19   :  { %37 = vsyncpa [#allocation12 + $0x1], 0 }
  0x1a   :  { %38 = vsyncpa [#allocation15], 0 }
  0x1b   :  { %40 = vsyncpa [#allocation15 + $0x1], 0 }
  0x1c   :  { %41 = vsyncpa [#allocation18], 0 }
  0x1d   :  { %43 = vsyncpa [#allocation18 + $0x1], 0 }
  0x1e   :  { %44 = vsyncpa [#allocation21], 0 }
  0x1f   :  { %46 = vsyncpa [#allocation21 + $0x1], 0 }
  0x20   :  { %47 = vsyncpa [#allocation24], 0 }
  0x21   :  { %49 = vsyncpa [#allocation24 + $0x1], 0 }
  0x22   :  { %50 = vsyncpa [#allocation27], 0 }
  0x23   :  { %52 = vsyncpa [#allocation27 + $0x1], 0 }
  0x24   :  { %53 = vsyncpa [#allocation4], 0 }
  0x25   :  { %55 = vsyncpa [#allocation4 + $0x1], 0 }
  0x26   :  { %56 = vsyncpa [#allocation31], 0 }
  0x27   :  { %58 = vsyncpa [#allocation31 + $0x1], 0 }
  0x28   :  { %59 = vsyncpa [#allocation34], 0 }
  0x29   :  { %61 = vsyncpa [#allocation34 + $0x1], 0  ;;  %s17063_s1 = smov 0   ;;  %s17065_s22 = smov 0  }
  0x2a   :  { %s17067_s23 = smov 0   ;;  %s17069_s24 = smov 0  }
  0x2b LB: > { %19598 = sst [smem:[#allocation47_spill]] %s16919_s1  ;;  %s17084_s2 = sadd.s32 4294967295, %s16931_s24   ;;  %s16931_s24 = sphi %s17069_s24, %s19652_s24   ;;  %s16927_s23 = sphi %s17067_s23, %s19654_s23   ;;  %s16923_s22 = sphi %s17065_s22, %s19656_s22   ;;  %s16919_s1 = sphi %s17063_s1, %s19655_s1  }
  0x2c   : > { %19599 = sst [smem:[#allocation48_spill]] %s16927_s23  ;;  %s19546_s25 = sadd.s32 4294967294, %s16931_s24  }
  0x2d   : > { %19600 = sst [smem:[#allocation49_spill]] %s17084_s2  ;;  %s17088_s3 = sadd.s32 1, %s16931_s24  }
  0x2e   : > { %19601 = sst [smem:[#allocation50_spill]] %s17088_s3  ;;  %s74_s26 = sadd.s32 1, %s16927_s23 }
  0x2f   : > { %s71_s27 = ssub.s32 %s16931_s24, %s17088_s3  ;;  %p81_p0 = scmp.ne.s32.totalorder %s16927_s23, %s16923_s22 }
  0x30   : > { %p72_p1 = scmp.eq.s32.totalorder %s71_s27, 0  ;;  %p82_p2 = scmp.eq.s32.totalorder %s16931_s24, 0 }
  0x31   : > { %p87_p3 = scmp.ne.s32.totalorder %s16923_s22, %s16919_s1  ;;  %p88_p4 = scmp.eq.s32.totalorder %s17084_s2, 0 }
  0x32   : > { %s17100_s28 = scalar_select %p72_p1, %s16927_s23, %s74_s26  }
  0x33   : > { %p17102_p5 = por %p82_p2, %p81_p0  ;;  %p17106_p6 = por %p88_p4, %p87_p3 }
  0x34   : > { %19602 = sst [smem:[#allocation51_spill]] %s17100_s28  ;;  %p527_p7 = scmp.eq.s32.totalorder %s17084_s2, 1 }
  0x35   : > { %s19604_s29 = scalar_select %p17106_p6, 1, 0 }
  0x36   : > { %p533_p8 = scmp.eq.s32.totalorder %s19546_s25, 1  ;;  %p17113_p9 = por %p527_p7, %p81_p0 }
  0x37   : > { %19605 = sst [smem:[#allocation52_spill]] %s19604_s29  ;;  %p19558_p11 = scmp.ge.s32.totalorder %s16931_s24, 2 }
  0x38   : > { %s19606_s30 = scalar_select %p17113_p9, 1, 0 }
  0x39   : > { %p17117_p10 = por %p533_p8, %p87_p3  ;;  %627 = sbr.rel (%p19558_p11) target bundleno = 525 (0x20d), region = 16 }
  0x3a   : > { %19607 = sst [smem:[#allocation53_spill]] %s19606_s30  ;;  %s17125_s21 = sand.u32 (!%p19558_p11), 1, %s16927_s23  }
  0x3b   : > { %s19608_s0 = scalar_select %p17117_p10, 1, 0 }
  0x3c   : > { %s17128_s26 = sand.u32 (!%p19558_p11), 1, %s16931_s24   ;;  %s12421_s27 = sshll.u32 (!%p19558_p11), %s17125_s21, 11 }
  0x3d   : > { %19609 = sst [smem:[#allocation54_spill]] %s19608_s0  ;;  %s13908_s25 = sshll.u32 (!%p19558_p11), %s16931_s24, 15 }
  0x3e   : > { %s19610_s0 = sld [smem:[#allocation56_spill]] (!%p19558_p11)  ;;  %s654_s20 = scalar_lea.vmem (!%p19558_p11), [#allocation5], %s12421_s27 }
  0x3f   : > { %s661_s19 = sshll.u32 (!%p19558_p11), %s654_s20, 4  ;;  %s19563_s23 = scalar_lea.sflag (!%p19558_p11), [#allocation6], %s17128_s26  ;;  %s17137_s19 = int_to_ptr.vmem [resolvable:$true] %s661_s19 }
  0x44   : > { %s17135_s1 = scalar_lea.hbm %s19610_s0, %s13908_s25  ;;  %s16269_s3 = scalar_lea.hbm %s19610_s0, 65536 }
  0x45   : > { %s16265_s17 = scalar_lea.hbm %s17135_s1, 32768  ;;  %p16270_p1 = scmp.lt.u32.totalorder %s17135_s1, %s19610_s0 }
  0x46   : > { %p16266_p12 = scmp.ne.s32.totalorder %s17135_s1, %s16265_s17  ;;  %p16271_p2 = scmp.lt.u32.totalorder %s16269_s3, %s16265_s17 }
  0x47   : > { %p16273_p4 = scmp.lt.u32.totalorder %s16265_s17, %s17135_s1 }
  0x48   : > { %p16267_p13 = pnand %p16266_p12, %p17102_p5  ;;  %p16272_p3 = por %p16271_p2, %p16270_p1 }
  0x4a   : > { %p16268_p0 = pneg %p16267_p13  ;;  %p16274_p7 = por %p16273_p4, %p16272_p3 }
  0x4c   : > { %p16275_p8 = pnand %p16274_p7, %p16268_p0 }
  0x4e   : > { %16278 = shalt.err (!%p16275_p8)
}
  0x4f   : > { %s16279_s20 = scalar_lea.vmem %s17137_s19, 32768  ;;  %s16933_s18 = smov [#allocation5]  }
  0x50   : > { %p16280_p12 = scmp.ne.s32.totalorder %s17137_s19, %s16279_s20  ;;  %s16283_s30 = sshll.u32 %s16933_s18, 4  ;;  %s16284_s30 = int_to_ptr.vmem [resolvable:$false] %s16283_s30 }
  0x51   : > { %s16285_s27 = scalar_lea.vmem %s16284_s30, 65536  ;;  %p16286_p10 = scmp.lt.s32.totalorder %s17137_s19, %s16284_s30 }
  0x52   : > { %p16281_p13 = pnand %p16280_p12, %p17102_p5  ;;  %p16287_p9 = scmp.lt.s32.totalorder %s16285_s27, %s16279_s20 }
  0x54   : > { %p16282_p11 = pneg %p16281_p13  ;;  %p16288_p1 = por %p16287_p9, %p16286_p10 }
  0x56   : > { %p16289_p2 = pnand %p16288_p1, %p16282_p11 }
  0x58   : > { %16292 = shalt.err (!%p16289_p2)
}
  0x59   : > { %s19564_s17 = smov 256   ;;  %s19566_s3 = smov 16  }
  0x5a   : > { %14057 = dma.hbm_to_vmem [thread:$0]  (%p17102_p5), %s17135_s1, 32768, %s17137_s19, %s19563_s23, %s19564_s17, %s19564_s17, %s19566_s3  }
  0x5b   : > { %s17167_s25 = sshll.u32 %s17125_s21, 10  ;;  %s17170_s28 = sshll.u32 %s16931_s24, 14 }
  0x5c   : > { %s19611_s30 = sld [smem:[#allocation58_spill]]  ;;  %s694_s0 = scalar_lea.vmem [#allocation8], %s17167_s25 }
  0x5d   : > { %s701_s2 = sshll.u32 %s694_s0, 4  ;;  %s19571_s19 = scalar_lea.sflag [#allocation9], %s17128_s26  ;;  %s17179_s2 = int_to_ptr.vmem [resolvable:$true] %s701_s2 }
  0x62   : > { %s17176_s27 = scalar_lea.hbm %s19611_s30, %s17170_s28  ;;  %s16297_s20 = scalar_lea.hbm %s19611_s30, 32768 }
  0x63   : > { %s16293_s1 = scalar_lea.hbm %s17176_s27, 16384  ;;  %p16298_p0 = scmp.lt.u32.totalorder %s17176_s27, %s19611_s30 }
  0x64   : > { %p16294_p9 = scmp.ne.s32.totalorder %s17176_s27, %s16293_s1  ;;  %p16299_p3 = scmp.lt.u32.totalorder %s16297_s20, %s16293_s1 }
  0x65   : > { %p16301_p7 = scmp.lt.u32.totalorder %s16293_s1, %s17176_s27 }
  0x66   : > { %p16295_p10 = pnand %p16294_p9, %p17102_p5  ;;  %p16300_p4 = por %p16299_p3, %p16298_p0 }
  0x68   : > { %p16296_p11 = pneg %p16295_p10  ;;  %p16302_p8 = por %p16301_p7, %p16300_p4 }
  0x6a   : > { %p16303_p12 = pnand %p16302_p8, %p16296_p11 }
  0x6c   : > { %16306 = shalt.err (!%p16303_p12)
}
  0x6d   : > { %s16307_s0 = scalar_lea.vmem %s17179_s2, 16384  ;;  %s16936_s23 = smov [#allocation8]  }
  0x6e   : > { %p16308_p13 = scmp.ne.s32.totalorder %s17179_s2, %s16307_s0  ;;  %s16311_s17 = sshll.u32 %s16936_s23, 4  ;;  %s16312_s17 = int_to_ptr.vmem [resolvable:$false] %s16311_s17 }
  0x6f   : > { %s16313_s3 = scalar_lea.vmem %s16312_s17, 32768  ;;  %p16314_p9 = scmp.lt.s32.totalorder %s17179_s2, %s16312_s17 }
  0x70   : > { %p16309_p1 = pnand %p16308_p13, %p17102_p5  ;;  %p16315_p10 = scmp.lt.s32.totalorder %s16313_s3, %s16307_s0 }
  0x72   : > { %p16310_p2 = pneg %p16309_p1  ;;  %p16316_p0 = por %p16315_p10, %p16314_p9 }
  0x74   : > { %p16317_p3 = pnand %p16316_p0, %p16310_p2 }
  0x76   : > { %16320 = shalt.err (!%p16317_p3)
}
  0x77   : > { %s19612_s1 = smov 16   ;;  %s19613_s20 = smov 256  }
  0x78   : > { %14059 = dma.hbm_to_vmem [thread:$0]  (%p17102_p5), %s17176_s27, 16384, %s17179_s2, %s19571_s19, %s19613_s20, %s19613_s20, %s19612_s1  }
  0x79   : > { %s19614_s5 = sld [smem:[#allocation60_spill]]  ;;  %s734_s17 = scalar_lea.vmem [#allocation11], %s17167_s25 }
  0x7a   : > { %s741_s3 = sshll.u32 %s734_s17, 4  ;;  %s19572_s30 = scalar_lea.sflag [#allocation12], %s17128_s26  ;;  %s17215_s3 = int_to_ptr.vmem [resolvable:$true] %s741_s3 }
  0x7f   : > { %s17212_s0 = scalar_lea.hbm %s19614_s5, %s17170_s28  ;;  %s16325_s18 = scalar_lea.hbm %s19614_s5, 32768 }
  0x80   : > { %s16321_s29 = scalar_lea.hbm %s17212_s0, 16384  ;;  %p16326_p8 = scmp.lt.u32.totalorder %s17212_s0, %s19614_s5 }
  0x81   : > { %p16322_p11 = scmp.ne.s32.totalorder %s17212_s0, %s16321_s29  ;;  %p16327_p12 = scmp.lt.u32.totalorder %s16325_s18, %s16321_s29 }
  0x82   : > { %p16329_p1 = scmp.lt.u32.totalorder %s16321_s29, %s17212_s0 }
  0x83   : > { %p16323_p4 = pnand %p16322_p11, %p17102_p5  ;;  %p16328_p13 = por %p16327_p12, %p16326_p8 }
  0x85   : > { %p16324_p7 = pneg %p16323_p4  ;;  %p16330_p2 = por %p16329_p1, %p16328_p13 }
  0x87   : > { %p16331_p9 = pnand %p16330_p2, %p16324_p7 }
  0x89   : > { %16334 = shalt.err (!%p16331_p9)
}
  0x8a   : > { %s16335_s17 = scalar_lea.vmem %s17215_s3, 16384  ;;  %s16937_s2 = smov [#allocation11]  }
  0x8b   : > { %p16336_p10 = scmp.ne.s32.totalorder %s17215_s3, %s16335_s17  ;;  %s16339_s27 = sshll.u32 %s16937_s2, 4  ;;  %s16340_s27 = int_to_ptr.vmem [resolvable:$false] %s16339_s27 }
  0x8c   : > { %s16341_s19 = scalar_lea.vmem %s16340_s27, 32768  ;;  %p16342_p11 = scmp.lt.s32.totalorder %s17215_s3, %s16340_s27 }
  0x8d   : > { %p16337_p0 = pnand %p16336_p10, %p17102_p5  ;;  %p16343_p4 = scmp.lt.s32.totalorder %s16341_s19, %s16335_s17 }
  0x8f   : > { %p16338_p3 = pneg %p16337_p0  ;;  %p16344_p8 = por %p16343_p4, %p16342_p11 }
  0x91   : > { %p16345_p12 = pnand %p16344_p8, %p16338_p3 }
  0x93   : > { %16348 = shalt.err (!%p16345_p12)
}
  0x94   : > { %14061 = dma.hbm_to_vmem [thread:$0]  (%p17102_p5), %s17212_s0, 16384, %s17215_s3, %s19572_s30, %s19613_s20, %s19613_s20, %s19612_s1  }
  0x95   : > { %s19615_s7 = sld [smem:[#allocation62_spill]]  ;;  %s774_s17 = scalar_lea.vmem [#allocation14], %s17167_s25 }
  0x96   : > { %s781_s2 = sshll.u32 %s774_s17, 4  ;;  %s14050_s27 = smul.u32 3072, %s17125_s21  ;;  %s17251_s2 = int_to_ptr.vmem [resolvable:$true] %s781_s2 }
  0x97   : > { %s19573_s19 = scalar_lea.sflag [#allocation15], %s17128_s26 }
  0x9b   : > { %s17248_s23 = scalar_lea.hbm %s19615_s7, %s17170_s28  ;;  %s16353_s29 = scalar_lea.hbm %s19615_s7, 32768 }
  0x9c   : > { %s16349_s5 = scalar_lea.hbm %s17248_s23, 16384  ;;  %p16354_p2 = scmp.lt.u32.totalorder %s17248_s23, %s19615_s7 }
  0x9d   : > { %p16350_p7 = scmp.ne.s32.totalorder %s17248_s23, %s16349_s5  ;;  %p16355_p9 = scmp.lt.u32.totalorder %s16353_s29, %s16349_s5 }
  0x9e   : > { %p16357_p0 = scmp.lt.u32.totalorder %s16349_s5, %s17248_s23 }
  0x9f   : > { %p16351_p13 = pnand %p16350_p7, %p17102_p5  ;;  %p16356_p10 = por %p16355_p9, %p16354_p2 }
  0xa1   : > { %p16352_p1 = pneg %p16351_p13  ;;  %p16358_p3 = por %p16357_p0, %p16356_p10 }
  0xa3   : > { %p16359_p11 = pnand %p16358_p3, %p16352_p1 }
  0xa5   : > { %16362 = shalt.err (!%p16359_p11)
}
  0xa6   : > { %s16363_s17 = scalar_lea.vmem %s17251_s2, 16384  ;;  %s16938_s0 = smov [#allocation14]  }
  0xa7   : > { %p16364_p4 = scmp.ne.s32.totalorder %s17251_s2, %s16363_s17  ;;  %s16367_s3 = sshll.u32 %s16938_s0, 4  ;;  %s16368_s3 = int_to_ptr.vmem [resolvable:$false] %s16367_s3 }
  0xa8   : > { %s16369_s30 = scalar_lea.vmem %s16368_s3, 32768  ;;  %p16370_p7 = scmp.lt.s32.totalorder %s17251_s2, %s16368_s3 }
  0xa9   : > { %p16365_p8 = pnand %p16364_p4, %p17102_p5  ;;  %p16371_p13 = scmp.lt.s32.totalorder %s16369_s30, %s16363_s17 }
  0xab   : > { %p16366_p12 = pneg %p16365_p8  ;;  %p16372_p2 = por %p16371_p13, %p16370_p7 }
  0xad   : > { %p16373_p9 = pnand %p16372_p2, %p16366_p12 }
  0xaf   : > { %16376 = shalt.err (!%p16373_p9)
}
  0xb0   : > { %14063 = dma.hbm_to_vmem [thread:$0]  (%p17102_p5), %s17248_s23, 16384, %s17251_s2, %s19573_s19, %s19613_s20, %s19613_s20, %s19612_s1  }
  0xb1   : > { %s14051_s5 = smul.u32 49152, %s16931_s24  ;;  %s814_s29 = scalar_lea.vmem [#allocation17], %s14050_s27 }
  0xb2   : > { %s821_s18 = sshll.u32 %s814_s29, 4  ;;  %s19616_s9 = sld [smem:[#allocation64_spill]]  ;;  %s17289_s18 = int_to_ptr.vmem [resolvable:$true] %s821_s18 }
  0xb3   : > { %s19576_s30 = scalar_lea.sflag [#allocation18], %s17128_s26 }
  0xb8   : > { %s17287_s3 = scalar_lea.hbm %s19616_s9, %s14051_s5  ;;  %s16381_s27 = scalar_lea.hbm %s19616_s9, 98304 }
  0xb9   : > { %s16377_s7 = scalar_lea.hbm %s17287_s3, 49152  ;;  %p16382_p3 = scmp.lt.u32.totalorder %s17287_s3, %s19616_s9 }
  0xba   : > { %p16378_p1 = scmp.ne.s32.totalorder %s17287_s3, %s16377_s7  ;;  %p16383_p11 = scmp.lt.u32.totalorder %s16381_s27, %s16377_s7 }
  0xbb   : > { %p16385_p8 = scmp.lt.u32.totalorder %s16377_s7, %s17287_s3 }
  0xbc   : > { %p16379_p10 = pnand %p16378_p1, %p17102_p5  ;;  %p16384_p4 = por %p16383_p11, %p16382_p3 }
  0xbe   : > { %p16380_p0 = pneg %p16379_p10  ;;  %p16386_p12 = por %p16385_p8, %p16384_p4 }
  0xc0   : > { %p16387_p7 = pnand %p16386_p12, %p16380_p0 }
  0xc2   : > { %16390 = shalt.err (!%p16387_p7)
}
  0xc3   : > { %s16391_s5 = scalar_lea.vmem %s17289_s18, 49152  ;;  %s16939_s0 = smov [#allocation17]  }
  0xc4   : > { %p16392_p13 = scmp.ne.s32.totalorder %s17289_s18, %s16391_s5  ;;  %s16395_s23 = sshll.u32 %s16939_s0, 4  ;;  %s16396_s23 = int_to_ptr.vmem [resolvable:$false] %s16395_s23 }
  0xc5   : > { %s16397_s2 = scalar_lea.vmem %s16396_s23, 98304  ;;  %p16398_p1 = scmp.lt.s32.totalorder %s17289_s18, %s16396_s23 }
  0xc6   : > { %p16393_p2 = pnand %p16392_p13, %p17102_p5  ;;  %p16399_p10 = scmp.lt.s32.totalorder %s16397_s2, %s16391_s5 }
  0xc8   : > { %p16394_p9 = pneg %p16393_p2  ;;  %p16400_p3 = por %p16399_p10, %p16398_p1 }
  0xca   : > { %p16401_p11 = pnand %p16400_p3, %p16394_p9 }
  0xcc   : > { %16404 = shalt.err (!%p16401_p11)
}
  0xcd   : > { %s16940_s7 = smov 768   ;;  %s16941_s27 = smov 48  }
  0xce   : > { %14065 = dma.hbm_to_vmem [thread:$0]  (%p17102_p5), %s17287_s3, 49152, %s17289_s18, %s19576_s30, %s16940_s7, %s16940_s7, %s16941_s27  }
  0xcf   : > { %s19617_s11 = sld [smem:[#allocation66_spill]]  ;;  %s854_s0 = scalar_lea.vmem [#allocation20], %s17167_s25 }
  0xd0   : > { %s861_s23 = sshll.u32 %s854_s0, 4  ;;  %s19574_s2 = scalar_lea.sflag [#allocation21], %s17128_s26  ;;  %s17322_s23 = int_to_ptr.vmem [resolvable:$true] %s861_s23 }
  0xd5   : > { %s17319_s5 = scalar_lea.hbm %s19617_s11, %s17170_s28  ;;  %s16409_s7 = scalar_lea.hbm %s19617_s11, 32768 }
  0xd6   : > { %s16405_s19 = scalar_lea.hbm %s17319_s5, 16384  ;;  %p16410_p12 = scmp.lt.u32.totalorder %s17319_s5, %s19617_s11 }
  0xd7   : > { %p16406_p0 = scmp.ne.s32.totalorder %s17319_s5, %s16405_s19  ;;  %p16411_p7 = scmp.lt.u32.totalorder %s16409_s7, %s16405_s19 }
  0xd8   : > { %p16413_p2 = scmp.lt.u32.totalorder %s16405_s19, %s17319_s5 }
  0xd9   : > { %p16407_p4 = pnand %p16406_p0, %p17102_p5  ;;  %p16412_p13 = por %p16411_p7, %p16410_p12 }
  0xdb   : > { %p16408_p8 = pneg %p16407_p4  ;;  %p16414_p9 = por %p16413_p2, %p16412_p13 }
  0xdd   : > { %p16415_p1 = pnand %p16414_p9, %p16408_p8 }
  0xdf   : > { %16418 = shalt.err (!%p16415_p1)
}
  0xe0   : > { %s16419_s17 = scalar_lea.vmem %s17322_s23, 16384  ;;  %s16942_s0 = smov [#allocation20]  }
  0xe1   : > { %p16420_p10 = scmp.ne.s32.totalorder %s17322_s23, %s16419_s17  ;;  %s16423_s18 = sshll.u32 %s16942_s0, 4  ;;  %s16424_s18 = int_to_ptr.vmem [resolvable:$false] %s16423_s18 }
  0xe2   : > { %s16425_s3 = scalar_lea.vmem %s16424_s18, 32768  ;;  %p16426_p0 = scmp.lt.s32.totalorder %s17322_s23, %s16424_s18 }
  0xe3   : > { %p16421_p3 = pnand %p16420_p10, %p17102_p5  ;;  %p16427_p4 = scmp.lt.s32.totalorder %s16425_s3, %s16419_s17 }
  0xe5   : > { %p16422_p11 = pneg %p16421_p3  ;;  %p16428_p12 = por %p16427_p4, %p16426_p0 }
  0xe7   : > { %p16429_p7 = pnand %p16428_p12, %p16422_p11 }
  0xe9   : > { %16432 = shalt.err (!%p16429_p7)
}
  0xea   : > { %14067 = dma.hbm_to_vmem [thread:$0]  (%p17102_p5), %s17319_s5, 16384, %s17322_s23, %s19574_s2, %s19613_s20, %s19613_s20, %s19612_s1  }
  0xeb   : > { %s17355_s27 = scalar_lea.hbm %s19533_s13, %s17170_s28  ;;  %s894_s29 = scalar_lea.vmem [#allocation23], %s17167_s25 }
  0xec   : > { %s901_s17 = sshll.u32 %s894_s29, 4  ;;  %s19575_s0 = scalar_lea.sflag [#allocation24], %s17128_s26  ;;  %s17358_s17 = int_to_ptr.vmem [resolvable:$true] %s901_s17 }
  0xed   : > { %s16433_s18 = scalar_lea.hbm %s17355_s27, 16384  ;;  %s16437_s3 = scalar_lea.hbm %s19533_s13, 32768 }
  0xee   : > { %p16434_p8 = scmp.ne.s32.totalorder %s17355_s27, %s16433_s18  ;;  %p16438_p9 = scmp.lt.u32.totalorder %s17355_s27, %s19533_s13 }
  0xef   : > { %p16439_p1 = scmp.lt.u32.totalorder %s16437_s3, %s16433_s18  ;;  %p16441_p3 = scmp.lt.u32.totalorder %s16433_s18, %s17355_s27 }
  0xf0   : > { %p16435_p13 = pnand %p16434_p8, %p17102_p5 }
  0xf1   : > { %p16440_p10 = por %p16439_p1, %p16438_p9 }
  0xf2   : > { %p16436_p2 = pneg %p16435_p13 }
  0xf3   : > { %p16442_p11 = por %p16441_p3, %p16440_p10 }
  0xf5   : > { %p16443_p0 = pnand %p16442_p11, %p16436_p2 }
  0xf7   : > { %16446 = shalt.err (!%p16443_p0)
}
  0xf8   : > { %s16447_s29 = scalar_lea.vmem %s17358_s17, 16384  ;;  %s16943_s5 = smov [#allocation23]  }
  0xf9   : > { %p16448_p4 = scmp.ne.s32.totalorder %s17358_s17, %s16447_s29  ;;  %s16451_s23 = sshll.u32 %s16943_s5, 4  ;;  %s16452_s23 = int_to_ptr.vmem [resolvable:$false] %s16451_s23 }
  0xfa   : > { %s16453_s19 = scalar_lea.vmem %s16452_s23, 32768  ;;  %p16454_p8 = scmp.lt.s32.totalorder %s17358_s17, %s16452_s23 }
  0xfb   : > { %p16449_p12 = pnand %p16448_p4, %p17102_p5  ;;  %p16455_p13 = scmp.lt.s32.totalorder %s16453_s19, %s16447_s29 }
  0xfd   : > { %p16450_p7 = pneg %p16449_p12  ;;  %p16456_p9 = por %p16455_p13, %p16454_p8 }
  0xff   : > { %p16457_p1 = pnand %p16456_p9, %p16450_p7 }
 0x101   : > { %16460 = shalt.err (!%p16457_p1)
}
 0x102   : > { %14069 = dma.hbm_to_vmem [thread:$0]  (%p17102_p5), %s17355_s27, 16384, %s17358_s17, %s19575_s0, %s19613_s20, %s19613_s20, %s19612_s1  }
 0x103   : > { %s17391_s7 = scalar_lea.hbm %s19535_s15, %s17170_s28  ;;  %s934_s29 = scalar_lea.vmem [#allocation26], %s17167_s25 }
 0x104   : > { %s941_s5 = sshll.u32 %s934_s29, 4  ;;  %s12418_s23 = sshll.u32 %s17125_s21, 6  ;;  %s17394_s5 = int_to_ptr.vmem [resolvable:$true] %s941_s5 }
 0x105   : > { %s19578_s19 = scalar_lea.sflag [#allocation27], %s17128_s26  ;;  %s16461_s2 = scalar_lea.hbm %s17391_s7, 16384 }
 0x106   : > { %p16462_p2 = scmp.ne.s32.totalorder %s17391_s7, %s16461_s2  ;;  %s16465_s28 = scalar_lea.hbm %s19535_s15, 32768 }
 0x107   : > { %p16466_p11 = scmp.lt.u32.totalorder %s17391_s7, %s19535_s15  ;;  %p16467_p0 = scmp.lt.u32.totalorder %s16465_s28, %s16461_s2 }
 0x108   : > { %p16463_p10 = pnand %p16462_p2, %p17102_p5  ;;  %p16469_p12 = scmp.lt.u32.totalorder %s16461_s2, %s17391_s7 }
 0x109   : > { %p16468_p4 = por %p16467_p0, %p16466_p11 }
 0x10a   : > { %p16464_p3 = pneg %p16463_p10 }
 0x10b   : > { %p16470_p7 = por %p16469_p12, %p16468_p4 }
 0x10d   : > { %p16471_p8 = pnand %p16470_p7, %p16464_p3 }
 0x10f   : > { %16474 = shalt.err (!%p16471_p8)
}
 0x110   : > { %s16475_s25 = scalar_lea.vmem %s17394_s5, 16384  ;;  %s16944_s29 = smov [#allocation26]  }
 0x111   : > { %p16476_p13 = scmp.ne.s32.totalorder %s17394_s5, %s16475_s25  ;;  %s16479_s27 = sshll.u32 %s16944_s29, 4  ;;  %s16480_s27 = int_to_ptr.vmem [resolvable:$false] %s16479_s27 }
 0x112   : > { %s16481_s17 = scalar_lea.vmem %s16480_s27, 32768  ;;  %p16482_p2 = scmp.lt.s32.totalorder %s17394_s5, %s16480_s27 }
 0x113   : > { %p16477_p9 = pnand %p16476_p13, %p17102_p5  ;;  %p16483_p10 = scmp.lt.s32.totalorder %s16481_s17, %s16475_s25 }
 0x115   : > { %p16478_p1 = pneg %p16477_p9  ;;  %p16484_p11 = por %p16483_p10, %p16482_p2 }
 0x117   : > { %p16485_p0 = pnand %p16484_p11, %p16478_p1 }
 0x119   : > { %16488 = shalt.err (!%p16485_p0)
}
 0x11a   : > { %14071 = dma.hbm_to_vmem [thread:$0]  (%p17102_p5), %s17391_s7, 16384, %s17394_s5, %s19578_s19, %s19613_s20, %s19613_s20, %s19612_s1  }
 0x11b   : > { %s13907_s2 = sshll.u32 %s16931_s24, 10  ;;  %s19618_s3 = sld [smem:[#allocation55_spill]] }
 0x11c   : > { %s635_s29 = scalar_lea.vmem [#allocation2], %s12418_s23  ;;  %s17435_s17 = sshll.u32 %s17125_s21, 2 }
 0x11d   : > { %s643_s27 = sshll.u32 %s635_s29, 4  ;;  %s632_s0 = scalar_lea.sflag [#allocation3], %s17125_s21  ;;  %s17432_s27 = int_to_ptr.vmem [resolvable:$true] %s643_s27 }
 0x121   : > { %s17428_s25 = scalar_lea.hbm %s19618_s3, %s13907_s2  ;;  %s16493_s7 = scalar_lea.hbm %s19618_s3, 2048 }
 0x122   : > { %s16489_s30 = scalar_lea.hbm %s17428_s25, 1024  ;;  %p16494_p7 = scmp.lt.u32.totalorder %s17428_s25, %s19618_s3 }
 0x123   : > { %p16490_p3 = scmp.ne.s32.totalorder %s17428_s25, %s16489_s30  ;;  %p16495_p8 = scmp.lt.u32.totalorder %s16493_s7, %s16489_s30 }
 0x124   : > { %p16497_p9 = scmp.lt.u32.totalorder %s16489_s30, %s17428_s25 }
 0x125   : > { %p16491_p4 = pnand %p16490_p3, %p17102_p5  ;;  %p16496_p13 = por %p16495_p8, %p16494_p7 }
 0x127   : > { %p16492_p12 = pneg %p16491_p4  ;;  %p16498_p1 = por %p16497_p9, %p16496_p13 }
 0x129   : > { %p16499_p2 = pnand %p16498_p1, %p16492_p12 }
 0x12b   : > { %16502 = shalt.err (!%p16499_p2)
}
 0x12c   : > { %s16503_s23 = scalar_lea.vmem %s17432_s27, 1024  ;;  %s16945_s28 = smov [#allocation2]  }
 0x12d   : > { %p16504_p10 = scmp.ne.s32.totalorder %s17432_s27, %s16503_s23  ;;  %s16507_s18 = sshll.u32 %s16945_s28, 4  ;;  %s16508_s18 = int_to_ptr.vmem [resolvable:$false] %s16507_s18 }
 0x12e   : > { %s16509_s29 = scalar_lea.vmem %s16508_s18, 2048  ;;  %p16510_p3 = scmp.lt.s32.totalorder %s17432_s27, %s16508_s18 }
 0x12f   : > { %p16505_p11 = pnand %p16504_p10, %p17102_p5  ;;  %p16511_p4 = scmp.lt.s32.totalorder %s16509_s29, %s16503_s23 }
 0x131   : > { %p16506_p0 = pneg %p16505_p11  ;;  %p16512_p7 = por %p16511_p4, %p16510_p3 }
 0x133   : > { %p16513_p8 = pnand %p16512_p7, %p16506_p0 }
 0x135   : > { %16516 = shalt.err (!%p16513_p8)
}
 0x136   : > { %14056 = dma.hbm_to_vmem [thread:$0]  (%p17102_p5), %s17428_s25, 1024, %s17432_s27, %s632_s0  }
 0x137   : > { %s17460_s30 = sshll.u32 %s16931_s24, 6  ;;  %s19619_s7 = sld [smem:[#allocation57_spill]] }
 0x138   : > { %s675_s2 = scalar_lea.vmem [#allocation7], %s17435_s17 }
 0x139   : > { %s683_s23 = sshll.u32 %s675_s2, 4  ;;  %s684_s23 = int_to_ptr.vmem [resolvable:$true] %s683_s23 }
 0x13d   : > { %s17466_s5 = scalar_lea.hbm %s19619_s7, %s17460_s30  ;;  %s16521_s27 = scalar_lea.hbm %s19619_s7, 128 }
 0x13e   : > { %s16517_s28 = scalar_lea.hbm %s17466_s5, 64  ;;  %p16522_p1 = scmp.lt.u32.totalorder %s17466_s5, %s19619_s7 }
 0x13f   : > { %p16518_p12 = scmp.ne.s32.totalorder %s17466_s5, %s16517_s28  ;;  %p16523_p2 = scmp.lt.u32.totalorder %s16521_s27, %s16517_s28 }
 0x140   : > { %p16525_p11 = scmp.lt.u32.totalorder %s16517_s28, %s17466_s5 }
 0x141   : > { %p16519_p13 = pnand %p16518_p12, %p17102_p5  ;;  %p16524_p10 = por %p16523_p2, %p16522_p1 }
 0x143   : > { %p16520_p9 = pneg %p16519_p13  ;;  %p16526_p0 = por %p16525_p11, %p16524_p10 }
 0x145   : > { %p16527_p3 = pnand %p16526_p0, %p16520_p9 }
 0x147   : > { %16530 = shalt.err (!%p16527_p3)
}
 0x148   : > { %s16531_s1 = scalar_lea.vmem %s684_s23, 64  ;;  %s16946_s20 = smov [#allocation7]  }
 0x149   : > { %p16532_p4 = scmp.ne.s32.totalorder %s684_s23, %s16531_s1  ;;  %s16535_s2 = sshll.u32 %s16946_s20, 4  ;;  %s16536_s2 = int_to_ptr.vmem [resolvable:$false] %s16535_s2 }
 0x14a   : > { %s16537_s0 = scalar_lea.vmem %s16536_s2, 128  ;;  %p16538_p12 = scmp.lt.s32.totalorder %s684_s23, %s16536_s2 }
 0x14b   : > { %p16533_p7 = pnand %p16532_p4, %p17102_p5  ;;  %p16539_p13 = scmp.lt.s32.totalorder %s16537_s0, %s16531_s1 }
 0x14d   : > { %p16534_p8 = pneg %p16533_p7  ;;  %p16540_p6 = por %p16539_p13, %p16538_p12 }
 0x14f   : > { %p16541_p1 = pnand %p16540_p6, %p16534_p8 }
 0x151   : > { %16544 = shalt.err (!%p16541_p1)
}
 0x152   : > { %s19620_s28 = scalar_lea.sflag [#allocation6], %s17128_s26  ;;  %s19621_s18 = sld [smem:[#allocation59_spill]] }
 0x153   : > { %14058 = dma.hbm_to_vmem [thread:$0]  (%p17102_p5), %s17466_s5, 64, %s684_s23, %s19620_s28  }
 0x154   : > { %s715_s1 = scalar_lea.vmem [#allocation10], %s17435_s17 }
 0x155   : > { %s723_s20 = sshll.u32 %s715_s1, 4  ;;  %s724_s20 = int_to_ptr.vmem [resolvable:$true] %s723_s20 }
 0x158   : > { %s17492_s29 = scalar_lea.hbm %s19621_s18, %s17460_s30  ;;  %s16549_s5 = scalar_lea.hbm %s19621_s18, 128 }
 0x159   : > { %s16545_s2 = scalar_lea.hbm %s17492_s29, 64  ;;  %p16550_p10 = scmp.lt.u32.totalorder %s17492_s29, %s19621_s18 }
 0x15a   : > { %p16546_p6 = scmp.ne.s32.totalorder %s17492_s29, %s16545_s2  ;;  %p16551_p11 = scmp.lt.u32.totalorder %s16549_s5, %s16545_s2 }
 0x15b   : > { %p16553_p3 = scmp.lt.u32.totalorder %s16545_s2, %s17492_s29 }
 0x15c   : > { %p16547_p9 = pnand %p16546_p6, %p17102_p5  ;;  %p16552_p0 = por %p16551_p11, %p16550_p10 }
 0x15e   : > { %p16548_p2 = pneg %p16547_p9  ;;  %p16554_p4 = por %p16553_p3, %p16552_p0 }
 0x160   : > { %p16555_p7 = pnand %p16554_p4, %p16548_p2 }
 0x162   : > { %16558 = shalt.err (!%p16555_p7)
}
 0x163   : > { %s16559_s25 = scalar_lea.vmem %s724_s20, 64  ;;  %s16947_s27 = smov [#allocation10]  }
 0x164   : > { %p16560_p8 = scmp.ne.s32.totalorder %s724_s20, %s16559_s25  ;;  %s16563_s1 = sshll.u32 %s16947_s27, 4  ;;  %s16564_s1 = int_to_ptr.vmem [resolvable:$false] %s16563_s1 }
 0x165   : > { %s16565_s19 = scalar_lea.vmem %s16564_s1, 128  ;;  %p16566_p1 = scmp.lt.s32.totalorder %s724_s20, %s16564_s1 }
 0x166   : > { %p16561_p12 = pnand %p16560_p8, %p17102_p5  ;;  %p16567_p6 = scmp.lt.s32.totalorder %s16565_s19, %s16559_s25 }
 0x168   : > { %p16562_p13 = pneg %p16561_p12  ;;  %p16568_p9 = por %p16567_p6, %p16566_p1 }
 0x16a   : > { %p16569_p10 = pnand %p16568_p9, %p16562_p13 }
 0x16c   : > { %16572 = shalt.err (!%p16569_p10)
}
 0x16d   : > { %s19622_s2 = scalar_lea.sflag [#allocation9], %s17128_s26  ;;  %s19623_s6 = sld [smem:[#allocation61_spill]] }
 0x16e   : > { %14060 = dma.hbm_to_vmem [thread:$0]  (%p17102_p5), %s17492_s29, 64, %s724_s20, %s19622_s2  }
 0x16f   : > { %s755_s28 = scalar_lea.vmem [#allocation13], %s17435_s17 }
 0x170   : > { %s763_s25 = sshll.u32 %s755_s28, 4  ;;  %s764_s25 = int_to_ptr.vmem [resolvable:$true] %s763_s25 }
 0x173   : > { %s17518_s23 = scalar_lea.hbm %s19623_s6, %s17460_s30  ;;  %s16577_s29 = scalar_lea.hbm %s19623_s6, 128 }
 0x174   : > { %s16573_s27 = scalar_lea.hbm %s17518_s23, 64  ;;  %p16578_p3 = scmp.lt.u32.totalorder %s17518_s23, %s19623_s6 }
 0x175   : > { %p16574_p2 = scmp.ne.s32.totalorder %s17518_s23, %s16573_s27  ;;  %p16579_p4 = scmp.lt.u32.totalorder %s16577_s29, %s16573_s27 }
 0x176   : > { %p16581_p8 = scmp.lt.u32.totalorder %s16573_s27, %s17518_s23 }
 0x177   : > { %p16575_p11 = pnand %p16574_p2, %p17102_p5  ;;  %p16580_p7 = por %p16579_p4, %p16578_p3 }
 0x179   : > { %p16576_p0 = pneg %p16575_p11  ;;  %p16582_p12 = por %p16581_p8, %p16580_p7 }
 0x17b   : > { %p16583_p13 = pnand %p16582_p12, %p16576_p0 }
 0x17d   : > { %16586 = shalt.err (!%p16583_p13)
}
 0x17e   : > { %s16587_s0 = scalar_lea.vmem %s764_s25, 64  ;;  %s16948_s5 = smov [#allocation13]  }
 0x17f   : > { %p16588_p1 = scmp.ne.s32.totalorder %s764_s25, %s16587_s0  ;;  %s16591_s28 = sshll.u32 %s16948_s5, 4  ;;  %s16592_s28 = int_to_ptr.vmem [resolvable:$false] %s16591_s28 }
 0x180   : > { %s16593_s1 = scalar_lea.vmem %s16592_s28, 128  ;;  %p16594_p10 = scmp.lt.s32.totalorder %s764_s25, %s16592_s28 }
 0x181   : > { %p16589_p6 = pnand %p16588_p1, %p17102_p5  ;;  %p16595_p2 = scmp.lt.s32.totalorder %s16593_s1, %s16587_s0 }
 0x183   : > { %p16590_p9 = pneg %p16589_p6  ;;  %p16596_p11 = por %p16595_p2, %p16594_p10 }
 0x185   : > { %p16597_p3 = pnand %p16596_p11, %p16590_p9 }
 0x187   : > { %16600 = shalt.err (!%p16597_p3)
}
 0x188   : > { %s19624_s27 = scalar_lea.sflag [#allocation12], %s17128_s26  ;;  %s19625_s8 = sld [smem:[#allocation63_spill]] }
 0x189   : > { %14062 = dma.hbm_to_vmem [thread:$0]  (%p17102_p5), %s17518_s23, 64, %s764_s25, %s19624_s27  }
 0x18a   : > { %s795_s2 = scalar_lea.vmem [#allocation16], %s17435_s17  ;;  %s14052_s5 = smul.u32 12, %s17125_s21 }
 0x18b   : > { %s803_s0 = sshll.u32 %s795_s2, 4  ;;  %s804_s0 = int_to_ptr.vmem [resolvable:$true] %s803_s0 }
 0x18e   : > { %s17544_s20 = scalar_lea.hbm %s19625_s8, %s17460_s30  ;;  %s16605_s25 = scalar_lea.hbm %s19625_s8, 128 }
 0x18f   : > { %s16601_s28 = scalar_lea.hbm %s17544_s20, 64  ;;  %p16606_p8 = scmp.lt.u32.totalorder %s17544_s20, %s19625_s8 }
 0x190   : > { %p16602_p0 = scmp.ne.s32.totalorder %s17544_s20, %s16601_s28  ;;  %p16607_p12 = scmp.lt.u32.totalorder %s16605_s25, %s16601_s28 }
 0x191   : > { %p16609_p1 = scmp.lt.u32.totalorder %s16601_s28, %s17544_s20 }
 0x192   : > { %p16603_p4 = pnand %p16602_p0, %p17102_p5  ;;  %p16608_p13 = por %p16607_p12, %p16606_p8 }
 0x194   : > { %p16604_p7 = pneg %p16603_p4  ;;  %p16610_p6 = por %p16609_p1, %p16608_p13 }
 0x196   : > { %p16611_p9 = pnand %p16610_p6, %p16604_p7 }
 0x198   : > { %16614 = shalt.err (!%p16611_p9)
}
 0x199   : > { %s16615_s21 = scalar_lea.vmem %s804_s0, 64  ;;  %s16949_s29 = smov [#allocation16]  }
 0x19a   : > { %p16616_p10 = scmp.ne.s32.totalorder %s804_s0, %s16615_s21  ;;  %s16619_s2 = sshll.u32 %s16949_s29, 4  ;;  %s16620_s2 = int_to_ptr.vmem [resolvable:$false] %s16619_s2 }
 0x19b   : > { %s16621_s1 = scalar_lea.vmem %s16620_s2, 128  ;;  %p16622_p3 = scmp.lt.s32.totalorder %s804_s0, %s16620_s2 }
 0x19c   : > { %p16617_p2 = pnand %p16616_p10, %p17102_p5  ;;  %p16623_p0 = scmp.lt.s32.totalorder %s16621_s1, %s16615_s21 }
 0x19e   : > { %p16618_p11 = pneg %p16617_p2  ;;  %p16624_p4 = por %p16623_p0, %p16622_p3 }
 0x1a0   : > { %p16625_p8 = pnand %p16624_p4, %p16618_p11 }
 0x1a2   : > { %16628 = shalt.err (!%p16625_p8)
}
 0x1a3   : > { %s19626_s28 = scalar_lea.sflag [#allocation15], %s17128_s26  ;;  %s14053_s23 = smul.u32 192, %s16931_s24 }
 0x1a4   : > { %14064 = dma.hbm_to_vmem [thread:$0]  (%p17102_p5), %s17544_s20, 64, %s804_s0, %s19626_s28  }
 0x1a5   : > { %s835_s25 = scalar_lea.vmem [#allocation19], %s14052_s5  ;;  %s19627_s10 = sld [smem:[#allocation65_spill]] }
 0x1a6   : > { %s843_s27 = sshll.u32 %s835_s25, 4  ;;  %s844_s27 = int_to_ptr.vmem [resolvable:$true] %s843_s27 }
 0x1ab   : > { %s841_s3 = scalar_lea.hbm %s19627_s10, %s14053_s23  ;;  %s16633_s6 = scalar_lea.hbm %s19627_s10, 384 }
 0x1ac   : > { %s16629_s21 = scalar_lea.hbm %s841_s3, 192  ;;  %p16634_p1 = scmp.lt.u32.totalorder %s841_s3, %s19627_s10 }
 0x1ad   : > { %p16630_p7 = scmp.ne.s32.totalorder %s841_s3, %s16629_s21  ;;  %p16635_p6 = scmp.lt.u32.totalorder %s16633_s6, %s16629_s21 }
 0x1ae   : > { %p16637_p10 = scmp.lt.u32.totalorder %s16629_s21, %s841_s3 }
 0x1af   : > { %p16631_p12 = pnand %p16630_p7, %p17102_p5  ;;  %p16636_p9 = por %p16635_p6, %p16634_p1 }
 0x1b1   : > { %p16632_p13 = pneg %p16631_p12  ;;  %p16638_p2 = por %p16637_p10, %p16636_p9 }
 0x1b3   : > { %p16639_p11 = pnand %p16638_p2, %p16632_p13 }
 0x1b5   : > { %16642 = shalt.err (!%p16639_p11)
}
 0x1b6   : > { %s16643_s20 = scalar_lea.vmem %s844_s27, 192  ;;  %s16950_s0 = smov [#allocation19]  }
 0x1b7   : > { %p16644_p3 = scmp.ne.s32.totalorder %s844_s27, %s16643_s20  ;;  %s16647_s5 = sshll.u32 %s16950_s0, 4  ;;  %s16648_s5 = int_to_ptr.vmem [resolvable:$false] %s16647_s5 }
 0x1b8   : > { %s16649_s28 = scalar_lea.vmem %s16648_s5, 384  ;;  %p16650_p8 = scmp.lt.s32.totalorder %s844_s27, %s16648_s5 }
 0x1b9   : > { %p16645_p0 = pnand %p16644_p3, %p17102_p5  ;;  %p16651_p7 = scmp.lt.s32.totalorder %s16649_s28, %s16643_s20 }
 0x1bb   : > { %p16646_p4 = pneg %p16645_p0  ;;  %p16652_p12 = por %p16651_p7, %p16650_p8 }
 0x1bd   : > { %p16653_p1 = pnand %p16652_p12, %p16646_p4 }
 0x1bf   : > { %16656 = shalt.err (!%p16653_p1)
}
 0x1c0   : > { %s19628_s6 = scalar_lea.sflag [#allocation18], %s17128_s26  ;;  %s19629_s12 = sld [smem:[#allocation67_spill]] }
 0x1c1   : > { %14066 = dma.hbm_to_vmem [thread:$0]  (%p17102_p5), %s841_s3, 192, %s844_s27, %s19628_s6  }
 0x1c2   : > { %s875_s25 = scalar_lea.vmem [#allocation22], %s17435_s17 }
 0x1c3   : > { %s883_s19 = sshll.u32 %s875_s25, 4  ;;  %s884_s19 = int_to_ptr.vmem [resolvable:$true] %s883_s19 }
 0x1c6   : > { %s17589_s23 = scalar_lea.hbm %s19629_s12, %s17460_s30  ;;  %s16661_s3 = scalar_lea.hbm %s19629_s12, 128 }
 0x1c7   : > { %s16657_s29 = scalar_lea.hbm %s17589_s23, 64  ;;  %p16662_p10 = scmp.lt.u32.totalorder %s17589_s23, %s19629_s12 }
 0x1c8   : > { %p16658_p13 = scmp.ne.s32.totalorder %s17589_s23, %s16657_s29  ;;  %p16663_p2 = scmp.lt.u32.totalorder %s16661_s3, %s16657_s29 }
 0x1c9   : > { %p16665_p3 = scmp.lt.u32.totalorder %s16657_s29, %s17589_s23 }
 0x1ca   : > { %p16659_p6 = pnand %p16658_p13, %p17102_p5  ;;  %p16664_p11 = por %p16663_p2, %p16662_p10 }
 0x1cc   : > { %p16660_p9 = pneg %p16659_p6  ;;  %p16666_p0 = por %p16665_p3, %p16664_p11 }
 0x1ce   : > { %p16667_p4 = pnand %p16666_p0, %p16660_p9 }
 0x1d0   : > { %16670 = shalt.err (!%p16667_p4)
}
 0x1d1   : > { %s16671_s20 = scalar_lea.vmem %s884_s19, 64  ;;  %s16951_s0 = smov [#allocation22]  }
 0x1d2   : > { %p16672_p8 = scmp.ne.s32.totalorder %s884_s19, %s16671_s20  ;;  %s16675_s5 = sshll.u32 %s16951_s0, 4  ;;  %s16676_s5 = int_to_ptr.vmem [resolvable:$false] %s16675_s5 }
 0x1d3   : > { %s16677_s28 = scalar_lea.vmem %s16676_s5, 128  ;;  %p16678_p1 = scmp.lt.s32.totalorder %s884_s19, %s16676_s5 }
 0x1d4   : > { %p16673_p7 = pnand %p16672_p8, %p17102_p5  ;;  %p16679_p13 = scmp.lt.s32.totalorder %s16677_s28, %s16671_s20 }
 0x1d6   : > { %p16674_p12 = pneg %p16673_p7  ;;  %p16680_p6 = por %p16679_p13, %p16678_p1 }
 0x1d8   : > { %p16681_p2 = pnand %p16680_p6, %p16674_p12 }
 0x1da   : > { %16684 = shalt.err (!%p16681_p2)
}
 0x1db   : > { %s19630_s6 = scalar_lea.sflag [#allocation21], %s17128_s26  ;;  %s17615_s25 = scalar_lea.hbm %s19534_s14, %s17460_s30 }
 0x1dc   : > { %14068 = dma.hbm_to_vmem [thread:$0]  (%p17102_p5), %s17589_s23, 64, %s884_s19, %s19630_s6  }
 0x1dd   : > { %s915_s29 = scalar_lea.vmem [#allocation25], %s17435_s17  ;;  %s16685_s2 = scalar_lea.hbm %s17615_s25, 64 }
 0x1de   : > { %s923_s21 = sshll.u32 %s915_s29, 4  ;;  %p16686_p9 = scmp.ne.s32.totalorder %s17615_s25, %s16685_s2  ;;  %s924_s21 = int_to_ptr.vmem [resolvable:$true] %s923_s21 }
 0x1df   : > { %s16689_s23 = scalar_lea.hbm %s19534_s14, 128  ;;  %p16690_p3 = scmp.lt.u32.totalorder %s17615_s25, %s19534_s14 }
 0x1e0   : > { %p16687_p10 = pnand %p16686_p9, %p17102_p5  ;;  %p16691_p0 = scmp.lt.u32.totalorder %s16689_s23, %s16685_s2 }
 0x1e1   : > { %p16693_p8 = scmp.lt.u32.totalorder %s16685_s2, %s17615_s25 }
 0x1e2   : > { %p16688_p11 = pneg %p16687_p10  ;;  %p16692_p4 = por %p16691_p0, %p16690_p3 }
 0x1e4   : > { %p16694_p7 = por %p16693_p8, %p16692_p4 }
 0x1e6   : > { %p16695_p12 = pnand %p16694_p7, %p16688_p11 }
 0x1e8   : > { %16698 = shalt.err (!%p16695_p12)
}
 0x1e9   : > { %s16699_s20 = scalar_lea.vmem %s924_s21, 64  ;;  %s16952_s0 = smov [#allocation25]  }
 0x1ea   : > { %p16700_p1 = scmp.ne.s32.totalorder %s924_s21, %s16699_s20  ;;  %s16703_s5 = sshll.u32 %s16952_s0, 4  ;;  %s16704_s5 = int_to_ptr.vmem [resolvable:$false] %s16703_s5 }
 0x1eb   : > { %s16705_s28 = scalar_lea.vmem %s16704_s5, 128  ;;  %p16706_p2 = scmp.lt.s32.totalorder %s924_s21, %s16704_s5 }
 0x1ec   : > { %p16701_p13 = pnand %p16700_p1, %p17102_p5  ;;  %p16707_p9 = scmp.lt.s32.totalorder %s16705_s28, %s16699_s20 }
 0x1ee   : > { %p16702_p6 = pneg %p16701_p13  ;;  %p16708_p10 = por %p16707_p9, %p16706_p2 }
 0x1f0   : > { %p16709_p0 = pnand %p16708_p10, %p16702_p6 }
 0x1f2   : > { %16712 = shalt.err (!%p16709_p0)
}
 0x1f3   : > { %s19631_s6 = scalar_lea.sflag [#allocation24], %s17128_s26  ;;  %s17641_s29 = scalar_lea.hbm %s19536_s16, %s17460_s30 }
 0x1f4   : > { %14070 = dma.hbm_to_vmem [thread:$0]  (%p17102_p5), %s17615_s25, 64, %s924_s21, %s19631_s6  }
 0x1f5   : > { %s955_s2 = scalar_lea.vmem [#allocation28], %s17435_s17  ;;  %s16713_s27 = scalar_lea.hbm %s17641_s29, 64 }
 0x1f6   : > { %s963_s3 = sshll.u32 %s955_s2, 4  ;;  %p16714_p11 = scmp.ne.s32.totalorder %s17641_s29, %s16713_s27  ;;  %s964_s3 = int_to_ptr.vmem [resolvable:$true] %s963_s3 }
 0x1f7   : > { %s16717_s25 = scalar_lea.hbm %s19536_s16, 128  ;;  %p16718_p8 = scmp.lt.u32.totalorder %s17641_s29, %s19536_s16 }
 0x1f8   : > { %p16715_p3 = pnand %p16714_p11, %p17102_p5  ;;  %p16719_p7 = scmp.lt.u32.totalorder %s16717_s25, %s16713_s27 }
 0x1f9   : > { %p16721_p1 = scmp.lt.u32.totalorder %s16713_s27, %s17641_s29 }
 0x1fa   : > { %p16716_p4 = pneg %p16715_p3  ;;  %p16720_p12 = por %p16719_p7, %p16718_p8 }
 0x1fc   : > { %p16722_p13 = por %p16721_p1, %p16720_p12 }
 0x1fe   : > { %p16723_p6 = pnand %p16722_p13, %p16716_p4 }
 0x200   : > { %16726 = shalt.err (!%p16723_p6)
}
 0x201   : > { %s16727_s17 = scalar_lea.vmem %s964_s3, 64  ;;  %s16953_s30 = smov [#allocation28]  }
 0x202   : > { %p16728_p2 = scmp.ne.s32.totalorder %s964_s3, %s16727_s17  ;;  %s16731_s20 = sshll.u32 %s16953_s30, 4  ;;  %s16732_s20 = int_to_ptr.vmem [resolvable:$false] %s16731_s20 }
 0x203   : > { %s16733_s0 = scalar_lea.vmem %s16732_s20, 128  ;;  %p16734_p0 = scmp.lt.s32.totalorder %s964_s3, %s16732_s20 }
 0x204   : > { %p16729_p9 = pnand %p16728_p2, %p17102_p5  ;;  %p16735_p11 = scmp.lt.s32.totalorder %s16733_s0, %s16727_s17 }
 0x206   : > { %p16730_p10 = pneg %p16729_p9  ;;  %p16736_p3 = por %p16735_p11, %p16734_p0 }
 0x208   : > { %p16737_p7 = pnand %p16736_p3, %p16730_p10 }
 0x20a   : > { %16740 = shalt.err (!%p16737_p7)
}
 0x20b   : > { %s19632_s5 = scalar_lea.sflag [#allocation27], %s17128_s26 }
 0x20c   : > { %14072 = dma.hbm_to_vmem [thread:$0]  (%p17102_p5), %s17641_s29, 64, %s964_s3, %s19632_s5  }
 0x20d PF: > { %p12465_p4 = scmp.ge.s32.totalorder %s16931_s24, 1  ;;  %p968_p8 = scmp.lt.s32.totalorder %s16931_s24, 3 }
 0x20f   : > { %p969_p12 = pnand %p12465_p4, %p968_p8 }
 0x210   : > { %s19633_s28 = sld [smem:[#allocation52_spill]] (!%p969_p12)  ;;  %s17666_s6 = sand.u32 (!%p969_p12), 1, %s16923_s22  }
 0x211   : > { %972 = sbr.rel (%p969_p12) target bundleno = 2768 (0xad0), region = 88  ;;  %s12466_s8 = sshll.u32 (!%p969_p12), %s17666_s6, 6 }
 0x212   : > { %s975_s7 = scalar_lea.sflag (!%p969_p12), [#allocation3], %s17666_s6  ;;  %s17670_s4 = scalar_lea.vmem (!%p969_p12), [#allocation2], %s12466_s8 }
 0x216   : > { %p19634_p1 = scmp.ne.s32.totalorder (!%p969_p12), %s19633_s28, 0 }
 0x218   : > { %16870 = dma.done.wait (%p19634_p1), %s975_s7, 1024  }
 0x219   : > { %16872 = vsyncadd (%p19634_p1), %s975_s7, 4294966272  ;;  %s19635_s26 = sld [smem:[#allocation49_spill]]  ;;  %s12467_s2 = sshll.u32 %s17666_s6, 11 }
 0x21a   : > { %s17681_s27 = scalar_lea.vmem [#allocation5], %s12467_s2 }
 0x21f   : > { %s17677_s29 = sand.u32 1, %s19635_s26  }
 0x220   : > { %s984_s3 = scalar_lea.sflag [#allocation6], %s17677_s29 }
 0x221   : > { %16874 = dma.done.wait (%p19634_p1), %s984_s3, 32832  }
 0x222   : > { %16876 = vsyncadd (%p19634_p1), %s984_s3, 4294934464  ;;  %s17688_s23 = sshll.u32 %s17666_s6, 2  ;;  %s17691_s19 = sshll.u32 %s17666_s6, 10 }
 0x223   : > { %s1002_s21 = scalar_lea.sflag [#allocation9], %s17677_s29  ;;  %s17696_s1 = scalar_lea.vmem [#allocation8], %s17691_s19 }
 0x224   : > { %16878 = dma.done.wait (%p19634_p1), %s1002_s21, 16448  }
 0x225   : > { %16880 = vsyncadd (%p19634_p1), %s1002_s21, 4294950848  ;;  %s1020_s30 = scalar_lea.sflag [#allocation12], %s17677_s29  ;;  %s17705_s20 = scalar_lea.vmem [#allocation11], %s17691_s19 }
 0x226   : > { %16882 = dma.done.wait (%p19634_p1), %s1020_s30, 16448  }
 0x227   : > { %16884 = vsyncadd (%p19634_p1), %s1020_s30, 4294950848  ;;  %s1038_s5 = scalar_lea.sflag [#allocation15], %s17677_s29  ;;  %s17714_s8 = scalar_lea.vmem [#allocation14], %s17691_s19 }
 0x228   : > { %16886 = dma.done.wait (%p19634_p1), %s1038_s5, 16448  }
 0x229   : > { %16888 = vsyncadd (%p19634_p1), %s1038_s5, 4294950848  ;;  %s14054_s7 = smul.u32 3072, %s17666_s6  ;;  %s1056_s3 = scalar_lea.sflag [#allocation18], %s17677_s29 }
 0x22b   : > { %s17723_s21 = scalar_lea.vmem [#allocation17], %s14054_s7 }
 0x22c   : > { %16890 = dma.done.wait (%p19634_p1), %s1056_s3, 49344  }
 0x22d   : > { %16892 = vsyncadd (%p19634_p1), %s1056_s3, 4294917952  ;;  %s14055_s30 = smul.u32 12, %s17666_s6  ;;  %s1074_s0 = scalar_lea.sflag [#allocation21], %s17677_s29 }
 0x22e   : > { %s17734_s17 = scalar_lea.vmem [#allocation20], %s17691_s19 }
 0x22f   : > { %s17730_s5 = scalar_lea.vmem [#allocation19], %s14055_s30 }
 0x230   : > { %16894 = dma.done.wait (%p19634_p1), %s1074_s0, 16448  }
 0x231   : > { %16896 = vsyncadd (%p19634_p1), %s1074_s0, 4294950848  ;;  %s1086_s7 = scalar_lea.vmem [#allocation22], %s17688_s23  ;;  %s1092_s3 = scalar_lea.sflag [#allocation24], %s17677_s29 }
 0x232   : > { %s17743_s2 = scalar_lea.vmem [#allocation23], %s17691_s19 }
 0x233   : > { %16898 = dma.done.wait (%p19634_p1), %s1092_s3, 16448  }
 0x234   : > { %16900 = vsyncadd (%p19634_p1), %s1092_s3, 4294950848  ;;  %s1104_s30 = scalar_lea.vmem [#allocation25], %s17688_s23  ;;  %s1110_s25 = scalar_lea.sflag [#allocation27], %s17677_s29 }
 0x235   : > { %s17752_s0 = scalar_lea.vmem [#allocation26], %s17691_s19 }
 0x236   : > { %16902 = dma.done.wait (%p19634_p1), %s1110_s25, 16448  }
 0x237   : > { %16904 = vsyncadd (%p19634_p1), %s1110_s25, 4294950848  ;;  %v14148_v0 = vld [vmem:[%s17681_s27 + $0x4] ss:$16 sps:$4 sm:$0xff]   ;;  %v14150_v1 = vld [vmem:[%s17681_s27 + $0xc] ss:$16 sps:$4 sm:$0xff]   ;;  %s19636_s28 = scalar_lea.vmem [#allocation7], %s17688_s23 }
 0x238   : > { %2848 = vmatprep.subr.bf16.mxu0 %v14148_v0  ;;  %v14152_v2 = vld [vmem:[%s17681_s27] ss:$16 sps:$4 sm:$0xff]   ;;  %v14153_v3 = vld [vmem:[%s17681_s27 + $0x8] ss:$16 sps:$4 sm:$0xff]   ;;  %3012 = vmatprep.subr.bf16.mxu1 %v14150_v1  ;;  %v14154_v4 = vld [vmem:[%s17681_s27 + $0x24] ss:$16 sps:$4 sm:$0xff]  }
 0x239   : > { %2849 = vmatpush1.bf16.msra.mxu0 %v14152_v2  ;;  %3013 = vmatpush1.bf16.msra.mxu1 %v14153_v3  ;;  %v14156_v5 = vld [vmem:[%s17681_s27 + $0x2c] ss:$16 sps:$4 sm:$0xff]   ;;  %v14158_v6 = vld [vmem:[%s17681_s27 + $0x20] ss:$16 sps:$4 sm:$0xff]   ;;  %v14159_v7 = vld [vmem:[%s17681_s27 + $0x28] ss:$16 sps:$4 sm:$0xff]  }
 0x23a   : > { %2850 = vmatprep.subr.bf16.mxu0 %v14154_v4  ;;  %3014 = vmatprep.subr.bf16.mxu1 %v14156_v5  ;;  %v14160_v8 = vld [vmem:[%s17681_s27 + $0x44] ss:$16 sps:$4 sm:$0xff]   ;;  %v14162_v9 = vld [vmem:[%s17681_s27 + $0x4c] ss:$16 sps:$4 sm:$0xff]   ;;  %v14164_v10 = vld [vmem:[%s17681_s27 + $0x40] ss:$16 sps:$4 sm:$0xff]  }
 0x23b   : > { %v14165_v11 = vld [vmem:[%s17681_s27 + $0x48] ss:$16 sps:$4 sm:$0xff]   ;;  %v14166_v12 = vld [vmem:[%s17681_s27 + $0x64] ss:$16 sps:$4 sm:$0xff]   ;;  %v14168_v13 = vld [vmem:[%s17681_s27 + $0x6c] ss:$16 sps:$4 sm:$0xff]  }
 0x23c   : > { %v14170_v14 = vld [vmem:[%s17681_s27 + $0x60] ss:$16 sps:$4 sm:$0xff]   ;;  %v14171_v15 = vld [vmem:[%s17681_s27 + $0x68] ss:$16 sps:$4 sm:$0xff]   ;;  %v14172_v16 = vld [vmem:[%s17681_s27 + $0x84] ss:$16 sps:$4 sm:$0xff]  }
 0x23d   : > { %2851 = vmatpush1.bf16.msra.mxu0 %v14158_v6  ;;  %3015 = vmatpush1.bf16.msra.mxu1 %v14159_v7  ;;  %v14174_v17 = vld [vmem:[%s17681_s27 + $0x8c] ss:$16 sps:$4 sm:$0xff]   ;;  %v14176_v18 = vld [vmem:[%s17681_s27 + $0x80] ss:$16 sps:$4 sm:$0xff]   ;;  %v14177_v19 = vld [vmem:[%s17681_s27 + $0x88] ss:$16 sps:$4 sm:$0xff]  }
 0x23e   : > { %2852 = vmatprep.subr.bf16.mxu0 %v14160_v8  ;;  %3016 = vmatprep.subr.bf16.mxu1 %v14162_v9  ;;  %v14178_v20 = vld [vmem:[%s17681_s27 + $0xa4] ss:$16 sps:$4 sm:$0xff]   ;;  %v14180_v21 = vld [vmem:[%s17681_s27 + $0xac] ss:$16 sps:$4 sm:$0xff]   ;;  %v14182_v22 = vld [vmem:[%s17681_s27 + $0xa0] ss:$16 sps:$4 sm:$0xff]  }
 0x23f   : > { %v14183_v23 = vld [vmem:[%s17681_s27 + $0xa8] ss:$16 sps:$4 sm:$0xff]   ;;  %v14184_v24 = vld [vmem:[%s17681_s27 + $0xc4] ss:$16 sps:$4 sm:$0xff]   ;;  %v14186_v25 = vld [vmem:[%s17681_s27 + $0xcc] ss:$16 sps:$4 sm:$0xff]  }
 0x240   : > { %v14188_v26 = vld [vmem:[%s17681_s27 + $0xc0] ss:$16 sps:$4 sm:$0xff]   ;;  %v14189_v27 = vld [vmem:[%s17681_s27 + $0xc8] ss:$16 sps:$4 sm:$0xff]   ;;  %v14190_v28 = vld [vmem:[%s17681_s27 + $0xe4] ss:$16 sps:$4 sm:$0xff]  }
 0x241   : > { %2853 = vmatpush1.bf16.msra.mxu0 %v14164_v10  ;;  %3017 = vmatpush1.bf16.msra.mxu1 %v14165_v11  ;;  %v14192_v29 = vld [vmem:[%s17681_s27 + $0xec] ss:$16 sps:$4 sm:$0xff]   ;;  %v14194_v30 = vld [vmem:[%s17681_s27 + $0xe0] ss:$16 sps:$4 sm:$0xff]   ;;  %v14195_v31 = vld [vmem:[%s17681_s27 + $0xe8] ss:$16 sps:$4 sm:$0xff]  }
 0x242   : > { %2854 = vmatprep.subr.bf16.mxu0 %v14166_v12  ;;  %3018 = vmatprep.subr.bf16.mxu1 %v14168_v13  ;;  %v14196_v32 = vld [vmem:[%s17681_s27 + $0x104] ss:$16 sps:$4 sm:$0xff]   ;;  %v14198_v33 = vld [vmem:[%s17681_s27 + $0x10c] ss:$16 sps:$4 sm:$0xff]   ;;  %v14200_v34 = vld [vmem:[%s17681_s27 + $0x100] ss:$16 sps:$4 sm:$0xff]  }
 0x243   : > { %v14201_v35 = vld [vmem:[%s17681_s27 + $0x108] ss:$16 sps:$4 sm:$0xff]   ;;  %v14202_v36 = vld [vmem:[%s17681_s27 + $0x124] ss:$16 sps:$4 sm:$0xff]   ;;  %v14204_v37 = vld [vmem:[%s17681_s27 + $0x12c] ss:$16 sps:$4 sm:$0xff]  }
 0x244   : > { %v14206_v38 = vld [vmem:[%s17681_s27 + $0x120] ss:$16 sps:$4 sm:$0xff]   ;;  %v14207_v39 = vld [vmem:[%s17681_s27 + $0x128] ss:$16 sps:$4 sm:$0xff]   ;;  %v14208_v40 = vld [vmem:[%s17681_s27 + $0x144] ss:$16 sps:$4 sm:$0xff]  }
 0x245   : > { %2855 = vmatpush1.bf16.msra.mxu0 %v14170_v14  ;;  %3019 = vmatpush1.bf16.msra.mxu1 %v14171_v15  ;;  %v14210_v41 = vld [vmem:[%s17681_s27 + $0x14c] ss:$16 sps:$4 sm:$0xff]   ;;  %v14212_v42 = vld [vmem:[%s17681_s27 + $0x140] ss:$16 sps:$4 sm:$0xff]   ;;  %v14213_v43 = vld [vmem:[%s17681_s27 + $0x148] ss:$16 sps:$4 sm:$0xff]  }
 0x246   : > { %2856 = vmatprep.subr.bf16.mxu0 %v14172_v16  ;;  %3020 = vmatprep.subr.bf16.mxu1 %v14174_v17  ;;  %v14214_v44 = vld [vmem:[%s17681_s27 + $0x164] ss:$16 sps:$4 sm:$0xff]   ;;  %v14216_v45 = vld [vmem:[%s17681_s27 + $0x16c] ss:$16 sps:$4 sm:$0xff]   ;;  %v14218_v47 = vld [vmem:[%s17681_s27 + $0x160] ss:$16 sps:$4 sm:$0xff]  }
 0x247   : > { %v1275_v46 = vld [vmem:[%s17670_s4 + $0x8] sm:$0xff]  ;;  %v14220_v50 = vld [vmem:[%s17681_s27 + $0x184] ss:$16 sps:$4 sm:$0xff]   ;;  %v14224_v52 = vld [vmem:[%s17681_s27 + $0x180] ss:$16 sps:$4 sm:$0xff]   ;;  %s19637_s19 = scalar_lea.vmem [#allocation10], %s17688_s23 }
 0x248   : > { %v1283_v48 = vpack.c.bf16 %v1275_v46, %v1275_v46  ;;  %v14219_v49 = vld [vmem:[%s17681_s27 + $0x168] ss:$16 sps:$4 sm:$0xff]   ;;  %v14222_v51 = vld [vmem:[%s17681_s27 + $0x18c] ss:$16 sps:$4 sm:$0xff]   ;;  %v14226_v54 = vld [vmem:[%s17681_s27 + $0x1a4] ss:$16 sps:$4 sm:$0xff]  }
 0x249   : > { %2857 = vmatpush1.bf16.msra.mxu0 %v14176_v18  ;;  %3021 = vmatpush1.bf16.msra.mxu1 %v14177_v19  ;;  %v14225_v53 = vld [vmem:[%s17681_s27 + $0x188] ss:$16 sps:$4 sm:$0xff]   ;;  %v14228_v55 = vld [vmem:[%s17681_s27 + $0x1ac] ss:$16 sps:$4 sm:$0xff]   ;;  %v14230_v56 = vld [vmem:[%s17681_s27 + $0x1a0] ss:$16 sps:$4 sm:$0xff]  }
 0x24a   : > { %2858 = vmatprep.subr.bf16.mxu0 %v14178_v20  ;;  %3022 = vmatprep.subr.bf16.mxu1 %v14180_v21  ;;  %v14231_v57 = vld [vmem:[%s17681_s27 + $0x1a8] ss:$16 sps:$4 sm:$0xff]   ;;  %v14232_v58 = vld [vmem:[%s17681_s27 + $0x1c4] ss:$16 sps:$4 sm:$0xff]   ;;  %v14234_v59 = vld [vmem:[%s17681_s27 + $0x1cc] ss:$16 sps:$4 sm:$0xff]  }
 0x24b   : > { %2880 = vmatprep.mubr.bf16.mxu0 %v1283_v48  ;;  %3044 = vmatprep.mubr.bf16.mxu1 %v1283_v48  ;;  %v14236_v60 = vld [vmem:[%s17681_s27 + $0x1c0] ss:$16 sps:$4 sm:$0xff]   ;;  %v14237_v61 = vld [vmem:[%s17681_s27 + $0x1c8] ss:$16 sps:$4 sm:$0xff]   ;;  %v14238_v62 = vld [vmem:[%s17681_s27 + $0x1e4] ss:$16 sps:$4 sm:$0xff]  }
 0x24c   : > { %v14240_v63 = vld [vmem:[%s17681_s27 + $0x1ec] ss:$16 sps:$4 sm:$0xff]   ;;  %v14242_v0 = vld [vmem:[%s17681_s27 + $0x1e0] ss:$16 sps:$4 sm:$0xff]   ;;  %v14243_v1 = vld [vmem:[%s17681_s27 + $0x1e8] ss:$16 sps:$4 sm:$0xff]  }
 0x24d   : > { %2859 = vmatpush1.bf16.msra.mxu0 %v14182_v22  ;;  %3023 = vmatpush1.bf16.msra.mxu1 %v14183_v23  ;;  %v1274_v2 = vld [vmem:[%s17670_s4] sm:$0xff]  ;;  %v14249_v4 = vld [vmem:[%s17681_s27 + $0x20c] ss:$16 sps:$4 sm:$0xff]   ;;  %v14247_v7 = vld [vmem:[%s17681_s27 + $0x208] ss:$16 sps:$4 sm:$0xff]   ;;  %s19638_s25 = scalar_lea.vmem [#allocation13], %s17688_s23 }
 0x24e   : > { %2860 = vmatprep.subr.bf16.mxu0 %v14184_v24  ;;  %3024 = vmatprep.subr.bf16.mxu1 %v14186_v25  ;;  %v14246_v3 = vld [vmem:[%s17681_s27 + $0x204] ss:$16 sps:$4 sm:$0xff]   ;;  %v1282_v5 = vpack.c.bf16 %v1274_v2, %v1274_v2  ;;  %v14244_v6 = vld [vmem:[%s17681_s27 + $0x200] ss:$16 sps:$4 sm:$0xff]   ;;  %v14255_v9 = vld [vmem:[%s17681_s27 + $0x22c] ss:$16 sps:$4 sm:$0xff]  }
 0x24f   : > { %v14252_v8 = vld [vmem:[%s17681_s27 + $0x224] ss:$16 sps:$4 sm:$0xff]   ;;  %v14250_v10 = vld [vmem:[%s17681_s27 + $0x220] ss:$16 sps:$4 sm:$0xff]   ;;  %v14253_v11 = vld [vmem:[%s17681_s27 + $0x228] ss:$16 sps:$4 sm:$0xff]  }
 0x250   : > { %v14258_v12 = vld [vmem:[%s17681_s27 + $0x244] ss:$16 sps:$4 sm:$0xff]   ;;  %v14261_v13 = vld [vmem:[%s17681_s27 + $0x24c] ss:$16 sps:$4 sm:$0xff]   ;;  %v14256_v14 = vld [vmem:[%s17681_s27 + $0x240] ss:$16 sps:$4 sm:$0xff]  }
 0x251   : > { %2861 = vmatpush1.bf16.msra.mxu0 %v14188_v26  ;;  %3025 = vmatpush1.bf16.msra.mxu1 %v14189_v27  ;;  %v14259_v15 = vld [vmem:[%s17681_s27 + $0x248] ss:$16 sps:$4 sm:$0xff]   ;;  %v14264_v16 = vld [vmem:[%s17681_s27 + $0x264] ss:$16 sps:$4 sm:$0xff]   ;;  %v14267_v17 = vld [vmem:[%s17681_s27 + $0x26c] ss:$16 sps:$4 sm:$0xff]  }
 0x252   : > { %2862 = vmatprep.subr.bf16.mxu0 %v14190_v28  ;;  %3026 = vmatprep.subr.bf16.mxu1 %v14192_v29  ;;  %v14262_v18 = vld [vmem:[%s17681_s27 + $0x260] ss:$16 sps:$4 sm:$0xff]   ;;  %v14265_v19 = vld [vmem:[%s17681_s27 + $0x268] ss:$16 sps:$4 sm:$0xff]   ;;  %v14270_v20 = vld [vmem:[%s17681_s27 + $0x284] ss:$16 sps:$4 sm:$0xff]  }
 0x253   : > { %v14273_v21 = vld [vmem:[%s17681_s27 + $0x28c] ss:$16 sps:$4 sm:$0xff]   ;;  %v14268_v22 = vld [vmem:[%s17681_s27 + $0x280] ss:$16 sps:$4 sm:$0xff]   ;;  %v14271_v23 = vld [vmem:[%s17681_s27 + $0x288] ss:$16 sps:$4 sm:$0xff]  }
 0x254   : > { %v14276_v24 = vld [vmem:[%s17681_s27 + $0x2a4] ss:$16 sps:$4 sm:$0xff]   ;;  %v14279_v25 = vld [vmem:[%s17681_s27 + $0x2ac] ss:$16 sps:$4 sm:$0xff]   ;;  %v14274_v26 = vld [vmem:[%s17681_s27 + $0x2a0] ss:$16 sps:$4 sm:$0xff]  }
 0x255   : > { %2863 = vmatpush1.bf16.msra.mxu0 %v14194_v30  ;;  %3027 = vmatpush1.bf16.msra.mxu1 %v14195_v31  ;;  %v14277_v27 = vld [vmem:[%s17681_s27 + $0x2a8] ss:$16 sps:$4 sm:$0xff]   ;;  %v14282_v28 = vld [vmem:[%s17681_s27 + $0x2c4] ss:$16 sps:$4 sm:$0xff]   ;;  %v14285_v29 = vld [vmem:[%s17681_s27 + $0x2cc] ss:$16 sps:$4 sm:$0xff]  }
 0x256   : > { %2864 = vmatprep.subr.bf16.mxu0 %v14196_v32  ;;  %3028 = vmatprep.subr.bf16.mxu1 %v14198_v33  ;;  %v1277_v30 = vld [vmem:[%s17670_s4 + $0x18] sm:$0xff]  ;;  %v14280_v31 = vld [vmem:[%s17681_s27 + $0x2c0] ss:$16 sps:$4 sm:$0xff]   ;;  %v14306_v46 = vld [vmem:[%s17681_s27 + $0x344] ss:$16 sps:$4 sm:$0xff]  }
 0x257   : > { %v1285_v32 = vpack.c.bf16 %v1277_v30, %v1277_v30  ;;  %v14283_v33 = vld [vmem:[%s17681_s27 + $0x2c8] ss:$16 sps:$4 sm:$0xff]   ;;  %v14304_v48 = vld [vmem:[%s17681_s27 + $0x340] ss:$16 sps:$4 sm:$0xff]   ;;  %v14336_v2 = vld [vmem:[%s17681_s27 + $0x3e4] ss:$16 sps:$4 sm:$0xff]  }
 0x258   : > { %v14372_v30 = vld [vmem:[%s17681_s27 + $0x4a4] ss:$16 sps:$4 sm:$0xff]  }
 0x259   : > { %2865 = vmatpush1.bf16.msra.mxu0 %v14200_v34  ;;  %3029 = vmatpush1.bf16.msra.mxu1 %v14201_v35  ;;  %v14288_v34 = vld [vmem:[%s17681_s27 + $0x2e4] ss:$16 sps:$4 sm:$0xff]   ;;  %v14291_v35 = vld [vmem:[%s17681_s27 + $0x2ec] ss:$16 sps:$4 sm:$0xff]  }
 0x25a   : > { %2866 = vmatprep.subr.bf16.mxu0 %v14202_v36  ;;  %3030 = vmatprep.subr.bf16.mxu1 %v14204_v37  ;;  %v14286_v36 = vld [vmem:[%s17681_s27 + $0x2e0] ss:$16 sps:$4 sm:$0xff]   ;;  %v14289_v37 = vld [vmem:[%s17681_s27 + $0x2e8] ss:$16 sps:$4 sm:$0xff]  }
 0x25d   : > { %2867 = vmatpush1.bf16.msra.mxu0 %v14206_v38  ;;  %3031 = vmatpush1.bf16.msra.mxu1 %v14207_v39  ;;  %v14294_v38 = vld [vmem:[%s17681_s27 + $0x304] ss:$16 sps:$4 sm:$0xff]   ;;  %v14297_v39 = vld [vmem:[%s17681_s27 + $0x30c] ss:$16 sps:$4 sm:$0xff]  }
 0x25e   : > { %2868 = vmatprep.subr.bf16.mxu0 %v14208_v40  ;;  %3032 = vmatprep.subr.bf16.mxu1 %v14210_v41  ;;  %v14292_v40 = vld [vmem:[%s17681_s27 + $0x300] ss:$16 sps:$4 sm:$0xff]   ;;  %v14295_v41 = vld [vmem:[%s17681_s27 + $0x308] ss:$16 sps:$4 sm:$0xff]  }
 0x261   : > { %2869 = vmatpush1.bf16.msra.mxu0 %v14212_v42  ;;  %3033 = vmatpush1.bf16.msra.mxu1 %v14213_v43  ;;  %v14300_v42 = vld [vmem:[%s17681_s27 + $0x324] ss:$16 sps:$4 sm:$0xff]   ;;  %v14303_v43 = vld [vmem:[%s17681_s27 + $0x32c] ss:$16 sps:$4 sm:$0xff]  }
 0x262   : > { %2870 = vmatprep.subr.bf16.mxu0 %v14214_v44  ;;  %3034 = vmatprep.subr.bf16.mxu1 %v14216_v45  ;;  %v14298_v44 = vld [vmem:[%s17681_s27 + $0x320] ss:$16 sps:$4 sm:$0xff]   ;;  %v14301_v45 = vld [vmem:[%s17681_s27 + $0x328] ss:$16 sps:$4 sm:$0xff]  }
 0x265   : > { %2871 = vmatpush1.bf16.msra.mxu0 %v14218_v47  ;;  %3035 = vmatpush1.bf16.msra.mxu1 %v14219_v49  ;;  %v14309_v47 = vld [vmem:[%s17681_s27 + $0x34c] ss:$16 sps:$4 sm:$0xff]   ;;  %v14307_v49 = vld [vmem:[%s17681_s27 + $0x348] ss:$16 sps:$4 sm:$0xff]  }
 0x266   : > { %2872 = vmatprep.subr.bf16.mxu0 %v14220_v50  ;;  %3036 = vmatprep.subr.bf16.mxu1 %v14222_v51  ;;  %v14312_v50 = vld [vmem:[%s17681_s27 + $0x364] ss:$16 sps:$4 sm:$0xff]   ;;  %v14315_v51 = vld [vmem:[%s17681_s27 + $0x36c] ss:$16 sps:$4 sm:$0xff]  }
 0x269   : > { %2873 = vmatpush1.bf16.msra.mxu0 %v14224_v52  ;;  %3037 = vmatpush1.bf16.msra.mxu1 %v14225_v53  ;;  %v14310_v52 = vld [vmem:[%s17681_s27 + $0x360] ss:$16 sps:$4 sm:$0xff]   ;;  %v14313_v53 = vld [vmem:[%s17681_s27 + $0x368] ss:$16 sps:$4 sm:$0xff]  }
 0x26a   : > { %2874 = vmatprep.subr.bf16.mxu0 %v14226_v54  ;;  %3038 = vmatprep.subr.bf16.mxu1 %v14228_v55  ;;  %v14318_v54 = vld [vmem:[%s17681_s27 + $0x384] ss:$16 sps:$4 sm:$0xff]   ;;  %v14321_v55 = vld [vmem:[%s17681_s27 + $0x38c] ss:$16 sps:$4 sm:$0xff]  }
 0x26d   : > { %2875 = vmatpush1.bf16.msra.mxu0 %v14230_v56  ;;  %3039 = vmatpush1.bf16.msra.mxu1 %v14231_v57  ;;  %v14316_v56 = vld [vmem:[%s17681_s27 + $0x380] ss:$16 sps:$4 sm:$0xff]   ;;  %v14319_v57 = vld [vmem:[%s17681_s27 + $0x388] ss:$16 sps:$4 sm:$0xff]  }
 0x26e   : > { %2876 = vmatprep.subr.bf16.mxu0 %v14232_v58  ;;  %3040 = vmatprep.subr.bf16.mxu1 %v14234_v59  ;;  %v14324_v58 = vld [vmem:[%s17681_s27 + $0x3a4] ss:$16 sps:$4 sm:$0xff]   ;;  %v14327_v59 = vld [vmem:[%s17681_s27 + $0x3ac] ss:$16 sps:$4 sm:$0xff]  }
 0x271   : > { %2877 = vmatpush1.bf16.msra.mxu0 %v14236_v60  ;;  %3041 = vmatpush1.bf16.msra.mxu1 %v14237_v61  ;;  %v14322_v60 = vld [vmem:[%s17681_s27 + $0x3a0] ss:$16 sps:$4 sm:$0xff]   ;;  %v14325_v61 = vld [vmem:[%s17681_s27 + $0x3a8] ss:$16 sps:$4 sm:$0xff]  }
 0x272   : > { %2878 = vmatprep.subr.bf16.mxu0 %v14238_v62  ;;  %3042 = vmatprep.subr.bf16.mxu1 %v14240_v63  ;;  %v14330_v62 = vld [vmem:[%s17681_s27 + $0x3c4] ss:$16 sps:$4 sm:$0xff]   ;;  %v14333_v63 = vld [vmem:[%s17681_s27 + $0x3cc] ss:$16 sps:$4 sm:$0xff]  }
 0x275   : > { %2879 = vmatpush1.bf16.msra.mxu0 %v14242_v0  ;;  %3043 = vmatpush1.bf16.msra.mxu1 %v14243_v1  ;;  %v14328_v0 = vld [vmem:[%s17681_s27 + $0x3c0] ss:$16 sps:$4 sm:$0xff]   ;;  %v14331_v1 = vld [vmem:[%s17681_s27 + $0x3c8] ss:$16 sps:$4 sm:$0xff]  }
 0x276   : > { %2889 = vmatprep.subr.bf16.mxu0 %v14246_v3  ;;  %3053 = vmatprep.subr.bf16.mxu1 %v14249_v4  ;;  %v14339_v3 = vld [vmem:[%s17681_s27 + $0x3ec] ss:$16 sps:$4 sm:$0xff]   ;;  %v14334_v4 = vld [vmem:[%s17681_s27 + $0x3e0] ss:$16 sps:$4 sm:$0xff]  }
 0x278   : > { %2881 = vmatmul.mubr.bf16.vlgmr.msra.gmra.mrb[0].mxu0 %v1282_v5  ;;  %3045 = vmatmul.mubr.bf16.vlgmr.msra.gmra.mrb[0].mxu1 %v1282_v5  ;;  %v14337_v5 = vld [vmem:[%s17681_s27 + $0x3e8] ss:$16 sps:$4 sm:$0xff]  }
 0x279   : > { %2890 = vmatpush1.bf16.msra.mxu0 %v14244_v6  ;;  %3054 = vmatpush1.bf16.msra.mxu1 %v14247_v7  ;;  %v14342_v6 = vld [vmem:[%s17681_s27 + $0x404] ss:$16 sps:$4 sm:$0xff]  }
 0x27a   : > { %2891 = vmatprep.subr.bf16.mxu0 %v14252_v8  ;;  %3055 = vmatprep.subr.bf16.mxu1 %v14255_v9  ;;  %v1276_v7 = vld [vmem:[%s17670_s4 + $0x10] sm:$0xff]  ;;  %v14345_v8 = vld [vmem:[%s17681_s27 + $0x40c] ss:$16 sps:$4 sm:$0xff]  }
 0x27b   : > { %2921 = vmatprep.mubr.bf16.mxu0 %v1285_v32  ;;  %3085 = vmatprep.mubr.bf16.mxu1 %v1285_v32  ;;  %v14340_v9 = vld [vmem:[%s17681_s27 + $0x400] ss:$16 sps:$4 sm:$0xff]  }
 0x27c   : > { %v14370_v32 = vld [vmem:[%s17681_s27 + $0x4a0] ss:$16 sps:$4 sm:$0xff]  }
 0x27d   : > { %2892 = vmatpush1.bf16.msra.mxu0 %v14250_v10  ;;  %3056 = vmatpush1.bf16.msra.mxu1 %v14253_v11  ;;  %v14343_v10 = vld [vmem:[%s17681_s27 + $0x408] ss:$16 sps:$4 sm:$0xff]   ;;  %v1284_v11 = vpack.c.bf16 %v1276_v7, %v1276_v7  ;;  %v14435_v7 = vld [vmem:[%s17681_s27 + $0x5ec] ss:$16 sps:$4 sm:$0xff]  }
 0x27e   : > { %2893 = vmatprep.subr.bf16.mxu0 %v14258_v12  ;;  %3057 = vmatprep.subr.bf16.mxu1 %v14261_v13  ;;  %v14348_v12 = vld [vmem:[%s17681_s27 + $0x424] ss:$16 sps:$4 sm:$0xff]   ;;  %v14351_v13 = vld [vmem:[%s17681_s27 + $0x42c] ss:$16 sps:$4 sm:$0xff]  }
 0x281   : > { %2894 = vmatpush1.bf16.msra.mxu0 %v14256_v14  ;;  %3058 = vmatpush1.bf16.msra.mxu1 %v14259_v15  ;;  %v1279_v14 = vld [vmem:[%s17670_s4 + $0x28] sm:$0xff] }
 0x282   : > { %2895 = vmatprep.subr.bf16.mxu0 %v14264_v16  ;;  %3059 = vmatprep.subr.bf16.mxu1 %v14267_v17  ;;  %v1287_v15 = vpack.c.bf16 %v1279_v14, %v1279_v14  ;;  %v14346_v16 = vld [vmem:[%s17681_s27 + $0x420] ss:$16 sps:$4 sm:$0xff]   ;;  %v14349_v17 = vld [vmem:[%s17681_s27 + $0x428] ss:$16 sps:$4 sm:$0xff]  }
 0x283   : > { %v14439_v14 = vld [vmem:[%s17681_s27 + $0x608] ss:$16 sps:$4 sm:$0xff]  }
 0x285   : > { %2896 = vmatpush1.bf16.msra.mxu0 %v14262_v18  ;;  %3060 = vmatpush1.bf16.msra.mxu1 %v14265_v19  ;;  %v14354_v18 = vld [vmem:[%s17681_s27 + $0x444] ss:$16 sps:$4 sm:$0xff]   ;;  %v14357_v19 = vld [vmem:[%s17681_s27 + $0x44c] ss:$16 sps:$4 sm:$0xff]  }
 0x286   : > { %2897 = vmatprep.subr.bf16.mxu0 %v14270_v20  ;;  %3061 = vmatprep.subr.bf16.mxu1 %v14273_v21  ;;  %v14352_v20 = vld [vmem:[%s17681_s27 + $0x440] ss:$16 sps:$4 sm:$0xff]   ;;  %v14355_v21 = vld [vmem:[%s17681_s27 + $0x448] ss:$16 sps:$4 sm:$0xff]  }
 0x289   : > { %2898 = vmatpush1.bf16.msra.mxu0 %v14268_v22  ;;  %3062 = vmatpush1.bf16.msra.mxu1 %v14271_v23  ;;  %v14360_v22 = vld [vmem:[%s17681_s27 + $0x464] ss:$16 sps:$4 sm:$0xff]   ;;  %v14363_v23 = vld [vmem:[%s17681_s27 + $0x46c] ss:$16 sps:$4 sm:$0xff]  }
 0x28a   : > { %2899 = vmatprep.subr.bf16.mxu0 %v14276_v24  ;;  %3063 = vmatprep.subr.bf16.mxu1 %v14279_v25  ;;  %v14358_v24 = vld [vmem:[%s17681_s27 + $0x460] ss:$16 sps:$4 sm:$0xff]   ;;  %v14361_v25 = vld [vmem:[%s17681_s27 + $0x468] ss:$16 sps:$4 sm:$0xff]  }
 0x28d   : > { %2900 = vmatpush1.bf16.msra.mxu0 %v14274_v26  ;;  %3064 = vmatpush1.bf16.msra.mxu1 %v14277_v27  ;;  %v14366_v26 = vld [vmem:[%s17681_s27 + $0x484] ss:$16 sps:$4 sm:$0xff]   ;;  %v14369_v27 = vld [vmem:[%s17681_s27 + $0x48c] ss:$16 sps:$4 sm:$0xff]  }
 0x28e   : > { %2901 = vmatprep.subr.bf16.mxu0 %v14282_v28  ;;  %3065 = vmatprep.subr.bf16.mxu1 %v14285_v29  ;;  %v14364_v28 = vld [vmem:[%s17681_s27 + $0x480] ss:$16 sps:$4 sm:$0xff]   ;;  %v14367_v29 = vld [vmem:[%s17681_s27 + $0x488] ss:$16 sps:$4 sm:$0xff]  }
 0x291   : > { %2902 = vmatpush1.bf16.msra.mxu0 %v14280_v31  ;;  %3066 = vmatpush1.bf16.msra.mxu1 %v14283_v33  ;;  %v14375_v31 = vld [vmem:[%s17681_s27 + $0x4ac] ss:$16 sps:$4 sm:$0xff]   ;;  %v14373_v33 = vld [vmem:[%s17681_s27 + $0x4a8] ss:$16 sps:$4 sm:$0xff]  }
 0x292   : > { %2903 = vmatprep.subr.bf16.mxu0 %v14288_v34  ;;  %3067 = vmatprep.subr.bf16.mxu1 %v14291_v35  ;;  %v14378_v34 = vld [vmem:[%s17681_s27 + $0x4c4] ss:$16 sps:$4 sm:$0xff]   ;;  %v14381_v35 = vld [vmem:[%s17681_s27 + $0x4cc] ss:$16 sps:$4 sm:$0xff]  }
 0x295   : > { %2904 = vmatpush1.bf16.msra.mxu0 %v14286_v36  ;;  %3068 = vmatpush1.bf16.msra.mxu1 %v14289_v37  ;;  %v14376_v36 = vld [vmem:[%s17681_s27 + $0x4c0] ss:$16 sps:$4 sm:$0xff]   ;;  %v14379_v37 = vld [vmem:[%s17681_s27 + $0x4c8] ss:$16 sps:$4 sm:$0xff]  }
 0x296   : > { %2905 = vmatprep.subr.bf16.mxu0 %v14294_v38  ;;  %3069 = vmatprep.subr.bf16.mxu1 %v14297_v39  ;;  %v14384_v38 = vld [vmem:[%s17681_s27 + $0x4e4] ss:$16 sps:$4 sm:$0xff]   ;;  %v14387_v39 = vld [vmem:[%s17681_s27 + $0x4ec] ss:$16 sps:$4 sm:$0xff]  }
 0x299   : > { %2906 = vmatpush1.bf16.msra.mxu0 %v14292_v40  ;;  %3070 = vmatpush1.bf16.msra.mxu1 %v14295_v41  ;;  %v14382_v40 = vld [vmem:[%s17681_s27 + $0x4e0] ss:$16 sps:$4 sm:$0xff]   ;;  %v14385_v41 = vld [vmem:[%s17681_s27 + $0x4e8] ss:$16 sps:$4 sm:$0xff]  }
 0x29a   : > { %2907 = vmatprep.subr.bf16.mxu0 %v14300_v42  ;;  %3071 = vmatprep.subr.bf16.mxu1 %v14303_v43  ;;  %v14390_v42 = vld [vmem:[%s17681_s27 + $0x504] ss:$16 sps:$4 sm:$0xff]   ;;  %v14393_v43 = vld [vmem:[%s17681_s27 + $0x50c] ss:$16 sps:$4 sm:$0xff]  }
 0x29d   : > { %2908 = vmatpush1.bf16.msra.mxu0 %v14298_v44  ;;  %3072 = vmatpush1.bf16.msra.mxu1 %v14301_v45  ;;  %v14388_v44 = vld [vmem:[%s17681_s27 + $0x500] ss:$16 sps:$4 sm:$0xff]   ;;  %v14391_v45 = vld [vmem:[%s17681_s27 + $0x508] ss:$16 sps:$4 sm:$0xff]  }
 0x29e   : > { %2909 = vmatprep.subr.bf16.mxu0 %v14306_v46  ;;  %3073 = vmatprep.subr.bf16.mxu1 %v14309_v47  ;;  %v14396_v46 = vld [vmem:[%s17681_s27 + $0x524] ss:$16 sps:$4 sm:$0xff]   ;;  %v14399_v47 = vld [vmem:[%s17681_s27 + $0x52c] ss:$16 sps:$4 sm:$0xff]  }
 0x2a1   : > { %2910 = vmatpush1.bf16.msra.mxu0 %v14304_v48  ;;  %3074 = vmatpush1.bf16.msra.mxu1 %v14307_v49  ;;  %v14394_v48 = vld [vmem:[%s17681_s27 + $0x520] ss:$16 sps:$4 sm:$0xff]   ;;  %v14397_v49 = vld [vmem:[%s17681_s27 + $0x528] ss:$16 sps:$4 sm:$0xff]  }
 0x2a2   : > { %2911 = vmatprep.subr.bf16.mxu0 %v14312_v50  ;;  %3075 = vmatprep.subr.bf16.mxu1 %v14315_v51  ;;  %v14402_v50 = vld [vmem:[%s17681_s27 + $0x544] ss:$16 sps:$4 sm:$0xff]   ;;  %v14405_v51 = vld [vmem:[%s17681_s27 + $0x54c] ss:$16 sps:$4 sm:$0xff]  }
 0x2a5   : > { %2912 = vmatpush1.bf16.msra.mxu0 %v14310_v52  ;;  %3076 = vmatpush1.bf16.msra.mxu1 %v14313_v53  ;;  %v14400_v52 = vld [vmem:[%s17681_s27 + $0x540] ss:$16 sps:$4 sm:$0xff]   ;;  %v14403_v53 = vld [vmem:[%s17681_s27 + $0x548] ss:$16 sps:$4 sm:$0xff]  }
 0x2a6   : > { %2913 = vmatprep.subr.bf16.mxu0 %v14318_v54  ;;  %3077 = vmatprep.subr.bf16.mxu1 %v14321_v55  ;;  %v14408_v54 = vld [vmem:[%s17681_s27 + $0x564] ss:$16 sps:$4 sm:$0xff]   ;;  %v14411_v55 = vld [vmem:[%s17681_s27 + $0x56c] ss:$16 sps:$4 sm:$0xff]  }
 0x2a9   : > { %2914 = vmatpush1.bf16.msra.mxu0 %v14316_v56  ;;  %3078 = vmatpush1.bf16.msra.mxu1 %v14319_v57  ;;  %v14406_v56 = vld [vmem:[%s17681_s27 + $0x560] ss:$16 sps:$4 sm:$0xff]   ;;  %v14409_v57 = vld [vmem:[%s17681_s27 + $0x568] ss:$16 sps:$4 sm:$0xff]  }
 0x2aa   : > { %2915 = vmatprep.subr.bf16.mxu0 %v14324_v58  ;;  %3079 = vmatprep.subr.bf16.mxu1 %v14327_v59  ;;  %v14414_v58 = vld [vmem:[%s17681_s27 + $0x584] ss:$16 sps:$4 sm:$0xff]   ;;  %v14417_v59 = vld [vmem:[%s17681_s27 + $0x58c] ss:$16 sps:$4 sm:$0xff]  }
 0x2ad   : > { %2916 = vmatpush1.bf16.msra.mxu0 %v14322_v60  ;;  %3080 = vmatpush1.bf16.msra.mxu1 %v14325_v61  ;;  %v14412_v60 = vld [vmem:[%s17681_s27 + $0x580] ss:$16 sps:$4 sm:$0xff]   ;;  %v14415_v61 = vld [vmem:[%s17681_s27 + $0x588] ss:$16 sps:$4 sm:$0xff]  }
 0x2ae   : > { %2917 = vmatprep.subr.bf16.mxu0 %v14330_v62  ;;  %3081 = vmatprep.subr.bf16.mxu1 %v14333_v63  ;;  %v14420_v62 = vld [vmem:[%s17681_s27 + $0x5a4] ss:$16 sps:$4 sm:$0xff]   ;;  %v14423_v63 = vld [vmem:[%s17681_s27 + $0x5ac] ss:$16 sps:$4 sm:$0xff]  }
 0x2b1   : > { %2918 = vmatpush1.bf16.msra.mxu0 %v14328_v0  ;;  %3082 = vmatpush1.bf16.msra.mxu1 %v14331_v1  ;;  %v14418_v0 = vld [vmem:[%s17681_s27 + $0x5a0] ss:$16 sps:$4 sm:$0xff]   ;;  %v14421_v1 = vld [vmem:[%s17681_s27 + $0x5a8] ss:$16 sps:$4 sm:$0xff]  }
 0x2b2   : > { %2919 = vmatprep.subr.bf16.mxu0 %v14336_v2  ;;  %3083 = vmatprep.subr.bf16.mxu1 %v14339_v3  ;;  %v14426_v2 = vld [vmem:[%s17681_s27 + $0x5c4] ss:$16 sps:$4 sm:$0xff]   ;;  %v14429_v3 = vld [vmem:[%s17681_s27 + $0x5cc] ss:$16 sps:$4 sm:$0xff]  }
 0x2b5   : > { %2920 = vmatpush1.bf16.msra.mxu0 %v14334_v4  ;;  %3084 = vmatpush1.bf16.msra.mxu1 %v14337_v5  ;;  %v14424_v4 = vld [vmem:[%s17681_s27 + $0x5c0] ss:$16 sps:$4 sm:$0xff]   ;;  %v14427_v5 = vld [vmem:[%s17681_s27 + $0x5c8] ss:$16 sps:$4 sm:$0xff]  }
 0x2b6   : > { %2930 = vmatprep.subr.bf16.mxu0 %v14342_v6  ;;  %3094 = vmatprep.subr.bf16.mxu1 %v14345_v8  ;;  %v14432_v6 = vld [vmem:[%s17681_s27 + $0x5e4] ss:$16 sps:$4 sm:$0xff]   ;;  %v14430_v8 = vld [vmem:[%s17681_s27 + $0x5e0] ss:$16 sps:$4 sm:$0xff]  }
 0x2b8   : > { %2922 = vmatmul.mubr.bf16.vlgmr.msra.gmra.mrb[0].mxu0 %v1284_v11  ;;  %3086 = vmatmul.mubr.bf16.vlgmr.msra.gmra.mrb[0].mxu1 %v1284_v11  ;;  %v1278_v11 = vld [vmem:[%s17670_s4 + $0x20] sm:$0xff] }
 0x2b9   : > { %2931 = vmatpush1.bf16.msra.mxu0 %v14340_v9  ;;  %3095 = vmatpush1.bf16.msra.mxu1 %v14343_v10  ;;  %v14433_v9 = vld [vmem:[%s17681_s27 + $0x5e8] ss:$16 sps:$4 sm:$0xff]   ;;  %v14438_v10 = vld [vmem:[%s17681_s27 + $0x604] ss:$16 sps:$4 sm:$0xff]  }
 0x2ba   : > { %2932 = vmatprep.subr.bf16.mxu0 %v14348_v12  ;;  %3096 = vmatprep.subr.bf16.mxu1 %v14351_v13  ;;  %v14441_v12 = vld [vmem:[%s17681_s27 + $0x60c] ss:$16 sps:$4 sm:$0xff]   ;;  %v14436_v13 = vld [vmem:[%s17681_s27 + $0x600] ss:$16 sps:$4 sm:$0xff]  }
 0x2bb   : > { %2962 = vmatprep.mubr.bf16.mxu0 %v1287_v15  ;;  %3126 = vmatprep.mubr.bf16.mxu1 %v1287_v15  ;;  %v1286_v15 = vpack.c.bf16 %v1278_v11, %v1278_v11  ;;  %v14531_v11 = vld [vmem:[%s17681_s27 + $0x7ec] ss:$16 sps:$4 sm:$0xff]  }
 0x2bd   : > { %2933 = vmatpush1.bf16.msra.mxu0 %v14346_v16  ;;  %3097 = vmatpush1.bf16.msra.mxu1 %v14349_v17  ;;  %v1281_v16 = vld [vmem:[%s17670_s4 + $0x38] sm:$0xff]  ;;  %v14444_v17 = vld [vmem:[%s17681_s27 + $0x624] ss:$16 sps:$4 sm:$0xff]  }
 0x2be   : > { %2934 = vmatprep.subr.bf16.mxu0 %v14354_v18  ;;  %3098 = vmatprep.subr.bf16.mxu1 %v14357_v19  ;;  %v14447_v18 = vld [vmem:[%s17681_s27 + $0x62c] ss:$16 sps:$4 sm:$0xff]   ;;  %v1289_v19 = vpack.c.bf16 %v1281_v16, %v1281_v16  ;;  %v14537_v16 = vld [vmem:[%s17696_s1 + $0xc] ss:$16 sps:$4 sm:$0xff]  }
 0x2c1   : > { %2935 = vmatpush1.bf16.msra.mxu0 %v14352_v20  ;;  %3099 = vmatpush1.bf16.msra.mxu1 %v14355_v21  ;;  %v14442_v20 = vld [vmem:[%s17681_s27 + $0x620] ss:$16 sps:$4 sm:$0xff]   ;;  %v14445_v21 = vld [vmem:[%s17681_s27 + $0x628] ss:$16 sps:$4 sm:$0xff]  }
 0x2c2   : > { %2936 = vmatprep.subr.bf16.mxu0 %v14360_v22  ;;  %3100 = vmatprep.subr.bf16.mxu1 %v14363_v23  ;;  %v14450_v22 = vld [vmem:[%s17681_s27 + $0x644] ss:$16 sps:$4 sm:$0xff]   ;;  %v14453_v23 = vld [vmem:[%s17681_s27 + $0x64c] ss:$16 sps:$4 sm:$0xff]  }
 0x2c5   : > { %2937 = vmatpush1.bf16.msra.mxu0 %v14358_v24  ;;  %3101 = vmatpush1.bf16.msra.mxu1 %v14361_v25  ;;  %v14448_v24 = vld [vmem:[%s17681_s27 + $0x640] ss:$16 sps:$4 sm:$0xff]   ;;  %v14451_v25 = vld [vmem:[%s17681_s27 + $0x648] ss:$16 sps:$4 sm:$0xff]  }
 0x2c6   : > { %2938 = vmatprep.subr.bf16.mxu0 %v14366_v26  ;;  %3102 = vmatprep.subr.bf16.mxu1 %v14369_v27  ;;  %v14456_v26 = vld [vmem:[%s17681_s27 + $0x664] ss:$16 sps:$4 sm:$0xff]   ;;  %v14459_v27 = vld [vmem:[%s17681_s27 + $0x66c] ss:$16 sps:$4 sm:$0xff]  }
 0x2c9   : > { %2939 = vmatpush1.bf16.msra.mxu0 %v14364_v28  ;;  %3103 = vmatpush1.bf16.msra.mxu1 %v14367_v29  ;;  %v14454_v28 = vld [vmem:[%s17681_s27 + $0x660] ss:$16 sps:$4 sm:$0xff]   ;;  %v14457_v29 = vld [vmem:[%s17681_s27 + $0x668] ss:$16 sps:$4 sm:$0xff]  }
 0x2ca   : > { %2940 = vmatprep.subr.bf16.mxu0 %v14372_v30  ;;  %3104 = vmatprep.subr.bf16.mxu1 %v14375_v31  ;;  %v14462_v30 = vld [vmem:[%s17681_s27 + $0x684] ss:$16 sps:$4 sm:$0xff]   ;;  %v14465_v31 = vld [vmem:[%s17681_s27 + $0x68c] ss:$16 sps:$4 sm:$0xff]  }
 0x2cd   : > { %2941 = vmatpush1.bf16.msra.mxu0 %v14370_v32  ;;  %3105 = vmatpush1.bf16.msra.mxu1 %v14373_v33  ;;  %v14460_v32 = vld [vmem:[%s17681_s27 + $0x680] ss:$16 sps:$4 sm:$0xff]   ;;  %v14463_v33 = vld [vmem:[%s17681_s27 + $0x688] ss:$16 sps:$4 sm:$0xff]  }
 0x2ce   : > { %2942 = vmatprep.subr.bf16.mxu0 %v14378_v34  ;;  %3106 = vmatprep.subr.bf16.mxu1 %v14381_v35  ;;  %v14468_v34 = vld [vmem:[%s17681_s27 + $0x6a4] ss:$16 sps:$4 sm:$0xff]   ;;  %v14471_v35 = vld [vmem:[%s17681_s27 + $0x6ac] ss:$16 sps:$4 sm:$0xff]  }
 0x2d1   : > { %2943 = vmatpush1.bf16.msra.mxu0 %v14376_v36  ;;  %3107 = vmatpush1.bf16.msra.mxu1 %v14379_v37  ;;  %v14466_v36 = vld [vmem:[%s17681_s27 + $0x6a0] ss:$16 sps:$4 sm:$0xff]   ;;  %v14469_v37 = vld [vmem:[%s17681_s27 + $0x6a8] ss:$16 sps:$4 sm:$0xff]  }
 0x2d2   : > { %2944 = vmatprep.subr.bf16.mxu0 %v14384_v38  ;;  %3108 = vmatprep.subr.bf16.mxu1 %v14387_v39  ;;  %v14474_v38 = vld [vmem:[%s17681_s27 + $0x6c4] ss:$16 sps:$4 sm:$0xff]   ;;  %v14477_v39 = vld [vmem:[%s17681_s27 + $0x6cc] ss:$16 sps:$4 sm:$0xff]  }
 0x2d5   : > { %2945 = vmatpush1.bf16.msra.mxu0 %v14382_v40  ;;  %3109 = vmatpush1.bf16.msra.mxu1 %v14385_v41  ;;  %v14472_v40 = vld [vmem:[%s17681_s27 + $0x6c0] ss:$16 sps:$4 sm:$0xff]   ;;  %v14475_v41 = vld [vmem:[%s17681_s27 + $0x6c8] ss:$16 sps:$4 sm:$0xff]  }
 0x2d6   : > { %2946 = vmatprep.subr.bf16.mxu0 %v14390_v42  ;;  %3110 = vmatprep.subr.bf16.mxu1 %v14393_v43  ;;  %v14480_v42 = vld [vmem:[%s17681_s27 + $0x6e4] ss:$16 sps:$4 sm:$0xff]   ;;  %v14483_v43 = vld [vmem:[%s17681_s27 + $0x6ec] ss:$16 sps:$4 sm:$0xff]  }
 0x2d9   : > { %2947 = vmatpush1.bf16.msra.mxu0 %v14388_v44  ;;  %3111 = vmatpush1.bf16.msra.mxu1 %v14391_v45  ;;  %v14478_v44 = vld [vmem:[%s17681_s27 + $0x6e0] ss:$16 sps:$4 sm:$0xff]   ;;  %v14481_v45 = vld [vmem:[%s17681_s27 + $0x6e8] ss:$16 sps:$4 sm:$0xff]  }
 0x2da   : > { %2948 = vmatprep.subr.bf16.mxu0 %v14396_v46  ;;  %3112 = vmatprep.subr.bf16.mxu1 %v14399_v47  ;;  %v14486_v46 = vld [vmem:[%s17681_s27 + $0x704] ss:$16 sps:$4 sm:$0xff]   ;;  %v14489_v47 = vld [vmem:[%s17681_s27 + $0x70c] ss:$16 sps:$4 sm:$0xff]  }
 0x2dd   : > { %2949 = vmatpush1.bf16.msra.mxu0 %v14394_v48  ;;  %3113 = vmatpush1.bf16.msra.mxu1 %v14397_v49  ;;  %v14484_v48 = vld [vmem:[%s17681_s27 + $0x700] ss:$16 sps:$4 sm:$0xff]   ;;  %v14487_v49 = vld [vmem:[%s17681_s27 + $0x708] ss:$16 sps:$4 sm:$0xff]  }
 0x2de   : > { %2950 = vmatprep.subr.bf16.mxu0 %v14402_v50  ;;  %3114 = vmatprep.subr.bf16.mxu1 %v14405_v51  ;;  %v14492_v50 = vld [vmem:[%s17681_s27 + $0x724] ss:$16 sps:$4 sm:$0xff]   ;;  %v14495_v51 = vld [vmem:[%s17681_s27 + $0x72c] ss:$16 sps:$4 sm:$0xff]  }
 0x2e1   : > { %2951 = vmatpush1.bf16.msra.mxu0 %v14400_v52  ;;  %3115 = vmatpush1.bf16.msra.mxu1 %v14403_v53  ;;  %v14490_v52 = vld [vmem:[%s17681_s27 + $0x720] ss:$16 sps:$4 sm:$0xff]   ;;  %v14493_v53 = vld [vmem:[%s17681_s27 + $0x728] ss:$16 sps:$4 sm:$0xff]  }
 0x2e2   : > { %2952 = vmatprep.subr.bf16.mxu0 %v14408_v54  ;;  %3116 = vmatprep.subr.bf16.mxu1 %v14411_v55  ;;  %v14498_v54 = vld [vmem:[%s17681_s27 + $0x744] ss:$16 sps:$4 sm:$0xff]   ;;  %v14501_v55 = vld [vmem:[%s17681_s27 + $0x74c] ss:$16 sps:$4 sm:$0xff]  }
 0x2e5   : > { %2953 = vmatpush1.bf16.msra.mxu0 %v14406_v56  ;;  %3117 = vmatpush1.bf16.msra.mxu1 %v14409_v57  ;;  %v14496_v56 = vld [vmem:[%s17681_s27 + $0x740] ss:$16 sps:$4 sm:$0xff]   ;;  %v14499_v57 = vld [vmem:[%s17681_s27 + $0x748] ss:$16 sps:$4 sm:$0xff]  }
 0x2e6   : > { %2954 = vmatprep.subr.bf16.mxu0 %v14414_v58  ;;  %3118 = vmatprep.subr.bf16.mxu1 %v14417_v59  ;;  %v14504_v58 = vld [vmem:[%s17681_s27 + $0x764] ss:$16 sps:$4 sm:$0xff]   ;;  %v14507_v59 = vld [vmem:[%s17681_s27 + $0x76c] ss:$16 sps:$4 sm:$0xff]  }
 0x2e9   : > { %2955 = vmatpush1.bf16.msra.mxu0 %v14412_v60  ;;  %3119 = vmatpush1.bf16.msra.mxu1 %v14415_v61  ;;  %v14502_v60 = vld [vmem:[%s17681_s27 + $0x760] ss:$16 sps:$4 sm:$0xff]   ;;  %v14505_v61 = vld [vmem:[%s17681_s27 + $0x768] ss:$16 sps:$4 sm:$0xff]  }
 0x2ea   : > { %2956 = vmatprep.subr.bf16.mxu0 %v14420_v62  ;;  %3120 = vmatprep.subr.bf16.mxu1 %v14423_v63  ;;  %v14510_v62 = vld [vmem:[%s17681_s27 + $0x784] ss:$16 sps:$4 sm:$0xff]   ;;  %v14513_v63 = vld [vmem:[%s17681_s27 + $0x78c] ss:$16 sps:$4 sm:$0xff]  }
 0x2ed   : > { %2957 = vmatpush1.bf16.msra.mxu0 %v14418_v0  ;;  %3121 = vmatpush1.bf16.msra.mxu1 %v14421_v1  ;;  %v14508_v0 = vld [vmem:[%s17681_s27 + $0x780] ss:$16 sps:$4 sm:$0xff]   ;;  %v14511_v1 = vld [vmem:[%s17681_s27 + $0x788] ss:$16 sps:$4 sm:$0xff]  }
 0x2ee   : > { %2958 = vmatprep.subr.bf16.mxu0 %v14426_v2  ;;  %3122 = vmatprep.subr.bf16.mxu1 %v14429_v3  ;;  %v14516_v2 = vld [vmem:[%s17681_s27 + $0x7a4] ss:$16 sps:$4 sm:$0xff]   ;;  %v14519_v3 = vld [vmem:[%s17681_s27 + $0x7ac] ss:$16 sps:$4 sm:$0xff]  }
 0x2f1   : > { %2959 = vmatpush1.bf16.msra.mxu0 %v14424_v4  ;;  %3123 = vmatpush1.bf16.msra.mxu1 %v14427_v5  ;;  %v14514_v4 = vld [vmem:[%s17681_s27 + $0x7a0] ss:$16 sps:$4 sm:$0xff]   ;;  %v14517_v5 = vld [vmem:[%s17681_s27 + $0x7a8] ss:$16 sps:$4 sm:$0xff]  }
 0x2f2   : > { %2960 = vmatprep.subr.bf16.mxu0 %v14432_v6  ;;  %3124 = vmatprep.subr.bf16.mxu1 %v14435_v7  ;;  %v14522_v6 = vld [vmem:[%s17681_s27 + $0x7c4] ss:$16 sps:$4 sm:$0xff]   ;;  %v14525_v7 = vld [vmem:[%s17681_s27 + $0x7cc] ss:$16 sps:$4 sm:$0xff]  }
 0x2f5   : > { %2961 = vmatpush1.bf16.msra.mxu0 %v14430_v8  ;;  %3125 = vmatpush1.bf16.msra.mxu1 %v14433_v9  ;;  %v14520_v8 = vld [vmem:[%s17681_s27 + $0x7c0] ss:$16 sps:$4 sm:$0xff]   ;;  %v14523_v9 = vld [vmem:[%s17681_s27 + $0x7c8] ss:$16 sps:$4 sm:$0xff]  }
 0x2f6   : > { %2971 = vmatprep.subr.bf16.mxu0 %v14438_v10  ;;  %3135 = vmatprep.subr.bf16.mxu1 %v14441_v12  ;;  %v14528_v10 = vld [vmem:[%s17681_s27 + $0x7e4] ss:$16 sps:$4 sm:$0xff]   ;;  %v14526_v12 = vld [vmem:[%s17681_s27 + $0x7e0] ss:$16 sps:$4 sm:$0xff]  }
 0x2f8   : > { %2963 = vmatmul.mubr.bf16.vlgmr.msra.gmra.mrb[0].mxu0 %v1286_v15  ;;  %3127 = vmatmul.mubr.bf16.vlgmr.msra.gmra.mrb[0].mxu1 %v1286_v15  ;;  %v14534_v15 = vld [vmem:[%s17696_s1 + $0x4] ss:$16 sps:$4 sm:$0xff]  }
 0x2f9   : > { %2972 = vmatpush1.bf16.msra.mxu0 %v14436_v13  ;;  %3136 = vmatpush1.bf16.msra.mxu1 %v14439_v14  ;;  %v14529_v13 = vld [vmem:[%s17681_s27 + $0x7e8] ss:$16 sps:$4 sm:$0xff]   ;;  %v1280_v14 = vld [vmem:[%s17670_s4 + $0x30] sm:$0xff]  ;;  %s18105_s4 = sshll.u32 %s17666_s6, 5 }
 0x2fa   : > { %2973 = vmatprep.subr.bf16.mxu0 %v14444_v17  ;;  %3137 = vmatprep.subr.bf16.mxu1 %v14447_v18  ;;  %v14532_v17 = vld [vmem:[%s17696_s1] ss:$16 sps:$4 sm:$0xff]   ;;  %v14535_v18 = vld [vmem:[%s17696_s1 + $0x8] ss:$16 sps:$4 sm:$0xff]   ;;  %s18116_s27 = scalar_lea.vmem [#allocation29], %s18105_s4 }
 0x2fb   : > { %3003 = vmatprep.mubr.bf16.mxu0 %v1289_v19  ;;  %3167 = vmatprep.mubr.bf16.mxu1 %v1289_v19  ;;  %v1288_v19 = vpack.c.bf16 %v1280_v14, %v1280_v14  ;;  %v14622_v14 = vld [vmem:[%s17696_s1 + $0x1e0] ss:$16 sps:$4 sm:$0xff]  }
 0x2fd   : > { %2974 = vmatpush1.bf16.msra.mxu0 %v14442_v20  ;;  %3138 = vmatpush1.bf16.msra.mxu1 %v14445_v21  ;;  %v14540_v20 = vld [vmem:[%s17696_s1 + $0x24] ss:$16 sps:$4 sm:$0xff]   ;;  %v14543_v21 = vld [vmem:[%s17696_s1 + $0x2c] ss:$16 sps:$4 sm:$0xff]  }
 0x2fe   : > { %2975 = vmatprep.subr.bf16.mxu0 %v14450_v22  ;;  %3139 = vmatprep.subr.bf16.mxu1 %v14453_v23  ;;  %v14538_v22 = vld [vmem:[%s17696_s1 + $0x20] ss:$16 sps:$4 sm:$0xff]   ;;  %v14541_v23 = vld [vmem:[%s17696_s1 + $0x28] ss:$16 sps:$4 sm:$0xff]  }
 0x301   : > { %2976 = vmatpush1.bf16.msra.mxu0 %v14448_v24  ;;  %3140 = vmatpush1.bf16.msra.mxu1 %v14451_v25  ;;  %v14546_v24 = vld [vmem:[%s17696_s1 + $0x44] ss:$16 sps:$4 sm:$0xff]   ;;  %v14549_v25 = vld [vmem:[%s17696_s1 + $0x4c] ss:$16 sps:$4 sm:$0xff]  }
 0x302   : > { %2977 = vmatprep.subr.bf16.mxu0 %v14456_v26  ;;  %3141 = vmatprep.subr.bf16.mxu1 %v14459_v27  ;;  %v14544_v26 = vld [vmem:[%s17696_s1 + $0x40] ss:$16 sps:$4 sm:$0xff]   ;;  %v14547_v27 = vld [vmem:[%s17696_s1 + $0x48] ss:$16 sps:$4 sm:$0xff]  }
 0x305   : > { %2978 = vmatpush1.bf16.msra.mxu0 %v14454_v28  ;;  %3142 = vmatpush1.bf16.msra.mxu1 %v14457_v29  ;;  %v14552_v28 = vld [vmem:[%s17696_s1 + $0x64] ss:$16 sps:$4 sm:$0xff]   ;;  %v14555_v29 = vld [vmem:[%s17696_s1 + $0x6c] ss:$16 sps:$4 sm:$0xff]  }
 0x306   : > { %2979 = vmatprep.subr.bf16.mxu0 %v14462_v30  ;;  %3143 = vmatprep.subr.bf16.mxu1 %v14465_v31  ;;  %v14550_v30 = vld [vmem:[%s17696_s1 + $0x60] ss:$16 sps:$4 sm:$0xff]   ;;  %v14553_v31 = vld [vmem:[%s17696_s1 + $0x68] ss:$16 sps:$4 sm:$0xff]  }
 0x309   : > { %2980 = vmatpush1.bf16.msra.mxu0 %v14460_v32  ;;  %3144 = vmatpush1.bf16.msra.mxu1 %v14463_v33  ;;  %v14558_v32 = vld [vmem:[%s17696_s1 + $0x84] ss:$16 sps:$4 sm:$0xff]   ;;  %v14561_v33 = vld [vmem:[%s17696_s1 + $0x8c] ss:$16 sps:$4 sm:$0xff]  }
 0x30a   : > { %2981 = vmatprep.subr.bf16.mxu0 %v14468_v34  ;;  %3145 = vmatprep.subr.bf16.mxu1 %v14471_v35  ;;  %v14556_v34 = vld [vmem:[%s17696_s1 + $0x80] ss:$16 sps:$4 sm:$0xff]   ;;  %v14559_v35 = vld [vmem:[%s17696_s1 + $0x88] ss:$16 sps:$4 sm:$0xff]  }
 0x30d   : > { %2982 = vmatpush1.bf16.msra.mxu0 %v14466_v36  ;;  %3146 = vmatpush1.bf16.msra.mxu1 %v14469_v37  ;;  %v14564_v36 = vld [vmem:[%s17696_s1 + $0xa4] ss:$16 sps:$4 sm:$0xff]   ;;  %v14567_v37 = vld [vmem:[%s17696_s1 + $0xac] ss:$16 sps:$4 sm:$0xff]  }
 0x30e   : > { %2983 = vmatprep.subr.bf16.mxu0 %v14474_v38  ;;  %3147 = vmatprep.subr.bf16.mxu1 %v14477_v39  ;;  %v14562_v38 = vld [vmem:[%s17696_s1 + $0xa0] ss:$16 sps:$4 sm:$0xff]   ;;  %v14565_v39 = vld [vmem:[%s17696_s1 + $0xa8] ss:$16 sps:$4 sm:$0xff]  }
 0x311   : > { %2984 = vmatpush1.bf16.msra.mxu0 %v14472_v40  ;;  %3148 = vmatpush1.bf16.msra.mxu1 %v14475_v41  ;;  %v14570_v40 = vld [vmem:[%s17696_s1 + $0xc4] ss:$16 sps:$4 sm:$0xff]   ;;  %v14573_v41 = vld [vmem:[%s17696_s1 + $0xcc] ss:$16 sps:$4 sm:$0xff]  }
 0x312   : > { %2985 = vmatprep.subr.bf16.mxu0 %v14480_v42  ;;  %3149 = vmatprep.subr.bf16.mxu1 %v14483_v43  ;;  %v14568_v42 = vld [vmem:[%s17696_s1 + $0xc0] ss:$16 sps:$4 sm:$0xff]   ;;  %v14571_v43 = vld [vmem:[%s17696_s1 + $0xc8] ss:$16 sps:$4 sm:$0xff]  }
 0x315   : > { %2986 = vmatpush1.bf16.msra.mxu0 %v14478_v44  ;;  %3150 = vmatpush1.bf16.msra.mxu1 %v14481_v45  ;;  %v14576_v44 = vld [vmem:[%s17696_s1 + $0xe4] ss:$16 sps:$4 sm:$0xff]   ;;  %v14579_v45 = vld [vmem:[%s17696_s1 + $0xec] ss:$16 sps:$4 sm:$0xff]  }
 0x316   : > { %2987 = vmatprep.subr.bf16.mxu0 %v14486_v46  ;;  %3151 = vmatprep.subr.bf16.mxu1 %v14489_v47  ;;  %v14574_v46 = vld [vmem:[%s17696_s1 + $0xe0] ss:$16 sps:$4 sm:$0xff]   ;;  %v14577_v47 = vld [vmem:[%s17696_s1 + $0xe8] ss:$16 sps:$4 sm:$0xff]  }
 0x319   : > { %2988 = vmatpush1.bf16.msra.mxu0 %v14484_v48  ;;  %3152 = vmatpush1.bf16.msra.mxu1 %v14487_v49  ;;  %v14582_v48 = vld [vmem:[%s17696_s1 + $0x104] ss:$16 sps:$4 sm:$0xff]   ;;  %v14585_v49 = vld [vmem:[%s17696_s1 + $0x10c] ss:$16 sps:$4 sm:$0xff]  }
 0x31a   : > { %2989 = vmatprep.subr.bf16.mxu0 %v14492_v50  ;;  %3153 = vmatprep.subr.bf16.mxu1 %v14495_v51  ;;  %v14580_v50 = vld [vmem:[%s17696_s1 + $0x100] ss:$16 sps:$4 sm:$0xff]   ;;  %v14583_v51 = vld [vmem:[%s17696_s1 + $0x108] ss:$16 sps:$4 sm:$0xff]  }
 0x31d   : > { %2990 = vmatpush1.bf16.msra.mxu0 %v14490_v52  ;;  %3154 = vmatpush1.bf16.msra.mxu1 %v14493_v53  ;;  %v14588_v52 = vld [vmem:[%s17696_s1 + $0x124] ss:$16 sps:$4 sm:$0xff]   ;;  %v14591_v53 = vld [vmem:[%s17696_s1 + $0x12c] ss:$16 sps:$4 sm:$0xff]  }
 0x31e   : > { %2991 = vmatprep.subr.bf16.mxu0 %v14498_v54  ;;  %3155 = vmatprep.subr.bf16.mxu1 %v14501_v55  ;;  %v14586_v54 = vld [vmem:[%s17696_s1 + $0x120] ss:$16 sps:$4 sm:$0xff]   ;;  %v14589_v55 = vld [vmem:[%s17696_s1 + $0x128] ss:$16 sps:$4 sm:$0xff]  }
 0x321   : > { %2992 = vmatpush1.bf16.msra.mxu0 %v14496_v56  ;;  %3156 = vmatpush1.bf16.msra.mxu1 %v14499_v57  ;;  %v14594_v56 = vld [vmem:[%s17696_s1 + $0x144] ss:$16 sps:$4 sm:$0xff]   ;;  %v14597_v57 = vld [vmem:[%s17696_s1 + $0x14c] ss:$16 sps:$4 sm:$0xff]  }
 0x322   : > { %2993 = vmatprep.subr.bf16.mxu0 %v14504_v58  ;;  %3157 = vmatprep.subr.bf16.mxu1 %v14507_v59  ;;  %v14592_v58 = vld [vmem:[%s17696_s1 + $0x140] ss:$16 sps:$4 sm:$0xff]   ;;  %v14595_v59 = vld [vmem:[%s17696_s1 + $0x148] ss:$16 sps:$4 sm:$0xff]  }
 0x325   : > { %2994 = vmatpush1.bf16.msra.mxu0 %v14502_v60  ;;  %3158 = vmatpush1.bf16.msra.mxu1 %v14505_v61  ;;  %v14600_v60 = vld [vmem:[%s17696_s1 + $0x164] ss:$16 sps:$4 sm:$0xff]   ;;  %v14603_v61 = vld [vmem:[%s17696_s1 + $0x16c] ss:$16 sps:$4 sm:$0xff]  }
 0x326   : > { %2995 = vmatprep.subr.bf16.mxu0 %v14510_v62  ;;  %3159 = vmatprep.subr.bf16.mxu1 %v14513_v63  ;;  %v14598_v62 = vld [vmem:[%s17696_s1 + $0x160] ss:$16 sps:$4 sm:$0xff]   ;;  %v14601_v63 = vld [vmem:[%s17696_s1 + $0x168] ss:$16 sps:$4 sm:$0xff]  }
 0x329   : > { %2996 = vmatpush1.bf16.msra.mxu0 %v14508_v0  ;;  %3160 = vmatpush1.bf16.msra.mxu1 %v14511_v1  ;;  %v14606_v0 = vld [vmem:[%s17696_s1 + $0x184] ss:$16 sps:$4 sm:$0xff]   ;;  %v14609_v1 = vld [vmem:[%s17696_s1 + $0x18c] ss:$16 sps:$4 sm:$0xff]  }
 0x32a   : > { %2997 = vmatprep.subr.bf16.mxu0 %v14516_v2  ;;  %3161 = vmatprep.subr.bf16.mxu1 %v14519_v3  ;;  %v14604_v2 = vld [vmem:[%s17696_s1 + $0x180] ss:$16 sps:$4 sm:$0xff]   ;;  %v14607_v3 = vld [vmem:[%s17696_s1 + $0x188] ss:$16 sps:$4 sm:$0xff]  }
 0x32d   : > { %2998 = vmatpush1.bf16.msra.mxu0 %v14514_v4  ;;  %3162 = vmatpush1.bf16.msra.mxu1 %v14517_v5  ;;  %v14612_v4 = vld [vmem:[%s17696_s1 + $0x1a4] ss:$16 sps:$4 sm:$0xff]   ;;  %v14615_v5 = vld [vmem:[%s17696_s1 + $0x1ac] ss:$16 sps:$4 sm:$0xff]  }
 0x32e   : > { %2999 = vmatprep.subr.bf16.mxu0 %v14522_v6  ;;  %3163 = vmatprep.subr.bf16.mxu1 %v14525_v7  ;;  %v14610_v6 = vld [vmem:[%s17696_s1 + $0x1a0] ss:$16 sps:$4 sm:$0xff]   ;;  %v14613_v7 = vld [vmem:[%s17696_s1 + $0x1a8] ss:$16 sps:$4 sm:$0xff]  }
 0x331   : > { %3000 = vmatpush1.bf16.msra.mxu0 %v14520_v8  ;;  %3164 = vmatpush1.bf16.msra.mxu1 %v14523_v9  ;;  %v14618_v8 = vld [vmem:[%s17696_s1 + $0x1c4] ss:$16 sps:$4 sm:$0xff]   ;;  %v14621_v9 = vld [vmem:[%s17696_s1 + $0x1cc] ss:$16 sps:$4 sm:$0xff]  }
 0x332   : > { %3001 = vmatprep.subr.bf16.mxu0 %v14528_v10  ;;  %3165 = vmatprep.subr.bf16.mxu1 %v14531_v11  ;;  %v14616_v10 = vld [vmem:[%s17696_s1 + $0x1c0] ss:$16 sps:$4 sm:$0xff]   ;;  %v14619_v11 = vld [vmem:[%s17696_s1 + $0x1c8] ss:$16 sps:$4 sm:$0xff]  }
 0x335   : > { %3002 = vmatpush1.bf16.msra.mxu0 %v14526_v12  ;;  %3166 = vmatpush1.bf16.msra.mxu1 %v14529_v13  ;;  %v14624_v12 = vld [vmem:[%s17696_s1 + $0x1e4] ss:$16 sps:$4 sm:$0xff]   ;;  %v14627_v13 = vld [vmem:[%s17696_s1 + $0x1ec] ss:$16 sps:$4 sm:$0xff]  }
 0x336   : > { %3974 = vmatprep.subr.bf16.mxu0 %v14534_v15  ;;  %4056 = vmatprep.subr.bf16.mxu1 %v14537_v16  ;;  %v14625_v15 = vld [vmem:[%s17696_s1 + $0x1e8] ss:$16 sps:$4 sm:$0xff]   ;;  %v14630_v16 = vld [vmem:[%s17696_s1 + $0x204] ss:$16 sps:$4 sm:$0xff]  }
 0x338   : > { %3004 = vmatmul.mubr.bf16.vlgmr.msra.gmra.mrb[0].mxu0 %v1288_v19  ;;  %3168 = vmatmul.mubr.bf16.vlgmr.msra.gmra.mrb[0].mxu1 %v1288_v19 }
 0x339   : > { %3975 = vmatpush1.bf16.msra.mxu0 %v14532_v17  ;;  %4057 = vmatpush1.bf16.msra.mxu1 %v14535_v18  ;;  %v14633_v17 = vld [vmem:[%s17696_s1 + $0x20c] ss:$16 sps:$4 sm:$0xff]   ;;  %v1548_v18 = vlaneseq }
 0x33a   : > { %3976 = vmatprep.subr.bf16.mxu0 %v14540_v20  ;;  %4058 = vmatprep.subr.bf16.mxu1 %v14543_v21  ;;  %v1546_v20 = vld [vmem:[%s19636_s28] sm:$0xf]  ;;  %s11842_s28 = scalar_lea.sflag [#allocation31], %s17677_s29 }
 0x33b   : > { %v18088_v19 = vshrl.u32 %v1548_v18, 7  ;;  %v14690_v18 = vld [vmem:[%s17696_s1 + $0x344] ss:$16 sps:$4 sm:$0xff]  }
 0x33d   : > { %3977 = vmatpush1.bf16.msra.mxu0 %v14538_v22  ;;  %4059 = vmatpush1.bf16.msra.mxu1 %v14541_v23  ;;  %v18093_v21 = vsub.s32 0, %v18088_v19  ;;  %v18096_v22 = vsub.s32 2, %v18088_v19  ;;  %v18099_v23 = vsub.s32 1, %v18088_v19 }
 0x33e   : > { %3978 = vmatprep.subr.bf16.mxu0 %v14546_v24  ;;  %4060 = vmatprep.subr.bf16.mxu1 %v14549_v25  ;;  %v18102_v24 = vsub.s32 3, %v18088_v19 }
 0x33f   : > { %v1551_v25 = vrot.slane %v1546_v20, %v18093_v21 }
 0x341   : > { %3979 = vmatpush1.bf16.msra.mxu0 %v14544_v26  ;;  %4061 = vmatpush1.bf16.msra.mxu1 %v14547_v27  ;;  %v1559_v26 = vrot.slane %v1546_v20, %v18096_v22  ;;  %v1555_v27 = vrot.slane %v1546_v20, %v18099_v23 }
 0x342   : > { %3980 = vmatprep.subr.bf16.mxu0 %v14552_v28  ;;  %4062 = vmatprep.subr.bf16.mxu1 %v14555_v29  ;;  %v1563_v28 = vrot.slane %v1546_v20, %v18102_v24  ;;  %v14693_v20 = vld [vmem:[%s17696_s1 + $0x34c] ss:$16 sps:$4 sm:$0xff]  }
 0x345   : > { %3981 = vmatpush1.bf16.msra.mxu0 %v14550_v30  ;;  %4063 = vmatpush1.bf16.msra.mxu1 %v14553_v31 }
 0x346   : > { %3982 = vmatprep.subr.bf16.mxu0 %v14558_v32  ;;  %4064 = vmatprep.subr.bf16.mxu1 %v14561_v33 }
 0x349   : > { %3983 = vmatpush1.bf16.msra.mxu0 %v14556_v34  ;;  %4065 = vmatpush1.bf16.msra.mxu1 %v14559_v35 }
 0x34a   : > { %3984 = vmatprep.subr.bf16.mxu0 %v14564_v36  ;;  %4066 = vmatprep.subr.bf16.mxu1 %v14567_v37 }
 0x34d   : > { %3985 = vmatpush1.bf16.msra.mxu0 %v14562_v38  ;;  %4067 = vmatpush1.bf16.msra.mxu1 %v14565_v39  ;;  %v14628_v39 = vld [vmem:[%s17696_s1 + $0x200] ss:$16 sps:$4 sm:$0xff]  }
 0x34e   : > { %3986 = vmatprep.subr.bf16.mxu0 %v14570_v40  ;;  %4068 = vmatprep.subr.bf16.mxu1 %v14573_v41  ;;  %v14631_v40 = vld [vmem:[%s17696_s1 + $0x208] ss:$16 sps:$4 sm:$0xff]  }
 0x351   : > { %3987 = vmatpush1.bf16.msra.mxu0 %v14568_v42  ;;  %4069 = vmatpush1.bf16.msra.mxu1 %v14571_v43 }
 0x352   : > { %3988 = vmatprep.subr.bf16.mxu0 %v14576_v44  ;;  %4070 = vmatprep.subr.bf16.mxu1 %v14579_v45  ;;  %v14636_v44 = vld [vmem:[%s17696_s1 + $0x224] ss:$16 sps:$4 sm:$0xff]   ;;  %v14639_v45 = vld [vmem:[%s17696_s1 + $0x22c] ss:$16 sps:$4 sm:$0xff]  }
 0x355   : > { %3989 = vmatpush1.bf16.msra.mxu0 %v14574_v46  ;;  %4071 = vmatpush1.bf16.msra.mxu1 %v14577_v47  ;;  %v14634_v47 = vld [vmem:[%s17696_s1 + $0x220] ss:$16 sps:$4 sm:$0xff]  }
 0x356   : > { %3990 = vmatprep.subr.bf16.mxu0 %v14582_v48  ;;  %4072 = vmatprep.subr.bf16.mxu1 %v14585_v49  ;;  %v14637_v48 = vld [vmem:[%s17696_s1 + $0x228] ss:$16 sps:$4 sm:$0xff]  }
 0x359   : > { %3991 = vmatpush1.bf16.msra.mxu0 %v14580_v50  ;;  %4073 = vmatpush1.bf16.msra.mxu1 %v14583_v51  ;;  %v14642_v50 = vld [vmem:[%s17696_s1 + $0x244] ss:$16 sps:$4 sm:$0xff]   ;;  %v14645_v51 = vld [vmem:[%s17696_s1 + $0x24c] ss:$16 sps:$4 sm:$0xff]  }
 0x35a   : > { %3992 = vmatprep.subr.bf16.mxu0 %v14588_v52  ;;  %4074 = vmatprep.subr.bf16.mxu1 %v14591_v53  ;;  %v14640_v52 = vld [vmem:[%s17696_s1 + $0x240] ss:$16 sps:$4 sm:$0xff]   ;;  %v14643_v53 = vld [vmem:[%s17696_s1 + $0x248] ss:$16 sps:$4 sm:$0xff]  }
 0x35d   : > { %3993 = vmatpush1.bf16.msra.mxu0 %v14586_v54  ;;  %4075 = vmatpush1.bf16.msra.mxu1 %v14589_v55  ;;  %v14648_v54 = vld [vmem:[%s17696_s1 + $0x264] ss:$16 sps:$4 sm:$0xff]   ;;  %v14651_v55 = vld [vmem:[%s17696_s1 + $0x26c] ss:$16 sps:$4 sm:$0xff]  }
 0x35e   : > { %3994 = vmatprep.subr.bf16.mxu0 %v14594_v56  ;;  %4076 = vmatprep.subr.bf16.mxu1 %v14597_v57  ;;  %v14646_v56 = vld [vmem:[%s17696_s1 + $0x260] ss:$16 sps:$4 sm:$0xff]   ;;  %v14649_v57 = vld [vmem:[%s17696_s1 + $0x268] ss:$16 sps:$4 sm:$0xff]  }
 0x361   : > { %3995 = vmatpush1.bf16.msra.mxu0 %v14592_v58  ;;  %4077 = vmatpush1.bf16.msra.mxu1 %v14595_v59  ;;  %v14654_v58 = vld [vmem:[%s17696_s1 + $0x284] ss:$16 sps:$4 sm:$0xff]   ;;  %v14657_v59 = vld [vmem:[%s17696_s1 + $0x28c] ss:$16 sps:$4 sm:$0xff]  }
 0x362   : > { %3996 = vmatprep.subr.bf16.mxu0 %v14600_v60  ;;  %4078 = vmatprep.subr.bf16.mxu1 %v14603_v61  ;;  %v14652_v60 = vld [vmem:[%s17696_s1 + $0x280] ss:$16 sps:$4 sm:$0xff]   ;;  %v14655_v61 = vld [vmem:[%s17696_s1 + $0x288] ss:$16 sps:$4 sm:$0xff]  }
 0x365   : > { %3997 = vmatpush1.bf16.msra.mxu0 %v14598_v62  ;;  %4079 = vmatpush1.bf16.msra.mxu1 %v14601_v63  ;;  %v14660_v62 = vld [vmem:[%s17696_s1 + $0x2a4] ss:$16 sps:$4 sm:$0xff]   ;;  %v14663_v63 = vld [vmem:[%s17696_s1 + $0x2ac] ss:$16 sps:$4 sm:$0xff]  }
 0x366   : > { %3998 = vmatprep.subr.bf16.mxu0 %v14606_v0  ;;  %4080 = vmatprep.subr.bf16.mxu1 %v14609_v1  ;;  %v14658_v0 = vld [vmem:[%s17696_s1 + $0x2a0] ss:$16 sps:$4 sm:$0xff]   ;;  %v14661_v1 = vld [vmem:[%s17696_s1 + $0x2a8] ss:$16 sps:$4 sm:$0xff]  }
 0x369   : > { %3999 = vmatpush1.bf16.msra.mxu0 %v14604_v2  ;;  %4081 = vmatpush1.bf16.msra.mxu1 %v14607_v3  ;;  %v14666_v2 = vld [vmem:[%s17696_s1 + $0x2c4] ss:$16 sps:$4 sm:$0xff]   ;;  %v14669_v3 = vld [vmem:[%s17696_s1 + $0x2cc] ss:$16 sps:$4 sm:$0xff]  }
 0x36a   : > { %4000 = vmatprep.subr.bf16.mxu0 %v14612_v4  ;;  %4082 = vmatprep.subr.bf16.mxu1 %v14615_v5  ;;  %v14664_v4 = vld [vmem:[%s17696_s1 + $0x2c0] ss:$16 sps:$4 sm:$0xff]   ;;  %v14667_v5 = vld [vmem:[%s17696_s1 + $0x2c8] ss:$16 sps:$4 sm:$0xff]  }
 0x36d   : > { %4001 = vmatpush1.bf16.msra.mxu0 %v14610_v6  ;;  %4083 = vmatpush1.bf16.msra.mxu1 %v14613_v7  ;;  %v14672_v6 = vld [vmem:[%s17696_s1 + $0x2e4] ss:$16 sps:$4 sm:$0xff]   ;;  %v14675_v7 = vld [vmem:[%s17696_s1 + $0x2ec] ss:$16 sps:$4 sm:$0xff]  }
 0x36e   : > { %4002 = vmatprep.subr.bf16.mxu0 %v14618_v8  ;;  %4084 = vmatprep.subr.bf16.mxu1 %v14621_v9  ;;  %v14670_v8 = vld [vmem:[%s17696_s1 + $0x2e0] ss:$16 sps:$4 sm:$0xff]   ;;  %v14673_v9 = vld [vmem:[%s17696_s1 + $0x2e8] ss:$16 sps:$4 sm:$0xff]  }
 0x371   : > { %4003 = vmatpush1.bf16.msra.mxu0 %v14616_v10  ;;  %4085 = vmatpush1.bf16.msra.mxu1 %v14619_v11  ;;  %v14678_v10 = vld [vmem:[%s17696_s1 + $0x304] ss:$16 sps:$4 sm:$0xff]   ;;  %v14681_v11 = vld [vmem:[%s17696_s1 + $0x30c] ss:$16 sps:$4 sm:$0xff]  }
 0x372   : > { %4004 = vmatprep.subr.bf16.mxu0 %v14624_v12  ;;  %4086 = vmatprep.subr.bf16.mxu1 %v14627_v13  ;;  %v14676_v12 = vld [vmem:[%s17696_s1 + $0x300] ss:$16 sps:$4 sm:$0xff]   ;;  %v14679_v13 = vld [vmem:[%s17696_s1 + $0x308] ss:$16 sps:$4 sm:$0xff]  }
 0x375   : > { %4005 = vmatpush1.bf16.msra.mxu0 %v14622_v14  ;;  %4087 = vmatpush1.bf16.msra.mxu1 %v14625_v15  ;;  %v14684_v14 = vld [vmem:[%s17696_s1 + $0x324] ss:$16 sps:$4 sm:$0xff]   ;;  %v14687_v15 = vld [vmem:[%s17696_s1 + $0x32c] ss:$16 sps:$4 sm:$0xff]  }
 0x376   : > { %4015 = vmatprep.subr.bf16.mxu0 %v14630_v16  ;;  %4097 = vmatprep.subr.bf16.mxu1 %v14633_v17  ;;  %v14682_v16 = vld [vmem:[%s17696_s1 + $0x320] ss:$16 sps:$4 sm:$0xff]   ;;  %v14685_v17 = vld [vmem:[%s17696_s1 + $0x328] ss:$16 sps:$4 sm:$0xff]  }
 0x40b   : > { %v3005_v29 = vpop.f32.mrb[0].mxu0  ;;  %v3169_v30 = vpop.f32.mrb[0].mxu1 }
 0x40c   : > { %v13926_v31 = vadd.f32 %v3005_v29, %v1551_v25  ;;  %v18111_v32 = vadd.f32 %v3169_v30, %v1559_v26  ;;  %v3007_v33 = vpop.f32.mrb[1].mxu0  ;;  %v3171_v34 = vpop.f32.mrb[1].mxu1  ;;  %v14688_v25 = vld [vmem:[%s17696_s1 + $0x340] ss:$16 sps:$4 sm:$0xff]   ;;  %v14691_v26 = vld [vmem:[%s17696_s1 + $0x348] ss:$16 sps:$4 sm:$0xff]  }
 0x40d   : > { %v13927_v35 = vadd.f32 %v3007_v33, %v1555_v27  ;;  %v13929_v36 = vadd.f32 %v3171_v34, %v1563_v28  ;;  %v3009_v37 = vpop.f32.mrb[2].mxu0  ;;  %v3173_v38 = vpop.f32.mrb[2].mxu1  ;;  %v14696_v27 = vld [vmem:[%s17696_s1 + $0x364] ss:$16 sps:$4 sm:$0xff]   ;;  %v14699_v28 = vld [vmem:[%s17696_s1 + $0x36c] ss:$16 sps:$4 sm:$0xff]  }
 0x40e   : > { %3176 = vst [vmem:[%s18116_s27] sm:$0xff] %v13926_v31  ;;  %3178 = vst [vmem:[%s18116_s27 + $0x10] sm:$0xff] %v18111_v32  ;;  %v3010_v41 = vpop.f32.mrb[3].mxu0  ;;  %v3174_v42 = vpop.f32.mrb[3].mxu1  ;;  %v3180_v46 = vpack.c.bf16 %v13926_v31, %v13926_v31  ;;  %v14694_v29 = vld [vmem:[%s17696_s1 + $0x360] ss:$16 sps:$4 sm:$0xff]  }
 0x40f   : > { %3177 = vst [vmem:[%s18116_s27 + $0x8] sm:$0xff] %v13927_v35  ;;  %3179 = vst [vmem:[%s18116_s27 + $0x18] sm:$0xff] %v13929_v36  ;;  %v3181_v43 = vpack.c.bf16 %v13927_v35, %v13927_v35  ;;  %v3183_v49 = vpack.c.bf16 %v13929_v36, %v13929_v36  ;;  %v14697_v30 = vld [vmem:[%s17696_s1 + $0x368] ss:$16 sps:$4 sm:$0xff]   ;;  %v14702_v31 = vld [vmem:[%s17696_s1 + $0x384] ss:$16 sps:$4 sm:$0xff]  }
 0x410   : > { %v14705_v33 = vld [vmem:[%s17696_s1 + $0x38c] ss:$16 sps:$4 sm:$0xff]   ;;  %v14700_v34 = vld [vmem:[%s17696_s1 + $0x380] ss:$16 sps:$4 sm:$0xff]   ;;  %v14703_v35 = vld [vmem:[%s17696_s1 + $0x388] ss:$16 sps:$4 sm:$0xff]  }
 0x411   : > { %4006 = vmatprep.mubr.bf16.mxu0 %v3181_v43  ;;  %4088 = vmatprep.mubr.bf16.mxu1 %v3181_v43  ;;  %v14708_v36 = vld [vmem:[%s17696_s1 + $0x3a4] ss:$16 sps:$4 sm:$0xff]   ;;  %v14711_v37 = vld [vmem:[%s17696_s1 + $0x3ac] ss:$16 sps:$4 sm:$0xff]   ;;  %v14706_v38 = vld [vmem:[%s17696_s1 + $0x3a0] ss:$16 sps:$4 sm:$0xff]  }
 0x412   : > { %4007 = vmatmul.mubr.bf16.vlgmr.msra.gmra.mrb[4].mxu0 %v3180_v46  ;;  %4089 = vmatmul.mubr.bf16.vlgmr.msra.gmra.mrb[4].mxu1 %v3180_v46  ;;  %v14717_v41 = vld [vmem:[%s17696_s1 + $0x3cc] ss:$16 sps:$4 sm:$0xff]   ;;  %v14712_v42 = vld [vmem:[%s17696_s1 + $0x3c0] ss:$16 sps:$4 sm:$0xff]   ;;  %v14715_v43 = vld [vmem:[%s17696_s1 + $0x3c8] ss:$16 sps:$4 sm:$0xff]  }
 0x413   : > { %4016 = vmatpush1.bf16.msra.mxu0 %v14628_v39  ;;  %4098 = vmatpush1.bf16.msra.mxu1 %v14631_v40  ;;  %v14709_v39 = vld [vmem:[%s17696_s1 + $0x3a8] ss:$16 sps:$4 sm:$0xff]   ;;  %v14714_v40 = vld [vmem:[%s17696_s1 + $0x3c4] ss:$16 sps:$4 sm:$0xff]   ;;  %v14718_v46 = vld [vmem:[%s17696_s1 + $0x3e0] ss:$16 sps:$4 sm:$0xff]  }
 0x414   : > { %4047 = vmatprep.mubr.bf16.mxu0 %v3183_v49  ;;  %4129 = vmatprep.mubr.bf16.mxu1 %v3183_v49  ;;  %v14729_v49 = vld [vmem:[%s17705_s20 + $0xc] ss:$16 sps:$4 sm:$0xff]  }
 0x415   : > { %4017 = vmatprep.subr.bf16.mxu0 %v14636_v44  ;;  %4099 = vmatprep.subr.bf16.mxu1 %v14639_v45  ;;  %v14720_v44 = vld [vmem:[%s17696_s1 + $0x3e4] ss:$16 sps:$4 sm:$0xff]   ;;  %v14723_v45 = vld [vmem:[%s17696_s1 + $0x3ec] ss:$16 sps:$4 sm:$0xff]  }
 0x417   : > { %4018 = vmatpush1.bf16.msra.mxu0 %v14634_v47  ;;  %4100 = vmatpush1.bf16.msra.mxu1 %v14637_v48  ;;  %v14721_v47 = vld [vmem:[%s17696_s1 + $0x3e8] ss:$16 sps:$4 sm:$0xff]   ;;  %v14726_v48 = vld [vmem:[%s17705_s20 + $0x4] ss:$16 sps:$4 sm:$0xff]   ;;  %s19639_s1 = scalar_lea.vmem [#allocation16], %s17688_s23 }
 0x418   : > { %4019 = vmatprep.subr.bf16.mxu0 %v14642_v50  ;;  %4101 = vmatprep.subr.bf16.mxu1 %v14645_v51  ;;  %v14724_v50 = vld [vmem:[%s17705_s20] ss:$16 sps:$4 sm:$0xff]   ;;  %v14727_v51 = vld [vmem:[%s17705_s20 + $0x8] ss:$16 sps:$4 sm:$0xff]  }
 0x41b   : > { %4020 = vmatpush1.bf16.msra.mxu0 %v14640_v52  ;;  %4102 = vmatpush1.bf16.msra.mxu1 %v14643_v53  ;;  %v14732_v52 = vld [vmem:[%s17705_s20 + $0x24] ss:$16 sps:$4 sm:$0xff]   ;;  %v14735_v53 = vld [vmem:[%s17705_s20 + $0x2c] ss:$16 sps:$4 sm:$0xff]  }
 0x41c   : > { %4021 = vmatprep.subr.bf16.mxu0 %v14648_v54  ;;  %4103 = vmatprep.subr.bf16.mxu1 %v14651_v55  ;;  %v3182_v54 = vpack.c.bf16 %v18111_v32, %v18111_v32  ;;  %v14730_v55 = vld [vmem:[%s17705_s20 + $0x20] ss:$16 sps:$4 sm:$0xff]   ;;  %v14739_v32 = vld [vmem:[%s17705_s20 + $0x48] ss:$16 sps:$4 sm:$0xff]  }
 0x41f   : > { %4022 = vmatpush1.bf16.msra.mxu0 %v14646_v56  ;;  %4104 = vmatpush1.bf16.msra.mxu1 %v14649_v57  ;;  %v14733_v56 = vld [vmem:[%s17705_s20 + $0x28] ss:$16 sps:$4 sm:$0xff]   ;;  %v14738_v57 = vld [vmem:[%s17705_s20 + $0x44] ss:$16 sps:$4 sm:$0xff]  }
 0x420   : > { %4023 = vmatprep.subr.bf16.mxu0 %v14654_v58  ;;  %4105 = vmatprep.subr.bf16.mxu1 %v14657_v59  ;;  %v14741_v58 = vld [vmem:[%s17705_s20 + $0x4c] ss:$16 sps:$4 sm:$0xff]   ;;  %v14736_v59 = vld [vmem:[%s17705_s20 + $0x40] ss:$16 sps:$4 sm:$0xff]  }
 0x423   : > { %4024 = vmatpush1.bf16.msra.mxu0 %v14652_v60  ;;  %4106 = vmatpush1.bf16.msra.mxu1 %v14655_v61  ;;  %v14744_v60 = vld [vmem:[%s17705_s20 + $0x64] ss:$16 sps:$4 sm:$0xff]   ;;  %v14747_v61 = vld [vmem:[%s17705_s20 + $0x6c] ss:$16 sps:$4 sm:$0xff]  }
 0x424   : > { %4025 = vmatprep.subr.bf16.mxu0 %v14660_v62  ;;  %4107 = vmatprep.subr.bf16.mxu1 %v14663_v63  ;;  %v14742_v62 = vld [vmem:[%s17705_s20 + $0x60] ss:$16 sps:$4 sm:$0xff]   ;;  %v14745_v63 = vld [vmem:[%s17705_s20 + $0x68] ss:$16 sps:$4 sm:$0xff]  }
 0x427   : > { %4026 = vmatpush1.bf16.msra.mxu0 %v14658_v0  ;;  %4108 = vmatpush1.bf16.msra.mxu1 %v14661_v1  ;;  %v14750_v0 = vld [vmem:[%s17705_s20 + $0x84] ss:$16 sps:$4 sm:$0xff]   ;;  %v14753_v1 = vld [vmem:[%s17705_s20 + $0x8c] ss:$16 sps:$4 sm:$0xff]  }
 0x428   : > { %4027 = vmatprep.subr.bf16.mxu0 %v14666_v2  ;;  %4109 = vmatprep.subr.bf16.mxu1 %v14669_v3  ;;  %v14748_v2 = vld [vmem:[%s17705_s20 + $0x80] ss:$16 sps:$4 sm:$0xff]   ;;  %v14751_v3 = vld [vmem:[%s17705_s20 + $0x88] ss:$16 sps:$4 sm:$0xff]  }
 0x42b   : > { %4028 = vmatpush1.bf16.msra.mxu0 %v14664_v4  ;;  %4110 = vmatpush1.bf16.msra.mxu1 %v14667_v5  ;;  %v14756_v4 = vld [vmem:[%s17705_s20 + $0xa4] ss:$16 sps:$4 sm:$0xff]   ;;  %v14759_v5 = vld [vmem:[%s17705_s20 + $0xac] ss:$16 sps:$4 sm:$0xff]  }
 0x42c   : > { %4029 = vmatprep.subr.bf16.mxu0 %v14672_v6  ;;  %4111 = vmatprep.subr.bf16.mxu1 %v14675_v7  ;;  %v14754_v6 = vld [vmem:[%s17705_s20 + $0xa0] ss:$16 sps:$4 sm:$0xff]   ;;  %v14757_v7 = vld [vmem:[%s17705_s20 + $0xa8] ss:$16 sps:$4 sm:$0xff]  }
 0x42f   : > { %4030 = vmatpush1.bf16.msra.mxu0 %v14670_v8  ;;  %4112 = vmatpush1.bf16.msra.mxu1 %v14673_v9  ;;  %v14762_v8 = vld [vmem:[%s17705_s20 + $0xc4] ss:$16 sps:$4 sm:$0xff]   ;;  %v14765_v9 = vld [vmem:[%s17705_s20 + $0xcc] ss:$16 sps:$4 sm:$0xff]  }
 0x430   : > { %4031 = vmatprep.subr.bf16.mxu0 %v14678_v10  ;;  %4113 = vmatprep.subr.bf16.mxu1 %v14681_v11  ;;  %v14760_v10 = vld [vmem:[%s17705_s20 + $0xc0] ss:$16 sps:$4 sm:$0xff]   ;;  %v14763_v11 = vld [vmem:[%s17705_s20 + $0xc8] ss:$16 sps:$4 sm:$0xff]  }
 0x433   : > { %4032 = vmatpush1.bf16.msra.mxu0 %v14676_v12  ;;  %4114 = vmatpush1.bf16.msra.mxu1 %v14679_v13  ;;  %v14768_v12 = vld [vmem:[%s17705_s20 + $0xe4] ss:$16 sps:$4 sm:$0xff]   ;;  %v14771_v13 = vld [vmem:[%s17705_s20 + $0xec] ss:$16 sps:$4 sm:$0xff]  }
 0x434   : > { %4033 = vmatprep.subr.bf16.mxu0 %v14684_v14  ;;  %4115 = vmatprep.subr.bf16.mxu1 %v14687_v15  ;;  %v14766_v14 = vld [vmem:[%s17705_s20 + $0xe0] ss:$16 sps:$4 sm:$0xff]   ;;  %v14769_v15 = vld [vmem:[%s17705_s20 + $0xe8] ss:$16 sps:$4 sm:$0xff]  }
 0x437   : > { %4034 = vmatpush1.bf16.msra.mxu0 %v14682_v16  ;;  %4116 = vmatpush1.bf16.msra.mxu1 %v14685_v17  ;;  %v14774_v16 = vld [vmem:[%s17705_s20 + $0x104] ss:$16 sps:$4 sm:$0xff]   ;;  %v14777_v17 = vld [vmem:[%s17705_s20 + $0x10c] ss:$16 sps:$4 sm:$0xff]  }
 0x438   : > { %4035 = vmatprep.subr.bf16.mxu0 %v14690_v18  ;;  %4117 = vmatprep.subr.bf16.mxu1 %v14693_v20  ;;  %v14772_v18 = vld [vmem:[%s17705_s20 + $0x100] ss:$16 sps:$4 sm:$0xff]   ;;  %v14775_v20 = vld [vmem:[%s17705_s20 + $0x108] ss:$16 sps:$4 sm:$0xff]  }
 0x43b   : > { %4036 = vmatpush1.bf16.msra.mxu0 %v14688_v25  ;;  %4118 = vmatpush1.bf16.msra.mxu1 %v14691_v26  ;;  %v14780_v25 = vld [vmem:[%s17705_s20 + $0x124] ss:$16 sps:$4 sm:$0xff]   ;;  %v14783_v26 = vld [vmem:[%s17705_s20 + $0x12c] ss:$16 sps:$4 sm:$0xff]  }
 0x43c   : > { %4037 = vmatprep.subr.bf16.mxu0 %v14696_v27  ;;  %4119 = vmatprep.subr.bf16.mxu1 %v14699_v28  ;;  %v14778_v27 = vld [vmem:[%s17705_s20 + $0x120] ss:$16 sps:$4 sm:$0xff]   ;;  %v14781_v28 = vld [vmem:[%s17705_s20 + $0x128] ss:$16 sps:$4 sm:$0xff]  }
 0x43f   : > { %4038 = vmatpush1.bf16.msra.mxu0 %v14694_v29  ;;  %4120 = vmatpush1.bf16.msra.mxu1 %v14697_v30  ;;  %v14786_v29 = vld [vmem:[%s17705_s20 + $0x144] ss:$16 sps:$4 sm:$0xff]   ;;  %v14789_v30 = vld [vmem:[%s17705_s20 + $0x14c] ss:$16 sps:$4 sm:$0xff]  }
 0x440   : > { %4039 = vmatprep.subr.bf16.mxu0 %v14702_v31  ;;  %4121 = vmatprep.subr.bf16.mxu1 %v14705_v33  ;;  %v14784_v31 = vld [vmem:[%s17705_s20 + $0x140] ss:$16 sps:$4 sm:$0xff]   ;;  %v14787_v33 = vld [vmem:[%s17705_s20 + $0x148] ss:$16 sps:$4 sm:$0xff]  }
 0x443   : > { %4040 = vmatpush1.bf16.msra.mxu0 %v14700_v34  ;;  %4122 = vmatpush1.bf16.msra.mxu1 %v14703_v35  ;;  %v14792_v34 = vld [vmem:[%s17705_s20 + $0x164] ss:$16 sps:$4 sm:$0xff]   ;;  %v14795_v35 = vld [vmem:[%s17705_s20 + $0x16c] ss:$16 sps:$4 sm:$0xff]  }
 0x444   : > { %4041 = vmatprep.subr.bf16.mxu0 %v14708_v36  ;;  %4123 = vmatprep.subr.bf16.mxu1 %v14711_v37  ;;  %v14790_v36 = vld [vmem:[%s17705_s20 + $0x160] ss:$16 sps:$4 sm:$0xff]   ;;  %v14793_v37 = vld [vmem:[%s17705_s20 + $0x168] ss:$16 sps:$4 sm:$0xff]  }
 0x447   : > { %4042 = vmatpush1.bf16.msra.mxu0 %v14706_v38  ;;  %4124 = vmatpush1.bf16.msra.mxu1 %v14709_v39  ;;  %v14798_v38 = vld [vmem:[%s17705_s20 + $0x184] ss:$16 sps:$4 sm:$0xff]   ;;  %v14801_v39 = vld [vmem:[%s17705_s20 + $0x18c] ss:$16 sps:$4 sm:$0xff]  }
 0x448   : > { %4043 = vmatprep.subr.bf16.mxu0 %v14714_v40  ;;  %4125 = vmatprep.subr.bf16.mxu1 %v14717_v41  ;;  %v14796_v40 = vld [vmem:[%s17705_s20 + $0x180] ss:$16 sps:$4 sm:$0xff]   ;;  %v14799_v41 = vld [vmem:[%s17705_s20 + $0x188] ss:$16 sps:$4 sm:$0xff]  }
 0x44b   : > { %4044 = vmatpush1.bf16.msra.mxu0 %v14712_v42  ;;  %4126 = vmatpush1.bf16.msra.mxu1 %v14715_v43  ;;  %v14804_v42 = vld [vmem:[%s17705_s20 + $0x1a4] ss:$16 sps:$4 sm:$0xff]   ;;  %v14807_v43 = vld [vmem:[%s17705_s20 + $0x1ac] ss:$16 sps:$4 sm:$0xff]  }
 0x44c   : > { %4045 = vmatprep.subr.bf16.mxu0 %v14720_v44  ;;  %4127 = vmatprep.subr.bf16.mxu1 %v14723_v45  ;;  %v14802_v44 = vld [vmem:[%s17705_s20 + $0x1a0] ss:$16 sps:$4 sm:$0xff]   ;;  %v14805_v45 = vld [vmem:[%s17705_s20 + $0x1a8] ss:$16 sps:$4 sm:$0xff]  }
 0x44f   : > { %4046 = vmatpush1.bf16.msra.mxu0 %v14718_v46  ;;  %4128 = vmatpush1.bf16.msra.mxu1 %v14721_v47  ;;  %v14810_v46 = vld [vmem:[%s17705_s20 + $0x1c4] ss:$16 sps:$4 sm:$0xff]   ;;  %v14813_v47 = vld [vmem:[%s17705_s20 + $0x1cc] ss:$16 sps:$4 sm:$0xff]  }
 0x450   : > { %4936 = vmatprep.subr.bf16.mxu0 %v14726_v48  ;;  %5018 = vmatprep.subr.bf16.mxu1 %v14729_v49  ;;  %v14808_v48 = vld [vmem:[%s17705_s20 + $0x1c0] ss:$16 sps:$4 sm:$0xff]   ;;  %v14811_v49 = vld [vmem:[%s17705_s20 + $0x1c8] ss:$16 sps:$4 sm:$0xff]  }
 0x452   : > { %4048 = vmatmul.mubr.bf16.vlgmr.msra.gmra.mrb[4].mxu0 %v3182_v54  ;;  %4130 = vmatmul.mubr.bf16.vlgmr.msra.gmra.mrb[4].mxu1 %v3182_v54  ;;  %v14822_v54 = vld [vmem:[%s17705_s20 + $0x204] ss:$16 sps:$4 sm:$0xff]  }
 0x453   : > { %4937 = vmatpush1.bf16.msra.mxu0 %v14724_v50  ;;  %5019 = vmatpush1.bf16.msra.mxu1 %v14727_v51  ;;  %v14816_v50 = vld [vmem:[%s17705_s20 + $0x1e4] ss:$16 sps:$4 sm:$0xff]   ;;  %v14819_v51 = vld [vmem:[%s17705_s20 + $0x1ec] ss:$16 sps:$4 sm:$0xff]  }
 0x454   : > { %4938 = vmatprep.subr.bf16.mxu0 %v14732_v52  ;;  %5020 = vmatprep.subr.bf16.mxu1 %v14735_v53  ;;  %v14814_v52 = vld [vmem:[%s17705_s20 + $0x1e0] ss:$16 sps:$4 sm:$0xff]   ;;  %v14817_v53 = vld [vmem:[%s17705_s20 + $0x1e8] ss:$16 sps:$4 sm:$0xff]  }
 0x457   : > { %4939 = vmatpush1.bf16.msra.mxu0 %v14730_v55  ;;  %5021 = vmatpush1.bf16.msra.mxu1 %v14733_v56  ;;  %v14825_v55 = vld [vmem:[%s17705_s20 + $0x20c] ss:$16 sps:$4 sm:$0xff]  }
 0x458   : > { %4940 = vmatprep.subr.bf16.mxu0 %v14738_v57  ;;  %5022 = vmatprep.subr.bf16.mxu1 %v14741_v58  ;;  %v18253_v56 = vld [vmem:[%s19637_s19] sm:$0xf] }
 0x459   : > { %v3317_v57 = vrot.slane %v18253_v56, %v18093_v21  ;;  %v3321_v58 = vrot.slane %v18253_v56, %v18099_v23 }
 0x45b   : > { %4941 = vmatpush1.bf16.msra.mxu0 %v14736_v59  ;;  %5023 = vmatpush1.bf16.msra.mxu1 %v14739_v32  ;;  %v3329_v59 = vrot.slane %v18253_v56, %v18102_v24 }
 0x45c   : > { %4942 = vmatprep.subr.bf16.mxu0 %v14744_v60  ;;  %5024 = vmatprep.subr.bf16.mxu1 %v14747_v61 }
 0x45f   : > { %4943 = vmatpush1.bf16.msra.mxu0 %v14742_v62  ;;  %5025 = vmatpush1.bf16.msra.mxu1 %v14745_v63 }
 0x460   : > { %4944 = vmatprep.subr.bf16.mxu0 %v14750_v0  ;;  %5026 = vmatprep.subr.bf16.mxu1 %v14753_v1 }
 0x463   : > { %4945 = vmatpush1.bf16.msra.mxu0 %v14748_v2  ;;  %5027 = vmatpush1.bf16.msra.mxu1 %v14751_v3 }
 0x464   : > { %4946 = vmatprep.subr.bf16.mxu0 %v14756_v4  ;;  %5028 = vmatprep.subr.bf16.mxu1 %v14759_v5 }
 0x467   : > { %4947 = vmatpush1.bf16.msra.mxu0 %v14754_v6  ;;  %5029 = vmatpush1.bf16.msra.mxu1 %v14757_v7 }
 0x468   : > { %4948 = vmatprep.subr.bf16.mxu0 %v14762_v8  ;;  %5030 = vmatprep.subr.bf16.mxu1 %v14765_v9 }
 0x46b   : > { %4949 = vmatpush1.bf16.msra.mxu0 %v14760_v10  ;;  %5031 = vmatpush1.bf16.msra.mxu1 %v14763_v11  ;;  %v14820_v10 = vld [vmem:[%s17705_s20 + $0x200] ss:$16 sps:$4 sm:$0xff]   ;;  %v14823_v11 = vld [vmem:[%s17705_s20 + $0x208] ss:$16 sps:$4 sm:$0xff]  }
 0x46c   : > { %4950 = vmatprep.subr.bf16.mxu0 %v14768_v12  ;;  %5032 = vmatprep.subr.bf16.mxu1 %v14771_v13  ;;  %v14828_v13 = vld [vmem:[%s17705_s20 + $0x224] ss:$16 sps:$4 sm:$0xff]  }
 0x46f   : > { %4951 = vmatpush1.bf16.msra.mxu0 %v14766_v14  ;;  %5033 = vmatpush1.bf16.msra.mxu1 %v14769_v15  ;;  %v14831_v14 = vld [vmem:[%s17705_s20 + $0x22c] ss:$16 sps:$4 sm:$0xff]  }
 0x470   : > { %4952 = vmatprep.subr.bf16.mxu0 %v14774_v16  ;;  %5034 = vmatprep.subr.bf16.mxu1 %v14777_v17  ;;  %v14826_v16 = vld [vmem:[%s17705_s20 + $0x220] ss:$16 sps:$4 sm:$0xff]   ;;  %v14829_v17 = vld [vmem:[%s17705_s20 + $0x228] ss:$16 sps:$4 sm:$0xff]  }
 0x473   : > { %4953 = vmatpush1.bf16.msra.mxu0 %v14772_v18  ;;  %5035 = vmatpush1.bf16.msra.mxu1 %v14775_v20  ;;  %v14834_v18 = vld [vmem:[%s17705_s20 + $0x244] ss:$16 sps:$4 sm:$0xff]   ;;  %v14837_v20 = vld [vmem:[%s17705_s20 + $0x24c] ss:$16 sps:$4 sm:$0xff]  }
 0x474   : > { %4954 = vmatprep.subr.bf16.mxu0 %v14780_v25  ;;  %5036 = vmatprep.subr.bf16.mxu1 %v14783_v26  ;;  %v14832_v25 = vld [vmem:[%s17705_s20 + $0x240] ss:$16 sps:$4 sm:$0xff]   ;;  %v14835_v26 = vld [vmem:[%s17705_s20 + $0x248] ss:$16 sps:$4 sm:$0xff]  }
 0x477   : > { %4955 = vmatpush1.bf16.msra.mxu0 %v14778_v27  ;;  %5037 = vmatpush1.bf16.msra.mxu1 %v14781_v28  ;;  %v14840_v27 = vld [vmem:[%s17705_s20 + $0x264] ss:$16 sps:$4 sm:$0xff]   ;;  %v14843_v28 = vld [vmem:[%s17705_s20 + $0x26c] ss:$16 sps:$4 sm:$0xff]  }
 0x478   : > { %4956 = vmatprep.subr.bf16.mxu0 %v14786_v29  ;;  %5038 = vmatprep.subr.bf16.mxu1 %v14789_v30  ;;  %v14838_v29 = vld [vmem:[%s17705_s20 + $0x260] ss:$16 sps:$4 sm:$0xff]   ;;  %v14841_v30 = vld [vmem:[%s17705_s20 + $0x268] ss:$16 sps:$4 sm:$0xff]  }
 0x47b   : > { %4957 = vmatpush1.bf16.msra.mxu0 %v14784_v31  ;;  %5039 = vmatpush1.bf16.msra.mxu1 %v14787_v33  ;;  %v14846_v31 = vld [vmem:[%s17705_s20 + $0x284] ss:$16 sps:$4 sm:$0xff]   ;;  %v14849_v33 = vld [vmem:[%s17705_s20 + $0x28c] ss:$16 sps:$4 sm:$0xff]  }
 0x47c   : > { %4958 = vmatprep.subr.bf16.mxu0 %v14792_v34  ;;  %5040 = vmatprep.subr.bf16.mxu1 %v14795_v35  ;;  %v14844_v34 = vld [vmem:[%s17705_s20 + $0x280] ss:$16 sps:$4 sm:$0xff]   ;;  %v14847_v35 = vld [vmem:[%s17705_s20 + $0x288] ss:$16 sps:$4 sm:$0xff]  }
 0x47f   : > { %4959 = vmatpush1.bf16.msra.mxu0 %v14790_v36  ;;  %5041 = vmatpush1.bf16.msra.mxu1 %v14793_v37  ;;  %v14852_v36 = vld [vmem:[%s17705_s20 + $0x2a4] ss:$16 sps:$4 sm:$0xff]   ;;  %v14855_v37 = vld [vmem:[%s17705_s20 + $0x2ac] ss:$16 sps:$4 sm:$0xff]  }
 0x480   : > { %4960 = vmatprep.subr.bf16.mxu0 %v14798_v38  ;;  %5042 = vmatprep.subr.bf16.mxu1 %v14801_v39  ;;  %v14850_v38 = vld [vmem:[%s17705_s20 + $0x2a0] ss:$16 sps:$4 sm:$0xff]   ;;  %v14853_v39 = vld [vmem:[%s17705_s20 + $0x2a8] ss:$16 sps:$4 sm:$0xff]  }
 0x483   : > { %4961 = vmatpush1.bf16.msra.mxu0 %v14796_v40  ;;  %5043 = vmatpush1.bf16.msra.mxu1 %v14799_v41  ;;  %v14858_v40 = vld [vmem:[%s17705_s20 + $0x2c4] ss:$16 sps:$4 sm:$0xff]   ;;  %v14861_v41 = vld [vmem:[%s17705_s20 + $0x2cc] ss:$16 sps:$4 sm:$0xff]  }
 0x484   : > { %4962 = vmatprep.subr.bf16.mxu0 %v14804_v42  ;;  %5044 = vmatprep.subr.bf16.mxu1 %v14807_v43  ;;  %v14856_v42 = vld [vmem:[%s17705_s20 + $0x2c0] ss:$16 sps:$4 sm:$0xff]   ;;  %v14859_v43 = vld [vmem:[%s17705_s20 + $0x2c8] ss:$16 sps:$4 sm:$0xff]  }
 0x487   : > { %4963 = vmatpush1.bf16.msra.mxu0 %v14802_v44  ;;  %5045 = vmatpush1.bf16.msra.mxu1 %v14805_v45  ;;  %v14864_v44 = vld [vmem:[%s17705_s20 + $0x2e4] ss:$16 sps:$4 sm:$0xff]   ;;  %v14867_v45 = vld [vmem:[%s17705_s20 + $0x2ec] ss:$16 sps:$4 sm:$0xff]  }
 0x488   : > { %4964 = vmatprep.subr.bf16.mxu0 %v14810_v46  ;;  %5046 = vmatprep.subr.bf16.mxu1 %v14813_v47  ;;  %v14862_v46 = vld [vmem:[%s17705_s20 + $0x2e0] ss:$16 sps:$4 sm:$0xff]   ;;  %v14865_v47 = vld [vmem:[%s17705_s20 + $0x2e8] ss:$16 sps:$4 sm:$0xff]  }
 0x48b   : > { %4965 = vmatpush1.bf16.msra.mxu0 %v14808_v48  ;;  %5047 = vmatpush1.bf16.msra.mxu1 %v14811_v49  ;;  %v14870_v48 = vld [vmem:[%s17705_s20 + $0x304] ss:$16 sps:$4 sm:$0xff]   ;;  %v14873_v49 = vld [vmem:[%s17705_s20 + $0x30c] ss:$16 sps:$4 sm:$0xff]  }
 0x48c   : > { %4966 = vmatprep.subr.bf16.mxu0 %v14816_v50  ;;  %5048 = vmatprep.subr.bf16.mxu1 %v14819_v51  ;;  %v14868_v50 = vld [vmem:[%s17705_s20 + $0x300] ss:$16 sps:$4 sm:$0xff]   ;;  %v14871_v51 = vld [vmem:[%s17705_s20 + $0x308] ss:$16 sps:$4 sm:$0xff]  }
 0x48f   : > { %4967 = vmatpush1.bf16.msra.mxu0 %v14814_v52  ;;  %5049 = vmatpush1.bf16.msra.mxu1 %v14817_v53  ;;  %v14876_v52 = vld [vmem:[%s17705_s20 + $0x324] ss:$16 sps:$4 sm:$0xff]   ;;  %v14879_v53 = vld [vmem:[%s17705_s20 + $0x32c] ss:$16 sps:$4 sm:$0xff]  }
 0x490   : > { %4977 = vmatprep.subr.bf16.mxu0 %v14822_v54  ;;  %5059 = vmatprep.subr.bf16.mxu1 %v14825_v55  ;;  %v14874_v54 = vld [vmem:[%s17705_s20 + $0x320] ss:$16 sps:$4 sm:$0xff]   ;;  %v14877_v55 = vld [vmem:[%s17705_s20 + $0x328] ss:$16 sps:$4 sm:$0xff]  }
 0x525   : > { %v4049_v32 = vpop.f32.mrb[4].mxu0  ;;  %v18261_v60 = vpop.f32.mrb[4].mxu1 }
 0x526   : > { %v13930_v61 = vadd.f32 %v4049_v32, %v3317_v57  ;;  %v4051_v62 = vpop.f32.mrb[5].mxu0  ;;  %v4133_v63 = vpop.f32.mrb[5].mxu1  ;;  %v14882_v57 = vld [vmem:[%s17705_s20 + $0x344] ss:$16 sps:$4 sm:$0xff]   ;;  %v14883_v32 = vld [vmem:[%s17705_s20 + $0x348] ss:$16 sps:$4 sm:$0xff]  }
 0x527   : > { %v13931_v0 = vadd.f32 %v4051_v62, %v3321_v58  ;;  %v13933_v1 = vadd.f32 %v4133_v63, %v3329_v59  ;;  %v4053_v2 = vpop.f32.mrb[6].mxu0  ;;  %v4135_v3 = vpop.f32.mrb[6].mxu1  ;;  %v14885_v58 = vld [vmem:[%s17705_s20 + $0x34c] ss:$16 sps:$4 sm:$0xff]   ;;  %v14880_v59 = vld [vmem:[%s17705_s20 + $0x340] ss:$16 sps:$4 sm:$0xff]  }
 0x528   : > { %v4138_v4 = vmax.f32 %v13930_v61, 0.0  ;;  %v4054_v5 = vpop.f32.mrb[7].mxu0  ;;  %v4136_v6 = vpop.f32.mrb[7].mxu1  ;;  %v14888_v61 = vld [vmem:[%s17705_s20 + $0x364] ss:$16 sps:$4 sm:$0xff]  }
 0x529   : > { %v4139_v7 = vmax.f32 %v13931_v0, 0.0  ;;  %v4141_v8 = vmax.f32 %v13933_v1, 0.0  ;;  %v14891_v62 = vld [vmem:[%s17705_s20 + $0x36c] ss:$16 sps:$4 sm:$0xff]   ;;  %v14886_v63 = vld [vmem:[%s17705_s20 + $0x360] ss:$16 sps:$4 sm:$0xff]  }
 0x52a   : > { %v4142_v12 = vpack.c.bf16 %v4138_v4, %v4138_v4  ;;  %v14889_v0 = vld [vmem:[%s17705_s20 + $0x368] ss:$16 sps:$4 sm:$0xff]   ;;  %v14894_v1 = vld [vmem:[%s17705_s20 + $0x384] ss:$16 sps:$4 sm:$0xff]   ;;  %v14897_v2 = vld [vmem:[%s17705_s20 + $0x38c] ss:$16 sps:$4 sm:$0xff]  }
 0x52b   : > { %v4143_v9 = vpack.c.bf16 %v4139_v7, %v4139_v7  ;;  %v4145_v15 = vpack.c.bf16 %v4141_v8, %v4141_v8  ;;  %v14892_v3 = vld [vmem:[%s17705_s20 + $0x380] ss:$16 sps:$4 sm:$0xff]   ;;  %v14895_v4 = vld [vmem:[%s17705_s20 + $0x388] ss:$16 sps:$4 sm:$0xff]   ;;  %v14900_v5 = vld [vmem:[%s17705_s20 + $0x3a4] ss:$16 sps:$4 sm:$0xff]  }
 0x52c   : > { %v14903_v6 = vld [vmem:[%s17705_s20 + $0x3ac] ss:$16 sps:$4 sm:$0xff]   ;;  %v14898_v7 = vld [vmem:[%s17705_s20 + $0x3a0] ss:$16 sps:$4 sm:$0xff]   ;;  %v14901_v8 = vld [vmem:[%s17705_s20 + $0x3a8] ss:$16 sps:$4 sm:$0xff]  }
 0x52d   : > { %4968 = vmatprep.mubr.bf16.mxu0 %v4143_v9  ;;  %5050 = vmatprep.mubr.bf16.mxu1 %v4143_v9  ;;  %v3325_v9 = vrot.slane %v18253_v56, %v18096_v22  ;;  %v14915_v56 = vld [vmem:[%s17705_s20 + $0x3ec] ss:$16 sps:$4 sm:$0xff]  }
 0x52e   : > { %4969 = vmatmul.mubr.bf16.vlgmr.msra.gmra.mrb[8].mxu0 %v4142_v12  ;;  %5051 = vmatmul.mubr.bf16.vlgmr.msra.gmra.mrb[8].mxu1 %v4142_v12  ;;  %v14904_v12 = vld [vmem:[%s17705_s20 + $0x3c0] ss:$16 sps:$4 sm:$0xff]  }
 0x52f   : > { %4978 = vmatpush1.bf16.msra.mxu0 %v14820_v10  ;;  %5060 = vmatpush1.bf16.msra.mxu1 %v14823_v11  ;;  %v14906_v10 = vld [vmem:[%s17705_s20 + $0x3c4] ss:$16 sps:$4 sm:$0xff]   ;;  %v14909_v11 = vld [vmem:[%s17705_s20 + $0x3cc] ss:$16 sps:$4 sm:$0xff]  }
 0x530   : > { %5009 = vmatprep.mubr.bf16.mxu0 %v4145_v15  ;;  %5091 = vmatprep.mubr.bf16.mxu1 %v4145_v15  ;;  %v14912_v15 = vld [vmem:[%s17705_s20 + $0x3e4] ss:$16 sps:$4 sm:$0xff]  }
 0x531   : > { %4979 = vmatprep.subr.bf16.mxu0 %v14828_v13  ;;  %5061 = vmatprep.subr.bf16.mxu1 %v14831_v14  ;;  %v14907_v13 = vld [vmem:[%s17705_s20 + $0x3c8] ss:$16 sps:$4 sm:$0xff]   ;;  %v13932_v14 = vadd.f32 %v18261_v60, %v3325_v9 }
 0x532   : > { %v14916_v60 = vld [vmem:[%s17714_s8] ss:$16 sps:$4 sm:$0xff]  }
 0x533   : > { %4980 = vmatpush1.bf16.msra.mxu0 %v14826_v16  ;;  %5062 = vmatpush1.bf16.msra.mxu1 %v14829_v17  ;;  %v14910_v16 = vld [vmem:[%s17705_s20 + $0x3e0] ss:$16 sps:$4 sm:$0xff]   ;;  %v14913_v17 = vld [vmem:[%s17705_s20 + $0x3e8] ss:$16 sps:$4 sm:$0xff]   ;;  %s1266_s20 = scalar_lea.vmem [#allocation32], %s18105_s4 }
 0x534   : > { %4981 = vmatprep.subr.bf16.mxu0 %v14834_v18  ;;  %5063 = vmatprep.subr.bf16.mxu1 %v14837_v20  ;;  %v4140_v18 = vmax.f32 %v13932_v14, 0.0  ;;  %v14918_v20 = vld [vmem:[%s17714_s8 + $0x4] ss:$16 sps:$4 sm:$0xff]   ;;  %v14985_v9 = vld [vmem:[%s17714_s8 + $0x360] ss:$16 sps:$4 sm:$0xff]  }
 0x535   : > { %v14996_v14 = vld [vmem:[%s17714_s8 + $0x1a4] ss:$16 sps:$4 sm:$0xff]  }
 0x537   : > { %4982 = vmatpush1.bf16.msra.mxu0 %v14832_v25  ;;  %5064 = vmatpush1.bf16.msra.mxu1 %v14835_v26  ;;  %v14921_v25 = vld [vmem:[%s17714_s8 + $0x204] ss:$16 sps:$4 sm:$0xff]   ;;  %v14919_v26 = vld [vmem:[%s17714_s8 + $0x200] ss:$16 sps:$4 sm:$0xff]  }
 0x538   : > { %4983 = vmatprep.subr.bf16.mxu0 %v14840_v27  ;;  %5065 = vmatprep.subr.bf16.mxu1 %v14843_v28  ;;  %v4144_v27 = vpack.c.bf16 %v4140_v18, %v4140_v18  ;;  %v14924_v28 = vld [vmem:[%s17714_s8 + $0x24] ss:$16 sps:$4 sm:$0xff]  }
 0x539   : > { %v15005_v18 = vld [vmem:[%s17714_s8 + $0x3c4] ss:$16 sps:$4 sm:$0xff]  }
 0x53b   : > { %4984 = vmatpush1.bf16.msra.mxu0 %v14838_v29  ;;  %5066 = vmatpush1.bf16.msra.mxu1 %v14841_v30  ;;  %v14927_v29 = vld [vmem:[%s17714_s8 + $0x224] ss:$16 sps:$4 sm:$0xff]   ;;  %v14922_v30 = vld [vmem:[%s17714_s8 + $0x20] ss:$16 sps:$4 sm:$0xff]  }
 0x53c   : > { %4985 = vmatprep.subr.bf16.mxu0 %v14846_v31  ;;  %5067 = vmatprep.subr.bf16.mxu1 %v14849_v33  ;;  %v14925_v31 = vld [vmem:[%s17714_s8 + $0x220] ss:$16 sps:$4 sm:$0xff]   ;;  %v14930_v33 = vld [vmem:[%s17714_s8 + $0x44] ss:$16 sps:$4 sm:$0xff]  }
 0x53f   : > { %4986 = vmatpush1.bf16.msra.mxu0 %v14844_v34  ;;  %5068 = vmatpush1.bf16.msra.mxu1 %v14847_v35  ;;  %v14933_v34 = vld [vmem:[%s17714_s8 + $0x244] ss:$16 sps:$4 sm:$0xff]   ;;  %v14928_v35 = vld [vmem:[%s17714_s8 + $0x40] ss:$16 sps:$4 sm:$0xff]  }
 0x540   : > { %4987 = vmatprep.subr.bf16.mxu0 %v14852_v36  ;;  %5069 = vmatprep.subr.bf16.mxu1 %v14855_v37  ;;  %v14931_v36 = vld [vmem:[%s17714_s8 + $0x240] ss:$16 sps:$4 sm:$0xff]   ;;  %v14936_v37 = vld [vmem:[%s17714_s8 + $0x64] ss:$16 sps:$4 sm:$0xff]  }
 0x543   : > { %4988 = vmatpush1.bf16.msra.mxu0 %v14850_v38  ;;  %5070 = vmatpush1.bf16.msra.mxu1 %v14853_v39  ;;  %v14939_v38 = vld [vmem:[%s17714_s8 + $0x264] ss:$16 sps:$4 sm:$0xff]   ;;  %v14934_v39 = vld [vmem:[%s17714_s8 + $0x60] ss:$16 sps:$4 sm:$0xff]  }
 0x544   : > { %4989 = vmatprep.subr.bf16.mxu0 %v14858_v40  ;;  %5071 = vmatprep.subr.bf16.mxu1 %v14861_v41  ;;  %v14937_v40 = vld [vmem:[%s17714_s8 + $0x260] ss:$16 sps:$4 sm:$0xff]   ;;  %v14942_v41 = vld [vmem:[%s17714_s8 + $0x84] ss:$16 sps:$4 sm:$0xff]  }
 0x547   : > { %4990 = vmatpush1.bf16.msra.mxu0 %v14856_v42  ;;  %5072 = vmatpush1.bf16.msra.mxu1 %v14859_v43  ;;  %v14945_v42 = vld [vmem:[%s17714_s8 + $0x284] ss:$16 sps:$4 sm:$0xff]   ;;  %v14940_v43 = vld [vmem:[%s17714_s8 + $0x80] ss:$16 sps:$4 sm:$0xff]  }
 0x548   : > { %4991 = vmatprep.subr.bf16.mxu0 %v14864_v44  ;;  %5073 = vmatprep.subr.bf16.mxu1 %v14867_v45  ;;  %v14943_v44 = vld [vmem:[%s17714_s8 + $0x280] ss:$16 sps:$4 sm:$0xff]   ;;  %v14948_v45 = vld [vmem:[%s17714_s8 + $0xa4] ss:$16 sps:$4 sm:$0xff]  }
 0x54b   : > { %4992 = vmatpush1.bf16.msra.mxu0 %v14862_v46  ;;  %5074 = vmatpush1.bf16.msra.mxu1 %v14865_v47  ;;  %v14951_v46 = vld [vmem:[%s17714_s8 + $0x2a4] ss:$16 sps:$4 sm:$0xff]   ;;  %v14946_v47 = vld [vmem:[%s17714_s8 + $0xa0] ss:$16 sps:$4 sm:$0xff]  }
 0x54c   : > { %4993 = vmatprep.subr.bf16.mxu0 %v14870_v48  ;;  %5075 = vmatprep.subr.bf16.mxu1 %v14873_v49  ;;  %v14949_v48 = vld [vmem:[%s17714_s8 + $0x2a0] ss:$16 sps:$4 sm:$0xff]   ;;  %v14954_v49 = vld [vmem:[%s17714_s8 + $0xc4] ss:$16 sps:$4 sm:$0xff]  }
 0x54f   : > { %4994 = vmatpush1.bf16.msra.mxu0 %v14868_v50  ;;  %5076 = vmatpush1.bf16.msra.mxu1 %v14871_v51  ;;  %v14957_v50 = vld [vmem:[%s17714_s8 + $0x2c4] ss:$16 sps:$4 sm:$0xff]   ;;  %v14952_v51 = vld [vmem:[%s17714_s8 + $0xc0] ss:$16 sps:$4 sm:$0xff]  }
 0x550   : > { %4995 = vmatprep.subr.bf16.mxu0 %v14876_v52  ;;  %5077 = vmatprep.subr.bf16.mxu1 %v14879_v53  ;;  %v14955_v52 = vld [vmem:[%s17714_s8 + $0x2c0] ss:$16 sps:$4 sm:$0xff]   ;;  %v14960_v53 = vld [vmem:[%s17714_s8 + $0xe4] ss:$16 sps:$4 sm:$0xff]  }
 0x553   : > { %4996 = vmatpush1.bf16.msra.mxu0 %v14874_v54  ;;  %5078 = vmatpush1.bf16.msra.mxu1 %v14877_v55  ;;  %v14963_v54 = vld [vmem:[%s17714_s8 + $0x2e4] ss:$16 sps:$4 sm:$0xff]   ;;  %v14958_v55 = vld [vmem:[%s17714_s8 + $0xe0] ss:$16 sps:$4 sm:$0xff]  }
 0x554   : > { %4997 = vmatprep.subr.bf16.mxu0 %v14882_v57  ;;  %5079 = vmatprep.subr.bf16.mxu1 %v14885_v58  ;;  %v14961_v57 = vld [vmem:[%s17714_s8 + $0x2e0] ss:$16 sps:$4 sm:$0xff]   ;;  %v14966_v58 = vld [vmem:[%s17714_s8 + $0x104] ss:$16 sps:$4 sm:$0xff]  }
 0x557   : > { %4998 = vmatpush1.bf16.msra.mxu0 %v14880_v59  ;;  %5080 = vmatpush1.bf16.msra.mxu1 %v14883_v32  ;;  %v14969_v59 = vld [vmem:[%s17714_s8 + $0x304] ss:$16 sps:$4 sm:$0xff]   ;;  %v14964_v32 = vld [vmem:[%s17714_s8 + $0x100] ss:$16 sps:$4 sm:$0xff]  }
 0x558   : > { %4999 = vmatprep.subr.bf16.mxu0 %v14888_v61  ;;  %5081 = vmatprep.subr.bf16.mxu1 %v14891_v62  ;;  %v14967_v61 = vld [vmem:[%s17714_s8 + $0x300] ss:$16 sps:$4 sm:$0xff]   ;;  %v14972_v62 = vld [vmem:[%s17714_s8 + $0x124] ss:$16 sps:$4 sm:$0xff]  }
 0x55b   : > { %5000 = vmatpush1.bf16.msra.mxu0 %v14886_v63  ;;  %5082 = vmatpush1.bf16.msra.mxu1 %v14889_v0  ;;  %v14975_v63 = vld [vmem:[%s17714_s8 + $0x324] ss:$16 sps:$4 sm:$0xff]   ;;  %v14970_v0 = vld [vmem:[%s17714_s8 + $0x120] ss:$16 sps:$4 sm:$0xff]  }
 0x55c   : > { %5001 = vmatprep.subr.bf16.mxu0 %v14894_v1  ;;  %5083 = vmatprep.subr.bf16.mxu1 %v14897_v2  ;;  %v14973_v1 = vld [vmem:[%s17714_s8 + $0x320] ss:$16 sps:$4 sm:$0xff]   ;;  %v14978_v2 = vld [vmem:[%s17714_s8 + $0x144] ss:$16 sps:$4 sm:$0xff]  }
 0x55f   : > { %5002 = vmatpush1.bf16.msra.mxu0 %v14892_v3  ;;  %5084 = vmatpush1.bf16.msra.mxu1 %v14895_v4  ;;  %v14981_v3 = vld [vmem:[%s17714_s8 + $0x344] ss:$16 sps:$4 sm:$0xff]   ;;  %v14976_v4 = vld [vmem:[%s17714_s8 + $0x140] ss:$16 sps:$4 sm:$0xff]  }
 0x560   : > { %5003 = vmatprep.subr.bf16.mxu0 %v14900_v5  ;;  %5085 = vmatprep.subr.bf16.mxu1 %v14903_v6  ;;  %v14979_v5 = vld [vmem:[%s17714_s8 + $0x340] ss:$16 sps:$4 sm:$0xff]   ;;  %v14984_v6 = vld [vmem:[%s17714_s8 + $0x164] ss:$16 sps:$4 sm:$0xff]  }
 0x563   : > { %5004 = vmatpush1.bf16.msra.mxu0 %v14898_v7  ;;  %5086 = vmatpush1.bf16.msra.mxu1 %v14901_v8  ;;  %v14987_v7 = vld [vmem:[%s17714_s8 + $0x364] ss:$16 sps:$4 sm:$0xff]   ;;  %v14982_v8 = vld [vmem:[%s17714_s8 + $0x160] ss:$16 sps:$4 sm:$0xff]  }
 0x564   : > { %5005 = vmatprep.subr.bf16.mxu0 %v14906_v10  ;;  %5087 = vmatprep.subr.bf16.mxu1 %v14909_v11  ;;  %v14990_v10 = vld [vmem:[%s17714_s8 + $0x184] ss:$16 sps:$4 sm:$0xff]  }
 0x565   : > { %v14993_v11 = vld [vmem:[%s17714_s8 + $0x384] ss:$16 sps:$4 sm:$0xff]  }
 0x567   : > { %5006 = vmatpush1.bf16.msra.mxu0 %v14904_v12  ;;  %5088 = vmatpush1.bf16.msra.mxu1 %v14907_v13  ;;  %v14988_v12 = vld [vmem:[%s17714_s8 + $0x180] ss:$16 sps:$4 sm:$0xff]  }
 0x568   : > { %5007 = vmatprep.subr.bf16.mxu0 %v14912_v15  ;;  %5089 = vmatprep.subr.bf16.mxu1 %v14915_v56  ;;  %v14991_v13 = vld [vmem:[%s17714_s8 + $0x380] ss:$16 sps:$4 sm:$0xff]   ;;  %v14999_v15 = vld [vmem:[%s17714_s8 + $0x3a4] ss:$16 sps:$4 sm:$0xff]  }
 0x569   : > { %v14994_v56 = vld [vmem:[%s17714_s8 + $0x1a0] ss:$16 sps:$4 sm:$0xff]  }
 0x56b   : > { %5008 = vmatpush1.bf16.msra.mxu0 %v14910_v16  ;;  %5090 = vmatpush1.bf16.msra.mxu1 %v14913_v17  ;;  %v14997_v16 = vld [vmem:[%s17714_s8 + $0x3a0] ss:$16 sps:$4 sm:$0xff]   ;;  %v15002_v17 = vld [vmem:[%s17714_s8 + $0x1c4] ss:$16 sps:$4 sm:$0xff]  }
 0x56c   : > { %5898 = vmatprep.subr.bf16.mxu0 %v14918_v20  ;;  %5939 = vmatprep.subr.bf16.mxu1 %v14921_v25  ;;  %v15000_v20 = vld [vmem:[%s17714_s8 + $0x1c0] ss:$16 sps:$4 sm:$0xff]  }
 0x56d   : > { %v15003_v25 = vld [vmem:[%s17714_s8 + $0x3c0] ss:$16 sps:$4 sm:$0xff]  }
 0x56e   : > { %5010 = vmatmul.mubr.bf16.vlgmr.msra.gmra.mrb[8].mxu0 %v4144_v27  ;;  %5092 = vmatmul.mubr.bf16.vlgmr.msra.gmra.mrb[8].mxu1 %v4144_v27  ;;  %v15006_v27 = vld [vmem:[%s17714_s8 + $0x1e0] ss:$16 sps:$4 sm:$0xff]  }
 0x56f   : > { %5899 = vmatpush1.bf16.msra.mxu0 %v14916_v60  ;;  %5940 = vmatpush1.bf16.msra.mxu1 %v14919_v26  ;;  %v15008_v60 = vld [vmem:[%s17714_s8 + $0x1e4] ss:$16 sps:$4 sm:$0xff]  }
 0x570   : > { %5900 = vmatprep.subr.bf16.mxu0 %v14924_v28  ;;  %5941 = vmatprep.subr.bf16.mxu1 %v14927_v29  ;;  %v15011_v26 = vld [vmem:[%s17714_s8 + $0x3e4] ss:$16 sps:$4 sm:$0xff]   ;;  %v15009_v28 = vld [vmem:[%s17714_s8 + $0x3e0] ss:$16 sps:$4 sm:$0xff]   ;;  %v15014_v29 = vld [vmem:[%s17714_s8 + $0xc] ss:$16 sps:$4 sm:$0xff]  }
 0x573   : > { %5901 = vmatpush1.bf16.msra.mxu0 %v14922_v30  ;;  %5942 = vmatpush1.bf16.msra.mxu1 %v14925_v31  ;;  %v15017_v30 = vld [vmem:[%s17714_s8 + $0x20c] ss:$16 sps:$4 sm:$0xff]  }
 0x574   : > { %5902 = vmatprep.subr.bf16.mxu0 %v14930_v33  ;;  %5943 = vmatprep.subr.bf16.mxu1 %v14933_v34  ;;  %v4274_v31 = vld [vmem:[%s19638_s25] sm:$0xf]  ;;  %s16954_s25 = smov [#allocation30]  }
 0x575   : > { %v4279_v33 = vrot.slane %v4274_v31, %v18093_v21  ;;  %v4287_v34 = vrot.slane %v4274_v31, %v18096_v22 }
 0x577   : > { %5903 = vmatpush1.bf16.msra.mxu0 %v14928_v35  ;;  %5944 = vmatpush1.bf16.msra.mxu1 %v14931_v36  ;;  %v4283_v35 = vrot.slane %v4274_v31, %v18099_v23  ;;  %v4291_v36 = vrot.slane %v4274_v31, %v18102_v24  ;;  %v15068_v31 = vld [vmem:[%s17714_s8 + $0x12c] ss:$16 sps:$4 sm:$0xff]  }
 0x578   : > { %5904 = vmatprep.subr.bf16.mxu0 %v14936_v37  ;;  %5945 = vmatprep.subr.bf16.mxu1 %v14939_v38 }
 0x57b   : > { %5905 = vmatpush1.bf16.msra.mxu0 %v14934_v39  ;;  %5946 = vmatpush1.bf16.msra.mxu1 %v14937_v40 }
 0x57c   : > { %5906 = vmatprep.subr.bf16.mxu0 %v14942_v41  ;;  %5947 = vmatprep.subr.bf16.mxu1 %v14945_v42 }
 0x57f   : > { %5907 = vmatpush1.bf16.msra.mxu0 %v14940_v43  ;;  %5948 = vmatpush1.bf16.msra.mxu1 %v14943_v44 }
 0x580   : > { %5908 = vmatprep.subr.bf16.mxu0 %v14948_v45  ;;  %5949 = vmatprep.subr.bf16.mxu1 %v14951_v46 }
 0x583   : > { %5909 = vmatpush1.bf16.msra.mxu0 %v14946_v47  ;;  %5950 = vmatpush1.bf16.msra.mxu1 %v14949_v48 }
 0x584   : > { %5910 = vmatprep.subr.bf16.mxu0 %v14954_v49  ;;  %5951 = vmatprep.subr.bf16.mxu1 %v14957_v50 }
 0x587   : > { %5911 = vmatpush1.bf16.msra.mxu0 %v14952_v51  ;;  %5952 = vmatpush1.bf16.msra.mxu1 %v14955_v52 }
 0x588   : > { %5912 = vmatprep.subr.bf16.mxu0 %v14960_v53  ;;  %5953 = vmatprep.subr.bf16.mxu1 %v14963_v54 }
 0x58b   : > { %5913 = vmatpush1.bf16.msra.mxu0 %v14958_v55  ;;  %5954 = vmatpush1.bf16.msra.mxu1 %v14961_v57  ;;  %v15012_v55 = vld [vmem:[%s17714_s8 + $0x8] ss:$16 sps:$4 sm:$0xff]  }
 0x58c   : > { %5914 = vmatprep.subr.bf16.mxu0 %v14966_v58  ;;  %5955 = vmatprep.subr.bf16.mxu1 %v14969_v59  ;;  %v15015_v57 = vld [vmem:[%s17714_s8 + $0x208] ss:$16 sps:$4 sm:$0xff]  }
 0x58f   : > { %5915 = vmatpush1.bf16.msra.mxu0 %v14964_v32  ;;  %5956 = vmatpush1.bf16.msra.mxu1 %v14967_v61  ;;  %v15020_v32 = vld [vmem:[%s17714_s8 + $0x2c] ss:$16 sps:$4 sm:$0xff]  }
 0x590   : > { %5916 = vmatprep.subr.bf16.mxu0 %v14972_v62  ;;  %5957 = vmatprep.subr.bf16.mxu1 %v14975_v63  ;;  %v15023_v61 = vld [vmem:[%s17714_s8 + $0x22c] ss:$16 sps:$4 sm:$0xff]   ;;  %v15018_v62 = vld [vmem:[%s17714_s8 + $0x28] ss:$16 sps:$4 sm:$0xff]  }
 0x591   : > { %v15021_v63 = vld [vmem:[%s17714_s8 + $0x228] ss:$16 sps:$4 sm:$0xff]  }
 0x593   : > { %5917 = vmatpush1.bf16.msra.mxu0 %v14970_v0  ;;  %5958 = vmatpush1.bf16.msra.mxu1 %v14973_v1  ;;  %v15026_v0 = vld [vmem:[%s17714_s8 + $0x4c] ss:$16 sps:$4 sm:$0xff]  }
 0x594   : > { %5918 = vmatprep.subr.bf16.mxu0 %v14978_v2  ;;  %5959 = vmatprep.subr.bf16.mxu1 %v14981_v3  ;;  %v15029_v1 = vld [vmem:[%s17714_s8 + $0x24c] ss:$16 sps:$4 sm:$0xff]   ;;  %v15024_v2 = vld [vmem:[%s17714_s8 + $0x48] ss:$16 sps:$4 sm:$0xff]  }
 0x595   : > { %v15027_v3 = vld [vmem:[%s17714_s8 + $0x248] ss:$16 sps:$4 sm:$0xff]  }
 0x597   : > { %5919 = vmatpush1.bf16.msra.mxu0 %v14976_v4  ;;  %5960 = vmatpush1.bf16.msra.mxu1 %v14979_v5  ;;  %v15032_v4 = vld [vmem:[%s17714_s8 + $0x6c] ss:$16 sps:$4 sm:$0xff]  }
 0x598   : > { %5920 = vmatprep.subr.bf16.mxu0 %v14984_v6  ;;  %5961 = vmatprep.subr.bf16.mxu1 %v14987_v7  ;;  %v15035_v5 = vld [vmem:[%s17714_s8 + $0x26c] ss:$16 sps:$4 sm:$0xff]   ;;  %v15030_v6 = vld [vmem:[%s17714_s8 + $0x68] ss:$16 sps:$4 sm:$0xff]  }
 0x599   : > { %v15033_v7 = vld [vmem:[%s17714_s8 + $0x268] ss:$16 sps:$4 sm:$0xff]  }
 0x59b   : > { %5921 = vmatpush1.bf16.msra.mxu0 %v14982_v8  ;;  %5962 = vmatpush1.bf16.msra.mxu1 %v14985_v9  ;;  %v15038_v8 = vld [vmem:[%s17714_s8 + $0x8c] ss:$16 sps:$4 sm:$0xff]  }
 0x59c   : > { %5922 = vmatprep.subr.bf16.mxu0 %v14990_v10  ;;  %5963 = vmatprep.subr.bf16.mxu1 %v14993_v11  ;;  %v15041_v9 = vld [vmem:[%s17714_s8 + $0x28c] ss:$16 sps:$4 sm:$0xff]   ;;  %v15036_v10 = vld [vmem:[%s17714_s8 + $0x88] ss:$16 sps:$4 sm:$0xff]  }
 0x59d   : > { %v15039_v11 = vld [vmem:[%s17714_s8 + $0x288] ss:$16 sps:$4 sm:$0xff]  }
 0x59f   : > { %5923 = vmatpush1.bf16.msra.mxu0 %v14988_v12  ;;  %5964 = vmatpush1.bf16.msra.mxu1 %v14991_v13  ;;  %v15044_v12 = vld [vmem:[%s17714_s8 + $0xac] ss:$16 sps:$4 sm:$0xff]  }
 0x5a0   : > { %5924 = vmatprep.subr.bf16.mxu0 %v14996_v14  ;;  %5965 = vmatprep.subr.bf16.mxu1 %v14999_v15  ;;  %v15047_v13 = vld [vmem:[%s17714_s8 + $0x2ac] ss:$16 sps:$4 sm:$0xff]   ;;  %v15042_v14 = vld [vmem:[%s17714_s8 + $0xa8] ss:$16 sps:$4 sm:$0xff]  }
 0x5a1   : > { %v15045_v15 = vld [vmem:[%s17714_s8 + $0x2a8] ss:$16 sps:$4 sm:$0xff]  }
 0x5a3   : > { %5925 = vmatpush1.bf16.msra.mxu0 %v14994_v56  ;;  %5966 = vmatpush1.bf16.msra.mxu1 %v14997_v16  ;;  %v15050_v56 = vld [vmem:[%s17714_s8 + $0xcc] ss:$16 sps:$4 sm:$0xff]  }
 0x5a4   : > { %5926 = vmatprep.subr.bf16.mxu0 %v15002_v17  ;;  %5967 = vmatprep.subr.bf16.mxu1 %v15005_v18  ;;  %v15053_v16 = vld [vmem:[%s17714_s8 + $0x2cc] ss:$16 sps:$4 sm:$0xff]   ;;  %v15048_v17 = vld [vmem:[%s17714_s8 + $0xc8] ss:$16 sps:$4 sm:$0xff]  }
 0x5a5   : > { %v15051_v18 = vld [vmem:[%s17714_s8 + $0x2c8] ss:$16 sps:$4 sm:$0xff]  }
 0x5a7   : > { %5927 = vmatpush1.bf16.msra.mxu0 %v15000_v20  ;;  %5968 = vmatpush1.bf16.msra.mxu1 %v15003_v25  ;;  %v15056_v20 = vld [vmem:[%s17714_s8 + $0xec] ss:$16 sps:$4 sm:$0xff]  }
 0x5a8   : > { %5928 = vmatprep.subr.bf16.mxu0 %v15008_v60  ;;  %5969 = vmatprep.subr.bf16.mxu1 %v15011_v26  ;;  %v15059_v25 = vld [vmem:[%s17714_s8 + $0x2ec] ss:$16 sps:$4 sm:$0xff]   ;;  %v15054_v60 = vld [vmem:[%s17714_s8 + $0xe8] ss:$16 sps:$4 sm:$0xff]  }
 0x5a9   : > { %v15057_v26 = vld [vmem:[%s17714_s8 + $0x2e8] ss:$16 sps:$4 sm:$0xff]  }
 0x5ab   : > { %5929 = vmatpush1.bf16.msra.mxu0 %v15006_v27  ;;  %5970 = vmatpush1.bf16.msra.mxu1 %v15009_v28  ;;  %v15062_v27 = vld [vmem:[%s17714_s8 + $0x10c] ss:$16 sps:$4 sm:$0xff]  }
 0x5ac   : > { %5980 = vmatprep.subr.bf16.mxu0 %v15014_v29  ;;  %6021 = vmatprep.subr.bf16.mxu1 %v15017_v30  ;;  %v15065_v28 = vld [vmem:[%s17714_s8 + $0x30c] ss:$16 sps:$4 sm:$0xff]   ;;  %v15060_v29 = vld [vmem:[%s17714_s8 + $0x108] ss:$16 sps:$4 sm:$0xff]  }
 0x5ad   : > { %v15063_v30 = vld [vmem:[%s17714_s8 + $0x308] ss:$16 sps:$4 sm:$0xff]  }
 0x641   : > { %v5011_v37 = vpop.f32.mrb[8].mxu0  ;;  %v5093_v38 = vpop.f32.mrb[8].mxu1 }
 0x642   : > { %v13934_v39 = vadd.f32 %v5011_v37, %v4279_v33  ;;  %v13936_v40 = vadd.f32 %v5093_v38, %v4287_v34  ;;  %v5013_v41 = vpop.f32.mrb[9].mxu0  ;;  %v5095_v42 = vpop.f32.mrb[9].mxu1  ;;  %v15071_v33 = vld [vmem:[%s17714_s8 + $0x32c] ss:$16 sps:$4 sm:$0xff]   ;;  %v15066_v34 = vld [vmem:[%s17714_s8 + $0x128] ss:$16 sps:$4 sm:$0xff]  }
 0x643   : > { %v13935_v43 = vadd.f32 %v5013_v41, %v4283_v35  ;;  %v13937_v44 = vadd.f32 %v5095_v42, %v4291_v36  ;;  %v5015_v45 = vpop.f32.mrb[10].mxu0  ;;  %v5097_v46 = vpop.f32.mrb[10].mxu1  ;;  %v15069_v35 = vld [vmem:[%s17714_s8 + $0x328] ss:$16 sps:$4 sm:$0xff]   ;;  %v15074_v36 = vld [vmem:[%s17714_s8 + $0x14c] ss:$16 sps:$4 sm:$0xff]  }
 0x644   : > { %v5100_v47 = vmax.f32 %v13934_v39, 0.0  ;;  %v5102_v48 = vmax.f32 %v13936_v40, 0.0  ;;  %v5016_v49 = vpop.f32.mrb[11].mxu0  ;;  %v5098_v50 = vpop.f32.mrb[11].mxu1  ;;  %v15077_v37 = vld [vmem:[%s17714_s8 + $0x34c] ss:$16 sps:$4 sm:$0xff]  }
 0x645   : > { %v5101_v51 = vmax.f32 %v13935_v43, 0.0  ;;  %v5103_v52 = vmax.f32 %v13937_v44, 0.0  ;;  %v15072_v38 = vld [vmem:[%s17714_s8 + $0x148] ss:$16 sps:$4 sm:$0xff]   ;;  %v15080_v40 = vld [vmem:[%s17714_s8 + $0x16c] ss:$16 sps:$4 sm:$0xff]  }
 0x646   : > { %v18402_v58 = vpack.c.bf16 %v5100_v47, %v5100_v47  ;;  %v18404_v59 = vpack.c.bf16 %v5102_v48, %v5102_v48  ;;  %v15075_v39 = vld [vmem:[%s17714_s8 + $0x348] ss:$16 sps:$4 sm:$0xff]   ;;  %v15083_v41 = vld [vmem:[%s17714_s8 + $0x36c] ss:$16 sps:$4 sm:$0xff]  }
 0x647   : > { %v5105_v53 = vpack.c.bf16 %v5101_v51, %v5101_v51  ;;  %v5107_v54 = vpack.c.bf16 %v5103_v52, %v5103_v52  ;;  %v15078_v42 = vld [vmem:[%s17714_s8 + $0x168] ss:$16 sps:$4 sm:$0xff]   ;;  %v15086_v44 = vld [vmem:[%s17714_s8 + $0x18c] ss:$16 sps:$4 sm:$0xff]  }
 0x648   : > { %v15081_v43 = vld [vmem:[%s17714_s8 + $0x368] ss:$16 sps:$4 sm:$0xff]   ;;  %v15089_v45 = vld [vmem:[%s17714_s8 + $0x38c] ss:$16 sps:$4 sm:$0xff]  }
 0x649   : > { %5930 = vmatprep.mubr.bf16.mxu0 %v5105_v53  ;;  %5971 = vmatprep.mubr.bf16.mxu1 %v5107_v54  ;;  %v15084_v46 = vld [vmem:[%s17714_s8 + $0x188] ss:$16 sps:$4 sm:$0xff]   ;;  %v15092_v48 = vld [vmem:[%s17714_s8 + $0x1ac] ss:$16 sps:$4 sm:$0xff]  }
 0x64a   : > { %5931 = vmatmul.mubr.bf16.vlgmr.msra.gmra.mrb[12].mxu0 %v18402_v58  ;;  %5972 = vmatmul.mubr.bf16.vlgmr.msra.gmra.mrb[12].mxu1 %v18404_v59  ;;  %v15087_v47 = vld [vmem:[%s17714_s8 + $0x388] ss:$16 sps:$4 sm:$0xff]   ;;  %v15095_v49 = vld [vmem:[%s17714_s8 + $0x3ac] ss:$16 sps:$4 sm:$0xff]  }
 0x64b   : > { %5981 = vmatpush1.bf16.msra.mxu0 %v15012_v55  ;;  %6022 = vmatpush1.bf16.msra.mxu1 %v15015_v57  ;;  %v15090_v50 = vld [vmem:[%s17714_s8 + $0x1a8] ss:$16 sps:$4 sm:$0xff]   ;;  %v15098_v52 = vld [vmem:[%s17714_s8 + $0x1cc] ss:$16 sps:$4 sm:$0xff]  }
 0x64c   : > { %6012 = vmatprep.mubr.bf16.mxu0 %v5105_v53  ;;  %6053 = vmatprep.mubr.bf16.mxu1 %v5107_v54  ;;  %v15093_v51 = vld [vmem:[%s17714_s8 + $0x3a8] ss:$16 sps:$4 sm:$0xff]   ;;  %v15101_v53 = vld [vmem:[%s17714_s8 + $0x3cc] ss:$16 sps:$4 sm:$0xff]  }
 0x64d   : > { %5982 = vmatprep.subr.bf16.mxu0 %v15020_v32  ;;  %6023 = vmatprep.subr.bf16.mxu1 %v15023_v61  ;;  %v15096_v54 = vld [vmem:[%s17714_s8 + $0x1c8] ss:$16 sps:$4 sm:$0xff]   ;;  %v15104_v57 = vld [vmem:[%s17714_s8 + $0x1ec] ss:$16 sps:$4 sm:$0xff]  }
 0x64e   : > { %v15099_v55 = vld [vmem:[%s17714_s8 + $0x3c8] ss:$16 sps:$4 sm:$0xff]   ;;  %v15107_v32 = vld [vmem:[%s17714_s8 + $0x3ec] ss:$16 sps:$4 sm:$0xff]  }
 0x64f   : > { %5983 = vmatpush1.bf16.msra.mxu0 %v15018_v62  ;;  %6024 = vmatpush1.bf16.msra.mxu1 %v15021_v63  ;;  %v15102_v61 = vld [vmem:[%s17714_s8 + $0x1e8] ss:$16 sps:$4 sm:$0xff]   ;;  %v15110_v63 = vld [vmem:[%s17723_s21 + $0x4] ss:$48 sps:$4 sm:$0xff]  }
 0x650   : > { %5984 = vmatprep.subr.bf16.mxu0 %v15026_v0  ;;  %6025 = vmatprep.subr.bf16.mxu1 %v15029_v1  ;;  %v15105_v62 = vld [vmem:[%s17714_s8 + $0x3e8] ss:$16 sps:$4 sm:$0xff]   ;;  %v15113_v0 = vld [vmem:[%s17723_s21 + $0xc] ss:$48 sps:$4 sm:$0xff]   ;;  %s11894_s8 = sshll.u32 %s1266_s20, 4  ;;  %s19372_s8 = int_to_ptr.vmem [resolvable:$true] %s11894_s8 }
 0x651   : > { %v15108_v1 = vld [vmem:[%s17723_s21] ss:$48 sps:$4 sm:$0xff]  }
 0x653   : > { %5985 = vmatpush1.bf16.msra.mxu0 %v15024_v2  ;;  %6026 = vmatpush1.bf16.msra.mxu1 %v15027_v3  ;;  %v15111_v2 = vld [vmem:[%s17723_s21 + $0x8] ss:$48 sps:$4 sm:$0xff]   ;;  %v15116_v3 = vld [vmem:[%s17723_s21 + $0x64] ss:$48 sps:$4 sm:$0xff]  }
 0x654   : > { %5986 = vmatprep.subr.bf16.mxu0 %v15032_v4  ;;  %6027 = vmatprep.subr.bf16.mxu1 %v15035_v5  ;;  %v15119_v4 = vld [vmem:[%s17723_s21 + $0x6c] ss:$48 sps:$4 sm:$0xff]   ;;  %v15114_v5 = vld [vmem:[%s17723_s21 + $0x60] ss:$48 sps:$4 sm:$0xff]  }
 0x657   : > { %5987 = vmatpush1.bf16.msra.mxu0 %v15030_v6  ;;  %6028 = vmatpush1.bf16.msra.mxu1 %v15033_v7  ;;  %v15117_v6 = vld [vmem:[%s17723_s21 + $0x68] ss:$48 sps:$4 sm:$0xff]   ;;  %v15122_v7 = vld [vmem:[%s17723_s21 + $0xc4] ss:$48 sps:$4 sm:$0xff]  }
 0x658   : > { %5988 = vmatprep.subr.bf16.mxu0 %v15038_v8  ;;  %6029 = vmatprep.subr.bf16.mxu1 %v15041_v9  ;;  %v15125_v8 = vld [vmem:[%s17723_s21 + $0xcc] ss:$48 sps:$4 sm:$0xff]   ;;  %v15120_v9 = vld [vmem:[%s17723_s21 + $0xc0] ss:$48 sps:$4 sm:$0xff]  }
 0x65b   : > { %5989 = vmatpush1.bf16.msra.mxu0 %v15036_v10  ;;  %6030 = vmatpush1.bf16.msra.mxu1 %v15039_v11  ;;  %v15131_v10 = vld [vmem:[%s17723_s21 + $0x12c] ss:$48 sps:$4 sm:$0xff]   ;;  %v15126_v11 = vld [vmem:[%s17723_s21 + $0x120] ss:$48 sps:$4 sm:$0xff]  }
 0x65c   : > { %5990 = vmatprep.subr.bf16.mxu0 %v15044_v12  ;;  %6031 = vmatprep.subr.bf16.mxu1 %v15047_v13  ;;  %v15129_v12 = vld [vmem:[%s17723_s21 + $0x128] ss:$48 sps:$4 sm:$0xff]   ;;  %v15134_v13 = vld [vmem:[%s17723_s21 + $0x184] ss:$48 sps:$4 sm:$0xff]  }
 0x65f   : > { %5991 = vmatpush1.bf16.msra.mxu0 %v15042_v14  ;;  %6032 = vmatpush1.bf16.msra.mxu1 %v15045_v15  ;;  %v15137_v14 = vld [vmem:[%s17723_s21 + $0x18c] ss:$48 sps:$4 sm:$0xff]   ;;  %v15132_v15 = vld [vmem:[%s17723_s21 + $0x180] ss:$48 sps:$4 sm:$0xff]  }
 0x660   : > { %5992 = vmatprep.subr.bf16.mxu0 %v15050_v56  ;;  %6033 = vmatprep.subr.bf16.mxu1 %v15053_v16  ;;  %v15135_v56 = vld [vmem:[%s17723_s21 + $0x188] ss:$48 sps:$4 sm:$0xff]   ;;  %v15140_v16 = vld [vmem:[%s17723_s21 + $0x1e4] ss:$48 sps:$4 sm:$0xff]  }
 0x663   : > { %5993 = vmatpush1.bf16.msra.mxu0 %v15048_v17  ;;  %6034 = vmatpush1.bf16.msra.mxu1 %v15051_v18  ;;  %v15143_v17 = vld [vmem:[%s17723_s21 + $0x1ec] ss:$48 sps:$4 sm:$0xff]   ;;  %v15138_v18 = vld [vmem:[%s17723_s21 + $0x1e0] ss:$48 sps:$4 sm:$0xff]  }
 0x664   : > { %5994 = vmatprep.subr.bf16.mxu0 %v15056_v20  ;;  %6035 = vmatprep.subr.bf16.mxu1 %v15059_v25  ;;  %v15141_v20 = vld [vmem:[%s17723_s21 + $0x1e8] ss:$48 sps:$4 sm:$0xff]   ;;  %v15146_v25 = vld [vmem:[%s17723_s21 + $0x244] ss:$48 sps:$4 sm:$0xff]  }
 0x667   : > { %5995 = vmatpush1.bf16.msra.mxu0 %v15054_v60  ;;  %6036 = vmatpush1.bf16.msra.mxu1 %v15057_v26  ;;  %v15149_v60 = vld [vmem:[%s17723_s21 + $0x24c] ss:$48 sps:$4 sm:$0xff]   ;;  %v15144_v26 = vld [vmem:[%s17723_s21 + $0x240] ss:$48 sps:$4 sm:$0xff]  }
 0x668   : > { %5996 = vmatprep.subr.bf16.mxu0 %v15062_v27  ;;  %6037 = vmatprep.subr.bf16.mxu1 %v15065_v28  ;;  %v15147_v27 = vld [vmem:[%s17723_s21 + $0x248] ss:$48 sps:$4 sm:$0xff]   ;;  %v15152_v28 = vld [vmem:[%s17723_s21 + $0x2a4] ss:$48 sps:$4 sm:$0xff]  }
 0x66b   : > { %5997 = vmatpush1.bf16.msra.mxu0 %v15060_v29  ;;  %6038 = vmatpush1.bf16.msra.mxu1 %v15063_v30  ;;  %v15155_v29 = vld [vmem:[%s17723_s21 + $0x2ac] ss:$48 sps:$4 sm:$0xff]   ;;  %v15150_v30 = vld [vmem:[%s17723_s21 + $0x2a0] ss:$48 sps:$4 sm:$0xff]  }
 0x66c   : > { %5998 = vmatprep.subr.bf16.mxu0 %v15068_v31  ;;  %6039 = vmatprep.subr.bf16.mxu1 %v15071_v33  ;;  %v15153_v31 = vld [vmem:[%s17723_s21 + $0x2a8] ss:$48 sps:$4 sm:$0xff]   ;;  %v15158_v33 = vld [vmem:[%s17723_s21 + $0x304] ss:$48 sps:$4 sm:$0xff]  }
 0x66f   : > { %5999 = vmatpush1.bf16.msra.mxu0 %v15066_v34  ;;  %6040 = vmatpush1.bf16.msra.mxu1 %v15069_v35  ;;  %v15161_v34 = vld [vmem:[%s17723_s21 + $0x30c] ss:$48 sps:$4 sm:$0xff]   ;;  %v15156_v35 = vld [vmem:[%s17723_s21 + $0x300] ss:$48 sps:$4 sm:$0xff]  }
 0x670   : > { %6000 = vmatprep.subr.bf16.mxu0 %v15074_v36  ;;  %6041 = vmatprep.subr.bf16.mxu1 %v15077_v37  ;;  %v15159_v36 = vld [vmem:[%s17723_s21 + $0x308] ss:$48 sps:$4 sm:$0xff]   ;;  %v15164_v37 = vld [vmem:[%s17723_s21 + $0x364] ss:$48 sps:$4 sm:$0xff]  }
 0x673   : > { %6001 = vmatpush1.bf16.msra.mxu0 %v15072_v38  ;;  %6042 = vmatpush1.bf16.msra.mxu1 %v15075_v39  ;;  %v15167_v38 = vld [vmem:[%s17723_s21 + $0x36c] ss:$48 sps:$4 sm:$0xff]   ;;  %v15162_v39 = vld [vmem:[%s17723_s21 + $0x360] ss:$48 sps:$4 sm:$0xff]  }
 0x674   : > { %6002 = vmatprep.subr.bf16.mxu0 %v15080_v40  ;;  %6043 = vmatprep.subr.bf16.mxu1 %v15083_v41  ;;  %v15165_v40 = vld [vmem:[%s17723_s21 + $0x368] ss:$48 sps:$4 sm:$0xff]   ;;  %v15170_v41 = vld [vmem:[%s17723_s21 + $0x3c4] ss:$48 sps:$4 sm:$0xff]  }
 0x677   : > { %6003 = vmatpush1.bf16.msra.mxu0 %v15078_v42  ;;  %6044 = vmatpush1.bf16.msra.mxu1 %v15081_v43  ;;  %v15173_v42 = vld [vmem:[%s17723_s21 + $0x3cc] ss:$48 sps:$4 sm:$0xff]   ;;  %v15168_v43 = vld [vmem:[%s17723_s21 + $0x3c0] ss:$48 sps:$4 sm:$0xff]  }
 0x678   : > { %6004 = vmatprep.subr.bf16.mxu0 %v15086_v44  ;;  %6045 = vmatprep.subr.bf16.mxu1 %v15089_v45  ;;  %v15171_v44 = vld [vmem:[%s17723_s21 + $0x3c8] ss:$48 sps:$4 sm:$0xff]   ;;  %v15176_v45 = vld [vmem:[%s17723_s21 + $0x424] ss:$48 sps:$4 sm:$0xff]  }
 0x67b   : > { %6005 = vmatpush1.bf16.msra.mxu0 %v15084_v46  ;;  %6046 = vmatpush1.bf16.msra.mxu1 %v15087_v47  ;;  %v15179_v46 = vld [vmem:[%s17723_s21 + $0x42c] ss:$48 sps:$4 sm:$0xff]   ;;  %v15174_v47 = vld [vmem:[%s17723_s21 + $0x420] ss:$48 sps:$4 sm:$0xff]  }
 0x67c   : > { %6006 = vmatprep.subr.bf16.mxu0 %v15092_v48  ;;  %6047 = vmatprep.subr.bf16.mxu1 %v15095_v49  ;;  %v15177_v48 = vld [vmem:[%s17723_s21 + $0x428] ss:$48 sps:$4 sm:$0xff]   ;;  %v15182_v49 = vld [vmem:[%s17723_s21 + $0x484] ss:$48 sps:$4 sm:$0xff]  }
 0x67f   : > { %6007 = vmatpush1.bf16.msra.mxu0 %v15090_v50  ;;  %6048 = vmatpush1.bf16.msra.mxu1 %v15093_v51  ;;  %v15185_v50 = vld [vmem:[%s17723_s21 + $0x48c] ss:$48 sps:$4 sm:$0xff]   ;;  %v15180_v51 = vld [vmem:[%s17723_s21 + $0x480] ss:$48 sps:$4 sm:$0xff]  }
 0x680   : > { %6008 = vmatprep.subr.bf16.mxu0 %v15098_v52  ;;  %6049 = vmatprep.subr.bf16.mxu1 %v15101_v53  ;;  %v15183_v52 = vld [vmem:[%s17723_s21 + $0x488] ss:$48 sps:$4 sm:$0xff]   ;;  %v15188_v53 = vld [vmem:[%s17723_s21 + $0x4e4] ss:$48 sps:$4 sm:$0xff]  }
 0x683   : > { %6009 = vmatpush1.bf16.msra.mxu0 %v15096_v54  ;;  %6050 = vmatpush1.bf16.msra.mxu1 %v15099_v55  ;;  %v15191_v54 = vld [vmem:[%s17723_s21 + $0x4ec] ss:$48 sps:$4 sm:$0xff]   ;;  %v15186_v55 = vld [vmem:[%s17723_s21 + $0x4e0] ss:$48 sps:$4 sm:$0xff]  }
 0x684   : > { %6010 = vmatprep.subr.bf16.mxu0 %v15104_v57  ;;  %6051 = vmatprep.subr.bf16.mxu1 %v15107_v32  ;;  %v15189_v57 = vld [vmem:[%s17723_s21 + $0x4e8] ss:$48 sps:$4 sm:$0xff]   ;;  %v15194_v32 = vld [vmem:[%s17723_s21 + $0x544] ss:$48 sps:$4 sm:$0xff]  }
 0x687   : > { %6011 = vmatpush1.bf16.msra.mxu0 %v15102_v61  ;;  %6052 = vmatpush1.bf16.msra.mxu1 %v15105_v62  ;;  %v15197_v61 = vld [vmem:[%s17723_s21 + $0x54c] ss:$48 sps:$4 sm:$0xff]   ;;  %v15192_v62 = vld [vmem:[%s17723_s21 + $0x540] ss:$48 sps:$4 sm:$0xff]  }
 0x688   : > { %8438 = vmatprep.subr.bf16.mxu0 %v15110_v63  ;;  %8520 = vmatprep.subr.bf16.mxu1 %v15113_v0  ;;  %v15195_v63 = vld [vmem:[%s17723_s21 + $0x548] ss:$48 sps:$4 sm:$0xff]   ;;  %v15200_v0 = vld [vmem:[%s17723_s21 + $0x5a4] ss:$48 sps:$4 sm:$0xff]  }
 0x68a   : > { %6013 = vmatmul.mubr.bf16.vlgmr.msra.gmra.mrb[16].mxu0 %v18402_v58  ;;  %6054 = vmatmul.mubr.bf16.vlgmr.msra.gmra.mrb[16].mxu1 %v18404_v59  ;;  %v15123_v58 = vld [vmem:[%s17723_s21 + $0xc8] ss:$48 sps:$4 sm:$0xff]   ;;  %v15128_v59 = vld [vmem:[%s17723_s21 + $0x124] ss:$48 sps:$4 sm:$0xff]  }
 0x68b   : > { %8439 = vmatpush1.bf16.msra.mxu0 %v15108_v1  ;;  %8521 = vmatpush1.bf16.msra.mxu1 %v15111_v2  ;;  %v15203_v1 = vld [vmem:[%s17723_s21 + $0x5ac] ss:$48 sps:$4 sm:$0xff]   ;;  %v15198_v2 = vld [vmem:[%s17723_s21 + $0x5a0] ss:$48 sps:$4 sm:$0xff]  }
 0x68c   : > { %8440 = vmatprep.subr.bf16.mxu0 %v15116_v3  ;;  %8522 = vmatprep.subr.bf16.mxu1 %v15119_v4  ;;  %v15201_v3 = vld [vmem:[%s17723_s21 + $0x5a8] ss:$48 sps:$4 sm:$0xff]   ;;  %v15206_v4 = vld [vmem:[%s17723_s21 + $0x604] ss:$48 sps:$4 sm:$0xff]  }
 0x68f   : > { %8441 = vmatpush1.bf16.msra.mxu0 %v15114_v5  ;;  %8523 = vmatpush1.bf16.msra.mxu1 %v15117_v6  ;;  %v15209_v5 = vld [vmem:[%s17723_s21 + $0x60c] ss:$48 sps:$4 sm:$0xff]  }
 0x690   : > { %8442 = vmatprep.subr.bf16.mxu0 %v15122_v7  ;;  %8524 = vmatprep.subr.bf16.mxu1 %v15125_v8  ;;  %v18538_v6 = vld [vmem:[%s19639_s1] sm:$0xf]  ;;  %s16745_s1 = sshll.u32 %s16954_s25, 4  ;;  %s16746_s1 = int_to_ptr.vmem [resolvable:$false] %s16745_s1 }
 0x691   : > { %v5241_v7 = vrot.slane %v18538_v6, %v18093_v21  ;;  %v5245_v8 = vrot.slane %v18538_v6, %v18099_v23 }
 0x693   : > { %8443 = vmatpush1.bf16.msra.mxu0 %v15120_v9  ;;  %8525 = vmatpush1.bf16.msra.mxu1 %v15123_v58 }
 0x694   : > { %8444 = vmatprep.subr.bf16.mxu0 %v15128_v59  ;;  %8526 = vmatprep.subr.bf16.mxu1 %v15131_v10 }
 0x697   : > { %8445 = vmatpush1.bf16.msra.mxu0 %v15126_v11  ;;  %8527 = vmatpush1.bf16.msra.mxu1 %v15129_v12 }
 0x698   : > { %8446 = vmatprep.subr.bf16.mxu0 %v15134_v13  ;;  %8528 = vmatprep.subr.bf16.mxu1 %v15137_v14 }
 0x69b   : > { %8447 = vmatpush1.bf16.msra.mxu0 %v15132_v15  ;;  %8529 = vmatpush1.bf16.msra.mxu1 %v15135_v56 }
 0x69c   : > { %8448 = vmatprep.subr.bf16.mxu0 %v15140_v16  ;;  %8530 = vmatprep.subr.bf16.mxu1 %v15143_v17 }
 0x69f   : > { %8449 = vmatpush1.bf16.msra.mxu0 %v15138_v18  ;;  %8531 = vmatpush1.bf16.msra.mxu1 %v15141_v20  ;;  %v16260_v18 = vld [vmem:[%s18116_s27] sm:$0xff] }
 0x6a0   : > { %8450 = vmatprep.subr.bf16.mxu0 %v15146_v25  ;;  %8532 = vmatprep.subr.bf16.mxu1 %v15149_v60  ;;  %v16261_v25 = vld [vmem:[%s18116_s27 + $0x8] sm:$0xff] }
 0x6a3   : > { %8451 = vmatpush1.bf16.msra.mxu0 %v15144_v26  ;;  %8533 = vmatpush1.bf16.msra.mxu1 %v15147_v27  ;;  %v15204_v27 = vld [vmem:[%s17723_s21 + $0x600] ss:$48 sps:$4 sm:$0xff]  }
 0x6a4   : > { %8452 = vmatprep.subr.bf16.mxu0 %v15152_v28  ;;  %8534 = vmatprep.subr.bf16.mxu1 %v15155_v29  ;;  %v15207_v28 = vld [vmem:[%s17723_s21 + $0x608] ss:$48 sps:$4 sm:$0xff]  }
 0x6a7   : > { %8453 = vmatpush1.bf16.msra.mxu0 %v15150_v30  ;;  %8535 = vmatpush1.bf16.msra.mxu1 %v15153_v31  ;;  %v15212_v30 = vld [vmem:[%s17723_s21 + $0x664] ss:$48 sps:$4 sm:$0xff]   ;;  %v15215_v31 = vld [vmem:[%s17723_s21 + $0x66c] ss:$48 sps:$4 sm:$0xff]  }
 0x6a8   : > { %8454 = vmatprep.subr.bf16.mxu0 %v15158_v33  ;;  %8536 = vmatprep.subr.bf16.mxu1 %v15161_v34  ;;  %v15210_v33 = vld [vmem:[%s17723_s21 + $0x660] ss:$48 sps:$4 sm:$0xff]   ;;  %v15213_v34 = vld [vmem:[%s17723_s21 + $0x668] ss:$48 sps:$4 sm:$0xff]  }
 0x6ab   : > { %8455 = vmatpush1.bf16.msra.mxu0 %v15156_v35  ;;  %8537 = vmatpush1.bf16.msra.mxu1 %v15159_v36  ;;  %v15218_v35 = vld [vmem:[%s17723_s21 + $0x6c4] ss:$48 sps:$4 sm:$0xff]   ;;  %v15221_v36 = vld [vmem:[%s17723_s21 + $0x6cc] ss:$48 sps:$4 sm:$0xff]  }
 0x6ac   : > { %8456 = vmatprep.subr.bf16.mxu0 %v15164_v37  ;;  %8538 = vmatprep.subr.bf16.mxu1 %v15167_v38  ;;  %v15216_v37 = vld [vmem:[%s17723_s21 + $0x6c0] ss:$48 sps:$4 sm:$0xff]   ;;  %v15219_v38 = vld [vmem:[%s17723_s21 + $0x6c8] ss:$48 sps:$4 sm:$0xff]  }
 0x6af   : > { %8457 = vmatpush1.bf16.msra.mxu0 %v15162_v39  ;;  %8539 = vmatpush1.bf16.msra.mxu1 %v15165_v40  ;;  %v15224_v39 = vld [vmem:[%s17723_s21 + $0x724] ss:$48 sps:$4 sm:$0xff]   ;;  %v15227_v40 = vld [vmem:[%s17723_s21 + $0x72c] ss:$48 sps:$4 sm:$0xff]  }
 0x6b0   : > { %8458 = vmatprep.subr.bf16.mxu0 %v15170_v41  ;;  %8540 = vmatprep.subr.bf16.mxu1 %v15173_v42  ;;  %v15222_v41 = vld [vmem:[%s17723_s21 + $0x720] ss:$48 sps:$4 sm:$0xff]   ;;  %v15225_v42 = vld [vmem:[%s17723_s21 + $0x728] ss:$48 sps:$4 sm:$0xff]  }
 0x6b3   : > { %8459 = vmatpush1.bf16.msra.mxu0 %v15168_v43  ;;  %8541 = vmatpush1.bf16.msra.mxu1 %v15171_v44  ;;  %v15230_v43 = vld [vmem:[%s17723_s21 + $0x784] ss:$48 sps:$4 sm:$0xff]   ;;  %v15233_v44 = vld [vmem:[%s17723_s21 + $0x78c] ss:$48 sps:$4 sm:$0xff]  }
 0x6b4   : > { %8460 = vmatprep.subr.bf16.mxu0 %v15176_v45  ;;  %8542 = vmatprep.subr.bf16.mxu1 %v15179_v46  ;;  %v15228_v45 = vld [vmem:[%s17723_s21 + $0x780] ss:$48 sps:$4 sm:$0xff]   ;;  %v15231_v46 = vld [vmem:[%s17723_s21 + $0x788] ss:$48 sps:$4 sm:$0xff]  }
 0x6b7   : > { %8461 = vmatpush1.bf16.msra.mxu0 %v15174_v47  ;;  %8543 = vmatpush1.bf16.msra.mxu1 %v15177_v48  ;;  %v15236_v47 = vld [vmem:[%s17723_s21 + $0x7e4] ss:$48 sps:$4 sm:$0xff]   ;;  %v15239_v48 = vld [vmem:[%s17723_s21 + $0x7ec] ss:$48 sps:$4 sm:$0xff]  }
 0x6b8   : > { %8462 = vmatprep.subr.bf16.mxu0 %v15182_v49  ;;  %8544 = vmatprep.subr.bf16.mxu1 %v15185_v50  ;;  %v15234_v49 = vld [vmem:[%s17723_s21 + $0x7e0] ss:$48 sps:$4 sm:$0xff]   ;;  %v15237_v50 = vld [vmem:[%s17723_s21 + $0x7e8] ss:$48 sps:$4 sm:$0xff]  }
 0x6bb   : > { %8463 = vmatpush1.bf16.msra.mxu0 %v15180_v51  ;;  %8545 = vmatpush1.bf16.msra.mxu1 %v15183_v52  ;;  %v15242_v51 = vld [vmem:[%s17723_s21 + $0x844] ss:$48 sps:$4 sm:$0xff]   ;;  %v15245_v52 = vld [vmem:[%s17723_s21 + $0x84c] ss:$48 sps:$4 sm:$0xff]  }
 0x6bc   : > { %8464 = vmatprep.subr.bf16.mxu0 %v15188_v53  ;;  %8546 = vmatprep.subr.bf16.mxu1 %v15191_v54  ;;  %v15240_v53 = vld [vmem:[%s17723_s21 + $0x840] ss:$48 sps:$4 sm:$0xff]   ;;  %v15243_v54 = vld [vmem:[%s17723_s21 + $0x848] ss:$48 sps:$4 sm:$0xff]  }
 0x6bf   : > { %8465 = vmatpush1.bf16.msra.mxu0 %v15186_v55  ;;  %8547 = vmatpush1.bf16.msra.mxu1 %v15189_v57  ;;  %v15248_v55 = vld [vmem:[%s17723_s21 + $0x8a4] ss:$48 sps:$4 sm:$0xff]   ;;  %v15251_v57 = vld [vmem:[%s17723_s21 + $0x8ac] ss:$48 sps:$4 sm:$0xff]  }
 0x6c0   : > { %8466 = vmatprep.subr.bf16.mxu0 %v15194_v32  ;;  %8548 = vmatprep.subr.bf16.mxu1 %v15197_v61  ;;  %v15246_v32 = vld [vmem:[%s17723_s21 + $0x8a0] ss:$48 sps:$4 sm:$0xff]   ;;  %v15249_v61 = vld [vmem:[%s17723_s21 + $0x8a8] ss:$48 sps:$4 sm:$0xff]  }
 0x6c3   : > { %8467 = vmatpush1.bf16.msra.mxu0 %v15192_v62  ;;  %8549 = vmatpush1.bf16.msra.mxu1 %v15195_v63  ;;  %v15254_v62 = vld [vmem:[%s17723_s21 + $0x904] ss:$48 sps:$4 sm:$0xff]   ;;  %v15257_v63 = vld [vmem:[%s17723_s21 + $0x90c] ss:$48 sps:$4 sm:$0xff]  }
 0x6c4   : > { %8468 = vmatprep.subr.bf16.mxu0 %v15200_v0  ;;  %8550 = vmatprep.subr.bf16.mxu1 %v15203_v1  ;;  %v15252_v0 = vld [vmem:[%s17723_s21 + $0x900] ss:$48 sps:$4 sm:$0xff]   ;;  %v15255_v1 = vld [vmem:[%s17723_s21 + $0x908] ss:$48 sps:$4 sm:$0xff]  }
 0x6c7   : > { %8469 = vmatpush1.bf16.msra.mxu0 %v15198_v2  ;;  %8551 = vmatpush1.bf16.msra.mxu1 %v15201_v3  ;;  %v15260_v2 = vld [vmem:[%s17723_s21 + $0x964] ss:$48 sps:$4 sm:$0xff]   ;;  %v15263_v3 = vld [vmem:[%s17723_s21 + $0x96c] ss:$48 sps:$4 sm:$0xff]  }
 0x6c8   : > { %8479 = vmatprep.subr.bf16.mxu0 %v15206_v4  ;;  %8561 = vmatprep.subr.bf16.mxu1 %v15209_v5  ;;  %v15258_v4 = vld [vmem:[%s17723_s21 + $0x960] ss:$48 sps:$4 sm:$0xff]   ;;  %v15261_v5 = vld [vmem:[%s17723_s21 + $0x968] ss:$48 sps:$4 sm:$0xff]  }
 0x71d   : > { %v5932_v9 = vpop.f32.mrb[12].mxu0  ;;  %v5973_v58 = vpop.f32.mrb[12].mxu1 }
 0x71e   : > { %v5933_v59 = vadd.f32 %v5932_v9, %v5241_v7  ;;  %v5934_v10 = vpop.f32.mrb[13].mxu0  ;;  %v5975_v11 = vpop.f32.mrb[13].mxu1  ;;  %v15266_v7 = vld [vmem:[%s17723_s21 + $0x9c4] ss:$48 sps:$4 sm:$0xff]   ;;  %v15264_v9 = vld [vmem:[%s17723_s21 + $0x9c0] ss:$48 sps:$4 sm:$0xff]  }
 0x71f   : > { %v5935_v12 = vadd.f32 %v5934_v10, %v5245_v8  ;;  %v5936_v13 = vpop.f32.mrb[14].mxu0  ;;  %v5977_v14 = vpop.f32.mrb[14].mxu1  ;;  %v15269_v8 = vld [vmem:[%s17723_s21 + $0x9cc] ss:$48 sps:$4 sm:$0xff]  }
 0x720   : > { %v5974_v15 = vadd.f32 %v5973_v58, %v5933_v59  ;;  %v5937_v56 = vpop.f32.mrb[15].mxu0  ;;  %v5978_v16 = vpop.f32.mrb[15].mxu1  ;;  %v15267_v58 = vld [vmem:[%s17723_s21 + $0x9c8] ss:$48 sps:$4 sm:$0xff]   ;;  %v15272_v59 = vld [vmem:[%s17723_s21 + $0xa24] ss:$48 sps:$4 sm:$0xff]  }
 0x721   : > { %v5976_v17 = vadd.f32 %v5975_v11, %v5935_v12  ;;  %v15275_v10 = vld [vmem:[%s17723_s21 + $0xa2c] ss:$48 sps:$4 sm:$0xff]   ;;  %v15270_v11 = vld [vmem:[%s17723_s21 + $0xa20] ss:$48 sps:$4 sm:$0xff]   ;;  %v15273_v12 = vld [vmem:[%s17723_s21 + $0xa28] ss:$48 sps:$4 sm:$0xff]  }
 0x722   : > { %v6062_v20 = vadd.f32 %v16260_v18, %v5974_v15  ;;  %v15278_v13 = vld [vmem:[%s17723_s21 + $0xa84] ss:$48 sps:$4 sm:$0xff]   ;;  %v15281_v14 = vld [vmem:[%s17723_s21 + $0xa8c] ss:$48 sps:$4 sm:$0xff]   ;;  %v15276_v15 = vld [vmem:[%s17723_s21 + $0xa80] ss:$48 sps:$4 sm:$0xff]  }
 0x723   : > { %v6063_v60 = vadd.f32 %v16261_v25, %v5976_v17  ;;  %v15279_v56 = vld [vmem:[%s17723_s21 + $0xa88] ss:$48 sps:$4 sm:$0xff]   ;;  %v15284_v16 = vld [vmem:[%s17723_s21 + $0xae4] ss:$48 sps:$4 sm:$0xff]   ;;  %v15287_v17 = vld [vmem:[%s17723_s21 + $0xaec] ss:$48 sps:$4 sm:$0xff]   ;;  %v5249_v25 = vrot.slane %v18538_v6, %v18096_v22 }
 0x724   : > { %v18550_v29 = vpack.c.bf16 %v6062_v20, %v6062_v20  ;;  %v15282_v18 = vld [vmem:[%s17723_s21 + $0xae0] ss:$48 sps:$4 sm:$0xff]   ;;  %v15285_v20 = vld [vmem:[%s17723_s21 + $0xae8] ss:$48 sps:$4 sm:$0xff]  }
 0x725   : > { %v18546_v26 = vpack.c.bf16 %v6063_v60, %v6063_v60  ;;  %v15290_v60 = vld [vmem:[%s17723_s21 + $0xb44] ss:$48 sps:$4 sm:$0xff]  }
 0x727   : > { %8470 = vmatprep.mubr.bf16.mxu0 %v18546_v26  ;;  %8552 = vmatprep.mubr.bf16.mxu1 %v18546_v26 }
 0x728   : > { %8471 = vmatmul.mubr.bf16.vlgmr.msra.gmra.mrb[20].mxu0 %v18550_v29  ;;  %8553 = vmatmul.mubr.bf16.vlgmr.msra.gmra.mrb[20].mxu1 %v18550_v29 }
 0x729   : > { %8480 = vmatpush1.bf16.msra.mxu0 %v15204_v27  ;;  %8562 = vmatpush1.bf16.msra.mxu1 %v15207_v28  ;;  %v15293_v27 = vld [vmem:[%s17723_s21 + $0xb4c] ss:$48 sps:$4 sm:$0xff]   ;;  %v5253_v28 = vrot.slane %v18538_v6, %v18102_v24 }
 0x72a   : > { %8481 = vmatprep.subr.bf16.mxu0 %v15212_v30  ;;  %8563 = vmatprep.subr.bf16.mxu1 %v15215_v31 }
 0x72d   : > { %8482 = vmatpush1.bf16.msra.mxu0 %v15210_v33  ;;  %8564 = vmatpush1.bf16.msra.mxu1 %v15213_v34  ;;  %v15288_v33 = vld [vmem:[%s17723_s21 + $0xb40] ss:$48 sps:$4 sm:$0xff]   ;;  %v15291_v34 = vld [vmem:[%s17723_s21 + $0xb48] ss:$48 sps:$4 sm:$0xff]  }
 0x72e   : > { %8483 = vmatprep.subr.bf16.mxu0 %v15218_v35  ;;  %8565 = vmatprep.subr.bf16.mxu1 %v15221_v36 }
 0x731   : > { %8484 = vmatpush1.bf16.msra.mxu0 %v15216_v37  ;;  %8566 = vmatpush1.bf16.msra.mxu1 %v15219_v38  ;;  %v15296_v38 = vld [vmem:[%s17723_s21 + $0xba4] ss:$48 sps:$4 sm:$0xff]  }
 0x732   : > { %8485 = vmatprep.subr.bf16.mxu0 %v15224_v39  ;;  %8567 = vmatprep.subr.bf16.mxu1 %v15227_v40  ;;  %v15299_v39 = vld [vmem:[%s17723_s21 + $0xbac] ss:$48 sps:$4 sm:$0xff]  }
 0x735   : > { %8486 = vmatpush1.bf16.msra.mxu0 %v15222_v41  ;;  %8568 = vmatpush1.bf16.msra.mxu1 %v15225_v42 }
 0x736   : > { %8487 = vmatprep.subr.bf16.mxu0 %v15230_v43  ;;  %8569 = vmatprep.subr.bf16.mxu1 %v15233_v44 }
 0x739   : > { %8488 = vmatpush1.bf16.msra.mxu0 %v15228_v45  ;;  %8570 = vmatpush1.bf16.msra.mxu1 %v15231_v46  ;;  %v15294_v46 = vld [vmem:[%s17723_s21 + $0xba0] ss:$48 sps:$4 sm:$0xff]  }
 0x73a   : > { %8489 = vmatprep.subr.bf16.mxu0 %v15236_v47  ;;  %8571 = vmatprep.subr.bf16.mxu1 %v15239_v48  ;;  %v15297_v47 = vld [vmem:[%s17723_s21 + $0xba8] ss:$48 sps:$4 sm:$0xff]   ;;  %v16262_v48 = vld [vmem:[%s18116_s27 + $0x10] sm:$0xff] }
 0x73d   : > { %8490 = vmatpush1.bf16.msra.mxu0 %v15234_v49  ;;  %8572 = vmatpush1.bf16.msra.mxu1 %v15237_v50  ;;  %v15302_v50 = vld [vmem:[%s17723_s21 + $0x14] ss:$48 sps:$4 sm:$0xff]  }
 0x73e   : > { %8491 = vmatprep.subr.bf16.mxu0 %v15242_v51  ;;  %8573 = vmatprep.subr.bf16.mxu1 %v15245_v52  ;;  %v15305_v51 = vld [vmem:[%s17723_s21 + $0x1c] ss:$48 sps:$4 sm:$0xff]  }
 0x73f   : > { %v16263_v52 = vld [vmem:[%s18116_s27 + $0x18] sm:$0xff] }
 0x741   : > { %8492 = vmatpush1.bf16.msra.mxu0 %v15240_v53  ;;  %8574 = vmatpush1.bf16.msra.mxu1 %v15243_v54 }
 0x742   : > { %8493 = vmatprep.subr.bf16.mxu0 %v15248_v55  ;;  %8575 = vmatprep.subr.bf16.mxu1 %v15251_v57  ;;  %v15300_v55 = vld [vmem:[%s17723_s21 + $0x10] ss:$48 sps:$4 sm:$0xff]  }
 0x745   : > { %8494 = vmatpush1.bf16.msra.mxu0 %v15246_v32  ;;  %8576 = vmatpush1.bf16.msra.mxu1 %v15249_v61  ;;  %v15303_v32 = vld [vmem:[%s17723_s21 + $0x18] ss:$48 sps:$4 sm:$0xff]   ;;  %v15308_v61 = vld [vmem:[%s17723_s21 + $0x74] ss:$48 sps:$4 sm:$0xff]  }
 0x746   : > { %8495 = vmatprep.subr.bf16.mxu0 %v15254_v62  ;;  %8577 = vmatprep.subr.bf16.mxu1 %v15257_v63  ;;  %v15311_v62 = vld [vmem:[%s17723_s21 + $0x7c] ss:$48 sps:$4 sm:$0xff]   ;;  %v15306_v63 = vld [vmem:[%s17723_s21 + $0x70] ss:$48 sps:$4 sm:$0xff]  }
 0x749   : > { %8496 = vmatpush1.bf16.msra.mxu0 %v15252_v0  ;;  %8578 = vmatpush1.bf16.msra.mxu1 %v15255_v1  ;;  %v15309_v0 = vld [vmem:[%s17723_s21 + $0x78] ss:$48 sps:$4 sm:$0xff]   ;;  %v15314_v1 = vld [vmem:[%s17723_s21 + $0xd4] ss:$48 sps:$4 sm:$0xff]  }
 0x74a   : > { %8497 = vmatprep.subr.bf16.mxu0 %v15260_v2  ;;  %8579 = vmatprep.subr.bf16.mxu1 %v15263_v3  ;;  %v15317_v2 = vld [vmem:[%s17723_s21 + $0xdc] ss:$48 sps:$4 sm:$0xff]   ;;  %v15312_v3 = vld [vmem:[%s17723_s21 + $0xd0] ss:$48 sps:$4 sm:$0xff]  }
 0x74d   : > { %8498 = vmatpush1.bf16.msra.mxu0 %v15258_v4  ;;  %8580 = vmatpush1.bf16.msra.mxu1 %v15261_v5  ;;  %v15315_v4 = vld [vmem:[%s17723_s21 + $0xd8] ss:$48 sps:$4 sm:$0xff]   ;;  %v15320_v5 = vld [vmem:[%s17723_s21 + $0x134] ss:$48 sps:$4 sm:$0xff]  }
 0x74e   : > { %8499 = vmatprep.subr.bf16.mxu0 %v15266_v7  ;;  %8581 = vmatprep.subr.bf16.mxu1 %v15269_v8  ;;  %v15323_v7 = vld [vmem:[%s17723_s21 + $0x13c] ss:$48 sps:$4 sm:$0xff]   ;;  %v15318_v8 = vld [vmem:[%s17723_s21 + $0x130] ss:$48 sps:$4 sm:$0xff]  }
 0x751   : > { %8500 = vmatpush1.bf16.msra.mxu0 %v15264_v9  ;;  %8582 = vmatpush1.bf16.msra.mxu1 %v15267_v58  ;;  %v15321_v9 = vld [vmem:[%s17723_s21 + $0x138] ss:$48 sps:$4 sm:$0xff]   ;;  %v15326_v58 = vld [vmem:[%s17723_s21 + $0x194] ss:$48 sps:$4 sm:$0xff]  }
 0x752   : > { %8501 = vmatprep.subr.bf16.mxu0 %v15272_v59  ;;  %8583 = vmatprep.subr.bf16.mxu1 %v15275_v10  ;;  %v15329_v59 = vld [vmem:[%s17723_s21 + $0x19c] ss:$48 sps:$4 sm:$0xff]   ;;  %v15324_v10 = vld [vmem:[%s17723_s21 + $0x190] ss:$48 sps:$4 sm:$0xff]  }
 0x755   : > { %8502 = vmatpush1.bf16.msra.mxu0 %v15270_v11  ;;  %8584 = vmatpush1.bf16.msra.mxu1 %v15273_v12  ;;  %v15327_v11 = vld [vmem:[%s17723_s21 + $0x198] ss:$48 sps:$4 sm:$0xff]   ;;  %v15332_v12 = vld [vmem:[%s17723_s21 + $0x1f4] ss:$48 sps:$4 sm:$0xff]  }
 0x756   : > { %8503 = vmatprep.subr.bf16.mxu0 %v15278_v13  ;;  %8585 = vmatprep.subr.bf16.mxu1 %v15281_v14  ;;  %v15335_v13 = vld [vmem:[%s17723_s21 + $0x1fc] ss:$48 sps:$4 sm:$0xff]   ;;  %v15330_v14 = vld [vmem:[%s17723_s21 + $0x1f0] ss:$48 sps:$4 sm:$0xff]  }
 0x759   : > { %8504 = vmatpush1.bf16.msra.mxu0 %v15276_v15  ;;  %8586 = vmatpush1.bf16.msra.mxu1 %v15279_v56  ;;  %v15333_v15 = vld [vmem:[%s17723_s21 + $0x1f8] ss:$48 sps:$4 sm:$0xff]   ;;  %v15338_v56 = vld [vmem:[%s17723_s21 + $0x254] ss:$48 sps:$4 sm:$0xff]  }
 0x75a   : > { %8505 = vmatprep.subr.bf16.mxu0 %v15284_v16  ;;  %8587 = vmatprep.subr.bf16.mxu1 %v15287_v17  ;;  %v15341_v16 = vld [vmem:[%s17723_s21 + $0x25c] ss:$48 sps:$4 sm:$0xff]   ;;  %v15336_v17 = vld [vmem:[%s17723_s21 + $0x250] ss:$48 sps:$4 sm:$0xff]  }
 0x75d   : > { %v6014_v30 = vpop.f32.mrb[16].mxu0  ;;  %v6055_v31 = vpop.f32.mrb[16].mxu1  ;;  %8506 = vmatpush1.bf16.msra.mxu0 %v15282_v18  ;;  %8588 = vmatpush1.bf16.msra.mxu1 %v15285_v20  ;;  %v15339_v18 = vld [vmem:[%s17723_s21 + $0x258] ss:$48 sps:$4 sm:$0xff]   ;;  %v15344_v20 = vld [vmem:[%s17723_s21 + $0x2b4] ss:$48 sps:$4 sm:$0xff]  }
 0x75e   : > { %v6015_v35 = vadd.f32 %v6014_v30, %v5249_v25  ;;  %v6016_v36 = vpop.f32.mrb[17].mxu0  ;;  %v6057_v37 = vpop.f32.mrb[17].mxu1  ;;  %8507 = vmatprep.subr.bf16.mxu0 %v15290_v60  ;;  %8589 = vmatprep.subr.bf16.mxu1 %v15293_v27  ;;  %v15347_v25 = vld [vmem:[%s17723_s21 + $0x2bc] ss:$48 sps:$4 sm:$0xff]   ;;  %v15342_v60 = vld [vmem:[%s17723_s21 + $0x2b0] ss:$48 sps:$4 sm:$0xff]  }
 0x75f   : > { %v6017_v40 = vadd.f32 %v6016_v36, %v5253_v28  ;;  %v6018_v6 = vpop.f32.mrb[18].mxu0  ;;  %v6059_v41 = vpop.f32.mrb[18].mxu1  ;;  %v15345_v27 = vld [vmem:[%s17723_s21 + $0x2b8] ss:$48 sps:$4 sm:$0xff]   ;;  %v15350_v28 = vld [vmem:[%s17723_s21 + $0x314] ss:$48 sps:$4 sm:$0xff]  }
 0x760   : > { %v6056_v42 = vadd.f32 %v6055_v31, %v6015_v35  ;;  %v6019_v43 = vpop.f32.mrb[19].mxu0  ;;  %v6060_v44 = vpop.f32.mrb[19].mxu1  ;;  %v15353_v30 = vld [vmem:[%s17723_s21 + $0x31c] ss:$48 sps:$4 sm:$0xff]   ;;  %v15348_v31 = vld [vmem:[%s17723_s21 + $0x310] ss:$48 sps:$4 sm:$0xff]  }
 0x761   : > { %v6058_v45 = vadd.f32 %v6057_v37, %v6017_v40  ;;  %8508 = vmatpush1.bf16.msra.mxu0 %v15288_v33  ;;  %8590 = vmatpush1.bf16.msra.mxu1 %v15291_v34  ;;  %v15351_v33 = vld [vmem:[%s17723_s21 + $0x318] ss:$48 sps:$4 sm:$0xff]   ;;  %v15356_v34 = vld [vmem:[%s17723_s21 + $0x374] ss:$48 sps:$4 sm:$0xff]   ;;  %v15359_v35 = vld [vmem:[%s17723_s21 + $0x37c] ss:$48 sps:$4 sm:$0xff]  }
 0x762   : > { %v6064_v49 = vadd.f32 %v16262_v48, %v6056_v42  ;;  %8509 = vmatprep.subr.bf16.mxu0 %v15296_v38  ;;  %8591 = vmatprep.subr.bf16.mxu1 %v15299_v39  ;;  %v15354_v36 = vld [vmem:[%s17723_s21 + $0x370] ss:$48 sps:$4 sm:$0xff]   ;;  %v15357_v37 = vld [vmem:[%s17723_s21 + $0x378] ss:$48 sps:$4 sm:$0xff]   ;;  %v15362_v38 = vld [vmem:[%s17723_s21 + $0x3d4] ss:$48 sps:$4 sm:$0xff]  }
 0x763   : > { %v6065_v53 = vadd.f32 %v16263_v52, %v6058_v45  ;;  %v15365_v39 = vld [vmem:[%s17723_s21 + $0x3dc] ss:$48 sps:$4 sm:$0xff]   ;;  %v15360_v40 = vld [vmem:[%s17723_s21 + $0x3d0] ss:$48 sps:$4 sm:$0xff]   ;;  %v15363_v6 = vld [vmem:[%s17723_s21 + $0x3d8] ss:$48 sps:$4 sm:$0xff]  }
 0x764   : > { %v18627_v57 = vpack.c.bf16 %v6064_v49, %v6064_v49  ;;  %v15368_v41 = vld [vmem:[%s17723_s21 + $0x434] ss:$48 sps:$4 sm:$0xff]   ;;  %v15371_v42 = vld [vmem:[%s17723_s21 + $0x43c] ss:$48 sps:$4 sm:$0xff]   ;;  %v15366_v43 = vld [vmem:[%s17723_s21 + $0x430] ss:$48 sps:$4 sm:$0xff]  }
 0x765   : > { %v18624_v54 = vpack.c.bf16 %v6065_v53, %v6065_v53  ;;  %8510 = vmatpush1.bf16.msra.mxu0 %v15294_v46  ;;  %8592 = vmatpush1.bf16.msra.mxu1 %v15297_v47  ;;  %v15369_v44 = vld [vmem:[%s17723_s21 + $0x438] ss:$48 sps:$4 sm:$0xff]   ;;  %v15374_v45 = vld [vmem:[%s17723_s21 + $0x494] ss:$48 sps:$4 sm:$0xff]   ;;  %v15377_v46 = vld [vmem:[%s17723_s21 + $0x49c] ss:$48 sps:$4 sm:$0xff]  }
 0x766   : > { %8602 = vmatprep.subr.bf16.mxu0 %v15302_v50  ;;  %8684 = vmatprep.subr.bf16.mxu1 %v15305_v51  ;;  %v15372_v47 = vld [vmem:[%s17723_s21 + $0x490] ss:$48 sps:$4 sm:$0xff]   ;;  %v15375_v48 = vld [vmem:[%s17723_s21 + $0x498] ss:$48 sps:$4 sm:$0xff]   ;;  %v15380_v49 = vld [vmem:[%s17723_s21 + $0x4f4] ss:$48 sps:$4 sm:$0xff]  }
 0x767   : > { %8511 = vmatprep.mubr.bf16.mxu0 %v18624_v54  ;;  %8593 = vmatprep.mubr.bf16.mxu1 %v18624_v54  ;;  %v15383_v50 = vld [vmem:[%s17723_s21 + $0x4fc] ss:$48 sps:$4 sm:$0xff]   ;;  %v15378_v51 = vld [vmem:[%s17723_s21 + $0x4f0] ss:$48 sps:$4 sm:$0xff]   ;;  %v15381_v52 = vld [vmem:[%s17723_s21 + $0x4f8] ss:$48 sps:$4 sm:$0xff]  }
 0x768   : > { %8512 = vmatmul.mubr.bf16.vlgmr.msra.gmra.mrb[20].mxu0 %v18627_v57  ;;  %8594 = vmatmul.mubr.bf16.vlgmr.msra.gmra.mrb[20].mxu1 %v18627_v57  ;;  %v15386_v53 = vld [vmem:[%s17723_s21 + $0x554] ss:$48 sps:$4 sm:$0xff]  }
 0x769   : > { %8603 = vmatpush1.bf16.msra.mxu0 %v15300_v55  ;;  %8634 = vmatprep.mubr.bf16.mxu0 %v18546_v26  ;;  %v15389_v55 = vld [vmem:[%s17723_s21 + $0x55c] ss:$48 sps:$4 sm:$0xff]  }
 0x76a   : > { %8685 = vmatpush1.bf16.msra.mxu1 %v15303_v32  ;;  %8716 = vmatprep.mubr.bf16.mxu1 %v18546_v26  ;;  %v15384_v32 = vld [vmem:[%s17723_s21 + $0x550] ss:$48 sps:$4 sm:$0xff]  }
 0x76b   : > { %8604 = vmatprep.subr.bf16.mxu0 %v15308_v61  ;;  %8686 = vmatprep.subr.bf16.mxu1 %v15311_v62  ;;  %v15387_v61 = vld [vmem:[%s17723_s21 + $0x558] ss:$48 sps:$4 sm:$0xff]   ;;  %v15392_v62 = vld [vmem:[%s17723_s21 + $0x5b4] ss:$48 sps:$4 sm:$0xff]  }
 0x76d   : > { %8605 = vmatpush1.bf16.msra.mxu0 %v15306_v63  ;;  %v15395_v63 = vld [vmem:[%s17723_s21 + $0x5bc] ss:$48 sps:$4 sm:$0xff]  }
 0x76e   : > { %8687 = vmatpush1.bf16.msra.mxu1 %v15309_v0  ;;  %8606 = vmatprep.subr.bf16.mxu0 %v15314_v1  ;;  %v15390_v0 = vld [vmem:[%s17723_s21 + $0x5b0] ss:$48 sps:$4 sm:$0xff]   ;;  %v15393_v1 = vld [vmem:[%s17723_s21 + $0x5b8] ss:$48 sps:$4 sm:$0xff]  }
 0x76f   : > { %8688 = vmatprep.subr.bf16.mxu1 %v15317_v2  ;;  %v15398_v2 = vld [vmem:[%s17723_s21 + $0x614] ss:$48 sps:$4 sm:$0xff]  }
 0x771   : > { %8607 = vmatpush1.bf16.msra.mxu0 %v15312_v3  ;;  %v15401_v3 = vld [vmem:[%s17723_s21 + $0x61c] ss:$48 sps:$4 sm:$0xff]  }
 0x772   : > { %8689 = vmatpush1.bf16.msra.mxu1 %v15315_v4  ;;  %8608 = vmatprep.subr.bf16.mxu0 %v15320_v5  ;;  %v15396_v4 = vld [vmem:[%s17723_s21 + $0x610] ss:$48 sps:$4 sm:$0xff]   ;;  %v15399_v5 = vld [vmem:[%s17723_s21 + $0x618] ss:$48 sps:$4 sm:$0xff]  }
 0x773   : > { %8690 = vmatprep.subr.bf16.mxu1 %v15323_v7  ;;  %v15404_v7 = vld [vmem:[%s17723_s21 + $0x674] ss:$48 sps:$4 sm:$0xff]  }
 0x775   : > { %8609 = vmatpush1.bf16.msra.mxu0 %v15318_v8  ;;  %v15407_v8 = vld [vmem:[%s17723_s21 + $0x67c] ss:$48 sps:$4 sm:$0xff]  }
 0x776   : > { %8691 = vmatpush1.bf16.msra.mxu1 %v15321_v9  ;;  %8610 = vmatprep.subr.bf16.mxu0 %v15326_v58  ;;  %v15402_v9 = vld [vmem:[%s17723_s21 + $0x670] ss:$48 sps:$4 sm:$0xff]   ;;  %v15405_v58 = vld [vmem:[%s17723_s21 + $0x678] ss:$48 sps:$4 sm:$0xff]  }
 0x777   : > { %8692 = vmatprep.subr.bf16.mxu1 %v15329_v59  ;;  %v15410_v59 = vld [vmem:[%s17723_s21 + $0x6d4] ss:$48 sps:$4 sm:$0xff]  }
 0x779   : > { %8611 = vmatpush1.bf16.msra.mxu0 %v15324_v10  ;;  %v15413_v10 = vld [vmem:[%s17723_s21 + $0x6dc] ss:$48 sps:$4 sm:$0xff]  }
 0x77a   : > { %8693 = vmatpush1.bf16.msra.mxu1 %v15327_v11  ;;  %8612 = vmatprep.subr.bf16.mxu0 %v15332_v12  ;;  %v15408_v11 = vld [vmem:[%s17723_s21 + $0x6d0] ss:$48 sps:$4 sm:$0xff]   ;;  %v15411_v12 = vld [vmem:[%s17723_s21 + $0x6d8] ss:$48 sps:$4 sm:$0xff]  }
 0x77b   : > { %8694 = vmatprep.subr.bf16.mxu1 %v15335_v13  ;;  %v15416_v13 = vld [vmem:[%s17723_s21 + $0x734] ss:$48 sps:$4 sm:$0xff]  }
 0x77d   : > { %8613 = vmatpush1.bf16.msra.mxu0 %v15330_v14  ;;  %v15419_v14 = vld [vmem:[%s17723_s21 + $0x73c] ss:$48 sps:$4 sm:$0xff]  }
 0x77e   : > { %8695 = vmatpush1.bf16.msra.mxu1 %v15333_v15  ;;  %8614 = vmatprep.subr.bf16.mxu0 %v15338_v56  ;;  %v15414_v15 = vld [vmem:[%s17723_s21 + $0x730] ss:$48 sps:$4 sm:$0xff]   ;;  %v15417_v56 = vld [vmem:[%s17723_s21 + $0x738] ss:$48 sps:$4 sm:$0xff]  }
 0x77f   : > { %8696 = vmatprep.subr.bf16.mxu1 %v15341_v16  ;;  %v15422_v16 = vld [vmem:[%s17723_s21 + $0x794] ss:$48 sps:$4 sm:$0xff]  }
 0x781   : > { %8615 = vmatpush1.bf16.msra.mxu0 %v15336_v17  ;;  %v15425_v17 = vld [vmem:[%s17723_s21 + $0x79c] ss:$48 sps:$4 sm:$0xff]  }
 0x782   : > { %8697 = vmatpush1.bf16.msra.mxu1 %v15339_v18  ;;  %8616 = vmatprep.subr.bf16.mxu0 %v15344_v20  ;;  %v15420_v18 = vld [vmem:[%s17723_s21 + $0x790] ss:$48 sps:$4 sm:$0xff]   ;;  %v15423_v20 = vld [vmem:[%s17723_s21 + $0x798] ss:$48 sps:$4 sm:$0xff]  }
 0x783   : > { %8698 = vmatprep.subr.bf16.mxu1 %v15347_v25  ;;  %v15428_v25 = vld [vmem:[%s17723_s21 + $0x7f4] ss:$48 sps:$4 sm:$0xff]  }
 0x785   : > { %8617 = vmatpush1.bf16.msra.mxu0 %v15342_v60  ;;  %v15431_v60 = vld [vmem:[%s17723_s21 + $0x7fc] ss:$48 sps:$4 sm:$0xff]  }
 0x786   : > { %8699 = vmatpush1.bf16.msra.mxu1 %v15345_v27  ;;  %8618 = vmatprep.subr.bf16.mxu0 %v15350_v28  ;;  %v15426_v27 = vld [vmem:[%s17723_s21 + $0x7f0] ss:$48 sps:$4 sm:$0xff]   ;;  %v15429_v28 = vld [vmem:[%s17723_s21 + $0x7f8] ss:$48 sps:$4 sm:$0xff]  }
 0x787   : > { %8700 = vmatprep.subr.bf16.mxu1 %v15353_v30  ;;  %v15434_v30 = vld [vmem:[%s17723_s21 + $0x854] ss:$48 sps:$4 sm:$0xff]  }
 0x789   : > { %8619 = vmatpush1.bf16.msra.mxu0 %v15348_v31  ;;  %v15437_v31 = vld [vmem:[%s17723_s21 + $0x85c] ss:$48 sps:$4 sm:$0xff]  }
 0x78a   : > { %8701 = vmatpush1.bf16.msra.mxu1 %v15351_v33  ;;  %8620 = vmatprep.subr.bf16.mxu0 %v15356_v34  ;;  %v15432_v33 = vld [vmem:[%s17723_s21 + $0x850] ss:$48 sps:$4 sm:$0xff]   ;;  %v15435_v34 = vld [vmem:[%s17723_s21 + $0x858] ss:$48 sps:$4 sm:$0xff]  }
 0x78b   : > { %8702 = vmatprep.subr.bf16.mxu1 %v15359_v35  ;;  %v15440_v35 = vld [vmem:[%s17723_s21 + $0x8b4] ss:$48 sps:$4 sm:$0xff]  }
 0x78d   : > { %8621 = vmatpush1.bf16.msra.mxu0 %v15354_v36  ;;  %v15443_v36 = vld [vmem:[%s17723_s21 + $0x8bc] ss:$48 sps:$4 sm:$0xff]  }
 0x78e   : > { %8703 = vmatpush1.bf16.msra.mxu1 %v15357_v37  ;;  %8622 = vmatprep.subr.bf16.mxu0 %v15362_v38  ;;  %v15438_v37 = vld [vmem:[%s17723_s21 + $0x8b0] ss:$48 sps:$4 sm:$0xff]   ;;  %v15441_v38 = vld [vmem:[%s17723_s21 + $0x8b8] ss:$48 sps:$4 sm:$0xff]  }
 0x78f   : > { %8704 = vmatprep.subr.bf16.mxu1 %v15365_v39  ;;  %v15446_v39 = vld [vmem:[%s17723_s21 + $0x914] ss:$48 sps:$4 sm:$0xff]  }
 0x791   : > { %8623 = vmatpush1.bf16.msra.mxu0 %v15360_v40  ;;  %v15449_v40 = vld [vmem:[%s17723_s21 + $0x91c] ss:$48 sps:$4 sm:$0xff]  }
 0x792   : > { %8705 = vmatpush1.bf16.msra.mxu1 %v15363_v6  ;;  %8624 = vmatprep.subr.bf16.mxu0 %v15368_v41  ;;  %v15444_v6 = vld [vmem:[%s17723_s21 + $0x910] ss:$48 sps:$4 sm:$0xff]   ;;  %v15447_v41 = vld [vmem:[%s17723_s21 + $0x918] ss:$48 sps:$4 sm:$0xff]  }
 0x793   : > { %8706 = vmatprep.subr.bf16.mxu1 %v15371_v42  ;;  %v15452_v42 = vld [vmem:[%s17723_s21 + $0x974] ss:$48 sps:$4 sm:$0xff]  }
 0x795   : > { %8625 = vmatpush1.bf16.msra.mxu0 %v15366_v43  ;;  %v15455_v43 = vld [vmem:[%s17723_s21 + $0x97c] ss:$48 sps:$4 sm:$0xff]  }
 0x796   : > { %8707 = vmatpush1.bf16.msra.mxu1 %v15369_v44  ;;  %8626 = vmatprep.subr.bf16.mxu0 %v15374_v45  ;;  %v15450_v44 = vld [vmem:[%s17723_s21 + $0x970] ss:$48 sps:$4 sm:$0xff]   ;;  %v15453_v45 = vld [vmem:[%s17723_s21 + $0x978] ss:$48 sps:$4 sm:$0xff]  }
 0x797   : > { %8708 = vmatprep.subr.bf16.mxu1 %v15377_v46  ;;  %v15458_v46 = vld [vmem:[%s17723_s21 + $0x9d4] ss:$48 sps:$4 sm:$0xff]  }
 0x799   : > { %8627 = vmatpush1.bf16.msra.mxu0 %v15372_v47  ;;  %v15461_v47 = vld [vmem:[%s17723_s21 + $0x9dc] ss:$48 sps:$4 sm:$0xff]  }
 0x79a   : > { %8709 = vmatpush1.bf16.msra.mxu1 %v15375_v48  ;;  %8628 = vmatprep.subr.bf16.mxu0 %v15380_v49  ;;  %v15456_v48 = vld [vmem:[%s17723_s21 + $0x9d0] ss:$48 sps:$4 sm:$0xff]   ;;  %v15459_v49 = vld [vmem:[%s17723_s21 + $0x9d8] ss:$48 sps:$4 sm:$0xff]  }
 0x79b   : > { %8710 = vmatprep.subr.bf16.mxu1 %v15383_v50  ;;  %v15464_v50 = vld [vmem:[%s17723_s21 + $0xa34] ss:$48 sps:$4 sm:$0xff]  }
 0x79d   : > { %8629 = vmatpush1.bf16.msra.mxu0 %v15378_v51  ;;  %v15467_v51 = vld [vmem:[%s17723_s21 + $0xa3c] ss:$48 sps:$4 sm:$0xff]  }
 0x79e   : > { %8711 = vmatpush1.bf16.msra.mxu1 %v15381_v52  ;;  %8630 = vmatprep.subr.bf16.mxu0 %v15386_v53  ;;  %v15462_v52 = vld [vmem:[%s17723_s21 + $0xa30] ss:$48 sps:$4 sm:$0xff]   ;;  %v15465_v53 = vld [vmem:[%s17723_s21 + $0xa38] ss:$48 sps:$4 sm:$0xff]  }
 0x79f   : > { %8712 = vmatprep.subr.bf16.mxu1 %v15389_v55  ;;  %v15470_v55 = vld [vmem:[%s17723_s21 + $0xa94] ss:$48 sps:$4 sm:$0xff]  }
 0x7a1   : > { %8631 = vmatpush1.bf16.msra.mxu0 %v15384_v32  ;;  %v15473_v32 = vld [vmem:[%s17723_s21 + $0xa9c] ss:$48 sps:$4 sm:$0xff]  }
 0x7a2   : > { %8713 = vmatpush1.bf16.msra.mxu1 %v15387_v61  ;;  %8632 = vmatprep.subr.bf16.mxu0 %v15392_v62  ;;  %v15468_v61 = vld [vmem:[%s17723_s21 + $0xa90] ss:$48 sps:$4 sm:$0xff]   ;;  %v15471_v62 = vld [vmem:[%s17723_s21 + $0xa98] ss:$48 sps:$4 sm:$0xff]  }
 0x7a3   : > { %8714 = vmatprep.subr.bf16.mxu1 %v15395_v63  ;;  %v15476_v63 = vld [vmem:[%s17723_s21 + $0xaf4] ss:$48 sps:$4 sm:$0xff]  }
 0x7a5   : > { %8633 = vmatpush1.bf16.msra.mxu0 %v15390_v0  ;;  %v15479_v0 = vld [vmem:[%s17723_s21 + $0xafc] ss:$48 sps:$4 sm:$0xff]  }
 0x7a6   : > { %8715 = vmatpush1.bf16.msra.mxu1 %v15393_v1  ;;  %8643 = vmatprep.subr.bf16.mxu0 %v15398_v2  ;;  %v15474_v1 = vld [vmem:[%s17723_s21 + $0xaf0] ss:$48 sps:$4 sm:$0xff]   ;;  %v15477_v2 = vld [vmem:[%s17723_s21 + $0xaf8] ss:$48 sps:$4 sm:$0xff]  }
 0x7a7   : > { %8725 = vmatprep.subr.bf16.mxu1 %v15401_v3  ;;  %v15482_v3 = vld [vmem:[%s17723_s21 + $0xb54] ss:$48 sps:$4 sm:$0xff]  }
 0x7a8   : > { %8635 = vmatmul.mubr.bf16.vlgmr.msra.gmra.mrb[24].mxu0 %v18550_v29 }
 0x7a9   : > { %8717 = vmatmul.mubr.bf16.vlgmr.msra.gmra.mrb[24].mxu1 %v18550_v29  ;;  %8644 = vmatpush1.bf16.msra.mxu0 %v15396_v4  ;;  %v15485_v4 = vld [vmem:[%s17723_s21 + $0xb5c] ss:$48 sps:$4 sm:$0xff]  }
 0x7aa   : > { %8675 = vmatprep.mubr.bf16.mxu0 %v18624_v54  ;;  %8726 = vmatpush1.bf16.msra.mxu1 %v15399_v5  ;;  %v15480_v5 = vld [vmem:[%s17723_s21 + $0xb50] ss:$48 sps:$4 sm:$0xff]  }
 0x7ab   : > { %8757 = vmatprep.mubr.bf16.mxu1 %v18624_v54  ;;  %8645 = vmatprep.subr.bf16.mxu0 %v15404_v7  ;;  %v15483_v7 = vld [vmem:[%s17723_s21 + $0xb58] ss:$48 sps:$4 sm:$0xff]  }
 0x7ac   : > { %8727 = vmatprep.subr.bf16.mxu1 %v15407_v8  ;;  %v15488_v8 = vld [vmem:[%s17723_s21 + $0xbb4] ss:$48 sps:$4 sm:$0xff]  }
 0x7ad   : > { %8646 = vmatpush1.bf16.msra.mxu0 %v15402_v9  ;;  %v15491_v9 = vld [vmem:[%s17723_s21 + $0xbbc] ss:$48 sps:$4 sm:$0xff]  }
 0x7ae   : > { %8728 = vmatpush1.bf16.msra.mxu1 %v15405_v58  ;;  %8647 = vmatprep.subr.bf16.mxu0 %v15410_v59  ;;  %v15486_v58 = vld [vmem:[%s17723_s21 + $0xbb0] ss:$48 sps:$4 sm:$0xff]   ;;  %v15489_v59 = vld [vmem:[%s17723_s21 + $0xbb8] ss:$48 sps:$4 sm:$0xff]  }
 0x7af   : > { %8729 = vmatprep.subr.bf16.mxu1 %v15413_v10  ;;  %v15494_v10 = vld [vmem:[%s17723_s21 + $0x24] ss:$48 sps:$4 sm:$0xff]  }
 0x7b1   : > { %8648 = vmatpush1.bf16.msra.mxu0 %v15408_v11  ;;  %v15497_v11 = vld [vmem:[%s17723_s21 + $0x2c] ss:$48 sps:$4 sm:$0xff]  }
 0x7b2   : > { %8730 = vmatpush1.bf16.msra.mxu1 %v15411_v12  ;;  %8649 = vmatprep.subr.bf16.mxu0 %v15416_v13  ;;  %v15492_v12 = vld [vmem:[%s17723_s21 + $0x20] ss:$48 sps:$4 sm:$0xff]   ;;  %v15495_v13 = vld [vmem:[%s17723_s21 + $0x28] ss:$48 sps:$4 sm:$0xff]  }
 0x7b3   : > { %8731 = vmatprep.subr.bf16.mxu1 %v15419_v14  ;;  %v15500_v14 = vld [vmem:[%s17723_s21 + $0x84] ss:$48 sps:$4 sm:$0xff]  }
 0x7b5   : > { %8650 = vmatpush1.bf16.msra.mxu0 %v15414_v15  ;;  %v15503_v15 = vld [vmem:[%s17723_s21 + $0x8c] ss:$48 sps:$4 sm:$0xff]  }
 0x7b6   : > { %8732 = vmatpush1.bf16.msra.mxu1 %v15417_v56  ;;  %8651 = vmatprep.subr.bf16.mxu0 %v15422_v16  ;;  %v15498_v56 = vld [vmem:[%s17723_s21 + $0x80] ss:$48 sps:$4 sm:$0xff]   ;;  %v15501_v16 = vld [vmem:[%s17723_s21 + $0x88] ss:$48 sps:$4 sm:$0xff]  }
 0x7b7   : > { %8733 = vmatprep.subr.bf16.mxu1 %v15425_v17  ;;  %v15506_v17 = vld [vmem:[%s17723_s21 + $0xe4] ss:$48 sps:$4 sm:$0xff]  }
 0x7b9   : > { %8652 = vmatpush1.bf16.msra.mxu0 %v15420_v18  ;;  %v15509_v18 = vld [vmem:[%s17723_s21 + $0xec] ss:$48 sps:$4 sm:$0xff]  }
 0x7ba   : > { %8734 = vmatpush1.bf16.msra.mxu1 %v15423_v20  ;;  %8653 = vmatprep.subr.bf16.mxu0 %v15428_v25  ;;  %v15504_v20 = vld [vmem:[%s17723_s21 + $0xe0] ss:$48 sps:$4 sm:$0xff]   ;;  %v15507_v25 = vld [vmem:[%s17723_s21 + $0xe8] ss:$48 sps:$4 sm:$0xff]  }
 0x7bb   : > { %8735 = vmatprep.subr.bf16.mxu1 %v15431_v60  ;;  %v15512_v60 = vld [vmem:[%s17723_s21 + $0x144] ss:$48 sps:$4 sm:$0xff]  }
 0x7bd   : > { %8654 = vmatpush1.bf16.msra.mxu0 %v15426_v27  ;;  %v15515_v27 = vld [vmem:[%s17723_s21 + $0x14c] ss:$48 sps:$4 sm:$0xff]  }
 0x7be   : > { %8736 = vmatpush1.bf16.msra.mxu1 %v15429_v28  ;;  %8655 = vmatprep.subr.bf16.mxu0 %v15434_v30  ;;  %v15513_v28 = vld [vmem:[%s17723_s21 + $0x148] ss:$48 sps:$4 sm:$0xff]   ;;  %v15518_v30 = vld [vmem:[%s17723_s21 + $0x1a4] ss:$48 sps:$4 sm:$0xff]  }
 0x7bf   : > { %8737 = vmatprep.subr.bf16.mxu1 %v15437_v31  ;;  %v15521_v31 = vld [vmem:[%s17723_s21 + $0x1ac] ss:$48 sps:$4 sm:$0xff]  }
 0x7c1   : > { %8656 = vmatpush1.bf16.msra.mxu0 %v15432_v33  ;;  %v15516_v33 = vld [vmem:[%s17723_s21 + $0x1a0] ss:$48 sps:$4 sm:$0xff]  }
 0x7c2   : > { %8738 = vmatpush1.bf16.msra.mxu1 %v15435_v34  ;;  %8657 = vmatprep.subr.bf16.mxu0 %v15440_v35  ;;  %v15519_v34 = vld [vmem:[%s17723_s21 + $0x1a8] ss:$48 sps:$4 sm:$0xff]   ;;  %v15524_v35 = vld [vmem:[%s17723_s21 + $0x204] ss:$48 sps:$4 sm:$0xff]  }
 0x7c3   : > { %8739 = vmatprep.subr.bf16.mxu1 %v15443_v36  ;;  %v15527_v36 = vld [vmem:[%s17723_s21 + $0x20c] ss:$48 sps:$4 sm:$0xff]  }
 0x7c5   : > { %8658 = vmatpush1.bf16.msra.mxu0 %v15438_v37  ;;  %v15522_v37 = vld [vmem:[%s17723_s21 + $0x200] ss:$48 sps:$4 sm:$0xff]  }
 0x7c6   : > { %8740 = vmatpush1.bf16.msra.mxu1 %v15441_v38  ;;  %8659 = vmatprep.subr.bf16.mxu0 %v15446_v39  ;;  %v15525_v38 = vld [vmem:[%s17723_s21 + $0x208] ss:$48 sps:$4 sm:$0xff]   ;;  %v15530_v39 = vld [vmem:[%s17723_s21 + $0x264] ss:$48 sps:$4 sm:$0xff]  }
 0x7c7   : > { %8741 = vmatprep.subr.bf16.mxu1 %v15449_v40  ;;  %v15533_v40 = vld [vmem:[%s17723_s21 + $0x26c] ss:$48 sps:$4 sm:$0xff]  }
 0x7c9   : > { %8660 = vmatpush1.bf16.msra.mxu0 %v15444_v6  ;;  %v15528_v6 = vld [vmem:[%s17723_s21 + $0x260] ss:$48 sps:$4 sm:$0xff]  }
 0x7ca   : > { %8742 = vmatpush1.bf16.msra.mxu1 %v15447_v41  ;;  %8661 = vmatprep.subr.bf16.mxu0 %v15452_v42  ;;  %v15531_v41 = vld [vmem:[%s17723_s21 + $0x268] ss:$48 sps:$4 sm:$0xff]   ;;  %v15536_v42 = vld [vmem:[%s17723_s21 + $0x2c4] ss:$48 sps:$4 sm:$0xff]  }
 0x7cb   : > { %8743 = vmatprep.subr.bf16.mxu1 %v15455_v43  ;;  %v15539_v43 = vld [vmem:[%s17723_s21 + $0x2cc] ss:$48 sps:$4 sm:$0xff]  }
 0x7cd   : > { %8662 = vmatpush1.bf16.msra.mxu0 %v15450_v44  ;;  %v15534_v44 = vld [vmem:[%s17723_s21 + $0x2c0] ss:$48 sps:$4 sm:$0xff]  }
 0x7ce   : > { %8744 = vmatpush1.bf16.msra.mxu1 %v15453_v45  ;;  %8663 = vmatprep.subr.bf16.mxu0 %v15458_v46  ;;  %v15537_v45 = vld [vmem:[%s17723_s21 + $0x2c8] ss:$48 sps:$4 sm:$0xff]   ;;  %v15542_v46 = vld [vmem:[%s17723_s21 + $0x324] ss:$48 sps:$4 sm:$0xff]  }
 0x7cf   : > { %8745 = vmatprep.subr.bf16.mxu1 %v15461_v47  ;;  %v15545_v47 = vld [vmem:[%s17723_s21 + $0x32c] ss:$48 sps:$4 sm:$0xff]  }
 0x7d1   : > { %8664 = vmatpush1.bf16.msra.mxu0 %v15456_v48  ;;  %v15540_v48 = vld [vmem:[%s17723_s21 + $0x320] ss:$48 sps:$4 sm:$0xff]  }
 0x7d2   : > { %8746 = vmatpush1.bf16.msra.mxu1 %v15459_v49  ;;  %8665 = vmatprep.subr.bf16.mxu0 %v15464_v50  ;;  %v15543_v49 = vld [vmem:[%s17723_s21 + $0x328] ss:$48 sps:$4 sm:$0xff]   ;;  %v15548_v50 = vld [vmem:[%s17723_s21 + $0x384] ss:$48 sps:$4 sm:$0xff]  }
 0x7d3   : > { %8747 = vmatprep.subr.bf16.mxu1 %v15467_v51  ;;  %v15551_v51 = vld [vmem:[%s17723_s21 + $0x38c] ss:$48 sps:$4 sm:$0xff]  }
 0x7d5   : > { %8666 = vmatpush1.bf16.msra.mxu0 %v15462_v52  ;;  %v15546_v52 = vld [vmem:[%s17723_s21 + $0x380] ss:$48 sps:$4 sm:$0xff]  }
 0x7d6   : > { %8748 = vmatpush1.bf16.msra.mxu1 %v15465_v53  ;;  %8667 = vmatprep.subr.bf16.mxu0 %v15470_v55  ;;  %v15549_v53 = vld [vmem:[%s17723_s21 + $0x388] ss:$48 sps:$4 sm:$0xff]   ;;  %v15554_v55 = vld [vmem:[%s17723_s21 + $0x3e4] ss:$48 sps:$4 sm:$0xff]  }
 0x7d7   : > { %8749 = vmatprep.subr.bf16.mxu1 %v15473_v32  ;;  %v15557_v32 = vld [vmem:[%s17723_s21 + $0x3ec] ss:$48 sps:$4 sm:$0xff]  }
 0x7d9   : > { %8668 = vmatpush1.bf16.msra.mxu0 %v15468_v61  ;;  %v15552_v61 = vld [vmem:[%s17723_s21 + $0x3e0] ss:$48 sps:$4 sm:$0xff]  }
 0x7da   : > { %8750 = vmatpush1.bf16.msra.mxu1 %v15471_v62  ;;  %8669 = vmatprep.subr.bf16.mxu0 %v15476_v63  ;;  %v15555_v62 = vld [vmem:[%s17723_s21 + $0x3e8] ss:$48 sps:$4 sm:$0xff]   ;;  %v15560_v63 = vld [vmem:[%s17723_s21 + $0x444] ss:$48 sps:$4 sm:$0xff]  }
 0x7db   : > { %8751 = vmatprep.subr.bf16.mxu1 %v15479_v0  ;;  %v15563_v0 = vld [vmem:[%s17723_s21 + $0x44c] ss:$48 sps:$4 sm:$0xff]  }
 0x7dd   : > { %8670 = vmatpush1.bf16.msra.mxu0 %v15474_v1  ;;  %v15558_v1 = vld [vmem:[%s17723_s21 + $0x440] ss:$48 sps:$4 sm:$0xff]  }
 0x7de   : > { %8752 = vmatpush1.bf16.msra.mxu1 %v15477_v2  ;;  %8671 = vmatprep.subr.bf16.mxu0 %v15482_v3  ;;  %v15561_v2 = vld [vmem:[%s17723_s21 + $0x448] ss:$48 sps:$4 sm:$0xff]   ;;  %v15566_v3 = vld [vmem:[%s17723_s21 + $0x4a4] ss:$48 sps:$4 sm:$0xff]  }
 0x7df   : > { %8753 = vmatprep.subr.bf16.mxu1 %v15485_v4  ;;  %v15569_v4 = vld [vmem:[%s17723_s21 + $0x4ac] ss:$48 sps:$4 sm:$0xff]  }
 0x7e1   : > { %8672 = vmatpush1.bf16.msra.mxu0 %v15480_v5  ;;  %v15564_v5 = vld [vmem:[%s17723_s21 + $0x4a0] ss:$48 sps:$4 sm:$0xff]  }
 0x7e2   : > { %8754 = vmatpush1.bf16.msra.mxu1 %v15483_v7  ;;  %8673 = vmatprep.subr.bf16.mxu0 %v15488_v8  ;;  %v15567_v7 = vld [vmem:[%s17723_s21 + $0x4a8] ss:$48 sps:$4 sm:$0xff]   ;;  %v15572_v8 = vld [vmem:[%s17723_s21 + $0x504] ss:$48 sps:$4 sm:$0xff]  }
 0x7e3   : > { %8755 = vmatprep.subr.bf16.mxu1 %v15491_v9  ;;  %v15575_v9 = vld [vmem:[%s17723_s21 + $0x50c] ss:$48 sps:$4 sm:$0xff]  }
 0x7e5   : > { %8674 = vmatpush1.bf16.msra.mxu0 %v15486_v58  ;;  %v15570_v58 = vld [vmem:[%s17723_s21 + $0x500] ss:$48 sps:$4 sm:$0xff]  }
 0x7e6   : > { %8756 = vmatpush1.bf16.msra.mxu1 %v15489_v59  ;;  %8766 = vmatprep.subr.bf16.mxu0 %v15494_v10  ;;  %v15573_v59 = vld [vmem:[%s17723_s21 + $0x508] ss:$48 sps:$4 sm:$0xff]   ;;  %v15578_v10 = vld [vmem:[%s17723_s21 + $0x564] ss:$48 sps:$4 sm:$0xff]  }
 0x7e7   : > { %8848 = vmatprep.subr.bf16.mxu1 %v15497_v11  ;;  %v15581_v11 = vld [vmem:[%s17723_s21 + $0x56c] ss:$48 sps:$4 sm:$0xff]  }
 0x7e8   : > { %8676 = vmatmul.mubr.bf16.vlgmr.msra.gmra.mrb[24].mxu0 %v18627_v57 }
 0x7e9   : > { %8758 = vmatmul.mubr.bf16.vlgmr.msra.gmra.mrb[24].mxu1 %v18627_v57  ;;  %8767 = vmatpush1.bf16.msra.mxu0 %v15492_v12  ;;  %v15576_v12 = vld [vmem:[%s17723_s21 + $0x560] ss:$48 sps:$4 sm:$0xff]  }
 0x7ea   : > { %8798 = vmatprep.mubr.bf16.mxu0 %v18546_v26  ;;  %8849 = vmatpush1.bf16.msra.mxu1 %v15495_v13  ;;  %v15579_v13 = vld [vmem:[%s17723_s21 + $0x568] ss:$48 sps:$4 sm:$0xff]  }
 0x7eb   : > { %8880 = vmatprep.mubr.bf16.mxu1 %v18546_v26  ;;  %8768 = vmatprep.subr.bf16.mxu0 %v15500_v14  ;;  %v15510_v26 = vld [vmem:[%s17723_s21 + $0x140] ss:$48 sps:$4 sm:$0xff]   ;;  %v15584_v14 = vld [vmem:[%s17723_s21 + $0x5c4] ss:$48 sps:$4 sm:$0xff]  }
 0x7ec   : > { %8850 = vmatprep.subr.bf16.mxu1 %v15503_v15  ;;  %v15587_v15 = vld [vmem:[%s17723_s21 + $0x5cc] ss:$48 sps:$4 sm:$0xff]  }
 0x7ed   : > { %8769 = vmatpush1.bf16.msra.mxu0 %v15498_v56  ;;  %v15582_v56 = vld [vmem:[%s17723_s21 + $0x5c0] ss:$48 sps:$4 sm:$0xff]  }
 0x7ee   : > { %8851 = vmatpush1.bf16.msra.mxu1 %v15501_v16  ;;  %8770 = vmatprep.subr.bf16.mxu0 %v15506_v17  ;;  %v15585_v16 = vld [vmem:[%s17723_s21 + $0x5c8] ss:$48 sps:$4 sm:$0xff]   ;;  %v15590_v17 = vld [vmem:[%s17723_s21 + $0x624] ss:$48 sps:$4 sm:$0xff]  }
 0x7ef   : > { %8852 = vmatprep.subr.bf16.mxu1 %v15509_v18  ;;  %v15593_v18 = vld [vmem:[%s17723_s21 + $0x62c] ss:$48 sps:$4 sm:$0xff]  }
 0x7f1   : > { %8771 = vmatpush1.bf16.msra.mxu0 %v15504_v20  ;;  %v15588_v20 = vld [vmem:[%s17723_s21 + $0x620] ss:$48 sps:$4 sm:$0xff]  }
 0x7f2   : > { %8853 = vmatpush1.bf16.msra.mxu1 %v15507_v25  ;;  %8772 = vmatprep.subr.bf16.mxu0 %v15512_v60  ;;  %v15591_v25 = vld [vmem:[%s17723_s21 + $0x628] ss:$48 sps:$4 sm:$0xff]   ;;  %v15596_v60 = vld [vmem:[%s17723_s21 + $0x684] ss:$48 sps:$4 sm:$0xff]  }
 0x7f3   : > { %8854 = vmatprep.subr.bf16.mxu1 %v15515_v27  ;;  %v15599_v27 = vld [vmem:[%s17723_s21 + $0x68c] ss:$48 sps:$4 sm:$0xff]  }
 0x7f5   : > { %8773 = vmatpush1.bf16.msra.mxu0 %v15510_v26  ;;  %v15594_v26 = vld [vmem:[%s17723_s21 + $0x680] ss:$48 sps:$4 sm:$0xff]  }
 0x7f6   : > { %8855 = vmatpush1.bf16.msra.mxu1 %v15513_v28  ;;  %8774 = vmatprep.subr.bf16.mxu0 %v15518_v30  ;;  %v15597_v28 = vld [vmem:[%s17723_s21 + $0x688] ss:$48 sps:$4 sm:$0xff]   ;;  %v15602_v30 = vld [vmem:[%s17723_s21 + $0x6e4] ss:$48 sps:$4 sm:$0xff]  }
 0x7f7   : > { %8856 = vmatprep.subr.bf16.mxu1 %v15521_v31  ;;  %v15605_v31 = vld [vmem:[%s17723_s21 + $0x6ec] ss:$48 sps:$4 sm:$0xff]  }
 0x7f9   : > { %8775 = vmatpush1.bf16.msra.mxu0 %v15516_v33  ;;  %v15603_v33 = vld [vmem:[%s17723_s21 + $0x6e8] ss:$48 sps:$4 sm:$0xff]  }
 0x7fa   : > { %8857 = vmatpush1.bf16.msra.mxu1 %v15519_v34  ;;  %8776 = vmatprep.subr.bf16.mxu0 %v15524_v35  ;;  %v15608_v34 = vld [vmem:[%s17723_s21 + $0x744] ss:$48 sps:$4 sm:$0xff]   ;;  %v15611_v35 = vld [vmem:[%s17723_s21 + $0x74c] ss:$48 sps:$4 sm:$0xff]  }
 0x7fb   : > { %8858 = vmatprep.subr.bf16.mxu1 %v15527_v36  ;;  %v15609_v36 = vld [vmem:[%s17723_s21 + $0x748] ss:$48 sps:$4 sm:$0xff]  }
 0x7fd   : > { %8777 = vmatpush1.bf16.msra.mxu0 %v15522_v37  ;;  %v15614_v37 = vld [vmem:[%s17723_s21 + $0x7a4] ss:$48 sps:$4 sm:$0xff]  }
 0x7fe   : > { %8859 = vmatpush1.bf16.msra.mxu1 %v15525_v38  ;;  %8778 = vmatprep.subr.bf16.mxu0 %v15530_v39  ;;  %v15617_v38 = vld [vmem:[%s17723_s21 + $0x7ac] ss:$48 sps:$4 sm:$0xff]   ;;  %v15612_v39 = vld [vmem:[%s17723_s21 + $0x7a0] ss:$48 sps:$4 sm:$0xff]  }
 0x7ff   : > { %8860 = vmatprep.subr.bf16.mxu1 %v15533_v40  ;;  %v15615_v40 = vld [vmem:[%s17723_s21 + $0x7a8] ss:$48 sps:$4 sm:$0xff]  }
 0x801   : > { %8779 = vmatpush1.bf16.msra.mxu0 %v15528_v6  ;;  %v15620_v6 = vld [vmem:[%s17723_s21 + $0x804] ss:$48 sps:$4 sm:$0xff]  }
 0x802   : > { %8861 = vmatpush1.bf16.msra.mxu1 %v15531_v41  ;;  %8780 = vmatprep.subr.bf16.mxu0 %v15536_v42  ;;  %v15623_v41 = vld [vmem:[%s17723_s21 + $0x80c] ss:$48 sps:$4 sm:$0xff]   ;;  %v15618_v42 = vld [vmem:[%s17723_s21 + $0x800] ss:$48 sps:$4 sm:$0xff]  }
 0x803   : > { %8862 = vmatprep.subr.bf16.mxu1 %v15539_v43  ;;  %v15621_v43 = vld [vmem:[%s17723_s21 + $0x808] ss:$48 sps:$4 sm:$0xff]  }
 0x805   : > { %8781 = vmatpush1.bf16.msra.mxu0 %v15534_v44  ;;  %v15626_v44 = vld [vmem:[%s17723_s21 + $0x864] ss:$48 sps:$4 sm:$0xff]  }
 0x806   : > { %8863 = vmatpush1.bf16.msra.mxu1 %v15537_v45  ;;  %8782 = vmatprep.subr.bf16.mxu0 %v15542_v46 }
 0x807   : > { %8864 = vmatprep.subr.bf16.mxu1 %v15545_v47  ;;  %v15629_v47 = vld [vmem:[%s17723_s21 + $0x86c] ss:$48 sps:$4 sm:$0xff]  }
 0x809   : > { %8783 = vmatpush1.bf16.msra.mxu0 %v15540_v48 }
 0x80a   : > { %8865 = vmatpush1.bf16.msra.mxu1 %v15543_v49  ;;  %8784 = vmatprep.subr.bf16.mxu0 %v15548_v50 }
 0x80b   : > { %8866 = vmatprep.subr.bf16.mxu1 %v15551_v51 }
 0x80d   : > { %8785 = vmatpush1.bf16.msra.mxu0 %v15546_v52  ;;  %v15624_v52 = vld [vmem:[%s17723_s21 + $0x860] ss:$48 sps:$4 sm:$0xff]  }
 0x80e   : > { %8867 = vmatpush1.bf16.msra.mxu1 %v15549_v53  ;;  %8786 = vmatprep.subr.bf16.mxu0 %v15554_v55 }
 0x80f   : > { %8868 = vmatprep.subr.bf16.mxu1 %v15557_v32  ;;  %v15627_v32 = vld [vmem:[%s17723_s21 + $0x868] ss:$48 sps:$4 sm:$0xff]  }
 0x811   : > { %8787 = vmatpush1.bf16.msra.mxu0 %v15552_v61  ;;  %v15632_v61 = vld [vmem:[%s17723_s21 + $0x8c4] ss:$48 sps:$4 sm:$0xff]  }
 0x812   : > { %8869 = vmatpush1.bf16.msra.mxu1 %v15555_v62  ;;  %8788 = vmatprep.subr.bf16.mxu0 %v15560_v63  ;;  %v15635_v62 = vld [vmem:[%s17723_s21 + $0x8cc] ss:$48 sps:$4 sm:$0xff]   ;;  %v15630_v63 = vld [vmem:[%s17723_s21 + $0x8c0] ss:$48 sps:$4 sm:$0xff]  }
 0x813   : > { %8870 = vmatprep.subr.bf16.mxu1 %v15563_v0  ;;  %v15633_v0 = vld [vmem:[%s17723_s21 + $0x8c8] ss:$48 sps:$4 sm:$0xff]  }
 0x815   : > { %8789 = vmatpush1.bf16.msra.mxu0 %v15558_v1  ;;  %v15638_v1 = vld [vmem:[%s17723_s21 + $0x924] ss:$48 sps:$4 sm:$0xff]  }
 0x816   : > { %8871 = vmatpush1.bf16.msra.mxu1 %v15561_v2  ;;  %8790 = vmatprep.subr.bf16.mxu0 %v15566_v3  ;;  %v15641_v2 = vld [vmem:[%s17723_s21 + $0x92c] ss:$48 sps:$4 sm:$0xff]   ;;  %v15636_v3 = vld [vmem:[%s17723_s21 + $0x920] ss:$48 sps:$4 sm:$0xff]  }
 0x817   : > { %8872 = vmatprep.subr.bf16.mxu1 %v15569_v4  ;;  %v15639_v4 = vld [vmem:[%s17723_s21 + $0x928] ss:$48 sps:$4 sm:$0xff]  }
 0x819   : > { %8791 = vmatpush1.bf16.msra.mxu0 %v15564_v5  ;;  %v15644_v5 = vld [vmem:[%s17723_s21 + $0x984] ss:$48 sps:$4 sm:$0xff]  }
 0x81a   : > { %8873 = vmatpush1.bf16.msra.mxu1 %v15567_v7  ;;  %8792 = vmatprep.subr.bf16.mxu0 %v15572_v8  ;;  %v15647_v7 = vld [vmem:[%s17723_s21 + $0x98c] ss:$48 sps:$4 sm:$0xff]   ;;  %v15642_v8 = vld [vmem:[%s17723_s21 + $0x980] ss:$48 sps:$4 sm:$0xff]  }
 0x81b   : > { %8874 = vmatprep.subr.bf16.mxu1 %v15575_v9  ;;  %v15645_v9 = vld [vmem:[%s17723_s21 + $0x988] ss:$48 sps:$4 sm:$0xff]  }
 0x81d   : > { %8793 = vmatpush1.bf16.msra.mxu0 %v15570_v58  ;;  %v15650_v58 = vld [vmem:[%s17723_s21 + $0x9e4] ss:$48 sps:$4 sm:$0xff]  }
 0x81e   : > { %8875 = vmatpush1.bf16.msra.mxu1 %v15573_v59  ;;  %8794 = vmatprep.subr.bf16.mxu0 %v15578_v10  ;;  %v15653_v59 = vld [vmem:[%s17723_s21 + $0x9ec] ss:$48 sps:$4 sm:$0xff]   ;;  %v15648_v10 = vld [vmem:[%s17723_s21 + $0x9e0] ss:$48 sps:$4 sm:$0xff]  }
 0x81f   : > { %8876 = vmatprep.subr.bf16.mxu1 %v15581_v11  ;;  %v15651_v11 = vld [vmem:[%s17723_s21 + $0x9e8] ss:$48 sps:$4 sm:$0xff]  }
 0x821   : > { %8795 = vmatpush1.bf16.msra.mxu0 %v15576_v12  ;;  %v15656_v12 = vld [vmem:[%s17723_s21 + $0xa44] ss:$48 sps:$4 sm:$0xff]  }
 0x822   : > { %8877 = vmatpush1.bf16.msra.mxu1 %v15579_v13  ;;  %8796 = vmatprep.subr.bf16.mxu0 %v15584_v14  ;;  %v15659_v13 = vld [vmem:[%s17723_s21 + $0xa4c] ss:$48 sps:$4 sm:$0xff]   ;;  %v15654_v14 = vld [vmem:[%s17723_s21 + $0xa40] ss:$48 sps:$4 sm:$0xff]  }
 0x823   : > { %8878 = vmatprep.subr.bf16.mxu1 %v15587_v15  ;;  %v15657_v15 = vld [vmem:[%s17723_s21 + $0xa48] ss:$48 sps:$4 sm:$0xff]  }
 0x825   : > { %8797 = vmatpush1.bf16.msra.mxu0 %v15582_v56  ;;  %v15662_v56 = vld [vmem:[%s17723_s21 + $0xaa4] ss:$48 sps:$4 sm:$0xff]  }
 0x826   : > { %8879 = vmatpush1.bf16.msra.mxu1 %v15585_v16  ;;  %8807 = vmatprep.subr.bf16.mxu0 %v15590_v17  ;;  %v15665_v16 = vld [vmem:[%s17723_s21 + $0xaac] ss:$48 sps:$4 sm:$0xff]   ;;  %v15660_v17 = vld [vmem:[%s17723_s21 + $0xaa0] ss:$48 sps:$4 sm:$0xff]  }
 0x827   : > { %8889 = vmatprep.subr.bf16.mxu1 %v15593_v18  ;;  %v15663_v18 = vld [vmem:[%s17723_s21 + $0xaa8] ss:$48 sps:$4 sm:$0xff]  }
 0x828   : > { %8799 = vmatmul.mubr.bf16.vlgmr.msra.gmra.mrb[28].mxu0 %v18550_v29 }
 0x829   : > { %8881 = vmatmul.mubr.bf16.vlgmr.msra.gmra.mrb[28].mxu1 %v18550_v29  ;;  %8808 = vmatpush1.bf16.msra.mxu0 %v15588_v20  ;;  %v15600_v29 = vld [vmem:[%s17723_s21 + $0x6e0] ss:$48 sps:$4 sm:$0xff]   ;;  %v15668_v20 = vld [vmem:[%s17723_s21 + $0xb04] ss:$48 sps:$4 sm:$0xff]  }
 0x82a   : > { %8839 = vmatprep.mubr.bf16.mxu0 %v18624_v54  ;;  %8890 = vmatpush1.bf16.msra.mxu1 %v15591_v25  ;;  %v15671_v25 = vld [vmem:[%s17723_s21 + $0xb0c] ss:$48 sps:$4 sm:$0xff]  }
 0x82b   : > { %8921 = vmatprep.mubr.bf16.mxu1 %v18624_v54  ;;  %8809 = vmatprep.subr.bf16.mxu0 %v15596_v60  ;;  %v15606_v54 = vld [vmem:[%s17723_s21 + $0x740] ss:$48 sps:$4 sm:$0xff]  }
 0x82c   : > { %8891 = vmatprep.subr.bf16.mxu1 %v15599_v27  ;;  %v18899_v60 = vld [vmem:[%s17730_s5] sm:$0xff] }
 0x82d   : > { %8810 = vmatpush1.bf16.msra.mxu0 %v15594_v26  ;;  %v15666_v27 = vld [vmem:[%s17723_s21 + $0xb00] ss:$48 sps:$4 sm:$0xff]   ;;  %v15669_v26 = vld [vmem:[%s17723_s21 + $0xb08] ss:$48 sps:$4 sm:$0xff]  }
 0x82e   : > { %8892 = vmatpush1.bf16.msra.mxu1 %v15597_v28  ;;  %8811 = vmatprep.subr.bf16.mxu0 %v15602_v30  ;;  %v15674_v28 = vld [vmem:[%s17723_s21 + $0xb64] ss:$48 sps:$4 sm:$0xff]   ;;  %v15677_v30 = vld [vmem:[%s17723_s21 + $0xb6c] ss:$48 sps:$4 sm:$0xff]  }
 0x82f   : > { %8893 = vmatprep.subr.bf16.mxu1 %v15605_v31  ;;  %v6465_v31 = vrot.slane %v18899_v60, %v18099_v23 }
 0x831   : > { %8812 = vmatpush1.bf16.msra.mxu0 %v15600_v29  ;;  %v15672_v29 = vld [vmem:[%s17723_s21 + $0xb60] ss:$48 sps:$4 sm:$0xff]  }
 0x832   : > { %8894 = vmatpush1.bf16.msra.mxu1 %v15603_v33  ;;  %8813 = vmatprep.subr.bf16.mxu0 %v15608_v34  ;;  %v15675_v33 = vld [vmem:[%s17723_s21 + $0xb68] ss:$48 sps:$4 sm:$0xff]   ;;  %v15680_v34 = vld [vmem:[%s17723_s21 + $0xbc4] ss:$48 sps:$4 sm:$0xff]  }
 0x833   : > { %8895 = vmatprep.subr.bf16.mxu1 %v15611_v35  ;;  %v15683_v35 = vld [vmem:[%s17723_s21 + $0xbcc] ss:$48 sps:$4 sm:$0xff]  }
 0x835   : > { %8814 = vmatpush1.bf16.msra.mxu0 %v15606_v54 }
 0x836   : > { %8896 = vmatpush1.bf16.msra.mxu1 %v15609_v36  ;;  %8815 = vmatprep.subr.bf16.mxu0 %v15614_v37  ;;  %v15678_v36 = vld [vmem:[%s17723_s21 + $0xbc0] ss:$48 sps:$4 sm:$0xff]   ;;  %v15681_v37 = vld [vmem:[%s17723_s21 + $0xbc8] ss:$48 sps:$4 sm:$0xff]   ;;  %s19375_s21 = sshll.u32 %s19635_s26, 9  ;;  %s16747_s26 = scalar_lea.vmem %s16746_s1, 1024 }
 0x837   : > { %8897 = vmatprep.subr.bf16.mxu1 %v15617_v38  ;;  %v15686_v38 = vld [vmem:[%s17734_s17 + $0x4] ss:$16 sps:$4 sm:$0xff]  }
 0x839   : > { %8816 = vmatpush1.bf16.msra.mxu0 %v15612_v39  ;;  %v15689_v39 = vld [vmem:[%s17734_s17 + $0xc] ss:$16 sps:$4 sm:$0xff]  }
 0x83a   : > { %8898 = vmatpush1.bf16.msra.mxu1 %v15615_v40  ;;  %8817 = vmatprep.subr.bf16.mxu0 %v15620_v6  ;;  %v15684_v6 = vld [vmem:[%s17734_s17] ss:$16 sps:$4 sm:$0xff]  }
 0x83b   : > { %v18861_v45 = vpop.f32.mrb[20].mxu0  ;;  %v18863_v46 = vpop.f32.mrb[20].mxu1  ;;  %8899 = vmatprep.subr.bf16.mxu1 %v15623_v41  ;;  %v15687_v41 = vld [vmem:[%s17734_s17 + $0x8] ss:$16 sps:$4 sm:$0xff]  }
 0x83c   : > { %v18866_v48 = vpop.f32.mrb[21].mxu0  ;;  %v18868_v49 = vpop.f32.mrb[21].mxu1 }
 0x83d   : > { %v8517_v50 = vpop.f32.mrb[22].mxu0  ;;  %v8599_v51 = vpop.f32.mrb[22].mxu1  ;;  %8818 = vmatpush1.bf16.msra.mxu0 %v15618_v42  ;;  %v13939_v54 = vadd.f32 %v18866_v48, %v6465_v31  ;;  %v15692_v42 = vld [vmem:[%s17734_s17 + $0x24] ss:$16 sps:$4 sm:$0xff]   ;;  %v15693_v48 = vld [vmem:[%s17734_s17 + $0x28] ss:$16 sps:$4 sm:$0xff]  }
 0x83e   : > { %8900 = vmatpush1.bf16.msra.mxu1 %v15621_v43  ;;  %v8518_v53 = vpop.f32.mrb[23].mxu0  ;;  %v8600_v55 = vpop.f32.mrb[23].mxu1  ;;  %8819 = vmatprep.subr.bf16.mxu0 %v15626_v44  ;;  %v15695_v44 = vld [vmem:[%s17734_s17 + $0x2c] ss:$16 sps:$4 sm:$0xff]   ;;  %v15698_v50 = vld [vmem:[%s17734_s17 + $0x44] ss:$16 sps:$4 sm:$0xff]  }
 0x83f   : > { %8901 = vmatprep.subr.bf16.mxu1 %v15629_v47  ;;  %v8931_v40 = vmax.f32 %v13939_v54, 0.0  ;;  %v15690_v47 = vld [vmem:[%s17734_s17 + $0x20] ss:$16 sps:$4 sm:$0xff]   ;;  %v15701_v51 = vld [vmem:[%s17734_s17 + $0x4c] ss:$16 sps:$4 sm:$0xff]  }
 0x840   : > { %v15704_v53 = vld [vmem:[%s17734_s17 + $0x64] ss:$16 sps:$4 sm:$0xff]   ;;  %v15707_v55 = vld [vmem:[%s17734_s17 + $0x6c] ss:$16 sps:$4 sm:$0xff]   ;;  %v15756_v54 = vld [vmem:[%s17734_s17 + $0x180] ss:$16 sps:$4 sm:$0xff]  }
 0x841   : > { %8820 = vmatpush1.bf16.msra.mxu0 %v15624_v52  ;;  %v8943_v43 = vpack.c.bf16 %v8931_v40, %v8931_v40  ;;  %v15696_v52 = vld [vmem:[%s17734_s17 + $0x40] ss:$16 sps:$4 sm:$0xff]   ;;  %v15755_v31 = vld [vmem:[%s17734_s17 + $0x16c] ss:$16 sps:$4 sm:$0xff]   ;;  %v6461_v40 = vrot.slane %v18899_v60, %v18093_v21 }
 0x842   : > { %8902 = vmatpush1.bf16.msra.mxu1 %v15627_v32  ;;  %8821 = vmatprep.subr.bf16.mxu0 %v15632_v61  ;;  %v15702_v32 = vld [vmem:[%s17734_s17 + $0x60] ss:$16 sps:$4 sm:$0xff]   ;;  %v15705_v61 = vld [vmem:[%s17734_s17 + $0x68] ss:$16 sps:$4 sm:$0xff]  }
 0x843   : > { %8903 = vmatprep.subr.bf16.mxu1 %v15635_v62  ;;  %v15710_v62 = vld [vmem:[%s17734_s17 + $0x84] ss:$16 sps:$4 sm:$0xff]  }
 0x845   : > { %8822 = vmatpush1.bf16.msra.mxu0 %v15630_v63  ;;  %v15713_v63 = vld [vmem:[%s17734_s17 + $0x8c] ss:$16 sps:$4 sm:$0xff]  }
 0x846   : > { %8904 = vmatpush1.bf16.msra.mxu1 %v15633_v0  ;;  %8823 = vmatprep.subr.bf16.mxu0 %v15638_v1  ;;  %v15708_v0 = vld [vmem:[%s17734_s17 + $0x80] ss:$16 sps:$4 sm:$0xff]   ;;  %v15711_v1 = vld [vmem:[%s17734_s17 + $0x88] ss:$16 sps:$4 sm:$0xff]  }
 0x847   : > { %8905 = vmatprep.subr.bf16.mxu1 %v15641_v2  ;;  %v15716_v2 = vld [vmem:[%s17734_s17 + $0xa4] ss:$16 sps:$4 sm:$0xff]  }
 0x849   : > { %8824 = vmatpush1.bf16.msra.mxu0 %v15636_v3  ;;  %v15719_v3 = vld [vmem:[%s17734_s17 + $0xac] ss:$16 sps:$4 sm:$0xff]  }
 0x84a   : > { %8906 = vmatpush1.bf16.msra.mxu1 %v15639_v4  ;;  %8825 = vmatprep.subr.bf16.mxu0 %v15644_v5  ;;  %v15714_v4 = vld [vmem:[%s17734_s17 + $0xa0] ss:$16 sps:$4 sm:$0xff]   ;;  %v15717_v5 = vld [vmem:[%s17734_s17 + $0xa8] ss:$16 sps:$4 sm:$0xff]  }
 0x84b   : > { %8907 = vmatprep.subr.bf16.mxu1 %v15647_v7  ;;  %v15722_v7 = vld [vmem:[%s17734_s17 + $0xc4] ss:$16 sps:$4 sm:$0xff]  }
 0x84d   : > { %8826 = vmatpush1.bf16.msra.mxu0 %v15642_v8  ;;  %v15725_v8 = vld [vmem:[%s17734_s17 + $0xcc] ss:$16 sps:$4 sm:$0xff]  }
 0x84e   : > { %8908 = vmatpush1.bf16.msra.mxu1 %v15645_v9  ;;  %8827 = vmatprep.subr.bf16.mxu0 %v15650_v58  ;;  %v15720_v9 = vld [vmem:[%s17734_s17 + $0xc0] ss:$16 sps:$4 sm:$0xff]   ;;  %v15723_v58 = vld [vmem:[%s17734_s17 + $0xc8] ss:$16 sps:$4 sm:$0xff]  }
 0x84f   : > { %8909 = vmatprep.subr.bf16.mxu1 %v15653_v59  ;;  %v15728_v59 = vld [vmem:[%s17734_s17 + $0xe4] ss:$16 sps:$4 sm:$0xff]  }
 0x851   : > { %8828 = vmatpush1.bf16.msra.mxu0 %v15648_v10  ;;  %v15731_v10 = vld [vmem:[%s17734_s17 + $0xec] ss:$16 sps:$4 sm:$0xff]  }
 0x852   : > { %8910 = vmatpush1.bf16.msra.mxu1 %v15651_v11  ;;  %8829 = vmatprep.subr.bf16.mxu0 %v15656_v12  ;;  %v15726_v11 = vld [vmem:[%s17734_s17 + $0xe0] ss:$16 sps:$4 sm:$0xff]   ;;  %v15729_v12 = vld [vmem:[%s17734_s17 + $0xe8] ss:$16 sps:$4 sm:$0xff]  }
 0x853   : > { %8911 = vmatprep.subr.bf16.mxu1 %v15659_v13  ;;  %v15734_v13 = vld [vmem:[%s17734_s17 + $0x104] ss:$16 sps:$4 sm:$0xff]  }
 0x855   : > { %8830 = vmatpush1.bf16.msra.mxu0 %v15654_v14  ;;  %v15737_v14 = vld [vmem:[%s17734_s17 + $0x10c] ss:$16 sps:$4 sm:$0xff]  }
 0x856   : > { %8912 = vmatpush1.bf16.msra.mxu1 %v15657_v15  ;;  %8831 = vmatprep.subr.bf16.mxu0 %v15662_v56  ;;  %v15732_v15 = vld [vmem:[%s17734_s17 + $0x100] ss:$16 sps:$4 sm:$0xff]   ;;  %v15735_v56 = vld [vmem:[%s17734_s17 + $0x108] ss:$16 sps:$4 sm:$0xff]  }
 0x857   : > { %8913 = vmatprep.subr.bf16.mxu1 %v15665_v16  ;;  %v15740_v16 = vld [vmem:[%s17734_s17 + $0x124] ss:$16 sps:$4 sm:$0xff]  }
 0x859   : > { %8832 = vmatpush1.bf16.msra.mxu0 %v15660_v17  ;;  %v15743_v17 = vld [vmem:[%s17734_s17 + $0x12c] ss:$16 sps:$4 sm:$0xff]  }
 0x85a   : > { %8914 = vmatpush1.bf16.msra.mxu1 %v15663_v18  ;;  %8833 = vmatprep.subr.bf16.mxu0 %v15668_v20  ;;  %v15738_v18 = vld [vmem:[%s17734_s17 + $0x120] ss:$16 sps:$4 sm:$0xff]   ;;  %v15741_v20 = vld [vmem:[%s17734_s17 + $0x128] ss:$16 sps:$4 sm:$0xff]  }
 0x85b   : > { %8915 = vmatprep.subr.bf16.mxu1 %v15671_v25  ;;  %v15746_v25 = vld [vmem:[%s17734_s17 + $0x144] ss:$16 sps:$4 sm:$0xff]  }
 0x85d   : > { %8834 = vmatpush1.bf16.msra.mxu0 %v15666_v27  ;;  %v15749_v27 = vld [vmem:[%s17734_s17 + $0x14c] ss:$16 sps:$4 sm:$0xff]  }
 0x85e   : > { %8916 = vmatpush1.bf16.msra.mxu1 %v15669_v26  ;;  %8835 = vmatprep.subr.bf16.mxu0 %v15674_v28  ;;  %v15744_v26 = vld [vmem:[%s17734_s17 + $0x140] ss:$16 sps:$4 sm:$0xff]   ;;  %v15747_v28 = vld [vmem:[%s17734_s17 + $0x148] ss:$16 sps:$4 sm:$0xff]  }
 0x85f   : > { %8917 = vmatprep.subr.bf16.mxu1 %v15677_v30  ;;  %v15752_v30 = vld [vmem:[%s17734_s17 + $0x164] ss:$16 sps:$4 sm:$0xff]  }
 0x861   : > { %8836 = vmatpush1.bf16.msra.mxu0 %v15672_v29  ;;  %v15750_v29 = vld [vmem:[%s17734_s17 + $0x160] ss:$16 sps:$4 sm:$0xff]  }
 0x862   : > { %8918 = vmatpush1.bf16.msra.mxu1 %v15675_v33  ;;  %8837 = vmatprep.subr.bf16.mxu0 %v15680_v34  ;;  %v15753_v33 = vld [vmem:[%s17734_s17 + $0x168] ss:$16 sps:$4 sm:$0xff]   ;;  %v15758_v34 = vld [vmem:[%s17734_s17 + $0x184] ss:$16 sps:$4 sm:$0xff]  }
 0x863   : > { %8919 = vmatprep.subr.bf16.mxu1 %v15683_v35  ;;  %v15761_v35 = vld [vmem:[%s17734_s17 + $0x18c] ss:$16 sps:$4 sm:$0xff]  }
 0x865   : > { %8838 = vmatpush1.bf16.msra.mxu0 %v15678_v36  ;;  %v15759_v36 = vld [vmem:[%s17734_s17 + $0x188] ss:$16 sps:$4 sm:$0xff]  }
 0x866   : > { %8920 = vmatpush1.bf16.msra.mxu1 %v15681_v37  ;;  %9736 = vmatprep.subr.bf16.mxu0 %v15686_v38  ;;  %v15764_v37 = vld [vmem:[%s17734_s17 + $0x1a4] ss:$16 sps:$4 sm:$0xff]   ;;  %v15767_v38 = vld [vmem:[%s17734_s17 + $0x1ac] ss:$16 sps:$4 sm:$0xff]  }
 0x867   : > { %9818 = vmatprep.subr.bf16.mxu1 %v15689_v39  ;;  %v15762_v39 = vld [vmem:[%s17734_s17 + $0x1a0] ss:$16 sps:$4 sm:$0xff]  }
 0x868   : > { %8840 = vmatmul.mubr.bf16.vlgmr.msra.gmra.mrb[28].mxu0 %v18627_v57 }
 0x869   : > { %8922 = vmatmul.mubr.bf16.vlgmr.msra.gmra.mrb[28].mxu1 %v18627_v57  ;;  %9737 = vmatpush1.bf16.msra.mxu0 %v15684_v6  ;;  %v15699_v57 = vld [vmem:[%s17734_s17 + $0x48] ss:$16 sps:$4 sm:$0xff]  }
 0x86a   : > { %9768 = vmatprep.mubr.bf16.mxu0 %v8943_v43  ;;  %9819 = vmatpush1.bf16.msra.mxu1 %v15687_v41  ;;  %v15765_v6 = vld [vmem:[%s17734_s17 + $0x1a8] ss:$16 sps:$4 sm:$0xff]   ;;  %v15770_v41 = vld [vmem:[%s17734_s17 + $0x1c4] ss:$16 sps:$4 sm:$0xff]  }
 0x86b   : > { %9850 = vmatprep.mubr.bf16.mxu1 %v8943_v43  ;;  %9738 = vmatprep.subr.bf16.mxu0 %v15692_v42  ;;  %v15773_v42 = vld [vmem:[%s17734_s17 + $0x1cc] ss:$16 sps:$4 sm:$0xff]   ;;  %v6473_v43 = vrot.slane %v18899_v60, %v18102_v24 }
 0x86c   : > { %9820 = vmatprep.subr.bf16.mxu1 %v15695_v44  ;;  %v15768_v44 = vld [vmem:[%s17734_s17 + $0x1c0] ss:$16 sps:$4 sm:$0xff]  }
 0x86d   : > { %9739 = vmatpush1.bf16.msra.mxu0 %v15690_v47  ;;  %v13938_v47 = vadd.f32 %v18861_v45, %v6461_v40  ;;  %v15782_v45 = vld [vmem:[%s17734_s17 + $0x204] ss:$16 sps:$4 sm:$0xff]  }
 0x86e   : > { %9821 = vmatpush1.bf16.msra.mxu1 %v15693_v48  ;;  %9740 = vmatprep.subr.bf16.mxu0 %v15698_v50  ;;  %v15771_v48 = vld [vmem:[%s17734_s17 + $0x1c8] ss:$16 sps:$4 sm:$0xff]   ;;  %v15776_v50 = vld [vmem:[%s17734_s17 + $0x1e4] ss:$16 sps:$4 sm:$0xff]  }
 0x86f   : > { %9822 = vmatprep.subr.bf16.mxu1 %v15701_v51  ;;  %v15779_v51 = vld [vmem:[%s17734_s17 + $0x1ec] ss:$16 sps:$4 sm:$0xff]   ;;  %v15830_v40 = vld [vmem:[%s17734_s17 + $0x304] ss:$16 sps:$4 sm:$0xff]  }
 0x871   : > { %9741 = vmatpush1.bf16.msra.mxu0 %v15696_v52  ;;  %v13941_v52 = vadd.f32 %v18868_v49, %v6473_v43  ;;  %v15783_v49 = vld [vmem:[%s17734_s17 + $0x208] ss:$16 sps:$4 sm:$0xff]   ;;  %v15836_v43 = vld [vmem:[%s17734_s17 + $0x324] ss:$16 sps:$4 sm:$0xff]  }
 0x872   : > { %9823 = vmatpush1.bf16.msra.mxu1 %v15699_v57  ;;  %9742 = vmatprep.subr.bf16.mxu0 %v15704_v53  ;;  %v15774_v57 = vld [vmem:[%s17734_s17 + $0x1e0] ss:$16 sps:$4 sm:$0xff]   ;;  %v8930_v53 = vmax.f32 %v13938_v47, 0.0 }
 0x873   : > { %9824 = vmatprep.subr.bf16.mxu1 %v15707_v55  ;;  %v15777_v55 = vld [vmem:[%s17734_s17 + $0x1e8] ss:$16 sps:$4 sm:$0xff]   ;;  %v15834_v47 = vld [vmem:[%s17734_s17 + $0x320] ss:$16 sps:$4 sm:$0xff]  }
 0x875   : > { %9743 = vmatpush1.bf16.msra.mxu0 %v15702_v32  ;;  %v15785_v32 = vld [vmem:[%s17734_s17 + $0x20c] ss:$16 sps:$4 sm:$0xff]  }
 0x876   : > { %9825 = vmatpush1.bf16.msra.mxu1 %v15705_v61  ;;  %9744 = vmatprep.subr.bf16.mxu0 %v15710_v62  ;;  %v8933_v61 = vmax.f32 %v13941_v52, 0.0  ;;  %v15780_v62 = vld [vmem:[%s17734_s17 + $0x200] ss:$16 sps:$4 sm:$0xff]  }
 0x877   : > { %9826 = vmatprep.subr.bf16.mxu1 %v15713_v63  ;;  %v8942_v63 = vpack.c.bf16 %v8930_v53, %v8930_v53  ;;  %v15840_v52 = vld [vmem:[%s17734_s17 + $0x340] ss:$16 sps:$4 sm:$0xff]   ;;  %v15848_v53 = vld [vmem:[%s17734_s17 + $0x364] ss:$16 sps:$4 sm:$0xff]  }
 0x879   : > { %9745 = vmatpush1.bf16.msra.mxu0 %v15708_v0  ;;  %v15788_v0 = vld [vmem:[%s17734_s17 + $0x224] ss:$16 sps:$4 sm:$0xff]  }
 0x87a   : > { %9827 = vmatpush1.bf16.msra.mxu1 %v15711_v1  ;;  %9746 = vmatprep.subr.bf16.mxu0 %v15716_v2  ;;  %v8945_v1 = vpack.c.bf16 %v8933_v61, %v8933_v61  ;;  %v15791_v2 = vld [vmem:[%s17734_s17 + $0x22c] ss:$16 sps:$4 sm:$0xff]   ;;  %v15854_v61 = vld [vmem:[%s17734_s17 + $0x384] ss:$16 sps:$4 sm:$0xff]  }
 0x87b   : > { %9828 = vmatprep.subr.bf16.mxu1 %v15719_v3  ;;  %v15786_v3 = vld [vmem:[%s17734_s17 + $0x220] ss:$16 sps:$4 sm:$0xff]  }
 0x87d   : > { %9747 = vmatpush1.bf16.msra.mxu0 %v15714_v4  ;;  %v15789_v4 = vld [vmem:[%s17734_s17 + $0x228] ss:$16 sps:$4 sm:$0xff]  }
 0x87e   : > { %9829 = vmatpush1.bf16.msra.mxu1 %v15717_v5  ;;  %9748 = vmatprep.subr.bf16.mxu0 %v15722_v7  ;;  %v15794_v5 = vld [vmem:[%s17734_s17 + $0x244] ss:$16 sps:$4 sm:$0xff]   ;;  %v15797_v7 = vld [vmem:[%s17734_s17 + $0x24c] ss:$16 sps:$4 sm:$0xff]  }
 0x87f   : > { %9830 = vmatprep.subr.bf16.mxu1 %v15725_v8  ;;  %v15792_v8 = vld [vmem:[%s17734_s17 + $0x240] ss:$16 sps:$4 sm:$0xff]  }
 0x881   : > { %9749 = vmatpush1.bf16.msra.mxu0 %v15720_v9  ;;  %v15795_v9 = vld [vmem:[%s17734_s17 + $0x248] ss:$16 sps:$4 sm:$0xff]  }
 0x882   : > { %9831 = vmatpush1.bf16.msra.mxu1 %v15723_v58  ;;  %9750 = vmatprep.subr.bf16.mxu0 %v15728_v59  ;;  %v15800_v58 = vld [vmem:[%s17734_s17 + $0x264] ss:$16 sps:$4 sm:$0xff]   ;;  %v15803_v59 = vld [vmem:[%s17734_s17 + $0x26c] ss:$16 sps:$4 sm:$0xff]  }
 0x883   : > { %9832 = vmatprep.subr.bf16.mxu1 %v15731_v10  ;;  %v15798_v10 = vld [vmem:[%s17734_s17 + $0x260] ss:$16 sps:$4 sm:$0xff]  }
 0x885   : > { %9751 = vmatpush1.bf16.msra.mxu0 %v15726_v11  ;;  %v15801_v11 = vld [vmem:[%s17734_s17 + $0x268] ss:$16 sps:$4 sm:$0xff]  }
 0x886   : > { %9833 = vmatpush1.bf16.msra.mxu1 %v15729_v12  ;;  %9752 = vmatprep.subr.bf16.mxu0 %v15734_v13  ;;  %v15806_v12 = vld [vmem:[%s17734_s17 + $0x284] ss:$16 sps:$4 sm:$0xff]   ;;  %v15809_v13 = vld [vmem:[%s17734_s17 + $0x28c] ss:$16 sps:$4 sm:$0xff]  }
 0x887   : > { %9834 = vmatprep.subr.bf16.mxu1 %v15737_v14  ;;  %v15804_v14 = vld [vmem:[%s17734_s17 + $0x280] ss:$16 sps:$4 sm:$0xff]  }
 0x889   : > { %9753 = vmatpush1.bf16.msra.mxu0 %v15732_v15  ;;  %v15807_v15 = vld [vmem:[%s17734_s17 + $0x288] ss:$16 sps:$4 sm:$0xff]  }
 0x88a   : > { %9835 = vmatpush1.bf16.msra.mxu1 %v15735_v56  ;;  %9754 = vmatprep.subr.bf16.mxu0 %v15740_v16  ;;  %v15812_v56 = vld [vmem:[%s17734_s17 + $0x2a4] ss:$16 sps:$4 sm:$0xff]   ;;  %v15815_v16 = vld [vmem:[%s17734_s17 + $0x2ac] ss:$16 sps:$4 sm:$0xff]  }
 0x88b   : > { %9836 = vmatprep.subr.bf16.mxu1 %v15743_v17  ;;  %v15810_v17 = vld [vmem:[%s17734_s17 + $0x2a0] ss:$16 sps:$4 sm:$0xff]  }
 0x88d   : > { %9755 = vmatpush1.bf16.msra.mxu0 %v15738_v18  ;;  %v15813_v18 = vld [vmem:[%s17734_s17 + $0x2a8] ss:$16 sps:$4 sm:$0xff]  }
 0x88e   : > { %9837 = vmatpush1.bf16.msra.mxu1 %v15741_v20  ;;  %9756 = vmatprep.subr.bf16.mxu0 %v15746_v25  ;;  %v15818_v20 = vld [vmem:[%s17734_s17 + $0x2c4] ss:$16 sps:$4 sm:$0xff]  }
 0x88f   : > { %9838 = vmatprep.subr.bf16.mxu1 %v15749_v27  ;;  %v15821_v27 = vld [vmem:[%s17734_s17 + $0x2cc] ss:$16 sps:$4 sm:$0xff]  }
 0x891   : > { %9757 = vmatpush1.bf16.msra.mxu0 %v15744_v26 }
 0x892   : > { %9839 = vmatpush1.bf16.msra.mxu1 %v15747_v28  ;;  %9758 = vmatprep.subr.bf16.mxu0 %v15752_v30 }
 0x893   : > { %9840 = vmatprep.subr.bf16.mxu1 %v15755_v31 }
 0x895   : > { %9759 = vmatpush1.bf16.msra.mxu0 %v15750_v29  ;;  %v15816_v29 = vld [vmem:[%s17734_s17 + $0x2c0] ss:$16 sps:$4 sm:$0xff]  }
 0x896   : > { %9841 = vmatpush1.bf16.msra.mxu1 %v15753_v33  ;;  %9760 = vmatprep.subr.bf16.mxu0 %v15758_v34 }
 0x897   : > { %9842 = vmatprep.subr.bf16.mxu1 %v15761_v35  ;;  %v15819_v35 = vld [vmem:[%s17734_s17 + $0x2c8] ss:$16 sps:$4 sm:$0xff]  }
 0x899   : > { %9761 = vmatpush1.bf16.msra.mxu0 %v15756_v54  ;;  %v15824_v54 = vld [vmem:[%s17734_s17 + $0x2e4] ss:$16 sps:$4 sm:$0xff]  }
 0x89a   : > { %9843 = vmatpush1.bf16.msra.mxu1 %v15759_v36  ;;  %9762 = vmatprep.subr.bf16.mxu0 %v15764_v37  ;;  %v15827_v37 = vld [vmem:[%s17734_s17 + $0x2ec] ss:$16 sps:$4 sm:$0xff]  }
 0x89b   : > { %9844 = vmatprep.subr.bf16.mxu1 %v15767_v38  ;;  %v15822_v38 = vld [vmem:[%s17734_s17 + $0x2e0] ss:$16 sps:$4 sm:$0xff]  }
 0x89d   : > { %9763 = vmatpush1.bf16.msra.mxu0 %v15762_v39  ;;  %v15825_v39 = vld [vmem:[%s17734_s17 + $0x2e8] ss:$16 sps:$4 sm:$0xff]  }
 0x89e   : > { %9845 = vmatpush1.bf16.msra.mxu1 %v15765_v6  ;;  %9764 = vmatprep.subr.bf16.mxu0 %v15770_v41  ;;  %v15833_v6 = vld [vmem:[%s17734_s17 + $0x30c] ss:$16 sps:$4 sm:$0xff]   ;;  %v15828_v41 = vld [vmem:[%s17734_s17 + $0x300] ss:$16 sps:$4 sm:$0xff]  }
 0x89f   : > { %9846 = vmatprep.subr.bf16.mxu1 %v15773_v42  ;;  %v15831_v42 = vld [vmem:[%s17734_s17 + $0x308] ss:$16 sps:$4 sm:$0xff]  }
 0x8a1   : > { %9765 = vmatpush1.bf16.msra.mxu0 %v15768_v44  ;;  %v15839_v44 = vld [vmem:[%s17734_s17 + $0x32c] ss:$16 sps:$4 sm:$0xff]  }
 0x8a2   : > { %9847 = vmatpush1.bf16.msra.mxu1 %v15771_v48  ;;  %9766 = vmatprep.subr.bf16.mxu0 %v15776_v50  ;;  %v15837_v48 = vld [vmem:[%s17734_s17 + $0x328] ss:$16 sps:$4 sm:$0xff]   ;;  %v15842_v50 = vld [vmem:[%s17734_s17 + $0x344] ss:$16 sps:$4 sm:$0xff]  }
 0x8a3   : > { %9848 = vmatprep.subr.bf16.mxu1 %v15779_v51  ;;  %v15845_v51 = vld [vmem:[%s17734_s17 + $0x34c] ss:$16 sps:$4 sm:$0xff]  }
 0x8a5   : > { %9767 = vmatpush1.bf16.msra.mxu0 %v15774_v57  ;;  %v15843_v57 = vld [vmem:[%s17734_s17 + $0x348] ss:$16 sps:$4 sm:$0xff]  }
 0x8a6   : > { %9849 = vmatpush1.bf16.msra.mxu1 %v15777_v55  ;;  %9777 = vmatprep.subr.bf16.mxu0 %v15782_v45  ;;  %v15851_v55 = vld [vmem:[%s17734_s17 + $0x36c] ss:$16 sps:$4 sm:$0xff]   ;;  %v15846_v45 = vld [vmem:[%s17734_s17 + $0x360] ss:$16 sps:$4 sm:$0xff]  }
 0x8a7   : > { %9859 = vmatprep.subr.bf16.mxu1 %v15785_v32  ;;  %v15849_v32 = vld [vmem:[%s17734_s17 + $0x368] ss:$16 sps:$4 sm:$0xff]  }
 0x8a8   : > { %9769 = vmatmul.mubr.bf16.vlgmr.msra.gmra.mrb[32].mxu0 %v8942_v63 }
 0x8a9   : > { %9851 = vmatmul.mubr.bf16.vlgmr.msra.gmra.mrb[32].mxu1 %v8942_v63  ;;  %9778 = vmatpush1.bf16.msra.mxu0 %v15780_v62  ;;  %v15857_v62 = vld [vmem:[%s17734_s17 + $0x38c] ss:$16 sps:$4 sm:$0xff]   ;;  %v15852_v63 = vld [vmem:[%s17734_s17 + $0x380] ss:$16 sps:$4 sm:$0xff]  }
 0x8aa   : > { %9809 = vmatprep.mubr.bf16.mxu0 %v8945_v1  ;;  %9860 = vmatpush1.bf16.msra.mxu1 %v15783_v49  ;;  %v15855_v49 = vld [vmem:[%s17734_s17 + $0x388] ss:$16 sps:$4 sm:$0xff]  }
 0x8ab   : > { %9891 = vmatprep.mubr.bf16.mxu1 %v8945_v1  ;;  %9779 = vmatprep.subr.bf16.mxu0 %v15788_v0  ;;  %v15860_v0 = vld [vmem:[%s17734_s17 + $0x3a4] ss:$16 sps:$4 sm:$0xff]   ;;  %v15863_v1 = vld [vmem:[%s17734_s17 + $0x3ac] ss:$16 sps:$4 sm:$0xff]  }
 0x8ac   : > { %9861 = vmatprep.subr.bf16.mxu1 %v15791_v2  ;;  %v6480_v2 = vsub.s32 5, %v18088_v19 }
 0x8ad   : > { %9780 = vmatpush1.bf16.msra.mxu0 %v15786_v3  ;;  %v15858_v3 = vld [vmem:[%s17734_s17 + $0x3a0] ss:$16 sps:$4 sm:$0xff]  }
 0x8ae   : > { %9862 = vmatpush1.bf16.msra.mxu1 %v15789_v4  ;;  %9781 = vmatprep.subr.bf16.mxu0 %v15794_v5  ;;  %v6469_v4 = vrot.slane %v18899_v60, %v18096_v22  ;;  %v15861_v5 = vld [vmem:[%s17734_s17 + $0x3a8] ss:$16 sps:$4 sm:$0xff]  }
 0x8af   : > { %9863 = vmatprep.subr.bf16.mxu1 %v15797_v7  ;;  %v15866_v7 = vld [vmem:[%s17734_s17 + $0x3c4] ss:$16 sps:$4 sm:$0xff]  }
 0x8b1   : > { %9782 = vmatpush1.bf16.msra.mxu0 %v15792_v8  ;;  %v15869_v8 = vld [vmem:[%s17734_s17 + $0x3cc] ss:$16 sps:$4 sm:$0xff]  }
 0x8b2   : > { %9864 = vmatpush1.bf16.msra.mxu1 %v15795_v9  ;;  %9783 = vmatprep.subr.bf16.mxu0 %v15800_v58  ;;  %v6481_v9 = vrot.slane %v18899_v60, %v6480_v2  ;;  %v15864_v58 = vld [vmem:[%s17734_s17 + $0x3c0] ss:$16 sps:$4 sm:$0xff]   ;;  %v15932_v2 = vld [vmem:[%s17743_s2 + $0x124] ss:$16 sps:$4 sm:$0xff]  }
 0x8b3   : > { %9865 = vmatprep.subr.bf16.mxu1 %v15803_v59  ;;  %v13940_v59 = vadd.f32 %v18863_v46, %v6469_v4  ;;  %v15878_v46 = vld [vmem:[%s17743_s2 + $0x4] ss:$16 sps:$4 sm:$0xff]   ;;  %v15930_v4 = vld [vmem:[%s17743_s2 + $0x120] ss:$16 sps:$4 sm:$0xff]  }
 0x8b5   : > { %9784 = vmatpush1.bf16.msra.mxu0 %v15798_v10  ;;  %v15867_v10 = vld [vmem:[%s17734_s17 + $0x3c8] ss:$16 sps:$4 sm:$0xff]  }
 0x8b6   : > { %9866 = vmatpush1.bf16.msra.mxu1 %v15801_v11  ;;  %9785 = vmatprep.subr.bf16.mxu0 %v15806_v12  ;;  %v15872_v11 = vld [vmem:[%s17734_s17 + $0x3e4] ss:$16 sps:$4 sm:$0xff]   ;;  %v15875_v12 = vld [vmem:[%s17734_s17 + $0x3ec] ss:$16 sps:$4 sm:$0xff]  }
 0x8b7   : > { %9867 = vmatprep.subr.bf16.mxu1 %v15809_v13 }
 0x8b9   : > { %9786 = vmatpush1.bf16.msra.mxu0 %v15804_v14  ;;  %v15870_v14 = vld [vmem:[%s17734_s17 + $0x3e0] ss:$16 sps:$4 sm:$0xff]  }
 0x8ba   : > { %9868 = vmatpush1.bf16.msra.mxu1 %v15807_v15  ;;  %9787 = vmatprep.subr.bf16.mxu0 %v15812_v56  ;;  %v8932_v15 = vmax.f32 %v13940_v59, 0.0  ;;  %v15873_v56 = vld [vmem:[%s17734_s17 + $0x3e8] ss:$16 sps:$4 sm:$0xff]   ;;  %v15944_v59 = vld [vmem:[%s17743_s2 + $0x164] ss:$16 sps:$4 sm:$0xff]   ;;  %s19321_s17 = scalar_lea.vmem [#allocation30], %s18105_s4 }
 0x8bb   : > { %v19011_v25 = vpop.f32.mrb[24].mxu0  ;;  %9869 = vmatprep.subr.bf16.mxu1 %v15815_v16  ;;  %v15881_v16 = vld [vmem:[%s17743_s2 + $0xc] ss:$16 sps:$4 sm:$0xff]  }
 0x8bc   : > { %v19014_v26 = vpop.f32.mrb[24].mxu1  ;;  %v19016_v28 = vpop.f32.mrb[25].mxu0 }
 0x8bd   : > { %v19018_v30 = vpop.f32.mrb[25].mxu1  ;;  %v8681_v31 = vpop.f32.mrb[26].mxu0  ;;  %9788 = vmatpush1.bf16.msra.mxu0 %v15810_v17  ;;  %v13943_v13 = vadd.f32 %v19016_v28, %v6481_v9  ;;  %v15884_v28 = vld [vmem:[%s17743_s2 + $0x24] ss:$16 sps:$4 sm:$0xff]   ;;  %v15936_v9 = vld [vmem:[%s17743_s2 + $0x140] ss:$16 sps:$4 sm:$0xff]  }
 0x8be   : > { %v8763_v33 = vpop.f32.mrb[26].mxu1  ;;  %9870 = vmatpush1.bf16.msra.mxu1 %v15813_v18  ;;  %v8682_v34 = vpop.f32.mrb[27].mxu0  ;;  %9789 = vmatprep.subr.bf16.mxu0 %v15818_v20  ;;  %v15876_v18 = vld [vmem:[%s17743_s2] ss:$16 sps:$4 sm:$0xff]   ;;  %v8944_v20 = vpack.c.bf16 %v8932_v15, %v8932_v15 }
 0x8bf   : > { %v8764_v36 = vpop.f32.mrb[27].mxu1  ;;  %9871 = vmatprep.subr.bf16.mxu1 %v15821_v27  ;;  %v8935_v17 = vmax.f32 %v13943_v13, 0.0  ;;  %v15879_v27 = vld [vmem:[%s17743_s2 + $0x8] ss:$16 sps:$4 sm:$0xff]   ;;  %v15882_v33 = vld [vmem:[%s17743_s2 + $0x20] ss:$16 sps:$4 sm:$0xff]  }
 0x8c0   : > { %v15885_v34 = vld [vmem:[%s17743_s2 + $0x28] ss:$16 sps:$4 sm:$0xff]   ;;  %v15888_v36 = vld [vmem:[%s17743_s2 + $0x40] ss:$16 sps:$4 sm:$0xff]   ;;  %v15950_v13 = vld [vmem:[%s17743_s2 + $0x184] ss:$16 sps:$4 sm:$0xff]  }
 0x8c1   : > { %9790 = vmatpush1.bf16.msra.mxu0 %v15816_v29  ;;  %v9905_v31 = vpack.c.bf16 %v8935_v17, %v8935_v17  ;;  %v15887_v29 = vld [vmem:[%s17743_s2 + $0x2c] ss:$16 sps:$4 sm:$0xff]   ;;  %v15948_v15 = vld [vmem:[%s17743_s2 + $0x180] ss:$16 sps:$4 sm:$0xff]  }
 0x8c2   : > { %9872 = vmatpush1.bf16.msra.mxu1 %v15819_v35  ;;  %9791 = vmatprep.subr.bf16.mxu0 %v15824_v54  ;;  %v15890_v35 = vld [vmem:[%s17743_s2 + $0x44] ss:$16 sps:$4 sm:$0xff]   ;;  %v15893_v54 = vld [vmem:[%s17743_s2 + $0x4c] ss:$16 sps:$4 sm:$0xff]  }
 0x8c3   : > { %9873 = vmatprep.subr.bf16.mxu1 %v15827_v37  ;;  %v15891_v37 = vld [vmem:[%s17743_s2 + $0x48] ss:$16 sps:$4 sm:$0xff]   ;;  %v15959_v17 = vld [vmem:[%s17743_s2 + $0x1ac] ss:$16 sps:$4 sm:$0xff]  }
 0x8c5   : > { %9792 = vmatpush1.bf16.msra.mxu0 %v15822_v38  ;;  %v15896_v38 = vld [vmem:[%s17743_s2 + $0x64] ss:$16 sps:$4 sm:$0xff]  }
 0x8c6   : > { %9874 = vmatpush1.bf16.msra.mxu1 %v15825_v39  ;;  %9793 = vmatprep.subr.bf16.mxu0 %v15830_v40  ;;  %v15899_v39 = vld [vmem:[%s17743_s2 + $0x6c] ss:$16 sps:$4 sm:$0xff]   ;;  %v15894_v40 = vld [vmem:[%s17743_s2 + $0x60] ss:$16 sps:$4 sm:$0xff]  }
 0x8c7   : > { %9875 = vmatprep.subr.bf16.mxu1 %v15833_v6  ;;  %v15897_v6 = vld [vmem:[%s17743_s2 + $0x68] ss:$16 sps:$4 sm:$0xff]  }
 0x8c9   : > { %9794 = vmatpush1.bf16.msra.mxu0 %v15828_v41  ;;  %v15902_v41 = vld [vmem:[%s17743_s2 + $0x84] ss:$16 sps:$4 sm:$0xff]  }
 0x8ca   : > { %9876 = vmatpush1.bf16.msra.mxu1 %v15831_v42  ;;  %9795 = vmatprep.subr.bf16.mxu0 %v15836_v43  ;;  %v15905_v42 = vld [vmem:[%s17743_s2 + $0x8c] ss:$16 sps:$4 sm:$0xff]   ;;  %v15900_v43 = vld [vmem:[%s17743_s2 + $0x80] ss:$16 sps:$4 sm:$0xff]  }
 0x8cb   : > { %9877 = vmatprep.subr.bf16.mxu1 %v15839_v44  ;;  %v15903_v44 = vld [vmem:[%s17743_s2 + $0x88] ss:$16 sps:$4 sm:$0xff]  }
 0x8cd   : > { %9796 = vmatpush1.bf16.msra.mxu0 %v15834_v47  ;;  %v15908_v47 = vld [vmem:[%s17743_s2 + $0xa4] ss:$16 sps:$4 sm:$0xff]  }
 0x8ce   : > { %9878 = vmatpush1.bf16.msra.mxu1 %v15837_v48  ;;  %9797 = vmatprep.subr.bf16.mxu0 %v15842_v50  ;;  %v15911_v48 = vld [vmem:[%s17743_s2 + $0xac] ss:$16 sps:$4 sm:$0xff]   ;;  %v15906_v50 = vld [vmem:[%s17743_s2 + $0xa0] ss:$16 sps:$4 sm:$0xff]  }
 0x8cf   : > { %9879 = vmatprep.subr.bf16.mxu1 %v15845_v51  ;;  %v15909_v51 = vld [vmem:[%s17743_s2 + $0xa8] ss:$16 sps:$4 sm:$0xff]  }
 0x8d1   : > { %9798 = vmatpush1.bf16.msra.mxu0 %v15840_v52  ;;  %v15914_v52 = vld [vmem:[%s17743_s2 + $0xc4] ss:$16 sps:$4 sm:$0xff]  }
 0x8d2   : > { %9880 = vmatpush1.bf16.msra.mxu1 %v15843_v57  ;;  %9799 = vmatprep.subr.bf16.mxu0 %v15848_v53  ;;  %v15917_v57 = vld [vmem:[%s17743_s2 + $0xcc] ss:$16 sps:$4 sm:$0xff]   ;;  %v15912_v53 = vld [vmem:[%s17743_s2 + $0xc0] ss:$16 sps:$4 sm:$0xff]  }
 0x8d3   : > { %9881 = vmatprep.subr.bf16.mxu1 %v15851_v55  ;;  %v15915_v55 = vld [vmem:[%s17743_s2 + $0xc8] ss:$16 sps:$4 sm:$0xff]  }
 0x8d5   : > { %9800 = vmatpush1.bf16.msra.mxu0 %v15846_v45  ;;  %v15920_v45 = vld [vmem:[%s17743_s2 + $0xe4] ss:$16 sps:$4 sm:$0xff]  }
 0x8d6   : > { %9882 = vmatpush1.bf16.msra.mxu1 %v15849_v32  ;;  %9801 = vmatprep.subr.bf16.mxu0 %v15854_v61  ;;  %v15923_v32 = vld [vmem:[%s17743_s2 + $0xec] ss:$16 sps:$4 sm:$0xff]   ;;  %v15918_v61 = vld [vmem:[%s17743_s2 + $0xe0] ss:$16 sps:$4 sm:$0xff]  }
 0x8d7   : > { %9883 = vmatprep.subr.bf16.mxu1 %v15857_v62  ;;  %v15921_v62 = vld [vmem:[%s17743_s2 + $0xe8] ss:$16 sps:$4 sm:$0xff]  }
 0x8d9   : > { %9802 = vmatpush1.bf16.msra.mxu0 %v15852_v63  ;;  %v15926_v63 = vld [vmem:[%s17743_s2 + $0x104] ss:$16 sps:$4 sm:$0xff]  }
 0x8da   : > { %9884 = vmatpush1.bf16.msra.mxu1 %v15855_v49  ;;  %9803 = vmatprep.subr.bf16.mxu0 %v15860_v0  ;;  %v15929_v49 = vld [vmem:[%s17743_s2 + $0x10c] ss:$16 sps:$4 sm:$0xff]   ;;  %v15924_v0 = vld [vmem:[%s17743_s2 + $0x100] ss:$16 sps:$4 sm:$0xff]  }
 0x8db   : > { %9885 = vmatprep.subr.bf16.mxu1 %v15863_v1  ;;  %v15927_v1 = vld [vmem:[%s17743_s2 + $0x108] ss:$16 sps:$4 sm:$0xff]  }
 0x8dd   : > { %9804 = vmatpush1.bf16.msra.mxu0 %v15858_v3  ;;  %v15935_v3 = vld [vmem:[%s17743_s2 + $0x12c] ss:$16 sps:$4 sm:$0xff]  }
 0x8de   : > { %9886 = vmatpush1.bf16.msra.mxu1 %v15861_v5  ;;  %9805 = vmatprep.subr.bf16.mxu0 %v15866_v7  ;;  %v15933_v5 = vld [vmem:[%s17743_s2 + $0x128] ss:$16 sps:$4 sm:$0xff]   ;;  %v15938_v7 = vld [vmem:[%s17743_s2 + $0x144] ss:$16 sps:$4 sm:$0xff]  }
 0x8df   : > { %9887 = vmatprep.subr.bf16.mxu1 %v15869_v8  ;;  %v15941_v8 = vld [vmem:[%s17743_s2 + $0x14c] ss:$16 sps:$4 sm:$0xff]  }
 0x8e1   : > { %9806 = vmatpush1.bf16.msra.mxu0 %v15864_v58  ;;  %v15939_v58 = vld [vmem:[%s17743_s2 + $0x148] ss:$16 sps:$4 sm:$0xff]  }
 0x8e2   : > { %9888 = vmatpush1.bf16.msra.mxu1 %v15867_v10  ;;  %9807 = vmatprep.subr.bf16.mxu0 %v15872_v11  ;;  %v15947_v10 = vld [vmem:[%s17743_s2 + $0x16c] ss:$16 sps:$4 sm:$0xff]   ;;  %v15942_v11 = vld [vmem:[%s17743_s2 + $0x160] ss:$16 sps:$4 sm:$0xff]  }
 0x8e3   : > { %9889 = vmatprep.subr.bf16.mxu1 %v15875_v12  ;;  %v15945_v12 = vld [vmem:[%s17743_s2 + $0x168] ss:$16 sps:$4 sm:$0xff]  }
 0x8e5   : > { %9808 = vmatpush1.bf16.msra.mxu0 %v15870_v14  ;;  %v15953_v14 = vld [vmem:[%s17743_s2 + $0x18c] ss:$16 sps:$4 sm:$0xff]  }
 0x8e6   : > { %9890 = vmatpush1.bf16.msra.mxu1 %v15873_v56  ;;  %10698 = vmatprep.subr.bf16.mxu0 %v15878_v46  ;;  %v6476_v56 = vsub.s32 4, %v18088_v19  ;;  %v15951_v46 = vld [vmem:[%s17743_s2 + $0x188] ss:$16 sps:$4 sm:$0xff]  }
 0x8e7   : > { %10780 = vmatprep.subr.bf16.mxu1 %v15881_v16  ;;  %v15956_v16 = vld [vmem:[%s17743_s2 + $0x1a4] ss:$16 sps:$4 sm:$0xff]  }
 0x8e8   : > { %9810 = vmatmul.mubr.bf16.vlgmr.msra.gmra.mrb[32].mxu0 %v8944_v20 }
 0x8e9   : > { %9892 = vmatmul.mubr.bf16.vlgmr.msra.gmra.mrb[32].mxu1 %v8944_v20  ;;  %10699 = vmatpush1.bf16.msra.mxu0 %v15876_v18  ;;  %v6488_v18 = vsub.s32 7, %v18088_v19  ;;  %v15954_v20 = vld [vmem:[%s17743_s2 + $0x1a0] ss:$16 sps:$4 sm:$0xff]  }
 0x8ea   : > { %10730 = vmatprep.mubr.bf16.mxu0 %v9905_v31  ;;  %10781 = vmatpush1.bf16.msra.mxu1 %v15879_v27  ;;  %v6477_v27 = vrot.slane %v18899_v60, %v6476_v56  ;;  %v16008_v56 = vld [vmem:[%s17743_s2 + $0x2c0] ss:$16 sps:$4 sm:$0xff]  }
 0x8eb   : > { %10812 = vmatprep.mubr.bf16.mxu1 %v9905_v31  ;;  %10700 = vmatprep.subr.bf16.mxu0 %v15884_v28  ;;  %v15957_v28 = vld [vmem:[%s17743_s2 + $0x1a8] ss:$16 sps:$4 sm:$0xff]   ;;  %v15962_v31 = vld [vmem:[%s17743_s2 + $0x1c4] ss:$16 sps:$4 sm:$0xff]  }
 0x8ec   : > { %10782 = vmatprep.subr.bf16.mxu1 %v15887_v29  ;;  %v15965_v29 = vld [vmem:[%s17743_s2 + $0x1cc] ss:$16 sps:$4 sm:$0xff]  }
 0x8ed   : > { %10701 = vmatpush1.bf16.msra.mxu0 %v15882_v33  ;;  %v6489_v33 = vrot.slane %v18899_v60, %v6488_v18  ;;  %v16011_v18 = vld [vmem:[%s17743_s2 + $0x2c8] ss:$16 sps:$4 sm:$0xff]  }
 0x8ee   : > { %10783 = vmatpush1.bf16.msra.mxu1 %v15885_v34  ;;  %10702 = vmatprep.subr.bf16.mxu0 %v15890_v35  ;;  %v15960_v34 = vld [vmem:[%s17743_s2 + $0x1c0] ss:$16 sps:$4 sm:$0xff]   ;;  %v13942_v35 = vadd.f32 %v19011_v25, %v6477_v27  ;;  %v15974_v25 = vld [vmem:[%s17743_s2 + $0x204] ss:$16 sps:$4 sm:$0xff]  }
 0x8ef   : > { %10784 = vmatprep.subr.bf16.mxu1 %v15893_v54  ;;  %v15963_v54 = vld [vmem:[%s17743_s2 + $0x1c8] ss:$16 sps:$4 sm:$0xff]  }
 0x8f0   : > { %v8934_v60 = vmax.f32 %v13942_v35, 0.0  ;;  %v16020_v35 = vld [vmem:[%s17743_s2 + $0x300] ss:$16 sps:$4 sm:$0xff]  }
 0x8f1   : > { %10703 = vmatpush1.bf16.msra.mxu0 %v15888_v36  ;;  %v15968_v36 = vld [vmem:[%s17743_s2 + $0x1e4] ss:$16 sps:$4 sm:$0xff]  }
 0x8f2   : > { %10785 = vmatpush1.bf16.msra.mxu1 %v15891_v37  ;;  %10704 = vmatprep.subr.bf16.mxu0 %v15896_v38  ;;  %v15971_v37 = vld [vmem:[%s17743_s2 + $0x1ec] ss:$16 sps:$4 sm:$0xff]   ;;  %v13945_v38 = vadd.f32 %v19018_v30, %v6489_v33  ;;  %v15975_v30 = vld [vmem:[%s17743_s2 + $0x208] ss:$16 sps:$4 sm:$0xff]   ;;  %v16022_v33 = vld [vmem:[%s17743_s2 + $0x304] ss:$16 sps:$4 sm:$0xff]  }
 0x8f3   : > { %10786 = vmatprep.subr.bf16.mxu1 %v15899_v39  ;;  %v15966_v39 = vld [vmem:[%s17743_s2 + $0x1e0] ss:$16 sps:$4 sm:$0xff]  }
 0x8f5   : > { %10705 = vmatpush1.bf16.msra.mxu0 %v15894_v40  ;;  %v15969_v40 = vld [vmem:[%s17743_s2 + $0x1e8] ss:$16 sps:$4 sm:$0xff]  }
 0x8f6   : > { %10787 = vmatpush1.bf16.msra.mxu1 %v15897_v6  ;;  %10706 = vmatprep.subr.bf16.mxu0 %v15902_v41  ;;  %v15977_v6 = vld [vmem:[%s17743_s2 + $0x20c] ss:$16 sps:$4 sm:$0xff]   ;;  %v8937_v41 = vmax.f32 %v13945_v38, 0.0  ;;  %v16026_v38 = vld [vmem:[%s17743_s2 + $0x320] ss:$16 sps:$4 sm:$0xff]  }
 0x8f7   : > { %10788 = vmatprep.subr.bf16.mxu1 %v15905_v42  ;;  %v15972_v42 = vld [vmem:[%s17743_s2 + $0x200] ss:$16 sps:$4 sm:$0xff]  }
 0x8f9   : > { %10707 = vmatpush1.bf16.msra.mxu0 %v15900_v43  ;;  %v9904_v43 = vpack.c.bf16 %v8934_v60, %v8934_v60  ;;  %v16034_v60 = vld [vmem:[%s17743_s2 + $0x344] ss:$16 sps:$4 sm:$0xff]  }
 0x8fa   : > { %10789 = vmatpush1.bf16.msra.mxu1 %v15903_v44  ;;  %10708 = vmatprep.subr.bf16.mxu0 %v15908_v47  ;;  %v15980_v44 = vld [vmem:[%s17743_s2 + $0x224] ss:$16 sps:$4 sm:$0xff]   ;;  %v9907_v47 = vpack.c.bf16 %v8937_v41, %v8937_v41 }
 0x8fb   : > { %10790 = vmatprep.subr.bf16.mxu1 %v15911_v48  ;;  %v15983_v48 = vld [vmem:[%s17743_s2 + $0x22c] ss:$16 sps:$4 sm:$0xff]   ;;  %v16040_v41 = vld [vmem:[%s17743_s2 + $0x364] ss:$16 sps:$4 sm:$0xff]  }
 0x8fd   : > { %10709 = vmatpush1.bf16.msra.mxu0 %v15906_v50  ;;  %v15978_v50 = vld [vmem:[%s17743_s2 + $0x220] ss:$16 sps:$4 sm:$0xff]  }
 0x8fe   : > { %10791 = vmatpush1.bf16.msra.mxu1 %v15909_v51  ;;  %10710 = vmatprep.subr.bf16.mxu0 %v15914_v52  ;;  %v15981_v51 = vld [vmem:[%s17743_s2 + $0x228] ss:$16 sps:$4 sm:$0xff]   ;;  %v15986_v52 = vld [vmem:[%s17743_s2 + $0x244] ss:$16 sps:$4 sm:$0xff]  }
 0x8ff   : > { %10792 = vmatprep.subr.bf16.mxu1 %v15917_v57  ;;  %v15989_v57 = vld [vmem:[%s17743_s2 + $0x24c] ss:$16 sps:$4 sm:$0xff]  }
 0x901   : > { %10711 = vmatpush1.bf16.msra.mxu0 %v15912_v53  ;;  %v15984_v53 = vld [vmem:[%s17743_s2 + $0x240] ss:$16 sps:$4 sm:$0xff]  }
 0x902   : > { %10793 = vmatpush1.bf16.msra.mxu1 %v15915_v55  ;;  %10712 = vmatprep.subr.bf16.mxu0 %v15920_v45  ;;  %v15987_v55 = vld [vmem:[%s17743_s2 + $0x248] ss:$16 sps:$4 sm:$0xff]   ;;  %v15992_v45 = vld [vmem:[%s17743_s2 + $0x264] ss:$16 sps:$4 sm:$0xff]  }
 0x903   : > { %10794 = vmatprep.subr.bf16.mxu1 %v15923_v32  ;;  %v15995_v32 = vld [vmem:[%s17743_s2 + $0x26c] ss:$16 sps:$4 sm:$0xff]  }
 0x905   : > { %10713 = vmatpush1.bf16.msra.mxu0 %v15918_v61  ;;  %v15990_v61 = vld [vmem:[%s17743_s2 + $0x260] ss:$16 sps:$4 sm:$0xff]  }
 0x906   : > { %10795 = vmatpush1.bf16.msra.mxu1 %v15921_v62  ;;  %10714 = vmatprep.subr.bf16.mxu0 %v15926_v63  ;;  %v15993_v62 = vld [vmem:[%s17743_s2 + $0x268] ss:$16 sps:$4 sm:$0xff]   ;;  %v15998_v63 = vld [vmem:[%s17743_s2 + $0x284] ss:$16 sps:$4 sm:$0xff]  }
 0x907   : > { %10796 = vmatprep.subr.bf16.mxu1 %v15929_v49  ;;  %v16001_v49 = vld [vmem:[%s17743_s2 + $0x28c] ss:$16 sps:$4 sm:$0xff]  }
 0x909   : > { %10715 = vmatpush1.bf16.msra.mxu0 %v15924_v0  ;;  %v15996_v0 = vld [vmem:[%s17743_s2 + $0x280] ss:$16 sps:$4 sm:$0xff]  }
 0x90a   : > { %10797 = vmatpush1.bf16.msra.mxu1 %v15927_v1  ;;  %10716 = vmatprep.subr.bf16.mxu0 %v15932_v2  ;;  %v15999_v1 = vld [vmem:[%s17743_s2 + $0x288] ss:$16 sps:$4 sm:$0xff]  }
 0x90b   : > { %10798 = vmatprep.subr.bf16.mxu1 %v15935_v3  ;;  %v19155_v2 = vld [vmem:[%s17730_s5 + $0x8] sm:$0xf] }
 0x90c   : > { %v16004_v3 = vld [vmem:[%s17743_s2 + $0x2a4] ss:$16 sps:$4 sm:$0xff]  }
 0x90d   : > { %10717 = vmatpush1.bf16.msra.mxu0 %v15930_v4  ;;  %v16007_v4 = vld [vmem:[%s17743_s2 + $0x2ac] ss:$16 sps:$4 sm:$0xff]  }
 0x90e   : > { %10799 = vmatpush1.bf16.msra.mxu1 %v15933_v5  ;;  %10718 = vmatprep.subr.bf16.mxu0 %v15938_v7  ;;  %v6501_v5 = vrot.slane %v19155_v2, %v18096_v22  ;;  %v16002_v7 = vld [vmem:[%s17743_s2 + $0x2a0] ss:$16 sps:$4 sm:$0xff]  }
 0x90f   : > { %10800 = vmatprep.subr.bf16.mxu1 %v15941_v8  ;;  %v6505_v8 = vrot.slane %v19155_v2, %v18102_v24 }
 0x911   : > { %10719 = vmatpush1.bf16.msra.mxu0 %v15936_v9  ;;  %v16005_v9 = vld [vmem:[%s17743_s2 + $0x2a8] ss:$16 sps:$4 sm:$0xff]  }
 0x912   : > { %10801 = vmatpush1.bf16.msra.mxu1 %v15939_v58  ;;  %10720 = vmatprep.subr.bf16.mxu0 %v15944_v59  ;;  %v16010_v58 = vld [vmem:[%s17743_s2 + $0x2c4] ss:$16 sps:$4 sm:$0xff]  }
 0x913   : > { %10802 = vmatprep.subr.bf16.mxu1 %v15947_v10  ;;  %v16013_v10 = vld [vmem:[%s17743_s2 + $0x2cc] ss:$16 sps:$4 sm:$0xff]  }
 0x915   : > { %10721 = vmatpush1.bf16.msra.mxu0 %v15942_v11 }
 0x916   : > { %10803 = vmatpush1.bf16.msra.mxu1 %v15945_v12  ;;  %10722 = vmatprep.subr.bf16.mxu0 %v15950_v13 }
 0x917   : > { %10804 = vmatprep.subr.bf16.mxu1 %v15953_v14 }
 0x919   : > { %10723 = vmatpush1.bf16.msra.mxu0 %v15948_v15 }
 0x91a   : > { %10805 = vmatpush1.bf16.msra.mxu1 %v15951_v46  ;;  %10724 = vmatprep.subr.bf16.mxu0 %v15956_v16 }
 0x91b   : > { %10806 = vmatprep.subr.bf16.mxu1 %v15959_v17 }
 0x91d   : > { %10725 = vmatpush1.bf16.msra.mxu0 %v15954_v20  ;;  %v16016_v20 = vld [vmem:[%s17743_s2 + $0x2e4] ss:$16 sps:$4 sm:$0xff]  }
 0x91e   : > { %10807 = vmatpush1.bf16.msra.mxu1 %v15957_v28  ;;  %10726 = vmatprep.subr.bf16.mxu0 %v15962_v31  ;;  %v16019_v28 = vld [vmem:[%s17743_s2 + $0x2ec] ss:$16 sps:$4 sm:$0xff]   ;;  %v16014_v31 = vld [vmem:[%s17743_s2 + $0x2e0] ss:$16 sps:$4 sm:$0xff]  }
 0x91f   : > { %10808 = vmatprep.subr.bf16.mxu1 %v15965_v29  ;;  %v16017_v29 = vld [vmem:[%s17743_s2 + $0x2e8] ss:$16 sps:$4 sm:$0xff]  }
 0x921   : > { %10727 = vmatpush1.bf16.msra.mxu0 %v15960_v34  ;;  %v16025_v34 = vld [vmem:[%s17743_s2 + $0x30c] ss:$16 sps:$4 sm:$0xff]  }
 0x922   : > { %10809 = vmatpush1.bf16.msra.mxu1 %v15963_v54  ;;  %10728 = vmatprep.subr.bf16.mxu0 %v15968_v36  ;;  %v16023_v54 = vld [vmem:[%s17743_s2 + $0x308] ss:$16 sps:$4 sm:$0xff]   ;;  %v16028_v36 = vld [vmem:[%s17743_s2 + $0x324] ss:$16 sps:$4 sm:$0xff]  }
 0x923   : > { %10810 = vmatprep.subr.bf16.mxu1 %v15971_v37  ;;  %v16031_v37 = vld [vmem:[%s17743_s2 + $0x32c] ss:$16 sps:$4 sm:$0xff]  }
 0x925   : > { %10729 = vmatpush1.bf16.msra.mxu0 %v15966_v39  ;;  %v16029_v39 = vld [vmem:[%s17743_s2 + $0x328] ss:$16 sps:$4 sm:$0xff]  }
 0x926   : > { %10811 = vmatpush1.bf16.msra.mxu1 %v15969_v40  ;;  %10739 = vmatprep.subr.bf16.mxu0 %v15974_v25  ;;  %v16037_v40 = vld [vmem:[%s17743_s2 + $0x34c] ss:$16 sps:$4 sm:$0xff]   ;;  %v16032_v25 = vld [vmem:[%s17743_s2 + $0x340] ss:$16 sps:$4 sm:$0xff]  }
 0x927   : > { %10821 = vmatprep.subr.bf16.mxu1 %v15977_v6  ;;  %v16035_v6 = vld [vmem:[%s17743_s2 + $0x348] ss:$16 sps:$4 sm:$0xff]  }
 0x928   : > { %10731 = vmatmul.mubr.bf16.vlgmr.msra.gmra.mrb[36].mxu0 %v9904_v43 }
 0x929   : > { %10813 = vmatmul.mubr.bf16.vlgmr.msra.gmra.mrb[36].mxu1 %v9904_v43  ;;  %10740 = vmatpush1.bf16.msra.mxu0 %v15972_v42  ;;  %v16043_v42 = vld [vmem:[%s17743_s2 + $0x36c] ss:$16 sps:$4 sm:$0xff]   ;;  %v16038_v43 = vld [vmem:[%s17743_s2 + $0x360] ss:$16 sps:$4 sm:$0xff]  }
 0x92a   : > { %10771 = vmatprep.mubr.bf16.mxu0 %v9907_v47  ;;  %10822 = vmatpush1.bf16.msra.mxu1 %v15975_v30  ;;  %v16041_v30 = vld [vmem:[%s17743_s2 + $0x368] ss:$16 sps:$4 sm:$0xff]  }
 0x92b   : > { %10853 = vmatprep.mubr.bf16.mxu1 %v9907_v47  ;;  %10741 = vmatprep.subr.bf16.mxu0 %v15980_v44  ;;  %v16046_v44 = vld [vmem:[%s17743_s2 + $0x384] ss:$16 sps:$4 sm:$0xff]   ;;  %v16049_v47 = vld [vmem:[%s17743_s2 + $0x38c] ss:$16 sps:$4 sm:$0xff]  }
 0x92c   : > { %10823 = vmatprep.subr.bf16.mxu1 %v15983_v48  ;;  %v16044_v48 = vld [vmem:[%s17743_s2 + $0x380] ss:$16 sps:$4 sm:$0xff]  }
 0x92d   : > { %10742 = vmatpush1.bf16.msra.mxu0 %v15978_v50  ;;  %v6484_v50 = vsub.s32 6, %v18088_v19  ;;  %v16058_v19 = vld [vmem:[%s17743_s2 + $0x3c4] ss:$16 sps:$4 sm:$0xff]  }
 0x92e   : > { %10824 = vmatpush1.bf16.msra.mxu1 %v15981_v51  ;;  %10743 = vmatprep.subr.bf16.mxu0 %v15986_v52  ;;  %v16047_v51 = vld [vmem:[%s17743_s2 + $0x388] ss:$16 sps:$4 sm:$0xff]   ;;  %v16052_v52 = vld [vmem:[%s17743_s2 + $0x3a4] ss:$16 sps:$4 sm:$0xff]  }
 0x92f   : > { %10825 = vmatprep.subr.bf16.mxu1 %v15989_v57  ;;  %v16055_v57 = vld [vmem:[%s17743_s2 + $0x3ac] ss:$16 sps:$4 sm:$0xff]  }
 0x931   : > { %10744 = vmatpush1.bf16.msra.mxu0 %v15984_v53  ;;  %v16050_v53 = vld [vmem:[%s17743_s2 + $0x3a0] ss:$16 sps:$4 sm:$0xff]  }
 0x932   : > { %10826 = vmatpush1.bf16.msra.mxu1 %v15987_v55  ;;  %10745 = vmatprep.subr.bf16.mxu0 %v15992_v45  ;;  %v16264_v55 = vld [vmem:[%s17730_s5] sm:$0xff]  ;;  %s11880_s5 = sshll.u32 %s19321_s17, 4  ;;  %s11881_s5 = int_to_ptr.vmem [resolvable:$true] %s11880_s5 }
 0x933   : > { %10827 = vmatprep.subr.bf16.mxu1 %v15995_v32  ;;  %v6485_v45 = vrot.slane %v16264_v55, %v6484_v50  ;;  %v16053_v32 = vld [vmem:[%s17743_s2 + $0x3a8] ss:$16 sps:$4 sm:$0xff]   ;;  %v16121_v50 = vld [vmem:[%s17752_s0 + $0x10c] ss:$16 sps:$4 sm:$0xff]   ;;  %s16741_s19 = scalar_lea.vmem %s11881_s5, 512  ;;  %p16748_p9 = scmp.lt.s32.totalorder %s11881_s5, %s16746_s1 }
 0x934   : > { %v16122_v55 = vld [vmem:[%s17752_s0 + $0x120] ss:$16 sps:$4 sm:$0xff]   ;;  %p16742_p5 = scmp.ne.s32.totalorder %s11881_s5, %s16741_s19  ;;  %p16749_p10 = scmp.lt.s32.totalorder %s16747_s26, %s16741_s19 }
 0x935   : > { %10746 = vmatpush1.bf16.msra.mxu0 %v15990_v61  ;;  %v16061_v61 = vld [vmem:[%s17743_s2 + $0x3cc] ss:$16 sps:$4 sm:$0xff]  }
 0x936   : > { %10828 = vmatpush1.bf16.msra.mxu1 %v15993_v62  ;;  %10747 = vmatprep.subr.bf16.mxu0 %v15998_v63  ;;  %v6497_v62 = vrot.slane %v19155_v2, %v18099_v23  ;;  %v16056_v63 = vld [vmem:[%s17743_s2 + $0x3c0] ss:$16 sps:$4 sm:$0xff]   ;;  %p16750_p0 = por %p16749_p10, %p16748_p9 }
 0x937   : > { %10829 = vmatprep.subr.bf16.mxu1 %v16001_v49  ;;  %v13944_v49 = vadd.f32 %v19014_v26, %v6485_v45  ;;  %v16070_v26 = vld [vmem:[%s17752_s0 + $0x4] ss:$16 sps:$4 sm:$0xff]   ;;  %v16125_v45 = vld [vmem:[%s17752_s0 + $0x128] ss:$16 sps:$4 sm:$0xff]  }
 0x939   : > { %10748 = vmatpush1.bf16.msra.mxu0 %v15996_v0  ;;  %v16059_v0 = vld [vmem:[%s17743_s2 + $0x3c8] ss:$16 sps:$4 sm:$0xff]  }
 0x93a   : > { %10830 = vmatpush1.bf16.msra.mxu1 %v15999_v1  ;;  %10749 = vmatprep.subr.bf16.mxu0 %v16004_v3  ;;  %v16064_v1 = vld [vmem:[%s17743_s2 + $0x3e4] ss:$16 sps:$4 sm:$0xff]   ;;  %v16067_v3 = vld [vmem:[%s17743_s2 + $0x3ec] ss:$16 sps:$4 sm:$0xff]  }
 0x93b   : > { %v19166_v59 = vpop.f32.mrb[28].mxu0  ;;  %10831 = vmatprep.subr.bf16.mxu1 %v16007_v4 }
 0x93c   : > { %v8923_v11 = vpop.f32.mrb[28].mxu1  ;;  %v19169_v12 = vpop.f32.mrb[29].mxu0 }
 0x93d   : > { %v19171_v13 = vadd.f32 %v8923_v11, %v6501_v5  ;;  %v8925_v14 = vpop.f32.mrb[29].mxu1  ;;  %v8845_v15 = vpop.f32.mrb[30].mxu0  ;;  %10750 = vmatpush1.bf16.msra.mxu0 %v16002_v7  ;;  %v13947_v4 = vadd.f32 %v19169_v12, %v6497_v62  ;;  %v16062_v5 = vld [vmem:[%s17743_s2 + $0x3e0] ss:$16 sps:$4 sm:$0xff]   ;;  %v8936_v7 = vmax.f32 %v13944_v49, 0.0 }
 0x93e   : > { %v19174_v46 = vadd.f32 %v8925_v14, %v6505_v8  ;;  %v8927_v16 = vpop.f32.mrb[30].mxu1  ;;  %10832 = vmatpush1.bf16.msra.mxu1 %v16005_v9  ;;  %v8846_v17 = vpop.f32.mrb[31].mxu0  ;;  %10751 = vmatprep.subr.bf16.mxu0 %v16010_v58  ;;  %v16065_v8 = vld [vmem:[%s17743_s2 + $0x3e8] ss:$16 sps:$4 sm:$0xff]   ;;  %v16073_v9 = vld [vmem:[%s17752_s0 + $0xc] ss:$16 sps:$4 sm:$0xff]  }
 0x93f   : > { %v8928_v27 = vpop.f32.mrb[31].mxu1  ;;  %10833 = vmatprep.subr.bf16.mxu1 %v16013_v10  ;;  %v8939_v58 = vmax.f32 %v13947_v4, 0.0  ;;  %v16068_v10 = vld [vmem:[%s17752_s0] ss:$16 sps:$4 sm:$0xff]   ;;  %v9906_v11 = vpack.c.bf16 %v8936_v7, %v8936_v7  ;;  %v16071_v12 = vld [vmem:[%s17752_s0 + $0x8] ss:$16 sps:$4 sm:$0xff]  }
 0x940   : > { %v16076_v14 = vld [vmem:[%s17752_s0 + $0x24] ss:$16 sps:$4 sm:$0xff]   ;;  %v16074_v16 = vld [vmem:[%s17752_s0 + $0x20] ss:$16 sps:$4 sm:$0xff]   ;;  %v16077_v17 = vld [vmem:[%s17752_s0 + $0x28] ss:$16 sps:$4 sm:$0xff]  }
 0x941   : > { %10752 = vmatpush1.bf16.msra.mxu0 %v16008_v56  ;;  %v10871_v15 = vpack.c.bf16 %v8939_v58, %v8939_v58  ;;  %v16079_v56 = vld [vmem:[%s17752_s0 + $0x2c] ss:$16 sps:$4 sm:$0xff]   ;;  %v16080_v27 = vld [vmem:[%s17752_s0 + $0x40] ss:$16 sps:$4 sm:$0xff]   ;;  %v16131_v62 = vld [vmem:[%s17752_s0 + $0x148] ss:$16 sps:$4 sm:$0xff]   ;;  %v6493_v58 = vrot.slane %v19155_v2, %v18093_v21 }
 0x942   : > { %10834 = vmatpush1.bf16.msra.mxu1 %v16011_v18  ;;  %10753 = vmatprep.subr.bf16.mxu0 %v16016_v20  ;;  %v16082_v18 = vld [vmem:[%s17752_s0 + $0x44] ss:$16 sps:$4 sm:$0xff]   ;;  %v16085_v20 = vld [vmem:[%s17752_s0 + $0x4c] ss:$16 sps:$4 sm:$0xff]   ;;  %v16143_v7 = vld [vmem:[%s17752_s0 + $0x188] ss:$16 sps:$4 sm:$0xff]  }
 0x943   : > { %10835 = vmatprep.subr.bf16.mxu1 %v16019_v28  ;;  %v16083_v28 = vld [vmem:[%s17752_s0 + $0x48] ss:$16 sps:$4 sm:$0xff]   ;;  %v16139_v49 = vld [vmem:[%s17752_s0 + $0x16c] ss:$16 sps:$4 sm:$0xff]   ;;  %s19640_s2 = sld [smem:[#allocation53_spill]] }
 0x944   : > { %v16145_v4 = vld [vmem:[%s17752_s0 + $0x18c] ss:$16 sps:$4 sm:$0xff]  }
 0x945   : > { %10754 = vmatpush1.bf16.msra.mxu0 %v16014_v31  ;;  %v16088_v31 = vld [vmem:[%s17752_s0 + $0x64] ss:$16 sps:$4 sm:$0xff]   ;;  %v16163_v2 = vld [vmem:[%s17752_s0 + $0x1ec] ss:$16 sps:$4 sm:$0xff]  }
 0x946   : > { %10836 = vmatpush1.bf16.msra.mxu1 %v16017_v29  ;;  %10755 = vmatprep.subr.bf16.mxu0 %v16022_v33  ;;  %v16091_v29 = vld [vmem:[%s17752_s0 + $0x6c] ss:$16 sps:$4 sm:$0xff]   ;;  %v16086_v33 = vld [vmem:[%s17752_s0 + $0x60] ss:$16 sps:$4 sm:$0xff]  }
 0x947   : > { %10837 = vmatprep.subr.bf16.mxu1 %v16025_v34  ;;  %v16089_v34 = vld [vmem:[%s17752_s0 + $0x68] ss:$16 sps:$4 sm:$0xff]  }
 0x949   : > { %10756 = vmatpush1.bf16.msra.mxu0 %v16020_v35  ;;  %v16094_v35 = vld [vmem:[%s17752_s0 + $0x84] ss:$16 sps:$4 sm:$0xff]   ;;  %p19642_p13 = scmp.ne.s32.totalorder %s19640_s2, 0 }
 0x94a   : > { %10838 = vmatpush1.bf16.msra.mxu1 %v16023_v54  ;;  %10757 = vmatprep.subr.bf16.mxu0 %v16028_v36  ;;  %v16097_v54 = vld [vmem:[%s17752_s0 + $0x8c] ss:$16 sps:$4 sm:$0xff]   ;;  %v16092_v36 = vld [vmem:[%s17752_s0 + $0x80] ss:$16 sps:$4 sm:$0xff]  }
 0x94b   : > { %10839 = vmatprep.subr.bf16.mxu1 %v16031_v37  ;;  %v16095_v37 = vld [vmem:[%s17752_s0 + $0x88] ss:$16 sps:$4 sm:$0xff]   ;;  %p16743_p6 = pnand %p16742_p5, %p19642_p13 }
 0x94d   : > { %10758 = vmatpush1.bf16.msra.mxu0 %v16026_v38  ;;  %v16100_v38 = vld [vmem:[%s17752_s0 + $0xa4] ss:$16 sps:$4 sm:$0xff]   ;;  %p16744_p2 = pneg %p16743_p6 }
 0x94e   : > { %10840 = vmatpush1.bf16.msra.mxu1 %v16029_v39  ;;  %10759 = vmatprep.subr.bf16.mxu0 %v16034_v60  ;;  %v16103_v39 = vld [vmem:[%s17752_s0 + $0xac] ss:$16 sps:$4 sm:$0xff]   ;;  %v16098_v60 = vld [vmem:[%s17752_s0 + $0xa0] ss:$16 sps:$4 sm:$0xff]  }
 0x94f   : > { %10841 = vmatprep.subr.bf16.mxu1 %v16037_v40  ;;  %v16101_v40 = vld [vmem:[%s17752_s0 + $0xa8] ss:$16 sps:$4 sm:$0xff]   ;;  %p16751_p11 = pnand %p16750_p0, %p16744_p2 }
 0x951   : > { %10760 = vmatpush1.bf16.msra.mxu0 %v16032_v25  ;;  %v16106_v25 = vld [vmem:[%s17752_s0 + $0xc4] ss:$16 sps:$4 sm:$0xff]  }
 0x952   : > { %10842 = vmatpush1.bf16.msra.mxu1 %v16035_v6  ;;  %10761 = vmatprep.subr.bf16.mxu0 %v16040_v41  ;;  %v16109_v6 = vld [vmem:[%s17752_s0 + $0xcc] ss:$16 sps:$4 sm:$0xff]   ;;  %v16104_v41 = vld [vmem:[%s17752_s0 + $0xc0] ss:$16 sps:$4 sm:$0xff]  }
 0x953   : > { %10843 = vmatprep.subr.bf16.mxu1 %v16043_v42  ;;  %v16107_v42 = vld [vmem:[%s17752_s0 + $0xc8] ss:$16 sps:$4 sm:$0xff]  }
 0x955   : > { %10762 = vmatpush1.bf16.msra.mxu0 %v16038_v43  ;;  %v16112_v43 = vld [vmem:[%s17752_s0 + $0xe4] ss:$16 sps:$4 sm:$0xff]  }
 0x956   : > { %10844 = vmatpush1.bf16.msra.mxu1 %v16041_v30  ;;  %10763 = vmatprep.subr.bf16.mxu0 %v16046_v44  ;;  %v16115_v30 = vld [vmem:[%s17752_s0 + $0xec] ss:$16 sps:$4 sm:$0xff]   ;;  %v16110_v44 = vld [vmem:[%s17752_s0 + $0xe0] ss:$16 sps:$4 sm:$0xff]  }
 0x957   : > { %10845 = vmatprep.subr.bf16.mxu1 %v16049_v47  ;;  %v16113_v47 = vld [vmem:[%s17752_s0 + $0xe8] ss:$16 sps:$4 sm:$0xff]  }
 0x959   : > { %10764 = vmatpush1.bf16.msra.mxu0 %v16044_v48  ;;  %v16118_v48 = vld [vmem:[%s17752_s0 + $0x104] ss:$16 sps:$4 sm:$0xff]  }
 0x95a   : > { %10846 = vmatpush1.bf16.msra.mxu1 %v16047_v51  ;;  %10765 = vmatprep.subr.bf16.mxu0 %v16052_v52  ;;  %v16116_v51 = vld [vmem:[%s17752_s0 + $0x100] ss:$16 sps:$4 sm:$0xff]   ;;  %v16119_v52 = vld [vmem:[%s17752_s0 + $0x108] ss:$16 sps:$4 sm:$0xff]  }
 0x95b   : > { %10847 = vmatprep.subr.bf16.mxu1 %v16055_v57  ;;  %v16124_v57 = vld [vmem:[%s17752_s0 + $0x124] ss:$16 sps:$4 sm:$0xff]  }
 0x95d   : > { %10766 = vmatpush1.bf16.msra.mxu0 %v16050_v53  ;;  %v16127_v53 = vld [vmem:[%s17752_s0 + $0x12c] ss:$16 sps:$4 sm:$0xff]  }
 0x95e   : > { %10848 = vmatpush1.bf16.msra.mxu1 %v16053_v32  ;;  %10767 = vmatprep.subr.bf16.mxu0 %v16058_v19  ;;  %v16130_v32 = vld [vmem:[%s17752_s0 + $0x144] ss:$16 sps:$4 sm:$0xff]   ;;  %v16133_v19 = vld [vmem:[%s17752_s0 + $0x14c] ss:$16 sps:$4 sm:$0xff]  }
 0x95f   : > { %10849 = vmatprep.subr.bf16.mxu1 %v16061_v61  ;;  %v16128_v61 = vld [vmem:[%s17752_s0 + $0x140] ss:$16 sps:$4 sm:$0xff]  }
 0x961   : > { %10768 = vmatpush1.bf16.msra.mxu0 %v16056_v63  ;;  %v16136_v63 = vld [vmem:[%s17752_s0 + $0x164] ss:$16 sps:$4 sm:$0xff]  }
 0x962   : > { %10850 = vmatpush1.bf16.msra.mxu1 %v16059_v0  ;;  %10769 = vmatprep.subr.bf16.mxu0 %v16064_v1  ;;  %v16134_v0 = vld [vmem:[%s17752_s0 + $0x160] ss:$16 sps:$4 sm:$0xff]   ;;  %v16137_v1 = vld [vmem:[%s17752_s0 + $0x168] ss:$16 sps:$4 sm:$0xff]  }
 0x963   : > { %10851 = vmatprep.subr.bf16.mxu1 %v16067_v3  ;;  %v16142_v3 = vld [vmem:[%s17752_s0 + $0x184] ss:$16 sps:$4 sm:$0xff]  }
 0x965   : > { %10770 = vmatpush1.bf16.msra.mxu0 %v16062_v5  ;;  %v16140_v5 = vld [vmem:[%s17752_s0 + $0x180] ss:$16 sps:$4 sm:$0xff]  }
 0x966   : > { %10852 = vmatpush1.bf16.msra.mxu1 %v16065_v8  ;;  %11664 = vmatprep.subr.bf16.mxu0 %v16070_v26  ;;  %v16148_v8 = vld [vmem:[%s17752_s0 + $0x1a4] ss:$16 sps:$4 sm:$0xff]   ;;  %v16151_v26 = vld [vmem:[%s17752_s0 + $0x1ac] ss:$16 sps:$4 sm:$0xff]  }
 0x967   : > { %11746 = vmatprep.subr.bf16.mxu1 %v16073_v9  ;;  %v16146_v9 = vld [vmem:[%s17752_s0 + $0x1a0] ss:$16 sps:$4 sm:$0xff]  }
 0x968   : > { %10772 = vmatmul.mubr.bf16.vlgmr.msra.gmra.mrb[36].mxu0 %v9906_v11 }
 0x969   : > { %10854 = vmatmul.mubr.bf16.vlgmr.msra.gmra.mrb[36].mxu1 %v9906_v11  ;;  %11665 = vmatpush1.bf16.msra.mxu0 %v16068_v10  ;;  %v16149_v10 = vld [vmem:[%s17752_s0 + $0x1a8] ss:$16 sps:$4 sm:$0xff]   ;;  %v16154_v11 = vld [vmem:[%s17752_s0 + $0x1c4] ss:$16 sps:$4 sm:$0xff]  }
 0x96a   : > { %11696 = vmatprep.mubr.bf16.mxu0 %v10871_v15  ;;  %11747 = vmatpush1.bf16.msra.mxu1 %v16071_v12  ;;  %v16157_v12 = vld [vmem:[%s17752_s0 + $0x1cc] ss:$16 sps:$4 sm:$0xff]  }
 0x96b   : > { %11778 = vmatprep.mubr.bf16.mxu1 %v10871_v15  ;;  %11666 = vmatprep.subr.bf16.mxu0 %v16076_v14  ;;  %v16152_v14 = vld [vmem:[%s17752_s0 + $0x1c0] ss:$16 sps:$4 sm:$0xff]   ;;  %v13946_v15 = vadd.f32 %v19166_v59, %v6493_v58  ;;  %v16169_v59 = vld [vmem:[%s17752_s0 + $0x20c] ss:$16 sps:$4 sm:$0xff]   ;;  %v16208_v58 = vld [vmem:[%s17752_s0 + $0x2e4] ss:$16 sps:$4 sm:$0xff]  }
 0x96c   : > { %11748 = vmatprep.subr.bf16.mxu1 %v16079_v56  ;;  %v16155_v56 = vld [vmem:[%s17752_s0 + $0x1c8] ss:$16 sps:$4 sm:$0xff]  }
 0x96d   : > { %11667 = vmatpush1.bf16.msra.mxu0 %v16074_v16  ;;  %v16160_v16 = vld [vmem:[%s17752_s0 + $0x1e4] ss:$16 sps:$4 sm:$0xff]  }
 0x96e   : > { %11749 = vmatpush1.bf16.msra.mxu1 %v16077_v17  ;;  %11668 = vmatprep.subr.bf16.mxu0 %v16082_v18  ;;  %v16158_v17 = vld [vmem:[%s17752_s0 + $0x1e0] ss:$16 sps:$4 sm:$0xff]   ;;  %v8938_v18 = vmax.f32 %v13946_v15, 0.0  ;;  %v16214_v15 = vld [vmem:[%s17752_s0 + $0x304] ss:$16 sps:$4 sm:$0xff]  }
 0x96f   : > { %11750 = vmatprep.subr.bf16.mxu1 %v16085_v20  ;;  %v16161_v20 = vld [vmem:[%s17752_s0 + $0x1e8] ss:$16 sps:$4 sm:$0xff]  }
 0x971   : > { %11669 = vmatpush1.bf16.msra.mxu0 %v16080_v27  ;;  %v16166_v27 = vld [vmem:[%s17752_s0 + $0x204] ss:$16 sps:$4 sm:$0xff]  }
 0x972   : > { %11751 = vmatpush1.bf16.msra.mxu1 %v16083_v28  ;;  %11670 = vmatprep.subr.bf16.mxu0 %v16088_v31  ;;  %v8941_v28 = vmax.f32 %v19174_v46, 0.0  ;;  %v16164_v31 = vld [vmem:[%s17752_s0 + $0x200] ss:$16 sps:$4 sm:$0xff]  }
 0x973   : > { %11752 = vmatprep.subr.bf16.mxu1 %v16091_v29  ;;  %v10870_v29 = vpack.c.bf16 %v8938_v18, %v8938_v18  ;;  %v16170_v46 = vld [vmem:[%s17752_s0 + $0x220] ss:$16 sps:$4 sm:$0xff]   ;;  %v16223_v18 = vld [vmem:[%s17752_s0 + $0x32c] ss:$16 sps:$4 sm:$0xff]  }
 0x975   : > { %11671 = vmatpush1.bf16.msra.mxu0 %v16086_v33  ;;  %v16167_v33 = vld [vmem:[%s17752_s0 + $0x208] ss:$16 sps:$4 sm:$0xff]  }
 0x976   : > { %11753 = vmatpush1.bf16.msra.mxu1 %v16089_v34  ;;  %11672 = vmatprep.subr.bf16.mxu0 %v16094_v35  ;;  %v16172_v34 = vld [vmem:[%s17752_s0 + $0x224] ss:$16 sps:$4 sm:$0xff]   ;;  %v10873_v35 = vpack.c.bf16 %v8941_v28, %v8941_v28  ;;  %v16229_v28 = vld [vmem:[%s17752_s0 + $0x34c] ss:$16 sps:$4 sm:$0xff]  }
 0x977   : > { %11754 = vmatprep.subr.bf16.mxu1 %v16097_v54  ;;  %v16175_v54 = vld [vmem:[%s17752_s0 + $0x22c] ss:$16 sps:$4 sm:$0xff]  }
 0x979   : > { %11673 = vmatpush1.bf16.msra.mxu0 %v16092_v36  ;;  %v16173_v36 = vld [vmem:[%s17752_s0 + $0x228] ss:$16 sps:$4 sm:$0xff]  }
 0x97a   : > { %11755 = vmatpush1.bf16.msra.mxu1 %v16095_v37  ;;  %11674 = vmatprep.subr.bf16.mxu0 %v16100_v38  ;;  %v16178_v37 = vld [vmem:[%s17752_s0 + $0x244] ss:$16 sps:$4 sm:$0xff]   ;;  %v16181_v38 = vld [vmem:[%s17752_s0 + $0x24c] ss:$16 sps:$4 sm:$0xff]  }
 0x97b   : > { %11756 = vmatprep.subr.bf16.mxu1 %v16103_v39  ;;  %v16176_v39 = vld [vmem:[%s17752_s0 + $0x240] ss:$16 sps:$4 sm:$0xff]  }
 0x97d   : > { %11675 = vmatpush1.bf16.msra.mxu0 %v16098_v60  ;;  %v16179_v60 = vld [vmem:[%s17752_s0 + $0x248] ss:$16 sps:$4 sm:$0xff]  }
 0x97e   : > { %11757 = vmatpush1.bf16.msra.mxu1 %v16101_v40  ;;  %11676 = vmatprep.subr.bf16.mxu0 %v16106_v25  ;;  %v16184_v40 = vld [vmem:[%s17752_s0 + $0x264] ss:$16 sps:$4 sm:$0xff]   ;;  %v16187_v25 = vld [vmem:[%s17752_s0 + $0x26c] ss:$16 sps:$4 sm:$0xff]  }
 0x97f   : > { %11758 = vmatprep.subr.bf16.mxu1 %v16109_v6  ;;  %v16182_v6 = vld [vmem:[%s17752_s0 + $0x260] ss:$16 sps:$4 sm:$0xff]  }
 0x981   : > { %11677 = vmatpush1.bf16.msra.mxu0 %v16104_v41  ;;  %v16185_v41 = vld [vmem:[%s17752_s0 + $0x268] ss:$16 sps:$4 sm:$0xff]  }
 0x982   : > { %11759 = vmatpush1.bf16.msra.mxu1 %v16107_v42  ;;  %11678 = vmatprep.subr.bf16.mxu0 %v16112_v43  ;;  %v16190_v42 = vld [vmem:[%s17752_s0 + $0x284] ss:$16 sps:$4 sm:$0xff]   ;;  %v16193_v43 = vld [vmem:[%s17752_s0 + $0x28c] ss:$16 sps:$4 sm:$0xff]  }
 0x983   : > { %11760 = vmatprep.subr.bf16.mxu1 %v16115_v30  ;;  %v16188_v30 = vld [vmem:[%s17752_s0 + $0x280] ss:$16 sps:$4 sm:$0xff]  }
 0x985   : > { %11679 = vmatpush1.bf16.msra.mxu0 %v16110_v44  ;;  %v9074_v44 = vld [vmem:[%s1086_s7] sm:$0xf] }
 0x986   : > { %11761 = vmatpush1.bf16.msra.mxu1 %v16113_v47  ;;  %11680 = vmatprep.subr.bf16.mxu0 %v16118_v48  ;;  %v16191_v47 = vld [vmem:[%s17752_s0 + $0x288] ss:$16 sps:$4 sm:$0xff]   ;;  %v16196_v48 = vld [vmem:[%s17752_s0 + $0x2a4] ss:$16 sps:$4 sm:$0xff]  }
 0x987   : > { %11762 = vmatprep.subr.bf16.mxu1 %v16121_v50  ;;  %v16199_v50 = vld [vmem:[%s17752_s0 + $0x2ac] ss:$16 sps:$4 sm:$0xff]  }
 0x989   : > { %11681 = vmatpush1.bf16.msra.mxu0 %v16116_v51  ;;  %v9079_v51 = vrot.slane %v9074_v44, %v18093_v21 }
 0x98a   : > { %11763 = vmatpush1.bf16.msra.mxu1 %v16119_v52  ;;  %11682 = vmatprep.subr.bf16.mxu0 %v16124_v57  ;;  %v9087_v52 = vrot.slane %v9074_v44, %v18096_v22  ;;  %v9083_v57 = vrot.slane %v9074_v44, %v18099_v23 }
 0x98b   : > { %11764 = vmatprep.subr.bf16.mxu1 %v16127_v53  ;;  %v16194_v53 = vld [vmem:[%s17752_s0 + $0x2a0] ss:$16 sps:$4 sm:$0xff]  }
 0x98d   : > { %11683 = vmatpush1.bf16.msra.mxu0 %v16122_v55  ;;  %v9091_v55 = vrot.slane %v9074_v44, %v18102_v24  ;;  %v16259_v44 = vld [vmem:[%s17752_s0 + $0x3ec] ss:$16 sps:$4 sm:$0xff]  }
 0x98e   : > { %11765 = vmatpush1.bf16.msra.mxu1 %v16125_v45  ;;  %11684 = vmatprep.subr.bf16.mxu0 %v16130_v32  ;;  %v16197_v45 = vld [vmem:[%s17752_s0 + $0x2a8] ss:$16 sps:$4 sm:$0xff]   ;;  %v16202_v32 = vld [vmem:[%s17752_s0 + $0x2c4] ss:$16 sps:$4 sm:$0xff]  }
 0x98f   : > { %11766 = vmatprep.subr.bf16.mxu1 %v16133_v19 }
 0x991   : > { %11685 = vmatpush1.bf16.msra.mxu0 %v16128_v61  ;;  %v16205_v61 = vld [vmem:[%s17752_s0 + $0x2cc] ss:$16 sps:$4 sm:$0xff]  }
 0x992   : > { %11767 = vmatpush1.bf16.msra.mxu1 %v16131_v62  ;;  %11686 = vmatprep.subr.bf16.mxu0 %v16136_v63 }
 0x993   : > { %11768 = vmatprep.subr.bf16.mxu1 %v16139_v49 }
 0x995   : > { %11687 = vmatpush1.bf16.msra.mxu0 %v16134_v0 }
 0x996   : > { %11769 = vmatpush1.bf16.msra.mxu1 %v16137_v1  ;;  %11688 = vmatprep.subr.bf16.mxu0 %v16142_v3 }
 0x997   : > { %11770 = vmatprep.subr.bf16.mxu1 %v16145_v4 }
 0x999   : > { %11689 = vmatpush1.bf16.msra.mxu0 %v16140_v5  ;;  %v16200_v5 = vld [vmem:[%s17752_s0 + $0x2c0] ss:$16 sps:$4 sm:$0xff]  }
 0x99a   : > { %11771 = vmatpush1.bf16.msra.mxu1 %v16143_v7  ;;  %11690 = vmatprep.subr.bf16.mxu0 %v16148_v8 }
 0x99b   : > { %11772 = vmatprep.subr.bf16.mxu1 %v16151_v26 }
 0x99d   : > { %11691 = vmatpush1.bf16.msra.mxu0 %v16146_v9  ;;  %v16203_v9 = vld [vmem:[%s17752_s0 + $0x2c8] ss:$16 sps:$4 sm:$0xff]  }
 0x99e   : > { %11773 = vmatpush1.bf16.msra.mxu1 %v16149_v10  ;;  %11692 = vmatprep.subr.bf16.mxu0 %v16154_v11  ;;  %v16211_v11 = vld [vmem:[%s17752_s0 + $0x2ec] ss:$16 sps:$4 sm:$0xff]  }
 0x99f   : > { %11774 = vmatprep.subr.bf16.mxu1 %v16157_v12  ;;  %v16206_v12 = vld [vmem:[%s17752_s0 + $0x2e0] ss:$16 sps:$4 sm:$0xff]  }
 0x9a1   : > { %11693 = vmatpush1.bf16.msra.mxu0 %v16152_v14  ;;  %v16209_v14 = vld [vmem:[%s17752_s0 + $0x2e8] ss:$16 sps:$4 sm:$0xff]  }
 0x9a2   : > { %11775 = vmatpush1.bf16.msra.mxu1 %v16155_v56  ;;  %11694 = vmatprep.subr.bf16.mxu0 %v16160_v16  ;;  %v16217_v56 = vld [vmem:[%s17752_s0 + $0x30c] ss:$16 sps:$4 sm:$0xff]   ;;  %v16212_v16 = vld [vmem:[%s17752_s0 + $0x300] ss:$16 sps:$4 sm:$0xff]  }
 0x9a3   : > { %11776 = vmatprep.subr.bf16.mxu1 %v16163_v2  ;;  %v16215_v2 = vld [vmem:[%s17752_s0 + $0x308] ss:$16 sps:$4 sm:$0xff]  }
 0x9a5   : > { %11695 = vmatpush1.bf16.msra.mxu0 %v16158_v17  ;;  %v16220_v17 = vld [vmem:[%s17752_s0 + $0x324] ss:$16 sps:$4 sm:$0xff]  }
 0x9a6   : > { %11777 = vmatpush1.bf16.msra.mxu1 %v16161_v20  ;;  %11705 = vmatprep.subr.bf16.mxu0 %v16166_v27  ;;  %v16218_v20 = vld [vmem:[%s17752_s0 + $0x320] ss:$16 sps:$4 sm:$0xff]   ;;  %v16221_v27 = vld [vmem:[%s17752_s0 + $0x328] ss:$16 sps:$4 sm:$0xff]  }
 0x9a7   : > { %11787 = vmatprep.subr.bf16.mxu1 %v16169_v59  ;;  %v16226_v59 = vld [vmem:[%s17752_s0 + $0x344] ss:$16 sps:$4 sm:$0xff]  }
 0x9a8   : > { %11697 = vmatmul.mubr.bf16.vlgmr.msra.gmra.mrb[40].mxu0 %v10870_v29 }
 0x9a9   : > { %11779 = vmatmul.mubr.bf16.vlgmr.msra.gmra.mrb[40].mxu1 %v10870_v29  ;;  %11706 = vmatpush1.bf16.msra.mxu0 %v16164_v31  ;;  %v16224_v31 = vld [vmem:[%s17752_s0 + $0x340] ss:$16 sps:$4 sm:$0xff]   ;;  %v16227_v29 = vld [vmem:[%s17752_s0 + $0x348] ss:$16 sps:$4 sm:$0xff]  }
 0x9aa   : > { %11737 = vmatprep.mubr.bf16.mxu0 %v10873_v35  ;;  %11788 = vmatpush1.bf16.msra.mxu1 %v16167_v33  ;;  %v16232_v33 = vld [vmem:[%s17752_s0 + $0x364] ss:$16 sps:$4 sm:$0xff]  }
 0x9ab   : > { %11819 = vmatprep.mubr.bf16.mxu1 %v10873_v35  ;;  %11707 = vmatprep.subr.bf16.mxu0 %v16172_v34  ;;  %v16235_v34 = vld [vmem:[%s17752_s0 + $0x36c] ss:$16 sps:$4 sm:$0xff]   ;;  %v16230_v35 = vld [vmem:[%s17752_s0 + $0x360] ss:$16 sps:$4 sm:$0xff]  }
 0x9ac   : > { %11789 = vmatprep.subr.bf16.mxu1 %v16175_v54  ;;  %v16233_v54 = vld [vmem:[%s17752_s0 + $0x368] ss:$16 sps:$4 sm:$0xff]  }
 0x9ad   : > { %11708 = vmatpush1.bf16.msra.mxu0 %v16170_v46  ;;  %v16238_v46 = vld [vmem:[%s17752_s0 + $0x384] ss:$16 sps:$4 sm:$0xff]  }
 0x9ae   : > { %11790 = vmatpush1.bf16.msra.mxu1 %v16173_v36  ;;  %11709 = vmatprep.subr.bf16.mxu0 %v16178_v37  ;;  %v16241_v36 = vld [vmem:[%s17752_s0 + $0x38c] ss:$16 sps:$4 sm:$0xff]   ;;  %v16236_v37 = vld [vmem:[%s17752_s0 + $0x380] ss:$16 sps:$4 sm:$0xff]  }
 0x9af   : > { %11791 = vmatprep.subr.bf16.mxu1 %v16181_v38  ;;  %v16239_v38 = vld [vmem:[%s17752_s0 + $0x388] ss:$16 sps:$4 sm:$0xff]  }
 0x9b1   : > { %11710 = vmatpush1.bf16.msra.mxu0 %v16176_v39  ;;  %v16244_v39 = vld [vmem:[%s17752_s0 + $0x3a4] ss:$16 sps:$4 sm:$0xff]  }
 0x9b2   : > { %11792 = vmatpush1.bf16.msra.mxu1 %v16179_v60  ;;  %11711 = vmatprep.subr.bf16.mxu0 %v16184_v40  ;;  %v16247_v60 = vld [vmem:[%s17752_s0 + $0x3ac] ss:$16 sps:$4 sm:$0xff]   ;;  %v16242_v40 = vld [vmem:[%s17752_s0 + $0x3a0] ss:$16 sps:$4 sm:$0xff]  }
 0x9b3   : > { %11793 = vmatprep.subr.bf16.mxu1 %v16187_v25  ;;  %v16245_v25 = vld [vmem:[%s17752_s0 + $0x3a8] ss:$16 sps:$4 sm:$0xff]  }
 0x9b5   : > { %11712 = vmatpush1.bf16.msra.mxu0 %v16182_v6  ;;  %v16250_v6 = vld [vmem:[%s17752_s0 + $0x3c4] ss:$16 sps:$4 sm:$0xff]  }
 0x9b6   : > { %11794 = vmatpush1.bf16.msra.mxu1 %v16185_v41  ;;  %11713 = vmatprep.subr.bf16.mxu0 %v16190_v42  ;;  %v16253_v41 = vld [vmem:[%s17752_s0 + $0x3cc] ss:$16 sps:$4 sm:$0xff]   ;;  %v16248_v42 = vld [vmem:[%s17752_s0 + $0x3c0] ss:$16 sps:$4 sm:$0xff]  }
 0x9b7   : > { %11795 = vmatprep.subr.bf16.mxu1 %v16193_v43  ;;  %v16251_v43 = vld [vmem:[%s17752_s0 + $0x3c8] ss:$16 sps:$4 sm:$0xff]  }
 0x9b9   : > { %11714 = vmatpush1.bf16.msra.mxu0 %v16188_v30  ;;  %v16256_v30 = vld [vmem:[%s17752_s0 + $0x3e4] ss:$16 sps:$4 sm:$0xff]  }
 0x9ba   : > { %11796 = vmatpush1.bf16.msra.mxu1 %v16191_v47  ;;  %11715 = vmatprep.subr.bf16.mxu0 %v16196_v48  ;;  %v16254_v47 = vld [vmem:[%s17752_s0 + $0x3e0] ss:$16 sps:$4 sm:$0xff]   ;;  %v8940_v48 = vmax.f32 %v19171_v13, 0.0 }
 0x9bb   : > { %v9811_v19 = vpop.f32.mrb[32].mxu0  ;;  %11797 = vmatprep.subr.bf16.mxu1 %v16199_v50  ;;  %v16257_v50 = vld [vmem:[%s17752_s0 + $0x3e8] ss:$16 sps:$4 sm:$0xff]  }
 0x9bc   : > { %v13950_v62 = vadd.f32 %v9811_v19, %v9079_v51  ;;  %v9893_v63 = vpop.f32.mrb[32].mxu1  ;;  %v9813_v49 = vpop.f32.mrb[33].mxu0  ;;  %v10872_v51 = vpack.c.bf16 %v8940_v48, %v8940_v48 }
 0x9bd   : > { %v13952_v0 = vadd.f32 %v9893_v63, %v9087_v52  ;;  %v13951_v1 = vadd.f32 %v9813_v49, %v9083_v57  ;;  %v9895_v3 = vpop.f32.mrb[33].mxu1  ;;  %v9815_v4 = vpop.f32.mrb[34].mxu0  ;;  %11716 = vmatpush1.bf16.msra.mxu0 %v16194_v53  ;;  %v10036_v52 = vld [vmem:[%s1104_s30] sm:$0xf]  ;;  %s19641_s30 = sld [smem:[#allocation69_spill]] }
 0x9be   : > { %9900 = vst [vmem:[%s19321_s17] sm:$0xff] %v13950_v62  ;;  %v13953_v7 = vadd.f32 %v9895_v3, %v9091_v55  ;;  %v9897_v8 = vpop.f32.mrb[34].mxu1  ;;  %11798 = vmatpush1.bf16.msra.mxu1 %v16197_v45  ;;  %v9816_v26 = vpop.f32.mrb[35].mxu0  ;;  %11717 = vmatprep.subr.bf16.mxu0 %v16202_v32  ;;  %v10041_v57 = vrot.slane %v10036_v52, %v18093_v21 }
 0x9bf   : > { %9902 = vst [vmem:[%s19321_s17 + $0x10] sm:$0xff] %v13952_v0  ;;  %9901 = vst [vmem:[%s19321_s17 + $0x8] sm:$0xff] %v13951_v1  ;;  %v9898_v10 = vpop.f32.mrb[35].mxu1  ;;  %11799 = vmatprep.subr.bf16.mxu1 %v16205_v61  ;;  %v10049_v53 = vrot.slane %v10036_v52, %v18096_v22  ;;  %v10045_v55 = vrot.slane %v10036_v52, %v18099_v23  ;;  %v10053_v13 = vrot.slane %v10036_v52, %v18102_v24 }
 0x9c0   : > { %9903 = vst [vmem:[%s19321_s17 + $0x18] sm:$0xff] %v13953_v7 }
 0x9c1   : > { %11718 = vmatpush1.bf16.msra.mxu0 %v16200_v5 }
 0x9c2   : > { %11800 = vmatpush1.bf16.msra.mxu1 %v16203_v9  ;;  %11719 = vmatprep.subr.bf16.mxu0 %v16208_v58 }
 0x9c3   : > { %11801 = vmatprep.subr.bf16.mxu1 %v16211_v11  ;;  %s19382_s0 = scalar_lea.hbm %s19641_s30, %s19375_s21 }
 0x9c5   : > { %11720 = vmatpush1.bf16.msra.mxu0 %v16206_v12 }
 0x9c6   : > { %11802 = vmatpush1.bf16.msra.mxu1 %v16209_v14  ;;  %11721 = vmatprep.subr.bf16.mxu0 %v16214_v15 }
 0x9c7   : > { %11803 = vmatprep.subr.bf16.mxu1 %v16217_v56 }
 0x9c9   : > { %11722 = vmatpush1.bf16.msra.mxu0 %v16212_v16 }
 0x9ca   : > { %11804 = vmatpush1.bf16.msra.mxu1 %v16215_v2  ;;  %11723 = vmatprep.subr.bf16.mxu0 %v16220_v17 }
 0x9cb   : > { %11805 = vmatprep.subr.bf16.mxu1 %v16223_v18 }
 0x9cd   : > { %11724 = vmatpush1.bf16.msra.mxu0 %v16218_v20 }
 0x9ce   : > { %11806 = vmatpush1.bf16.msra.mxu1 %v16221_v27  ;;  %11725 = vmatprep.subr.bf16.mxu0 %v16226_v59 }
 0x9cf   : > { %11807 = vmatprep.subr.bf16.mxu1 %v16229_v28 }
 0x9d1   : > { %11726 = vmatpush1.bf16.msra.mxu0 %v16224_v31 }
 0x9d2   : > { %11808 = vmatpush1.bf16.msra.mxu1 %v16227_v29  ;;  %11727 = vmatprep.subr.bf16.mxu0 %v16232_v33 }
 0x9d3   : > { %11809 = vmatprep.subr.bf16.mxu1 %v16235_v34 }
 0x9d5   : > { %11728 = vmatpush1.bf16.msra.mxu0 %v16230_v35 }
 0x9d6   : > { %11810 = vmatpush1.bf16.msra.mxu1 %v16233_v54  ;;  %11729 = vmatprep.subr.bf16.mxu0 %v16238_v46 }
 0x9d7   : > { %11811 = vmatprep.subr.bf16.mxu1 %v16241_v36 }
 0x9d9   : > { %11730 = vmatpush1.bf16.msra.mxu0 %v16236_v37 }
 0x9da   : > { %11812 = vmatpush1.bf16.msra.mxu1 %v16239_v38  ;;  %11731 = vmatprep.subr.bf16.mxu0 %v16244_v39 }
 0x9db   : > { %11813 = vmatprep.subr.bf16.mxu1 %v16247_v60 }
 0x9dd   : > { %11732 = vmatpush1.bf16.msra.mxu0 %v16242_v40 }
 0x9de   : > { %11814 = vmatpush1.bf16.msra.mxu1 %v16245_v25  ;;  %11733 = vmatprep.subr.bf16.mxu0 %v16250_v6 }
 0x9df   : > { %11815 = vmatprep.subr.bf16.mxu1 %v16253_v41 }
 0x9e1   : > { %11734 = vmatpush1.bf16.msra.mxu0 %v16248_v42 }
 0x9e2   : > { %11816 = vmatpush1.bf16.msra.mxu1 %v16251_v43  ;;  %11735 = vmatprep.subr.bf16.mxu0 %v16256_v30 }
 0x9e3   : > { %11817 = vmatprep.subr.bf16.mxu1 %v16259_v44 }
 0x9e5   : > { %11736 = vmatpush1.bf16.msra.mxu0 %v16254_v47 }
 0x9e6   : > { %11818 = vmatpush1.bf16.msra.mxu1 %v16257_v50 }
 0x9e8   : > { %11738 = vmatmul.mubr.bf16.vlgmr.msra.gmra.mrb[40].mxu0 %v10872_v51 }
 0x9e9   : > { %11820 = vmatmul.mubr.bf16.vlgmr.msra.gmra.mrb[40].mxu1 %v10872_v51 }
 0xa3b   : > { %v10773_v45 = vpop.f32.mrb[36].mxu0 }
 0xa3c   : > { %v13954_v32 = vadd.f32 %v10773_v45, %v10041_v57  ;;  %v10855_v19 = vpop.f32.mrb[36].mxu1  ;;  %v10775_v61 = vpop.f32.mrb[37].mxu0 }
 0xa3d   : > { %v13956_v62 = vadd.f32 %v10855_v19, %v10049_v53  ;;  %v13955_v63 = vadd.f32 %v10775_v61, %v10045_v55  ;;  %v10857_v49 = vpop.f32.mrb[37].mxu1  ;;  %v10777_v0 = vpop.f32.mrb[38].mxu0 }
 0xa3e   : > { %v10862_v1 = vmax.f32 %v13954_v32, 0.0  ;;  %v13957_v3 = vadd.f32 %v10857_v49, %v10053_v13  ;;  %v10859_v4 = vpop.f32.mrb[38].mxu1  ;;  %v10778_v5 = vpop.f32.mrb[39].mxu0 }
 0xa3f   : > { %v10864_v7 = vmax.f32 %v13956_v62, 0.0  ;;  %v10863_v8 = vmax.f32 %v13955_v63, 0.0  ;;  %v10860_v26 = vpop.f32.mrb[39].mxu1 }
 0xa40   : > { %10866 = vst [vmem:[%s1266_s20] sm:$0xff] %v10862_v1  ;;  %v10865_v9 = vmax.f32 %v13957_v3, 0.0 }
 0xa41   : > { %10868 = vst [vmem:[%s1266_s20 + $0x10] sm:$0xff] %v10864_v7  ;;  %10867 = vst [vmem:[%s1266_s20 + $0x8] sm:$0xff] %v10863_v8 }
 0xa42   : > { %10869 = vst [vmem:[%s1266_s20 + $0x18] sm:$0xff] %v10865_v9 }
 0xa43   : > { %16754 = shalt.err (!%p16751_p11)
}
 0xa44   : > { %s16755_s17 = scalar_lea.hbm %s19382_s0, 512  ;;  %s16759_s3 = scalar_lea.hbm %s19641_s30, 1024 }
 0xa45   : > { %p16756_p3 = scmp.ne.s32.totalorder %s19382_s0, %s16755_s17  ;;  %p16760_p8 = scmp.lt.u32.totalorder %s19382_s0, %s19641_s30 }
 0xa46   : > { %p16761_p12 = scmp.lt.u32.totalorder %s16759_s3, %s16755_s17  ;;  %p16763_p5 = scmp.lt.u32.totalorder %s16755_s17, %s19382_s0 }
 0xa47   : > { %p16757_p7 = pnand %p16756_p3, %p19642_p13 }
 0xa48   : > { %p16762_p1 = por %p16761_p12, %p16760_p8 }
 0xa49   : > { %p16758_p4 = pneg %p16757_p7 }
 0xa4a   : > { %p16764_p6 = por %p16763_p5, %p16762_p1 }
 0xa4c   : > { %p16765_p2 = pnand %p16764_p6, %p16758_p4 }
 0xa4e   : > { %16768 = shalt.err (!%p16765_p2)
}
 0xa4f   : > { %14091 = dma.vmem_to_hbm [thread:$0]  (%p19642_p13), %s11881_s5, 512, %s19382_s0, %s11842_s28  }
 0xa50   : > { %s19643_s20 = sld [smem:[#allocation68_spill]]  ;;  %s11866_s17 = sshll.u32 %s18116_s27, 4  ;;  %s19411_s17 = int_to_ptr.vmem [resolvable:$true] %s11866_s17 }
 0xa51   : > { %s19644_s1 = sld [smem:[#allocation70_spill]]  ;;  %s11837_s11 = scalar_lea.sflag [#allocation4], %s17666_s6 }
 0xa52   : > { %s16769_s12 = scalar_lea.vmem %s19411_s17, 512  ;;  %s16955_s5 = smov [#allocation29]  }
 0xa53   : > { %p16770_p9 = scmp.ne.s32.totalorder %s19411_s17, %s16769_s12  ;;  %s16773_s0 = sshll.u32 %s16955_s5, 4  ;;  %s16774_s0 = int_to_ptr.vmem [resolvable:$false] %s16773_s0 }
 0xa54   : > { %s16775_s27 = scalar_lea.vmem %s16774_s0, 1024  ;;  %p16776_p11 = scmp.lt.s32.totalorder %s19411_s17, %s16774_s0 }
 0xa55   : > { %p16771_p10 = pnand %p16770_p9, %p19642_p13  ;;  %p16777_p3 = scmp.lt.s32.totalorder %s16775_s27, %s16769_s12 }
 0xa56   : > { %s19408_s7 = scalar_lea.hbm %s19643_s20, %s19375_s21 }
 0xa57   : > { %s19645_s9 = smov %s19644_s1  ;;  %s19417_s10 = scalar_lea.hbm %s19644_s1, %s19375_s21 }
 0xa58   : > { %p16772_p0 = pneg %p16771_p10  ;;  %p16778_p7 = por %p16777_p3, %p16776_p11 }
 0xa5a   : > { %p16779_p4 = pnand %p16778_p7, %p16772_p0 }
 0xa5c   : > { %16782 = shalt.err (!%p16779_p4)
}
 0xa5d   : > { %s16783_s19 = scalar_lea.hbm %s19408_s7, 512  ;;  %s16787_s25 = scalar_lea.hbm %s19643_s20, 1024 }
 0xa5e   : > { %p16784_p8 = scmp.ne.s32.totalorder %s19408_s7, %s16783_s19  ;;  %p16788_p5 = scmp.lt.u32.totalorder %s19408_s7, %s19643_s20 }
 0xa5f   : > { %p16789_p6 = scmp.lt.u32.totalorder %s16787_s25, %s16783_s19  ;;  %p16791_p9 = scmp.lt.u32.totalorder %s16783_s19, %s19408_s7 }
 0xa60   : > { %p16785_p12 = pnand %p16784_p8, %p19642_p13 }
 0xa61   : > { %p16790_p2 = por %p16789_p6, %p16788_p5 }
 0xa62   : > { %p16786_p1 = pneg %p16785_p12 }
 0xa63   : > { %p16792_p10 = por %p16791_p9, %p16790_p2 }
 0xa65   : > { %p16793_p0 = pnand %p16792_p10, %p16786_p1 }
 0xa67   : > { %16796 = shalt.err (!%p16793_p0)
}
 0xa68   : > { %14090 = dma.vmem_to_hbm [thread:$0]  (%p19642_p13), %s19411_s17, 512, %s19408_s7, %s11837_s11  }
 0xa69   : > { %s16797_s12 = scalar_lea.vmem %s19372_s8, 512  ;;  %s16956_s0 = smov [#allocation32]  }
 0xa6a   : > { %p16798_p11 = scmp.ne.s32.totalorder %s19372_s8, %s16797_s12  ;;  %s16801_s27 = sshll.u32 %s16956_s0, 4  ;;  %s16802_s27 = int_to_ptr.vmem [resolvable:$false] %s16801_s27 }
 0xa6b   : > { %s16803_s19 = scalar_lea.vmem %s16802_s27, 1024  ;;  %p16804_p4 = scmp.lt.s32.totalorder %s19372_s8, %s16802_s27 }
 0xa6c   : > { %p16799_p3 = pnand %p16798_p11, %p19642_p13  ;;  %p16805_p8 = scmp.lt.s32.totalorder %s16803_s19, %s16797_s12 }
 0xa6e   : > { %p16800_p7 = pneg %p16799_p3  ;;  %p16806_p12 = por %p16805_p8, %p16804_p4 }
 0xa70   : > { %p16807_p1 = pnand %p16806_p12, %p16800_p7 }
 0xa72   : > { %16810 = shalt.err (!%p16807_p1)
}
 0xa73   : > { %s16811_s11 = scalar_lea.hbm %s19417_s10, 512  ;;  %s16815_s26 = scalar_lea.hbm %s19645_s9, 1024 }
 0xa74   : > { %p16812_p5 = scmp.ne.s32.totalorder %s19417_s10, %s16811_s11  ;;  %p16816_p9 = scmp.lt.u32.totalorder %s19417_s10, %s19645_s9 }
 0xa75   : > { %p16817_p10 = scmp.lt.u32.totalorder %s16815_s26, %s16811_s11  ;;  %p16819_p11 = scmp.lt.u32.totalorder %s16811_s11, %s19417_s10 }
 0xa76   : > { %p16813_p6 = pnand %p16812_p5, %p19642_p13 }
 0xa77   : > { %p16818_p0 = por %p16817_p10, %p16816_p9 }
 0xa78   : > { %p16814_p2 = pneg %p16813_p6 }
 0xa79   : > { %p16820_p3 = por %p16819_p11, %p16818_p0 }
 0xa7b   : > { %p16821_p7 = pnand %p16820_p3, %p16814_p2 }
 0xa7d   : > { %16824 = shalt.err (!%p16821_p7)
}
 0xa7e   : > { %14092 = dma.vmem_to_hbm [thread:$0]  (%p19642_p13), %s19372_s8, 512, %s19417_s10, %s11842_s28  }
 0xa7f   : > { %s1122_s1 = scalar_lea.vmem [#allocation28], %s17688_s23  ;;  %s1273_s10 = scalar_lea.vmem [#allocation33], %s18105_s4 }
 0xa80   : > { %v11002_v58 = vld [vmem:[%s1122_s1] sm:$0xf]  ;;  %s11908_s29 = sshll.u32 %s1273_s10, 4  ;;  %s19646_s28 = sld [smem:[#allocation71_spill]]  ;;  %s19476_s29 = int_to_ptr.vmem [resolvable:$true] %s11908_s29 }
 0xa81   : > { %v11007_v10 = vrot.slane %v11002_v58, %v18093_v21  ;;  %v11015_v11 = vrot.slane %v11002_v58, %v18096_v22  ;;  %v11011_v12 = vrot.slane %v11002_v58, %v18099_v23  ;;  %v11019_v14 = vrot.slane %v11002_v58, %v18102_v24  ;;  %s11852_s4 = scalar_lea.sflag [#allocation34], %s17666_s6  ;;  %s16825_s12 = scalar_lea.vmem %s19476_s29, 512 }
 0xa82   : > { %p16826_p4 = scmp.ne.s32.totalorder %s19476_s29, %s16825_s12  ;;  %s16957_s0 = smov [#allocation33]  }
 0xa83   : > { %s16829_s27 = sshll.u32 %s16957_s0, 4  ;;  %s16830_s27 = int_to_ptr.vmem [resolvable:$false] %s16829_s27 }
 0xa84   : > { %p16827_p8 = pnand %p16826_p4, %p19642_p13  ;;  %s16831_s19 = scalar_lea.vmem %s16830_s27, 1024 }
 0xa85   : > { %p16832_p1 = scmp.lt.s32.totalorder %s19476_s29, %s16830_s27  ;;  %p16833_p5 = scmp.lt.s32.totalorder %s16831_s19, %s16825_s12 }
 0xa86   : > { %s19474_s5 = scalar_lea.hbm %s19646_s28, %s19375_s21  ;;  %p16828_p12 = pneg %p16827_p8 }
 0xa87   : > { %p16834_p6 = por %p16833_p5, %p16832_p1 }
 0xa89   : > { %p16835_p2 = pnand %p16834_p6, %p16828_p12 }
 0xabb   : > { %v11739_v15 = vpop.f32.mrb[40].mxu0 }
 0xabc   : > { %v13958_v56 = vadd.f32 %v11739_v15, %v11007_v10  ;;  %v11821_v16 = vpop.f32.mrb[40].mxu1  ;;  %v11741_v2 = vpop.f32.mrb[41].mxu0 }
 0xabd   : > { %v13960_v17 = vadd.f32 %v11821_v16, %v11015_v11  ;;  %v13959_v18 = vadd.f32 %v11741_v2, %v11011_v12  ;;  %v11823_v20 = vpop.f32.mrb[41].mxu1  ;;  %v11743_v27 = vpop.f32.mrb[42].mxu0 }
 0xabe   : > { %v11828_v59 = vmax.f32 %v13958_v56, 0.0  ;;  %v13961_v21 = vadd.f32 %v11823_v20, %v11019_v14  ;;  %v11825_v22 = vpop.f32.mrb[42].mxu1  ;;  %v11744_v28 = vpop.f32.mrb[43].mxu0 }
 0xabf   : > { %v11830_v23 = vmax.f32 %v13960_v17, 0.0  ;;  %v11829_v31 = vmax.f32 %v13959_v18, 0.0  ;;  %v11826_v24 = vpop.f32.mrb[43].mxu1 }
 0xac0   : > { %11832 = vst [vmem:[%s1273_s10] sm:$0xff] %v11828_v59  ;;  %v11831_v29 = vmax.f32 %v13961_v21, 0.0 }
 0xac1   : > { %11834 = vst [vmem:[%s1273_s10 + $0x10] sm:$0xff] %v11830_v23  ;;  %11833 = vst [vmem:[%s1273_s10 + $0x8] sm:$0xff] %v11829_v31 }
 0xac2   : > { %11835 = vst [vmem:[%s1273_s10 + $0x18] sm:$0xff] %v11831_v29 }
 0xac3   : > { %16838 = shalt.err (!%p16835_p2)
}
 0xac4   : > { %s16839_s6 = scalar_lea.hbm %s19474_s5, 512  ;;  %s16843_s7 = scalar_lea.hbm %s19646_s28, 1024 }
 0xac5   : > { %p16840_p9 = scmp.ne.s32.totalorder %s19474_s5, %s16839_s6  ;;  %p16844_p11 = scmp.lt.u32.totalorder %s19474_s5, %s19646_s28 }
 0xac6   : > { %p16845_p3 = scmp.lt.u32.totalorder %s16843_s7, %s16839_s6  ;;  %p16847_p4 = scmp.lt.u32.totalorder %s16839_s6, %s19474_s5 }
 0xac7   : > { %p16841_p10 = pnand %p16840_p9, %p19642_p13 }
 0xac8   : > { %p16846_p7 = por %p16845_p3, %p16844_p11 }
 0xac9   : > { %p16842_p0 = pneg %p16841_p10 }
 0xaca   : > { %p16848_p8 = por %p16847_p4, %p16846_p7 }
 0xacc   : > { %p16849_p12 = pnand %p16848_p8, %p16842_p0 }
 0xace   : > { %16852 = shalt.err (!%p16849_p12)
}
 0xacf   : > { %14093 = dma.vmem_to_hbm [thread:$0]  (%p19642_p13), %s19476_s29, 512, %s19474_s5, %s11852_s4  }
 0xad0 PF: > { %s19647_s3 = sld [smem:[#allocation47_spill]]  ;;  %s19648_s25 = sld [smem:[#allocation54_spill]] }
 0xad1   : > { %p19650_p5 = scmp.ge.s32.totalorder %s16931_s24, 2 }
 0xad6   : > { %s11920_s1 = sand.u32 1, %s19647_s3   ;;  %p19649_p1 = scmp.ne.s32.totalorder %s19648_s25, 0 }
 0xad7   : > { %s11921_s10 = scalar_lea.sflag [#allocation4], %s11920_s1 }
 0xad8   : > { %p14099_p6 = pnand %p19650_p5, %p19649_p1 }
 0xada   : > { %16906 = dma.done.wait (!%p14099_p6), %s11921_s10, 512  }
 0xadb   : > { %16908 = vsyncadd (!%p14099_p6), %s11921_s10, 4294966784  ;;  %s19651_s23 = sadd.s32 4294967294, %s16931_s24  }
 0xadc   : > { %s11929_s8 = sand.u32 1, %s19651_s23  }
 0xadd   : > { %s11930_s12 = scalar_lea.sflag [#allocation31], %s11929_s8 }
 0xade   : > { %16910 = dma.done.wait (!%p14099_p6), %s11930_s12, 1024  }
 0xadf   : > { %16912 = vsyncadd (!%p14099_p6), %s11930_s12, 4294966272  ;;  %s11948_s2 = scalar_lea.sflag [#allocation34], %s11920_s1 }
 0xae0   : > { %16914 = dma.done.wait (!%p14099_p6), %s11948_s2, 512  }
 0xae1   : > { %16916 = vsyncadd (!%p14099_p6), %s11948_s2, 4294966784  ;;  %s19652_s24 = sld [smem:[#allocation50_spill]]  ;;  %s19653_s29 = sld [smem:[#allocation48_spill]] }
 0xae2   : > { %s19654_s23 = sld [smem:[#allocation51_spill]]  ;;  %s19655_s1 = smov %s16923_s22 }
 0xae7   : > { %p64_p13 = scmp.ge.s32.totalorder %s19652_s24, 4   ;;  %s19656_s22 = smov %s19653_s29 }
 0xae9   :  { %66 = sbr.rel (!%p64_p13) target bundleno = 43 (0x2b), region = 374 }
 0xaf0   :  { %11953 = vsyncpa [#allocation3], 1 }
 0xaf1   :  { %11955 = vsyncpa [#allocation3 + $0x1], 1 }
 0xaf2   :  { %11956 = vsyncpa [#allocation6], 1 }
 0xaf3   :  { %11958 = vsyncpa [#allocation6 + $0x1], 1 }
 0xaf4   :  { %11959 = vsyncpa [#allocation9], 1 }
 0xaf5   :  { %11961 = vsyncpa [#allocation9 + $0x1], 1 }
 0xaf6   :  { %11962 = vsyncpa [#allocation12], 1 }
 0xaf7   :  { %11964 = vsyncpa [#allocation12 + $0x1], 1 }
 0xaf8   :  { %11965 = vsyncpa [#allocation15], 1 }
 0xaf9   :  { %11967 = vsyncpa [#allocation15 + $0x1], 1 }
 0xafa   :  { %11968 = vsyncpa [#allocation18], 1 }
 0xafb   :  { %11970 = vsyncpa [#allocation18 + $0x1], 1 }
 0xafc   :  { %11971 = vsyncpa [#allocation21], 1 }
 0xafd   :  { %11973 = vsyncpa [#allocation21 + $0x1], 1 }
 0xafe   :  { %11974 = vsyncpa [#allocation24], 1 }
 0xaff   :  { %11976 = vsyncpa [#allocation24 + $0x1], 1 }
 0xb00   :  { %11977 = vsyncpa [#allocation27], 1 }
 0xb01   :  { %11979 = vsyncpa [#allocation27 + $0x1], 1 }
 0xb02   :  { %11980 = vsyncpa [#allocation4], 1 }
 0xb03   :  { %11982 = vsyncpa [#allocation4 + $0x1], 1 }
 0xb04   :  { %11983 = vsyncpa [#allocation31], 1 }
 0xb05   :  { %11985 = vsyncpa [#allocation31 + $0x1], 1 }
 0xb06   :  { %11986 = vsyncpa [#allocation34], 1 }
 0xb07   :  { %11988 = vsyncpa [#allocation34 + $0x1], 1 }

</bundles_post_ra>
